<compile_context>
chip_gen: v6e
topology: v6e:2x2x1
jax: 0.10.0
libtpu: 0.0.40
codegen_flags: <defaults>
</compile_context>

<pallas_src>
import jax
import jax.numpy as jnp
from jax.experimental import pallas as pl


def _ceil_to(x, m):
    return -(-x // m) * m


# ----------------------------------------------------------------------------
# Kernel (conv1 / conv2): relu(patches @ W + shift).  BN scale is already
# folded into W's columns; operands bf16, accumulation f32, output bf16.
# ----------------------------------------------------------------------------
def _conv_mm_kernel(x_ref, w_ref, shift_ref, o_ref):
    acc = jnp.dot(x_ref[...], w_ref[...], preferred_element_type=jnp.float32)
    o_ref[...] = jnp.maximum(acc + shift_ref[...], 0.0).astype(o_ref.dtype)


def conv_mm(patches, w, shift):
    M = patches.shape[0]
    return pl.pallas_call(
        _conv_mm_kernel,
        out_shape=jax.ShapeDtypeStruct((M, 128), jnp.bfloat16),
    )(patches, w, shift)


# ----------------------------------------------------------------------------
# Fused conv3 + conv4 kernel.
#   conv3: one big matmul on the pre-built im2col patches (+shift, ReLU).
#   conv4 (3x3, stride 1, pad 1, 8x8 spatial): for each of the 9 taps,
#   y3 @ W4[t] gives the per-input-position contribution; a constant 0/1
#   row-gather matrix S[t] shifts it to the right output rows and zeroes
#   out-of-range taps.  Everything stays in VMEM / vregs.
# ----------------------------------------------------------------------------
def _conv34_kernel(p3_ref, w3_ref, w4_ref, s_ref, shifts_ref, o_ref):
    y3 = jnp.dot(p3_ref[...], w3_ref[...], preferred_element_type=jnp.float32)
    y3 = jnp.maximum(y3 + shifts_ref[0:1, :], 0.0).astype(jnp.bfloat16)

    acc = None
    for t in range(9):
        z = jnp.dot(y3, w4_ref[t], preferred_element_type=jnp.float32)
        zt = jnp.dot(s_ref[t], z, preferred_element_type=jnp.float32)
        acc = zt if acc is None else acc + zt

    o_ref[...] = jnp.maximum(acc + shifts_ref[1:2, :], 0.0).astype(o_ref.dtype)


# ----------------------------------------------------------------------------
# Fused FC head: cnn_fc -> fc1 -> fc2 -> (val1|adv1) -> packed output layer
# with the dueling combine folded into its weights.  Activations never leave
# VMEM/vregs.  Output cols 0..n_actions-1 hold the q-values.
# ----------------------------------------------------------------------------
def _head_kernel(fv_ref, flat_ref, wc_ref, w1_ref, w2_ref, wva1_ref, wq_ref,
                 b_ref, o_ref):
    bc, b1 = b_ref[0:1, 0:128], b_ref[1:2, :]
    b2, bva1, bq = b_ref[2:3, 0:128], b_ref[3:4, :], b_ref[4:5, 0:128]

    def mm(x, w_ref):
        return jnp.dot(x, w_ref[...], preferred_element_type=jnp.float32)

    feat = jnp.maximum(mm(flat_ref[...], wc_ref) + bc, 0.0)          # (Bp,128)
    cat = jnp.concatenate([fv_ref[...], feat.astype(jnp.bfloat16)], axis=-1)
    h = jnp.maximum(mm(cat, w1_ref) + b1, 0.0)                       # (Bp,256)
    h = jnp.maximum(mm(h.astype(jnp.bfloat16), w2_ref) + b2, 0.0)    # (Bp,128)
    hva = jnp.maximum(mm(h.astype(jnp.bfloat16), wva1_ref) + bva1, 0.0)
    o_ref[...] = mm(hva.astype(jnp.bfloat16), wq_ref) + bq           # (Bp,128)


# ----------------------------------------------------------------------------
# im2col glue (pure slicing/concat; fuses under jit, matmul is in Pallas).
# ----------------------------------------------------------------------------
def im2col(x, k, stride, pad):
    B, H, W, C = x.shape
    xp = jnp.pad(x, ((0, 0), (pad, pad), (pad, pad), (0, 0)))
    OH = (H + 2 * pad - k) // stride + 1
    OW = (W + 2 * pad - k) // stride + 1
    cols = [xp[:, dy:dy + stride * OH:stride, dx:dx + stride * OW:stride, :]
            for dy in range(k) for dx in range(k)]
    patches = jnp.concatenate(cols, axis=-1)            # (B, OH, OW, 9C)
    return patches.reshape(B * OH * OW, k * k * C), OH, OW


# ----------------------------------------------------------------------------
# Model forward
# ----------------------------------------------------------------------------
def model_forward(prep, feature_vec, feature_maps, n_actions):
    B = feature_maps.shape[0]
    x = jnp.transpose(feature_maps, (0, 2, 3, 1)).astype(jnp.bfloat16)  # NHWC

    p1, OH, OW = im2col(x, 3, 2, 2)                      # (B*29*29, 36)
    x = conv_mm(p1, prep["conv1_w"], prep["conv1_shift"]).reshape(B, OH, OW, 128)

    p2, OH, OW = im2col(x, 3, 2, 2)                      # (B*16*16, 1152)
    x = conv_mm(p2, prep["conv2_w"], prep["conv2_shift"]).reshape(B, OH, OW, 128)

    p3, OH, OW = im2col(x, 3, 2, 1)                      # (B*8*8, 1152)
    y4 = pl.pallas_call(
        _conv34_kernel,
        out_shape=jax.ShapeDtypeStruct((B * OH * OW, 128), jnp.bfloat16),
    )(p3, prep["conv3_w"], prep["conv4_w"], prep["conv4_gather"],
      prep["conv34_shift"])

    # (h, w, c) flatten; cnn_fc weight rows were permuted to match.
    flat = y4[:, :8].reshape(B, 512)                     # (B, 512) bf16

    Bp = max(16, _ceil_to(B, 16))                        # bf16 sublane tile
    flat_p = jnp.pad(flat, ((0, Bp - B), (0, 0)))
    fv = feature_vec.astype(jnp.bfloat16)
    fv_p = jnp.pad(fv, ((0, Bp - B), (0, 128 - fv.shape[1])))

    q_full = pl.pallas_call(
        _head_kernel,
        out_shape=jax.ShapeDtypeStruct((Bp, 128), jnp.float32),
    )(fv_p, flat_p, prep["cnn_fc_w"], prep["fc1_w"], prep["fc2_w"],
      prep["va1_w"], prep["q_w"], prep["biases"])
    return q_full[:B, :n_actions]


# ----------------------------------------------------------------------------
# One-time weight pre-layout: transpose / channel-pad / fold BN scale /
# permute cnn_fc rows / merge fc1 / pack val-adv streams / fold dueling.
# ----------------------------------------------------------------------------
def prepare_params(params, state_dim, n_actions, batch_size):
    assert state_dim <= 128, "head kernel assumes state_dim <= 128"
    assert n_actions <= 128, "head kernel assumes n_actions <= 128"
    prep = {}

    def conv_w(name, ic, oc, cin_lanes):
        w = params[name + "_w"]                            # torch (oc, ic, 3, 3)
        scale = params[name + "_bn_scale"]                 # (oc,) BN scale folded
        wt = jnp.transpose(w, (2, 3, 1, 0)) * scale        # (3, 3, ic, oc)
        big = jnp.zeros((3, 3, cin_lanes, 128), jnp.float32)
        big = big.at[:, :, :ic, :oc].set(wt)               # zero rows for padded chans
        return big.reshape(9 * cin_lanes, 128).astype(jnp.bfloat16)

    def shift(name, oc):
        return jnp.pad(params[name + "_bn_shift"],
                       (0, 128 - oc)).reshape(1, 128).astype(jnp.float32)

    prep["conv1_w"] = conv_w("conv1", 4, 16, 4)            # (36, 128)  raw 4-ch input
    prep["conv2_w"] = conv_w("conv2", 16, 32, 128)         # (1152, 128)
    prep["conv3_w"] = conv_w("conv3", 32, 64, 128)         # (1152, 128)
    prep["conv4_w"] = conv_w("conv4", 64, 8, 128).reshape(9, 128, 128)
    prep["conv1_shift"] = shift("conv1", 16)
    prep["conv2_shift"] = shift("conv2", 32)
    prep["conv34_shift"] = jnp.concatenate(
        [shift("conv3", 64), shift("conv4", 8)], axis=0)   # (2, 128)

    # Constant 0/1 row-gather matrices for conv4's 3x3 taps on an 8x8 grid.
    M = batch_size * 64
    r = jnp.arange(M)
    b, i, j = r // 64, (r % 64) // 8, r % 8
    cols = jnp.arange(M)
    mats = []
    for dy in range(3):
        for dx in range(3):
            ii, jj = i + dy - 1, j + dx - 1
            valid = (ii >= 0) & (ii < 8) & (jj >= 0) & (jj < 8)
            src = b * 64 + ii * 8 + jj
            mats.append(((cols[None, :] == src[:, None]) &
                         valid[:, None]).astype(jnp.float32))
    prep["conv4_gather"] = jnp.stack(mats)                 # (9, M, M)

    # cnn_fc: permute rows from torch NCHW flatten (c,h,w) -> our (h,w,c).
    wc = params["cnn_fc_w"].T.reshape(8, 8, 8, 128).transpose(1, 2, 0, 3)
    prep["cnn_fc_w"] = wc.reshape(512, 128).astype(jnp.bfloat16)

    # fc1 merged: single (256,256); rows [0:state_dim]=fv part, [128:256]=cnn part.
    w1 = params["fc1_w"].T                                 # (state_dim+128, 256)
    w1_full = jnp.zeros((256, 256), jnp.float32)
    w1_full = w1_full.at[:state_dim].set(w1[:state_dim])
    w1_full = w1_full.at[128:].set(w1[state_dim:])
    prep["fc1_w"] = w1_full.astype(jnp.bfloat16)

    prep["fc2_w"] = params["fc2_w"].T.astype(jnp.bfloat16)            # (256, 128)

    # Packed value/advantage hidden layers: (128, 256) = [val1.T | adv1.T].
    prep["va1_w"] = jnp.concatenate(
        [params["val1_w"].T, params["adv1_w"].T], axis=1).astype(jnp.bfloat16)

    # Output layer with dueling combine folded in:
    #   Q = val_hidden @ val2 + adv_hidden @ (adv2 - mean_cols(adv2))
    #       + val2_b + (adv2_b - mean(adv2_b))
    A = n_actions
    adv_w = params["adv2_w"].T
    adv_w = adv_w - adv_w.mean(axis=1, keepdims=True)
    val_w = jnp.broadcast_to(params["val2_w"].T, (128, A))
    wq = jnp.zeros((256, 128), jnp.float32)
    wq = wq.at[:128, :A].set(val_w)
    wq = wq.at[128:, :A].set(adv_w)
    prep["q_w"] = wq.astype(jnp.bfloat16)
    bq = params["val2_b"][0] + params["adv2_b"] - params["adv2_b"].mean()

    # All head biases packed into one (8, 256) f32 array, sliced in-kernel.
    biases = jnp.zeros((8, 256), jnp.float32)
    biases = biases.at[0, :128].set(params["cnn_fc_b"])
    biases = biases.at[1, :].set(params["fc1_b"])
    biases = biases.at[2, :128].set(params["fc2_b"])
    biases = biases.at[3, :128].set(params["val1_b"])
    biases = biases.at[3, 128:].set(params["adv1_b"])
    biases = biases.at[4, :A].set(bq)
    prep["biases"] = biases
    return prep


# ----------------------------------------------------------------------------
# Deterministic parameter construction (Kaiming normal, fan_in, relu; bias=0)
# ----------------------------------------------------------------------------
def kaiming(key, shape, fan_in):
    std = (2.0 / fan_in) ** 0.5
    return std * jax.random.normal(key, shape, dtype=jnp.float32)


def make_params(key, state_dim, n_actions):
    keys = iter(jax.random.split(key, 32))
    params = {}
    bn_scale_val = (1.0 + 1e-5) ** -0.5   # eval-mode BN with fresh running stats

    def conv(name, ic, oc):
        params[name + "_w"] = kaiming(next(keys), (oc, ic, 3, 3), ic * 9)
        params[name + "_bn_scale"] = jnp.full((oc,), bn_scale_val, jnp.float32)
        params[name + "_bn_shift"] = jnp.zeros((oc,), jnp.float32)

    def lin(name, fin, fout):
        params[name + "_w"] = kaiming(next(keys), (fout, fin), fin)
        params[name + "_b"] = jnp.zeros((fout,), jnp.float32)

    conv("conv1", 4, 16)
    conv("conv2", 16, 32)
    conv("conv3", 32, 64)
    conv("conv4", 64, 8)
    lin("cnn_fc", 512, 128)
    lin("fc1", state_dim + 128, 256)
    lin("fc2", 256, 128)
    lin("val1", 128, 128)
    lin("val2", 128, 1)
    lin("adv1", 128, 128)
    lin("adv2", 128, n_actions)
    return params


if __name__ == "__main__":
    B = 2
    state_dim = 8          # np.prod(state_shape)
    n_actions = 6          # np.prod(action_shape)
    H = W = 56             # spatial size implied by Linear(512, 128) after the convs

    root = jax.random.PRNGKey(0)
    kp, kv, km = jax.random.split(root, 3)
    params = make_params(kp, state_dim, n_actions)
    prep = prepare_params(params, state_dim, n_actions, B)
    feature_vec = jax.random.normal(kv, (B, state_dim), jnp.float32)
    feature_maps = jax.random.normal(km, (B, 4, H, W), jnp.float32)   # NCHW

    fwd = jax.jit(model_forward, static_argnums=(3,))
    q_values = fwd(prep, feature_vec, feature_maps, n_actions)
    q_values = jax.block_until_ready(q_values)
    assert q_values.shape == (B, n_actions)
    assert bool(jnp.all(jnp.isfinite(q_values)))
    print("KERNEL_OK")
</pallas_src>

<mosaic_0001>
module attributes {stable_mosaic.version = 11 : i64} {
  func.func @_conv_mm_kernel(%arg0: memref<1682x36xbf16, #tpu.memory_space<vmem>>, %arg1: memref<36x128xbf16, #tpu.memory_space<vmem>>, %arg2: memref<1x128xf32, #tpu.memory_space<vmem>>, %arg3: memref<1682x128xbf16, #tpu.memory_space<vmem>>) attributes {dimension_semantics = [], scalar_prefetch = 0 : i64, scratch_operands = 0 : i64, tpu.core_type = #tpu.core_type<tc>} {
    %c0 = arith.constant 0 : index
    %c0_0 = arith.constant 0 : index
    %0 = vector.load %arg0[%c0, %c0_0] : memref<1682x36xbf16, #tpu.memory_space<vmem>>, vector<1682x36xbf16>
    %c0_1 = arith.constant 0 : index
    %c0_2 = arith.constant 0 : index
    %1 = vector.load %arg1[%c0_1, %c0_2] : memref<36x128xbf16, #tpu.memory_space<vmem>>, vector<36x128xbf16>
    %cst = arith.constant dense<0.000000e+00> : vector<1682x128xf32>
    %2 = tpu.matmul %0, %1, %cst {dimension_numbers = #tpu.dot_dimension_numbers<[1], [0], [0], [1], [0, 0, 1, 1], [], []>} : vector<1682x36xbf16>, vector<36x128xbf16>, vector<1682x128xf32> -> vector<1682x128xf32>
    %c0_3 = arith.constant 0 : index
    %c0_4 = arith.constant 0 : index
    %3 = vector.load %arg2[%c0_3, %c0_4] : memref<1x128xf32, #tpu.memory_space<vmem>>, vector<1x128xf32>
    %4 = vector.broadcast %3 : vector<1x128xf32> to vector<1682x128xf32>
    %5 = arith.addf %2, %4 : vector<1682x128xf32>
    %cst_5 = arith.constant 0.000000e+00 : f32
    %6 = vector.broadcast %cst_5 : f32 to vector<1682x128xf32>
    %7 = arith.maximumf %5, %6 : vector<1682x128xf32>
    %8 = arith.truncf %7 : vector<1682x128xf32> to vector<1682x128xbf16>
    %c0_6 = arith.constant 0 : index
    %c0_7 = arith.constant 0 : index
    %9 = vector.load %arg3[%c0_6, %c0_7] : memref<1682x128xbf16, #tpu.memory_space<vmem>>, vector<1682x128xbf16>
    tpu.vector_store %arg3[%c0_6, %c0_7], %8 {strides = array<i32>} : memref<1682x128xbf16, #tpu.memory_space<vmem>>, vector<1682x128xbf16>,
    return
  }
}

module attributes {stable_mosaic.version = 11 : i64} {
  func.func @_conv_mm_kernel(%arg0: memref<512x1152xbf16, #tpu.memory_space<vmem>>, %arg1: memref<1152x128xbf16, #tpu.memory_space<vmem>>, %arg2: memref<1x128xf32, #tpu.memory_space<vmem>>, %arg3: memref<512x128xbf16, #tpu.memory_space<vmem>>) attributes {dimension_semantics = [], scalar_prefetch = 0 : i64, scratch_operands = 0 : i64, tpu.core_type = #tpu.core_type<tc>} {
    %c0 = arith.constant 0 : index
    %c0_0 = arith.constant 0 : index
    %0 = vector.load %arg0[%c0, %c0_0] : memref<512x1152xbf16, #tpu.memory_space<vmem>>, vector<512x1152xbf16>
    %c0_1 = arith.constant 0 : index
    %c0_2 = arith.constant 0 : index
    %1 = vector.load %arg1[%c0_1, %c0_2] : memref<1152x128xbf16, #tpu.memory_space<vmem>>, vector<1152x128xbf16>
    %cst = arith.constant dense<0.000000e+00> : vector<512x128xf32>
    %2 = tpu.matmul %0, %1, %cst {dimension_numbers = #tpu.dot_dimension_numbers<[1], [0], [0], [1], [0, 0, 1, 1], [], []>} : vector<512x1152xbf16>, vector<1152x128xbf16>, vector<512x128xf32> -> vector<512x128xf32>
    %c0_3 = arith.constant 0 : index
    %c0_4 = arith.constant 0 : index
    %3 = vector.load %arg2[%c0_3, %c0_4] : memref<1x128xf32, #tpu.memory_space<vmem>>, vector<1x128xf32>
    %4 = vector.broadcast %3 : vector<1x128xf32> to vector<512x128xf32>
    %5 = arith.addf %2, %4 : vector<512x128xf32>
    %cst_5 = arith.constant 0.000000e+00 : f32
    %6 = vector.broadcast %cst_5 : f32 to vector<512x128xf32>
    %7 = arith.maximumf %5, %6 : vector<512x128xf32>
    %8 = arith.truncf %7 : vector<512x128xf32> to vector<512x128xbf16>
    %c0_6 = arith.constant 0 : index
    %c0_7 = arith.constant 0 : index
    %9 = vector.load %arg3[%c0_6, %c0_7] : memref<512x128xbf16, #tpu.memory_space<vmem>>, vector<512x128xbf16>
    tpu.vector_store %arg3[%c0_6, %c0_7], %8 {strides = array<i32>} : memref<512x128xbf16, #tpu.memory_space<vmem>>, vector<512x128xbf16>,
    return
  }
}

module attributes {stable_mosaic.version = 11 : i64} {
  func.func @_conv34_kernel(%arg0: memref<128x1152xbf16, #tpu.memory_space<vmem>>, %arg1: memref<1152x128xbf16, #tpu.memory_space<vmem>>, %arg2: memref<9x128x128xbf16, #tpu.memory_space<vmem>>, %arg3: memref<9x128x128xf32, #tpu.memory_space<vmem>>, %arg4: memref<2x128xf32, #tpu.memory_space<vmem>>, %arg5: memref<128x128xbf16, #tpu.memory_space<vmem>>) attributes {dimension_semantics = [], scalar_prefetch = 0 : i64, scratch_operands = 0 : i64, tpu.core_type = #tpu.core_type<tc>} {
    %c0 = arith.constant 0 : index
    %c0_0 = arith.constant 0 : index
    %0 = vector.load %arg0[%c0, %c0_0] : memref<128x1152xbf16, #tpu.memory_space<vmem>>, vector<128x1152xbf16>
    %c0_1 = arith.constant 0 : index
    %c0_2 = arith.constant 0 : index
    %1 = vector.load %arg1[%c0_1, %c0_2] : memref<1152x128xbf16, #tpu.memory_space<vmem>>, vector<1152x128xbf16>
    %cst = arith.constant dense<0.000000e+00> : vector<128x128xf32>
    %2 = tpu.matmul %0, %1, %cst {dimension_numbers = #tpu.dot_dimension_numbers<[1], [0], [0], [1], [0, 0, 1, 1], [], []>} : vector<128x1152xbf16>, vector<1152x128xbf16>, vector<128x128xf32> -> vector<128x128xf32>
    %c0_3 = arith.constant 0 : index
    %c0_4 = arith.constant 0 : index
    %3 = vector.load %arg4[%c0_3, %c0_4] : memref<2x128xf32, #tpu.memory_space<vmem>>, vector<1x128xf32>
    %4 = vector.broadcast %3 : vector<1x128xf32> to vector<128x128xf32>
    %5 = arith.addf %2, %4 : vector<128x128xf32>
    %cst_5 = arith.constant 0.000000e+00 : f32
    %6 = vector.broadcast %cst_5 : f32 to vector<128x128xf32>
    %7 = arith.maximumf %5, %6 : vector<128x128xf32>
    %8 = arith.truncf %7 : vector<128x128xf32> to vector<128x128xbf16>
    %c0_6 = arith.constant 0 : index
    %c0_7 = arith.constant 0 : index
    %c0_8 = arith.constant 0 : index
    %9 = vector.load %arg2[%c0_6, %c0_7, %c0_8] : memref<9x128x128xbf16, #tpu.memory_space<vmem>>, vector<1x128x128xbf16>
    %10 = vector.shape_cast %9 : vector<1x128x128xbf16> to vector<128x128xbf16>
    %cst_9 = arith.constant dense<0.000000e+00> : vector<128x128xf32>
    %11 = tpu.matmul %8, %10, %cst_9 {dimension_numbers = #tpu.dot_dimension_numbers<[1], [0], [0], [1], [0, 0, 1, 1], [], []>} : vector<128x128xbf16>, vector<128x128xbf16>, vector<128x128xf32> -> vector<128x128xf32>
    %c0_10 = arith.constant 0 : index
    %c0_11 = arith.constant 0 : index
    %c0_12 = arith.constant 0 : index
    %12 = vector.load %arg3[%c0_10, %c0_11, %c0_12] : memref<9x128x128xf32, #tpu.memory_space<vmem>>, vector<1x128x128xf32>
    %13 = vector.shape_cast %12 : vector<1x128x128xf32> to vector<128x128xf32>
    %cst_13 = arith.constant dense<0.000000e+00> : vector<128x128xf32>
    %14 = tpu.matmul %13, %11, %cst_13 {dimension_numbers = #tpu.dot_dimension_numbers<[1], [0], [0], [1], [0, 0, 1, 1], [], []>} : vector<128x128xf32>, vector<128x128xf32>, vector<128x128xf32> -> vector<128x128xf32>
    %c1 = arith.constant 1 : index
    %c0_14 = arith.constant 0 : index
    %c0_15 = arith.constant 0 : index
    %15 = vector.load %arg2[%c1, %c0_14, %c0_15] : memref<9x128x128xbf16, #tpu.memory_space<vmem>>, vector<1x128x128xbf16>
    %16 = vector.shape_cast %15 : vector<1x128x128xbf16> to vector<128x128xbf16>
    %cst_16 = arith.constant dense<0.000000e+00> : vector<128x128xf32>
    %17 = tpu.matmul %8, %16, %cst_16 {dimension_numbers = #tpu.dot_dimension_numbers<[1], [0], [0], [1], [0, 0, 1, 1], [], []>} : vector<128x128xbf16>, vector<128x128xbf16>, vector<128x128xf32> -> vector<128x128xf32>
    %c1_17 = arith.constant 1 : index
    %c0_18 = arith.constant 0 : index
    %c0_19 = arith.constant 0 : index
    %18 = vector.load %arg3[%c1_17, %c0_18, %c0_19] : memref<9x128x128xf32, #tpu.memory_space<vmem>>, vector<1x128x128xf32>
    %19 = vector.shape_cast %18 : vector<1x128x128xf32> to vector<128x128xf32>
    %cst_20 = arith.constant dense<0.000000e+00> : vector<128x128xf32>
    %20 = tpu.matmul %19, %17, %cst_20 {dimension_numbers = #tpu.dot_dimension_numbers<[1], [0], [0], [1], [0, 0, 1, 1], [], []>} : vector<128x128xf32>, vector<128x128xf32>, vector<128x128xf32> -> vector<128x128xf32>
    %21 = arith.addf %14, %20 : vector<128x128xf32>
    %c2 = arith.constant 2 : index
    %c0_21 = arith.constant 0 : index
    %c0_22 = arith.constant 0 : index
    %22 = vector.load %arg2[%c2, %c0_21, %c0_22] : memref<9x128x128xbf16, #tpu.memory_space<vmem>>, vector<1x128x128xbf16>
    %23 = vector.shape_cast %22 : vector<1x128x128xbf16> to vector<128x128xbf16>
    %cst_23 = arith.constant dense<0.000000e+00> : vector<128x128xf32>
    %24 = tpu.matmul %8, %23, %cst_23 {dimension_numbers = #tpu.dot_dimension_numbers<[1], [0], [0], [1], [0, 0, 1, 1], [], []>} : vector<128x128xbf16>, vector<128x128xbf16>, vector<128x128xf32> -> vector<128x128xf32>
    %c2_24 = arith.constant 2 : index
    %c0_25 = arith.constant 0 : index
    %c0_26 = arith.constant 0 : index
    %25 = vector.load %arg3[%c2_24, %c0_25, %c0_26] : memref<9x128x128xf32, #tpu.memory_space<vmem>>, vector<1x128x128xf32>
    %26 = vector.shape_cast %25 : vector<1x128x128xf32> to vector<128x128xf32>
    %cst_27 = arith.constant dense<0.000000e+00> : vector<128x128xf32>
    %27 = tpu.matmul %26, %24, %cst_27 {dimension_numbers = #tpu.dot_dimension_numbers<[1], [0], [0], [1], [0, 0, 1, 1], [], []>} : vector<128x128xf32>, vector<128x128xf32>, vector<128x128xf32> -> vector<128x128xf32>
    %28 = arith.addf %21, %27 : vector<128x128xf32>
    %c3 = arith.constant 3 : index
    %c0_28 = arith.constant 0 : index
    %c0_29 = arith.constant 0 : index
    %29 = vector.load %arg2[%c3, %c0_28, %c0_29] : memref<9x128x128xbf16, #tpu.memory_space<vmem>>, vector<1x128x128xbf16>
    %30 = vector.shape_cast %29 : vector<1x128x128xbf16> to vector<128x128xbf16>
    %cst_30 = arith.constant dense<0.000000e+00> : vector<128x128xf32>
    %31 = tpu.matmul %8, %30, %cst_30 {dimension_numbers = #tpu.dot_dimension_numbers<[1], [0], [0], [1], [0, 0, 1, 1], [], []>} : vector<128x128xbf16>, vector<128x128xbf16>, vector<128x128xf32> -> vector<128x128xf32>
    %c3_31 = arith.constant 3 : index
    %c0_32 = arith.constant 0 : index
    %c0_33 = arith.constant 0 : index
    %32 = vector.load %arg3[%c3_31, %c0_32, %c0_33] : memref<9x128x128xf32, #tpu.memory_space<vmem>>, vector<1x128x128xf32>
    %33 = vector.shape_cast %32 : vector<1x128x128xf32> to vector<128x128xf32>
    %cst_34 = arith.constant dense<0.000000e+00> : vector<128x128xf32>
    %34 = tpu.matmul %33, %31, %cst_34 {dimension_numbers = #tpu.dot_dimension_numbers<[1], [0], [0], [1], [0, 0, 1, 1], [], []>} : vector<128x128xf32>, vector<128x128xf32>, vector<128x128xf32> -> vector<128x128xf32>
    %35 = arith.addf %28, %34 : vector<128x128xf32>
    %c4 = arith.constant 4 : index
    %c0_35 = arith.constant 0 : index
    %c0_36 = arith.constant 0 : index
    %36 = vector.load %arg2[%c4, %c0_35, %c0_36] : memref<9x128x128xbf16, #tpu.memory_space<vmem>>, vector<1x128x128xbf16>
    %37 = vector.shape_cast %36 : vector<1x128x128xbf16> to vector<128x128xbf16>
    %cst_37 = arith.constant dense<0.000000e+00> : vector<128x128xf32>
    %38 = tpu.matmul %8, %37, %cst_37 {dimension_numbers = #tpu.dot_dimension_numbers<[1], [0], [0], [1], [0, 0, 1, 1], [], []>} : vector<128x128xbf16>, vector<128x128xbf16>, vector<128x128xf32> -> vector<128x128xf32>
    %c4_38 = arith.constant 4 : index
    %c0_39 = arith.constant 0 : index
    %c0_40 = arith.constant 0 : index
    %39 = vector.load %arg3[%c4_38, %c0_39, %c0_40] : memref<9x128x128xf32, #tpu.memory_space<vmem>>, vector<1x128x128xf32>
    %40 = vector.shape_cast %39 : vector<1x128x128xf32> to vector<128x128xf32>
    %cst_41 = arith.constant dense<0.000000e+00> : vector<128x128xf32>
    %41 = tpu.matmul %40, %38, %cst_41 {dimension_numbers = #tpu.dot_dimension_numbers<[1], [0], [0], [1], [0, 0, 1, 1], [], []>} : vector<128x128xf32>, vector<128x128xf32>, vector<128x128xf32> -> vector<128x128xf32>
    %42 = arith.addf %35, %41 : vector<128x128xf32>
    %c5 = arith.constant 5 : index
    %c0_42 = arith.constant 0 : index
    %c0_43 = arith.constant 0 : index
    %43 = vector.load %arg2[%c5, %c0_42, %c0_43] : memref<9x128x128xbf16, #tpu.memory_space<vmem>>, vector<1x128x128xbf16>
    %44 = vector.shape_cast %43 : vector<1x128x128xbf16> to vector<128x128xbf16>
    %cst_44 = arith.constant dense<0.000000e+00> : vector<128x128xf32>
    %45 = tpu.matmul %8, %44, %cst_44 {dimension_numbers = #tpu.dot_dimension_numbers<[1], [0], [0], [1], [0, 0, 1, 1], [], []>} : vector<128x128xbf16>, vector<128x128xbf16>, vector<128x128xf32> -> vector<128x128xf32>
    %c5_45 = arith.constant 5 : index
    %c0_46 = arith.constant 0 : index
    %c0_47 = arith.constant 0 : index
    %46 = vector.load %arg3[%c5_45, %c0_46, %c0_47] : memref<9x128x128xf32, #tpu.memory_space<vmem>>, vector<1x128x128xf32>
    %47 = vector.shape_cast %46 : vector<1x128x128xf32> to vector<128x128xf32>
    %cst_48 = arith.constant dense<0.000000e+00> : vector<128x128xf32>
    %48 = tpu.matmul %47, %45, %cst_48 {dimension_numbers = #tpu.dot_dimension_numbers<[1], [0], [0], [1], [0, 0, 1, 1], [], []>} : vector<128x128xf32>, vector<128x128xf32>, vector<128x128xf32> -> vector<128x128xf32>
    %49 = arith.addf %42, %48 : vector<128x128xf32>
    %c6 = arith.constant 6 : index
    %c0_49 = arith.constant 0 : index
    %c0_50 = arith.constant 0 : index
    %50 = vector.load %arg2[%c6, %c0_49, %c0_50] : memref<9x128x128xbf16, #tpu.memory_space<vmem>>, vector<1x128x128xbf16>
    %51 = vector.shape_cast %50 : vector<1x128x128xbf16> to vector<128x128xbf16>
    %cst_51 = arith.constant dense<0.000000e+00> : vector<128x128xf32>
    %52 = tpu.matmul %8, %51, %cst_51 {dimension_numbers = #tpu.dot_dimension_numbers<[1], [0], [0], [1], [0, 0, 1, 1], [], []>} : vector<128x128xbf16>, vector<128x128xbf16>, vector<128x128xf32> -> vector<128x128xf32>
    %c6_52 = arith.constant 6 : index
    %c0_53 = arith.constant 0 : index
    %c0_54 = arith.constant 0 : index
    %53 = vector.load %arg3[%c6_52, %c0_53, %c0_54] : memref<9x128x128xf32, #tpu.memory_space<vmem>>, vector<1x128x128xf32>
    %54 = vector.shape_cast %53 : vector<1x128x128xf32> to vector<128x128xf32>
    %cst_55 = arith.constant dense<0.000000e+00> : vector<128x128xf32>
    %55 = tpu.matmul %54, %52, %cst_55 {dimension_numbers = #tpu.dot_dimension_numbers<[1], [0], [0], [1], [0, 0, 1, 1], [], []>} : vector<128x128xf32>, vector<128x128xf32>, vector<128x128xf32> -> vector<128x128xf32>
    %56 = arith.addf %49, %55 : vector<128x128xf32>
    %c7 = arith.constant 7 : index
    %c0_56 = arith.constant 0 : index
    %c0_57 = arith.constant 0 : index
    %57 = vector.load %arg2[%c7, %c0_56, %c0_57] : memref<9x128x128xbf16, #tpu.memory_space<vmem>>, vector<1x128x128xbf16>
    %58 = vector.shape_cast %57 : vector<1x128x128xbf16> to vector<128x128xbf16>
    %cst_58 = arith.constant dense<0.000000e+00> : vector<128x128xf32>
    %59 = tpu.matmul %8, %58, %cst_58 {dimension_numbers = #tpu.dot_dimension_numbers<[1], [0], [0], [1], [0, 0, 1, 1], [], []>} : vector<128x128xbf16>, vector<128x128xbf16>, vector<128x128xf32> -> vector<128x128xf32>
    %c7_59 = arith.constant 7 : index
    %c0_60 = arith.constant 0 : index
    %c0_61 = arith.constant 0 : index
    %60 = vector.load %arg3[%c7_59, %c0_60, %c0_61] : memref<9x128x128xf32, #tpu.memory_space<vmem>>, vector<1x128x128xf32>
    %61 = vector.shape_cast %60 : vector<1x128x128xf32> to vector<128x128xf32>
    %cst_62 = arith.constant dense<0.000000e+00> : vector<128x128xf32>
    %62 = tpu.matmul %61, %59, %cst_62 {dimension_numbers = #tpu.dot_dimension_numbers<[1], [0], [0], [1], [0, 0, 1, 1], [], []>} : vector<128x128xf32>, vector<128x128xf32>, vector<128x128xf32> -> vector<128x128xf32>
    %63 = arith.addf %56, %62 : vector<128x128xf32>
    %c8 = arith.constant 8 : index
    %c0_63 = arith.constant 0 : index
    %c0_64 = arith.constant 0 : index
    %64 = vector.load %arg2[%c8, %c0_63, %c0_64] : memref<9x128x128xbf16, #tpu.memory_space<vmem>>, vector<1x128x128xbf16>
    %65 = vector.shape_cast %64 : vector<1x128x128xbf16> to vector<128x128xbf16>
    %cst_65 = arith.constant dense<0.000000e+00> : vector<128x128xf32>
    %66 = tpu.matmul %8, %65, %cst_65 {dimension_numbers = #tpu.dot_dimension_numbers<[1], [0], [0], [1], [0, 0, 1, 1], [], []>} : vector<128x128xbf16>, vector<128x128xbf16>, vector<128x128xf32> -> vector<128x128xf32>
    %c8_66 = arith.constant 8 : index
    %c0_67 = arith.constant 0 : index
    %c0_68 = arith.constant 0 : index
    %67 = vector.load %arg3[%c8_66, %c0_67, %c0_68] : memref<9x128x128xf32, #tpu.memory_space<vmem>>, vector<1x128x128xf32>
    %68 = vector.shape_cast %67 : vector<1x128x128xf32> to vector<128x128xf32>
    %cst_69 = arith.constant dense<0.000000e+00> : vector<128x128xf32>
    %69 = tpu.matmul %68, %66, %cst_69 {dimension_numbers = #tpu.dot_dimension_numbers<[1], [0], [0], [1], [0, 0, 1, 1], [], []>} : vector<128x128xf32>, vector<128x128xf32>, vector<128x128xf32> -> vector<128x128xf32>
    %70 = arith.addf %63, %69 : vector<128x128xf32>
    %c1_70 = arith.constant 1 : index
    %c0_71 = arith.constant 0 : index
    %71 = vector.load %arg4[%c1_70, %c0_71] : memref<2x128xf32, #tpu.memory_space<vmem>>, vector<1x128xf32>
    %72 = vector.broadcast %71 : vector<1x128xf32> to vector<128x128xf32>
    %73 = arith.addf %70, %72 : vector<128x128xf32>
    %cst_72 = arith.constant 0.000000e+00 : f32
    %74 = vector.broadcast %cst_72 : f32 to vector<128x128xf32>
    %75 = arith.maximumf %73, %74 : vector<128x128xf32>
    %76 = arith.truncf %75 : vector<128x128xf32> to vector<128x128xbf16>
    %c0_73 = arith.constant 0 : index
    %c0_74 = arith.constant 0 : index
    %77 = vector.load %arg5[%c0_73, %c0_74] : memref<128x128xbf16, #tpu.memory_space<vmem>>, vector<128x128xbf16>
    tpu.vector_store %arg5[%c0_73, %c0_74], %76 {strides = array<i32>} : memref<128x128xbf16, #tpu.memory_space<vmem>>, vector<128x128xbf16>,
    return
  }
}

module attributes {stable_mosaic.version = 11 : i64} {
  func.func @_head_kernel(%arg0: memref<16x128xbf16, #tpu.memory_space<vmem>>, %arg1: memref<16x512xbf16, #tpu.memory_space<vmem>>, %arg2: memref<512x128xbf16, #tpu.memory_space<vmem>>, %arg3: memref<256x256xbf16, #tpu.memory_space<vmem>>, %arg4: memref<256x128xbf16, #tpu.memory_space<vmem>>, %arg5: memref<128x256xbf16, #tpu.memory_space<vmem>>, %arg6: memref<256x128xbf16, #tpu.memory_space<vmem>>, %arg7: memref<8x256xf32, #tpu.memory_space<vmem>>, %arg8: memref<16x128xf32, #tpu.memory_space<vmem>>) attributes {dimension_semantics = [], scalar_prefetch = 0 : i64, scratch_operands = 0 : i64, tpu.core_type = #tpu.core_type<tc>} {
    %c0 = arith.constant 0 : index
    %c0_0 = arith.constant 0 : index
    %0 = vector.load %arg7[%c0, %c0_0] : memref<8x256xf32, #tpu.memory_space<vmem>>, vector<1x128xf32>
    %c1 = arith.constant 1 : index
    %c0_1 = arith.constant 0 : index
    %1 = vector.load %arg7[%c1, %c0_1] : memref<8x256xf32, #tpu.memory_space<vmem>>, vector<1x256xf32>
    %c2 = arith.constant 2 : index
    %c0_2 = arith.constant 0 : index
    %2 = vector.load %arg7[%c2, %c0_2] : memref<8x256xf32, #tpu.memory_space<vmem>>, vector<1x128xf32>
    %c3 = arith.constant 3 : index
    %c0_3 = arith.constant 0 : index
    %3 = vector.load %arg7[%c3, %c0_3] : memref<8x256xf32, #tpu.memory_space<vmem>>, vector<1x256xf32>
    %c4 = arith.constant 4 : index
    %c0_4 = arith.constant 0 : index
    %4 = vector.load %arg7[%c4, %c0_4] : memref<8x256xf32, #tpu.memory_space<vmem>>, vector<1x128xf32>
    %c0_5 = arith.constant 0 : index
    %c0_6 = arith.constant 0 : index
    %5 = vector.load %arg1[%c0_5, %c0_6] : memref<16x512xbf16, #tpu.memory_space<vmem>>, vector<16x512xbf16>
    %c0_7 = arith.constant 0 : index
    %c0_8 = arith.constant 0 : index
    %6 = vector.load %arg2[%c0_7, %c0_8] : memref<512x128xbf16, #tpu.memory_space<vmem>>, vector<512x128xbf16>
    %cst = arith.constant dense<0.000000e+00> : vector<16x128xf32>
    %7 = tpu.matmul %5, %6, %cst {dimension_numbers = #tpu.dot_dimension_numbers<[1], [0], [0], [1], [0, 0, 1, 1], [], []>} : vector<16x512xbf16>, vector<512x128xbf16>, vector<16x128xf32> -> vector<16x128xf32>
    %8 = vector.broadcast %0 : vector<1x128xf32> to vector<16x128xf32>
    %9 = arith.addf %7, %8 : vector<16x128xf32>
    %cst_9 = arith.constant 0.000000e+00 : f32
    %10 = vector.broadcast %cst_9 : f32 to vector<16x128xf32>
    %11 = arith.maximumf %9, %10 : vector<16x128xf32>
    %c0_10 = arith.constant 0 : index
    %c0_11 = arith.constant 0 : index
    %12 = vector.load %arg0[%c0_10, %c0_11] : memref<16x128xbf16, #tpu.memory_space<vmem>>, vector<16x128xbf16>
    %13 = arith.truncf %11 : vector<16x128xf32> to vector<16x128xbf16>
    %14 = tpu.concatenate %12, %13 in 1 : vector<16x128xbf16>, vector<16x128xbf16> -> vector<16x256xbf16>
    %c0_12 = arith.constant 0 : index
    %c0_13 = arith.constant 0 : index
    %15 = vector.load %arg3[%c0_12, %c0_13] : memref<256x256xbf16, #tpu.memory_space<vmem>>, vector<256x256xbf16>
    %cst_14 = arith.constant dense<0.000000e+00> : vector<16x256xf32>
    %16 = tpu.matmul %14, %15, %cst_14 {dimension_numbers = #tpu.dot_dimension_numbers<[1], [0], [0], [1], [0, 0, 1, 1], [], []>} : vector<16x256xbf16>, vector<256x256xbf16>, vector<16x256xf32> -> vector<16x256xf32>
    %17 = vector.broadcast %1 : vector<1x256xf32> to vector<16x256xf32>
    %18 = arith.addf %16, %17 : vector<16x256xf32>
    %cst_15 = arith.constant 0.000000e+00 : f32
    %19 = vector.broadcast %cst_15 : f32 to vector<16x256xf32>
    %20 = arith.maximumf %18, %19 : vector<16x256xf32>
    %21 = arith.truncf %20 : vector<16x256xf32> to vector<16x256xbf16>
    %c0_16 = arith.constant 0 : index
    %c0_17 = arith.constant 0 : index
    %22 = vector.load %arg4[%c0_16, %c0_17] : memref<256x128xbf16, #tpu.memory_space<vmem>>, vector<256x128xbf16>
    %cst_18 = arith.constant dense<0.000000e+00> : vector<16x128xf32>
    %23 = tpu.matmul %21, %22, %cst_18 {dimension_numbers = #tpu.dot_dimension_numbers<[1], [0], [0], [1], [0, 0, 1, 1], [], []>} : vector<16x256xbf16>, vector<256x128xbf16>, vector<16x128xf32> -> vector<16x128xf32>
    %24 = vector.broadcast %2 : vector<1x128xf32> to vector<16x128xf32>
    %25 = arith.addf %23, %24 : vector<16x128xf32>
    %cst_19 = arith.constant 0.000000e+00 : f32
    %26 = vector.broadcast %cst_19 : f32 to vector<16x128xf32>
    %27 = arith.maximumf %25, %26 : vector<16x128xf32>
    %28 = arith.truncf %27 : vector<16x128xf32> to vector<16x128xbf16>
    %c0_20 = arith.constant 0 : index
    %c0_21 = arith.constant 0 : index
    %29 = vector.load %arg5[%c0_20, %c0_21] : memref<128x256xbf16, #tpu.memory_space<vmem>>, vector<128x256xbf16>
    %cst_22 = arith.constant dense<0.000000e+00> : vector<16x256xf32>
    %30 = tpu.matmul %28, %29, %cst_22 {dimension_numbers = #tpu.dot_dimension_numbers<[1], [0], [0], [1], [0, 0, 1, 1], [], []>} : vector<16x128xbf16>, vector<128x256xbf16>, vector<16x256xf32> -> vector<16x256xf32>
    %31 = vector.broadcast %3 : vector<1x256xf32> to vector<16x256xf32>
    %32 = arith.addf %30, %31 : vector<16x256xf32>
    %cst_23 = arith.constant 0.000000e+00 : f32
    %33 = vector.broadcast %cst_23 : f32 to vector<16x256xf32>
    %34 = arith.maximumf %32, %33 : vector<16x256xf32>
    %35 = arith.truncf %34 : vector<16x256xf32> to vector<16x256xbf16>
    %c0_24 = arith.constant 0 : index
    %c0_25 = arith.constant 0 : index
    %36 = vector.load %arg6[%c0_24, %c0_25] : memref<256x128xbf16, #tpu.memory_space<vmem>>, vector<256x128xbf16>
    %cst_26 = arith.constant dense<0.000000e+00> : vector<16x128xf32>
    %37 = tpu.matmul %35, %36, %cst_26 {dimension_numbers = #tpu.dot_dimension_numbers<[1], [0], [0], [1], [0, 0, 1, 1], [], []>} : vector<16x256xbf16>, vector<256x128xbf16>, vector<16x128xf32> -> vector<16x128xf32>
    %38 = vector.broadcast %4 : vector<1x128xf32> to vector<16x128xf32>
    %39 = arith.addf %37, %38 : vector<16x128xf32>
    %c0_27 = arith.constant 0 : index
    %c0_28 = arith.constant 0 : index
    %40 = vector.load %arg8[%c0_27, %c0_28] : memref<16x128xf32, #tpu.memory_space<vmem>>, vector<16x128xf32>
    tpu.vector_store %arg8[%c0_27, %c0_28], %39 {strides = array<i32>} : memref<16x128xf32, #tpu.memory_space<vmem>>, vector<16x128xf32>,
    return
  }
}

</mosaic_0001>

<bundles_post_ra>
// kernel: model_forward.4
= control target key start
LH: loop header
LB: loop body
LE: loop exit
PB: predicated region body
PF: predicated region fallthrough
CT: control target
= control target key end

     0   :  { %vm1100_vm0 = vcmask 1041408   ;;  %vm781_vm1 = vcmask 293888   ;;  %s5959_s1 = inlined_call_operand.vmem [shape: bf16[36,128], index: 1, kind: input, shape index: {}]   ;;  %s5960_s0 = inlined_call_operand.vmem [shape: bf16[1682,36], index: 0, kind: input, shape index: {}]   ;;  %s5961_s2 = inlined_call_operand.vmem [shape: f32[1,128], index: 2, kind: input, shape index: {}]   ;;  %s5962_s3 = inlined_call_operand.vmem [shape: bf16[1682,128], index: 3, kind: output, shape index: {}]  }
   0x1   :  { %v4857_v0 = vld [vmem:[%s5959_s1 + $0x10] ss:$0 sps:$4 sm:$0x33]   ;;  %v4858_v1 = vld [vmem:[%s5959_s1 + $0x8] sm:$0xff]   ;;  %v4860_v3 = vld [vmem:[%s5960_s0] sm:$0xff]  }
   0x2   :  { %4855 = vmatprep.subr.msk.bf16.mxu0 %vm1100_vm0, %v4857_v0  ;;  %v1102_v2 = vsel %vm1100_vm0, %v4857_v0, 0  ;;  %4856 = vmatprep.subr.msk.bf16.mxu1 %vm1100_vm0, %v4857_v0  ;;  %v4859_v4 = vld [vmem:[%s5959_s1] sm:$0xff]   ;;  %v4862_v5 = vld [vmem:[%s5960_s0 + $0x1b0] sm:$0xff]   ;;  %v4861_v6 = vld [vmem:[%s5960_s0 + $0x8] sm:$0xff]  }
   0x3   :  { %4632 = vmatpush3.bf16.msra.mxu0 %v1102_v2  ;;  %4852 = vmatpush3.bf16.msra.mxu1 %v1102_v2  ;;  %v4863_v7 = vld [vmem:[%s5960_s0 + $0x1b8] sm:$0xff]   ;;  %v4864_v8 = vld [vmem:[%s5960_s0 + $0x10] sm:$0xff]   ;;  %v4866_v9 = vld [vmem:[%s5960_s0 + $0x1c0] sm:$0xff]  }
   0x4   :  { %4633 = vmatprep.subr.bf16.mxu0 %v4858_v1  ;;  %4850 = vmatprep.subr.bf16.mxu1 %v4858_v1  ;;  %v4865_v10 = vld [vmem:[%s5960_s0 + $0x18] sm:$0xff]   ;;  %v4867_v11 = vld [vmem:[%s5960_s0 + $0x1c8] sm:$0xff]   ;;  %v4868_v12 = vld [vmem:[%s5960_s0 + $0x20] sm:$0xff]  }
   0x5   :  { %4637 = vmatprep.mubr.msk.bf16.mxu0 %vm781_vm1, %v4860_v3  ;;  %4745 = vmatprep.mubr.msk.bf16.mxu1 %vm781_vm1, %v4862_v5  ;;  %v4870_v13 = vld [vmem:[%s5960_s0 + $0x1d0] sm:$0xff]   ;;  %v4869_v14 = vld [vmem:[%s5960_s0 + $0x28] sm:$0xff]   ;;  %v4871_v15 = vld [vmem:[%s5960_s0 + $0x1d8] sm:$0xff]  }
   0x6   :  { %v4872_v16 = vld [vmem:[%s5960_s0 + $0x30] sm:$0xff]   ;;  %v4874_v17 = vld [vmem:[%s5960_s0 + $0x1e0] sm:$0xff]   ;;  %v4873_v18 = vld [vmem:[%s5960_s0 + $0x38] sm:$0xff]  }
   0x7   :  { %4634 = vmatpush3.bf16.msra.mxu0 %v4858_v1  ;;  %4853 = vmatpush3.bf16.msra.mxu1 %v4858_v1  ;;  %v4875_v19 = vld [vmem:[%s5960_s0 + $0x1e8] sm:$0xff]   ;;  %v4876_v20 = vld [vmem:[%s5960_s0 + $0x40] sm:$0xff]   ;;  %v4878_v21 = vld [vmem:[%s5960_s0 + $0x1f0] sm:$0xff]  }
   0x8   :  { %4635 = vmatprep.subr.bf16.mxu0 %v4859_v4  ;;  %4851 = vmatprep.subr.bf16.mxu1 %v4859_v4  ;;  %v4877_v22 = vld [vmem:[%s5960_s0 + $0x48] sm:$0xff]   ;;  %v4879_v23 = vld [vmem:[%s5960_s0 + $0x1f8] sm:$0xff]   ;;  %v4880_v24 = vld [vmem:[%s5960_s0 + $0x50] sm:$0xff]  }
   0x9   :  { %v4882_v25 = vld [vmem:[%s5960_s0 + $0x200] sm:$0xff]   ;;  %v4881_v26 = vld [vmem:[%s5960_s0 + $0x58] sm:$0xff]   ;;  %v4883_v27 = vld [vmem:[%s5960_s0 + $0x208] sm:$0xff]  }
   0xa   :  { %v4884_v28 = vld [vmem:[%s5960_s0 + $0x60] sm:$0xff]   ;;  %v4886_v29 = vld [vmem:[%s5960_s0 + $0x210] sm:$0xff]   ;;  %v4885_v30 = vld [vmem:[%s5960_s0 + $0x68] sm:$0xff]  }
   0xb   :  { %4636 = vmatpush3.bf16.msra.mxu0 %v4859_v4  ;;  %4854 = vmatpush3.bf16.msra.mxu1 %v4859_v4  ;;  %v4887_v31 = vld [vmem:[%s5960_s0 + $0x218] sm:$0xff]   ;;  %v4888_v32 = vld [vmem:[%s5960_s0 + $0x70] sm:$0xff]   ;;  %v4890_v33 = vld [vmem:[%s5960_s0 + $0x220] sm:$0xff]  }
   0xc   :  { %v4889_v34 = vld [vmem:[%s5960_s0 + $0x78] sm:$0xff]   ;;  %v4891_v35 = vld [vmem:[%s5960_s0 + $0x228] sm:$0xff]   ;;  %v4892_v36 = vld [vmem:[%s5960_s0 + $0x80] sm:$0xff]  }
   0xd   :  { %v4894_v37 = vld [vmem:[%s5960_s0 + $0x230] sm:$0xff]   ;;  %v4893_v38 = vld [vmem:[%s5960_s0 + $0x88] sm:$0xff]   ;;  %v4895_v39 = vld [vmem:[%s5960_s0 + $0x238] sm:$0xff]  }
   0xe   :  { %4638 = vmatmul.mubr.msk.bf16.vlgmr.msra.gmra.mxu0 %vm781_vm1, %v4861_v6  ;;  %4746 = vmatmul.mubr.msk.bf16.vlgmr.msra.gmra.mxu1 %vm781_vm1, %v4863_v7  ;;  %v4896_v40 = vld [vmem:[%s5960_s0 + $0x90] sm:$0xff]   ;;  %v4898_v41 = vld [vmem:[%s5960_s0 + $0x240] sm:$0xff]   ;;  %v4897_v42 = vld [vmem:[%s5960_s0 + $0x98] sm:$0xff]  }
   0xf   :  { %4641 = vmatprep.mubr.msk.bf16.mxu0 %vm781_vm1, %v4864_v8  ;;  %4749 = vmatprep.mubr.msk.bf16.mxu1 %vm781_vm1, %v4866_v9  ;;  %v4899_v43 = vld [vmem:[%s5960_s0 + $0x248] sm:$0xff]   ;;  %v4900_v44 = vld [vmem:[%s5960_s0 + $0xa0] sm:$0xff]   ;;  %v4902_v45 = vld [vmem:[%s5960_s0 + $0x250] sm:$0xff]  }
  0x10   :  { %v4901_v46 = vld [vmem:[%s5960_s0 + $0xa8] sm:$0xff]   ;;  %v4903_v47 = vld [vmem:[%s5960_s0 + $0x258] sm:$0xff]   ;;  %v4904_v48 = vld [vmem:[%s5960_s0 + $0xb0] sm:$0xff]  }
  0x11   :  { %v4906_v49 = vld [vmem:[%s5960_s0 + $0x260] sm:$0xff]   ;;  %v4905_v50 = vld [vmem:[%s5960_s0 + $0xb8] sm:$0xff]   ;;  %v4907_v51 = vld [vmem:[%s5960_s0 + $0x268] sm:$0xff]  }
  0x12   :  { %v4908_v52 = vld [vmem:[%s5960_s0 + $0xc0] sm:$0xff]   ;;  %v4910_v53 = vld [vmem:[%s5960_s0 + $0x270] sm:$0xff]   ;;  %v4909_v54 = vld [vmem:[%s5960_s0 + $0xc8] sm:$0xff]  }
  0x13   :  { %v4911_v55 = vld [vmem:[%s5960_s0 + $0x278] sm:$0xff]   ;;  %v4912_v56 = vld [vmem:[%s5960_s0 + $0xd0] sm:$0xff]   ;;  %v4914_v57 = vld [vmem:[%s5960_s0 + $0x280] sm:$0xff]  }
  0x14   :  { %v4913_v58 = vld [vmem:[%s5960_s0 + $0xd8] sm:$0xff]   ;;  %v4915_v59 = vld [vmem:[%s5960_s0 + $0x288] sm:$0xff]   ;;  %v4916_v60 = vld [vmem:[%s5960_s0 + $0xe0] sm:$0xff]  }
  0x15   :  { %v4918_v61 = vld [vmem:[%s5960_s0 + $0x290] sm:$0xff]   ;;  %v4917_v62 = vld [vmem:[%s5960_s0 + $0xe8] sm:$0xff]   ;;  %v4919_v63 = vld [vmem:[%s5960_s0 + $0x298] sm:$0xff]  }
  0x16   :  { %4642 = vmatmul.mubr.msk.bf16.gmra.mxu0 %vm781_vm1, %v4865_v10  ;;  %4750 = vmatmul.mubr.msk.bf16.gmra.mxu1 %vm781_vm1, %v4867_v11  ;;  %v4920_v0 = vld [vmem:[%s5960_s0 + $0xf0] sm:$0xff]   ;;  %v4922_v1 = vld [vmem:[%s5960_s0 + $0x2a0] sm:$0xff]   ;;  %v4921_v2 = vld [vmem:[%s5960_s0 + $0xf8] sm:$0xff]  }
  0x17   :  { %4645 = vmatprep.mubr.msk.bf16.mxu0 %vm781_vm1, %v4868_v12  ;;  %4753 = vmatprep.mubr.msk.bf16.mxu1 %vm781_vm1, %v4870_v13  ;;  %v4923_v3 = vld [vmem:[%s5960_s0 + $0x2a8] sm:$0xff]   ;;  %v4924_v4 = vld [vmem:[%s5960_s0 + $0x100] sm:$0xff]   ;;  %v4926_v5 = vld [vmem:[%s5960_s0 + $0x2b0] sm:$0xff]  }
  0x18   :  { %v4925_v6 = vld [vmem:[%s5960_s0 + $0x108] sm:$0xff]   ;;  %v4927_v7 = vld [vmem:[%s5960_s0 + $0x2b8] sm:$0xff]   ;;  %v4928_v8 = vld [vmem:[%s5960_s0 + $0x110] sm:$0xff]  }
  0x19   :  { %v4930_v9 = vld [vmem:[%s5960_s0 + $0x2c0] sm:$0xff]   ;;  %v4929_v10 = vld [vmem:[%s5960_s0 + $0x118] sm:$0xff]   ;;  %v4931_v11 = vld [vmem:[%s5960_s0 + $0x2c8] sm:$0xff]  }
  0x1a   :  { %v4932_v12 = vld [vmem:[%s5960_s0 + $0x120] sm:$0xff]   ;;  %v4934_v13 = vld [vmem:[%s5960_s0 + $0x2d0] sm:$0xff]  }
  0x1e   :  { %4646 = vmatmul.mubr.msk.bf16.gmra.mxu0 %vm781_vm1, %v4869_v14  ;;  %4754 = vmatmul.mubr.msk.bf16.gmra.mxu1 %vm781_vm1, %v4871_v15  ;;  %v4933_v14 = vld [vmem:[%s5960_s0 + $0x128] sm:$0xff]   ;;  %v4935_v15 = vld [vmem:[%s5960_s0 + $0x2d8] sm:$0xff]  }
  0x1f   :  { %4649 = vmatprep.mubr.msk.bf16.mxu0 %vm781_vm1, %v4872_v16  ;;  %4757 = vmatprep.mubr.msk.bf16.mxu1 %vm781_vm1, %v4874_v17  ;;  %v4936_v16 = vld [vmem:[%s5960_s0 + $0x130] sm:$0xff]   ;;  %v4938_v17 = vld [vmem:[%s5960_s0 + $0x2e0] sm:$0xff]  }
  0x26   :  { %4650 = vmatmul.mubr.msk.bf16.gmra.mxu0 %vm781_vm1, %v4873_v18  ;;  %4758 = vmatmul.mubr.msk.bf16.gmra.mxu1 %vm781_vm1, %v4875_v19  ;;  %v4937_v18 = vld [vmem:[%s5960_s0 + $0x138] sm:$0xff]   ;;  %v4939_v19 = vld [vmem:[%s5960_s0 + $0x2e8] sm:$0xff]  }
  0x27   :  { %4653 = vmatprep.mubr.msk.bf16.mxu0 %vm781_vm1, %v4876_v20  ;;  %4761 = vmatprep.mubr.msk.bf16.mxu1 %vm781_vm1, %v4878_v21  ;;  %v4940_v20 = vld [vmem:[%s5960_s0 + $0x140] sm:$0xff]   ;;  %v4942_v21 = vld [vmem:[%s5960_s0 + $0x2f0] sm:$0xff]  }
  0x2e   :  { %4654 = vmatmul.mubr.msk.bf16.gmra.mxu0 %vm781_vm1, %v4877_v22  ;;  %4762 = vmatmul.mubr.msk.bf16.gmra.mxu1 %vm781_vm1, %v4879_v23  ;;  %v4941_v22 = vld [vmem:[%s5960_s0 + $0x148] sm:$0xff]   ;;  %v4943_v23 = vld [vmem:[%s5960_s0 + $0x2f8] sm:$0xff]  }
  0x2f   :  { %4657 = vmatprep.mubr.msk.bf16.mxu0 %vm781_vm1, %v4880_v24  ;;  %4765 = vmatprep.mubr.msk.bf16.mxu1 %vm781_vm1, %v4882_v25  ;;  %v4944_v24 = vld [vmem:[%s5960_s0 + $0x150] sm:$0xff]   ;;  %v4946_v25 = vld [vmem:[%s5960_s0 + $0x300] sm:$0xff]  }
  0x36   :  { %4658 = vmatmul.mubr.msk.bf16.gmra.mxu0 %vm781_vm1, %v4881_v26  ;;  %4766 = vmatmul.mubr.msk.bf16.gmra.mxu1 %vm781_vm1, %v4883_v27  ;;  %v4945_v26 = vld [vmem:[%s5960_s0 + $0x158] sm:$0xff]   ;;  %v4947_v27 = vld [vmem:[%s5960_s0 + $0x308] sm:$0xff]  }
  0x37   :  { %4661 = vmatprep.mubr.msk.bf16.mxu0 %vm781_vm1, %v4884_v28  ;;  %4769 = vmatprep.mubr.msk.bf16.mxu1 %vm781_vm1, %v4886_v29  ;;  %v4948_v28 = vld [vmem:[%s5960_s0 + $0x160] sm:$0xff]   ;;  %v4950_v29 = vld [vmem:[%s5960_s0 + $0x310] sm:$0xff]  }
  0x3e   :  { %4662 = vmatmul.mubr.msk.bf16.gmra.mxu0 %vm781_vm1, %v4885_v30  ;;  %4770 = vmatmul.mubr.msk.bf16.gmra.mxu1 %vm781_vm1, %v4887_v31  ;;  %v4949_v30 = vld [vmem:[%s5960_s0 + $0x168] sm:$0xff]   ;;  %v4951_v31 = vld [vmem:[%s5960_s0 + $0x318] sm:$0xff]  }
  0x3f   :  { %4665 = vmatprep.mubr.msk.bf16.mxu0 %vm781_vm1, %v4888_v32  ;;  %4773 = vmatprep.mubr.msk.bf16.mxu1 %vm781_vm1, %v4890_v33  ;;  %v4952_v32 = vld [vmem:[%s5960_s0 + $0x170] sm:$0xff]   ;;  %v4954_v33 = vld [vmem:[%s5960_s0 + $0x320] sm:$0xff]  }
  0x46   :  { %4666 = vmatmul.mubr.msk.bf16.gmra.mxu0 %vm781_vm1, %v4889_v34  ;;  %4774 = vmatmul.mubr.msk.bf16.gmra.mxu1 %vm781_vm1, %v4891_v35  ;;  %v4953_v34 = vld [vmem:[%s5960_s0 + $0x178] sm:$0xff]   ;;  %v4955_v35 = vld [vmem:[%s5960_s0 + $0x328] sm:$0xff]  }
  0x47   :  { %4669 = vmatprep.mubr.msk.bf16.mxu0 %vm781_vm1, %v4892_v36  ;;  %4777 = vmatprep.mubr.msk.bf16.mxu1 %vm781_vm1, %v4894_v37  ;;  %v4956_v36 = vld [vmem:[%s5960_s0 + $0x180] sm:$0xff]   ;;  %v4958_v37 = vld [vmem:[%s5960_s0 + $0x330] sm:$0xff]  }
  0x4e   :  { %4670 = vmatmul.mubr.msk.bf16.gmra.mxu0 %vm781_vm1, %v4893_v38  ;;  %4778 = vmatmul.mubr.msk.bf16.gmra.mxu1 %vm781_vm1, %v4895_v39  ;;  %v4957_v38 = vld [vmem:[%s5960_s0 + $0x188] sm:$0xff]   ;;  %v4959_v39 = vld [vmem:[%s5960_s0 + $0x338] sm:$0xff]  }
  0x4f   :  { %4673 = vmatprep.mubr.msk.bf16.mxu0 %vm781_vm1, %v4896_v40  ;;  %4781 = vmatprep.mubr.msk.bf16.mxu1 %vm781_vm1, %v4898_v41  ;;  %v4960_v40 = vld [vmem:[%s5960_s0 + $0x190] sm:$0xff]   ;;  %v4962_v41 = vld [vmem:[%s5960_s0 + $0x340] sm:$0xff]  }
  0x56   :  { %4674 = vmatmul.mubr.msk.bf16.gmra.mxu0 %vm781_vm1, %v4897_v42  ;;  %4782 = vmatmul.mubr.msk.bf16.gmra.mxu1 %vm781_vm1, %v4899_v43  ;;  %v5403_v42 = vld [vmem:[%s5961_s2] ss:$0 sm:$0xff] }
  0x57   :  { %4677 = vmatprep.mubr.msk.bf16.mxu0 %vm781_vm1, %v4900_v44  ;;  %4785 = vmatprep.mubr.msk.bf16.mxu1 %vm781_vm1, %v4902_v45 }
  0x5e   :  { %4678 = vmatmul.mubr.msk.bf16.gmra.mxu0 %vm781_vm1, %v4901_v46  ;;  %4786 = vmatmul.mubr.msk.bf16.gmra.mxu1 %vm781_vm1, %v4903_v47 }
  0x5f   :  { %4681 = vmatprep.mubr.msk.bf16.mxu0 %vm781_vm1, %v4904_v48  ;;  %4789 = vmatprep.mubr.msk.bf16.mxu1 %vm781_vm1, %v4906_v49 }
  0x66   :  { %4682 = vmatmul.mubr.msk.bf16.gmra.mxu0 %vm781_vm1, %v4905_v50  ;;  %4790 = vmatmul.mubr.msk.bf16.gmra.mxu1 %vm781_vm1, %v4907_v51 }
  0x67   :  { %4685 = vmatprep.mubr.msk.bf16.mxu0 %vm781_vm1, %v4908_v52  ;;  %4793 = vmatprep.mubr.msk.bf16.mxu1 %vm781_vm1, %v4910_v53  ;;  %v4961_v52 = vld [vmem:[%s5960_s0 + $0x198] sm:$0xff]   ;;  %v4963_v53 = vld [vmem:[%s5960_s0 + $0x348] ss:$0 sps:$4 sm:$0x11]  }
  0x6e   :  { %4686 = vmatmul.mubr.msk.bf16.gmra.mxu0 %vm781_vm1, %v4909_v54  ;;  %4794 = vmatmul.mubr.msk.bf16.gmra.mxu1 %vm781_vm1, %v4911_v55 }
  0x6f   :  { %4689 = vmatprep.mubr.msk.bf16.mxu0 %vm781_vm1, %v4912_v56  ;;  %4797 = vmatprep.mubr.msk.bf16.mxu1 %vm781_vm1, %v4914_v57 }
  0x76   :  { %4690 = vmatmul.mubr.msk.bf16.gmra.mxu0 %vm781_vm1, %v4913_v58  ;;  %4798 = vmatmul.mubr.msk.bf16.gmra.mxu1 %vm781_vm1, %v4915_v59  ;;  %v4964_v58 = vld [vmem:[%s5960_s0 + $0x1a0] sm:$0xff]  }
  0x77   :  { %4693 = vmatprep.mubr.msk.bf16.mxu0 %vm781_vm1, %v4916_v60  ;;  %4801 = vmatprep.mubr.msk.bf16.mxu1 %vm781_vm1, %v4918_v61 }
  0x7e   :  { %4694 = vmatmul.mubr.msk.bf16.gmra.mxu0 %vm781_vm1, %v4917_v62  ;;  %4802 = vmatmul.mubr.msk.bf16.gmra.mxu1 %vm781_vm1, %v4919_v63 }
  0x7f   :  { %4697 = vmatprep.mubr.msk.bf16.mxu0 %vm781_vm1, %v4920_v0  ;;  %4805 = vmatprep.mubr.msk.bf16.mxu1 %vm781_vm1, %v4922_v1 }
  0x86   :  { %4698 = vmatmul.mubr.msk.bf16.gmra.mxu0 %vm781_vm1, %v4921_v2  ;;  %4806 = vmatmul.mubr.msk.bf16.gmra.mxu1 %vm781_vm1, %v4923_v3 }
  0x87   :  { %4701 = vmatprep.mubr.msk.bf16.mxu0 %vm781_vm1, %v4924_v4  ;;  %4809 = vmatprep.mubr.msk.bf16.mxu1 %vm781_vm1, %v4926_v5 }
  0x8e   :  { %4702 = vmatmul.mubr.msk.bf16.gmra.mxu0 %vm781_vm1, %v4925_v6  ;;  %4810 = vmatmul.mubr.msk.bf16.gmra.mxu1 %vm781_vm1, %v4927_v7 }
  0x8f   :  { %4705 = vmatprep.mubr.msk.bf16.mxu0 %vm781_vm1, %v4928_v8  ;;  %4813 = vmatprep.mubr.msk.bf16.mxu1 %vm781_vm1, %v4930_v9 }
  0x96   :  { %4706 = vmatmul.mubr.msk.bf16.gmra.mxu0 %vm781_vm1, %v4929_v10  ;;  %4814 = vmatmul.mubr.msk.bf16.gmra.mxu1 %vm781_vm1, %v4931_v11 }
  0x97   :  { %4709 = vmatprep.mubr.msk.bf16.mxu0 %vm781_vm1, %v4932_v12  ;;  %4817 = vmatprep.mubr.msk.bf16.mxu1 %vm781_vm1, %v4934_v13 }
  0x9e   :  { %4710 = vmatmul.mubr.msk.bf16.gmra.mxu0 %vm781_vm1, %v4933_v14  ;;  %4818 = vmatmul.mubr.msk.bf16.gmra.mxu1 %vm781_vm1, %v4935_v15 }
  0x9f   :  { %4713 = vmatprep.mubr.msk.bf16.mxu0 %vm781_vm1, %v4936_v16  ;;  %4821 = vmatprep.mubr.msk.bf16.mxu1 %vm781_vm1, %v4938_v17 }
  0xa6   :  { %4714 = vmatmul.mubr.msk.bf16.gmra.mxu0 %vm781_vm1, %v4937_v18  ;;  %4822 = vmatmul.mubr.msk.bf16.gmra.mxu1 %vm781_vm1, %v4939_v19  ;;  %v4965_v19 = vld [vmem:[%s5960_s0 + $0x1a8] sm:$0xff]  }
  0xa7   :  { %4717 = vmatprep.mubr.msk.bf16.mxu0 %vm781_vm1, %v4940_v20  ;;  %4825 = vmatprep.mubr.msk.bf16.mxu1 %vm781_vm1, %v4942_v21 }
  0xae   :  { %4718 = vmatmul.mubr.msk.bf16.gmra.mxu0 %vm781_vm1, %v4941_v22  ;;  %4826 = vmatmul.mubr.msk.bf16.gmra.mxu1 %vm781_vm1, %v4943_v23 }
  0xaf   :  { %4721 = vmatprep.mubr.msk.bf16.mxu0 %vm781_vm1, %v4944_v24  ;;  %4829 = vmatprep.mubr.msk.bf16.mxu1 %vm781_vm1, %v4946_v25 }
  0xb6   :  { %4722 = vmatmul.mubr.msk.bf16.gmra.mxu0 %vm781_vm1, %v4945_v26  ;;  %4830 = vmatmul.mubr.msk.bf16.gmra.mxu1 %vm781_vm1, %v4947_v27 }
  0xb7   :  { %4725 = vmatprep.mubr.msk.bf16.mxu0 %vm781_vm1, %v4948_v28  ;;  %4833 = vmatprep.mubr.msk.bf16.mxu1 %vm781_vm1, %v4950_v29 }
  0xbe   :  { %4726 = vmatmul.mubr.msk.bf16.gmra.mxu0 %vm781_vm1, %v4949_v30  ;;  %4834 = vmatmul.mubr.msk.bf16.gmra.mxu1 %vm781_vm1, %v4951_v31 }
  0xbf   :  { %4729 = vmatprep.mubr.msk.bf16.mxu0 %vm781_vm1, %v4952_v32  ;;  %4837 = vmatprep.mubr.msk.bf16.mxu1 %vm781_vm1, %v4954_v33 }
  0xc6   :  { %4730 = vmatmul.mubr.msk.bf16.gmra.mxu0 %vm781_vm1, %v4953_v34  ;;  %4838 = vmatmul.mubr.msk.bf16.gmra.mxu1 %vm781_vm1, %v4955_v35 }
  0xc7   :  { %4733 = vmatprep.mubr.msk.bf16.mxu0 %vm781_vm1, %v4956_v36  ;;  %4841 = vmatprep.mubr.msk.bf16.mxu1 %vm781_vm1, %v4958_v37 }
  0xce   :  { %v4639_v43 = vpop.f32.mrf.mxu0  ;;  %4734 = vmatmul.mubr.msk.bf16.gmra.mxu0 %vm781_vm1, %v4957_v38  ;;  %v4747_v44 = vpop.f32.mrf.mxu1  ;;  %4842 = vmatmul.mubr.msk.bf16.gmra.mxu1 %vm781_vm1, %v4959_v39 }
  0xcf   :  { %v1579_v45 = vadd.f32 %v4747_v44, %v5403_v42  ;;  %4737 = vmatprep.mubr.msk.bf16.mxu0 %vm781_vm1, %v4960_v40  ;;  %4845 = vmatprep.mubr.msk.bf16.mxu1 %vm781_vm1, %v4962_v41  ;;  %v1147_v46 = vadd.f32 %v4639_v43, %v5403_v42 }
  0xd0   :  { %v1138_v47 = vpop.f32.mrf.mxu0  ;;  %v1570_v48 = vpop.f32.mrf.mxu1 }
  0xd1   :  { %v1571_v50 = vadd.f32 %v5403_v42, %v1570_v48  ;;  %v1139_v54 = vadd.f32 %v5403_v42, %v1138_v47  ;;  %v2094_v55 = vmax.f32 %v1579_v45, 0.0  ;;  %v1986_v59 = vmax.f32 %v1147_v46, 0.0 }
  0xd2   :  { %v4640_v49 = vpop.f32.mrf.mxu0  ;;  %v4748_v51 = vpop.f32.mrf.mxu1 }
  0xd3   :  { %v1150_v56 = vadd.f32 %v4640_v49, %v5403_v42  ;;  %v1582_v57 = vadd.f32 %v4748_v51, %v5403_v42  ;;  %v2092_v2 = vmax.f32 %v1571_v50, 0.0  ;;  %v1984_v5 = vmax.f32 %v1139_v54, 0.0 }
  0xd4   :  { %v1141_v60 = vpop.f32.mrf.mxu0  ;;  %v1573_v61 = vpop.f32.mrf.mxu1 }
  0xd5   :  { %v1987_v62 = vmax.f32 %v1150_v56, 0.0  ;;  %v1142_v63 = vadd.f32 %v5403_v42, %v1141_v60  ;;  %v2095_v0 = vmax.f32 %v1582_v57, 0.0  ;;  %v1574_v1 = vadd.f32 %v5403_v42, %v1573_v61 }
  0xd6   :  { %v4643_v3 = vpop.f32.mrf.mxu0  ;;  %4738 = vmatmul.mubr.msk.bf16.gmra.mxu0 %vm781_vm1, %v4961_v52  ;;  %v4751_v4 = vpop.f32.mrf.mxu1  ;;  %4846 = vmatmul.mubr.msk.bf16.gmra.mxu1 %vm781_vm1, %v4963_v53 }
  0xd7   :  { %v3901_v6 = vpack.c.bf16 %v1987_v62, %v1986_v59  ;;  %v1985_v7 = vmax.f32 %v1142_v63, 0.0  ;;  %v4171_v8 = vpack.c.bf16 %v2095_v0, %v2094_v55  ;;  %4741 = vmatprep.mubr.msk.bf16.mxu0 %vm781_vm1, %v4964_v58  ;;  %v1163_v9 = vadd.f32 %v4643_v3, %v5403_v42 }
  0xd8   :  { %v2093_v10 = vmax.f32 %v1574_v1, 0.0  ;;  %v1154_v11 = vpop.f32.mrf.mxu0  ;;  %v1595_v12 = vadd.f32 %v4751_v4, %v5403_v42  ;;  %v1586_v13 = vpop.f32.mrf.mxu1 }
  0xd9   :  { %4418 = vst [vmem:[%s5962_s3 + $0x8] sm:$0xff] %v3901_v6   ;;  %v3896_v14 = vpack.c.bf16 %v1985_v7, %v1984_v5  ;;  %4472 = vst [vmem:[%s5962_s3 + $0x1b8] sm:$0xff] %v4171_v8   ;;  %v1587_v17 = vadd.f32 %v5403_v42, %v1586_v13  ;;  %v1155_v20 = vadd.f32 %v5403_v42, %v1154_v11  ;;  %v1990_v24 = vmax.f32 %v1163_v9, 0.0 }
  0xda   :  { %v4166_v15 = vpack.c.bf16 %v2093_v10, %v2092_v2  ;;  %v4644_v16 = vpop.f32.mrf.mxu0  ;;  %v4752_v18 = vpop.f32.mrf.mxu1  ;;  %v2098_v21 = vmax.f32 %v1595_v12, 0.0 }
  0xdb   :  { %3897 = vst [vmem:[%s5962_s3] sm:$0xff] %v3896_v14   ;;  %v1166_v22 = vadd.f32 %v4644_v16, %v5403_v42  ;;  %v1598_v23 = vadd.f32 %v4752_v18, %v5403_v42  ;;  %v2096_v31 = vmax.f32 %v1587_v17, 0.0  ;;  %v1988_v34 = vmax.f32 %v1155_v20, 0.0 }
  0xdc   :  { %4471 = vst [vmem:[%s5962_s3 + $0x1b0] sm:$0xff] %v4166_v15   ;;  %v1157_v25 = vpop.f32.mrf.mxu0  ;;  %v1589_v26 = vpop.f32.mrf.mxu1 }
  0xdd   :  { %v1991_v27 = vmax.f32 %v1166_v22, 0.0  ;;  %v1158_v28 = vadd.f32 %v5403_v42, %v1157_v25  ;;  %v2099_v29 = vmax.f32 %v1598_v23, 0.0  ;;  %v1590_v30 = vadd.f32 %v5403_v42, %v1589_v26 }
  0xde   :  { %v4647_v32 = vpop.f32.mrf.mxu0  ;;  %4742 = vmatmul.mubr.msk.bf16.gmra.mxu0 %vm781_vm1, %v4965_v19  ;;  %v4755_v33 = vpop.f32.mrf.mxu1 }
  0xdf   :  { %v3911_v35 = vpack.c.bf16 %v1991_v27, %v1990_v24  ;;  %v1989_v36 = vmax.f32 %v1158_v28, 0.0  ;;  %v4181_v37 = vpack.c.bf16 %v2099_v29, %v2098_v21  ;;  %v1179_v38 = vadd.f32 %v4647_v32, %v5403_v42 }
  0xe0   :  { %v2097_v39 = vmax.f32 %v1590_v30, 0.0  ;;  %v1170_v40 = vpop.f32.mrf.mxu0  ;;  %v1611_v41 = vadd.f32 %v4755_v33, %v5403_v42  ;;  %v1602_v43 = vpop.f32.mrf.mxu1 }
  0xe1   :  { %4420 = vst [vmem:[%s5962_s3 + $0x18] sm:$0xff] %v3911_v35   ;;  %v3906_v44 = vpack.c.bf16 %v1989_v36, %v1988_v34  ;;  %4474 = vst [vmem:[%s5962_s3 + $0x1c8] sm:$0xff] %v4181_v37   ;;  %v1603_v47 = vadd.f32 %v5403_v42, %v1602_v43  ;;  %v1171_v49 = vadd.f32 %v5403_v42, %v1170_v40  ;;  %v1994_v53 = vmax.f32 %v1179_v38, 0.0 }
  0xe2   :  { %v4176_v45 = vpack.c.bf16 %v2097_v39, %v2096_v31  ;;  %v4648_v46 = vpop.f32.mrf.mxu0  ;;  %v4756_v48 = vpop.f32.mrf.mxu1  ;;  %v2102_v50 = vmax.f32 %v1611_v41, 0.0 }
  0xe3   :  { %4419 = vst [vmem:[%s5962_s3 + $0x10] sm:$0xff] %v3906_v44   ;;  %v1182_v51 = vadd.f32 %v4648_v46, %v5403_v42  ;;  %v1614_v52 = vadd.f32 %v4756_v48, %v5403_v42  ;;  %v2100_v60 = vmax.f32 %v1603_v47, 0.0  ;;  %v1992_v63 = vmax.f32 %v1171_v49, 0.0 }
  0xe4   :  { %4473 = vst [vmem:[%s5962_s3 + $0x1c0] sm:$0xff] %v4176_v45   ;;  %v1173_v54 = vpop.f32.mrf.mxu0  ;;  %v1605_v55 = vpop.f32.mrf.mxu1 }
  0xe5   :  { %v1995_v56 = vmax.f32 %v1182_v51, 0.0  ;;  %v1174_v57 = vadd.f32 %v5403_v42, %v1173_v54  ;;  %v2103_v58 = vmax.f32 %v1614_v52, 0.0  ;;  %v1606_v59 = vadd.f32 %v5403_v42, %v1605_v55 }
  0xe6   :  { %v4651_v61 = vpop.f32.mrf.mxu0  ;;  %v4759_v62 = vpop.f32.mrf.mxu1 }
  0xe7   :  { %v3921_v0 = vpack.c.bf16 %v1995_v56, %v1994_v53  ;;  %v1993_v1 = vmax.f32 %v1174_v57, 0.0  ;;  %v4191_v2 = vpack.c.bf16 %v2103_v58, %v2102_v50  ;;  %v1195_v3 = vadd.f32 %v4651_v61, %v5403_v42 }
  0xe8   :  { %v2101_v4 = vmax.f32 %v1606_v59, 0.0  ;;  %v1186_v5 = vpop.f32.mrf.mxu0  ;;  %v1627_v6 = vadd.f32 %v4759_v62, %v5403_v42  ;;  %v1618_v7 = vpop.f32.mrf.mxu1 }
  0xe9   :  { %4422 = vst [vmem:[%s5962_s3 + $0x28] sm:$0xff] %v3921_v0   ;;  %v3916_v8 = vpack.c.bf16 %v1993_v1, %v1992_v63  ;;  %4476 = vst [vmem:[%s5962_s3 + $0x1d8] sm:$0xff] %v4191_v2   ;;  %v1619_v11 = vadd.f32 %v5403_v42, %v1618_v7  ;;  %v1187_v13 = vadd.f32 %v5403_v42, %v1186_v5  ;;  %v1998_v17 = vmax.f32 %v1195_v3, 0.0 }
  0xea   :  { %v4186_v9 = vpack.c.bf16 %v2101_v4, %v2100_v60  ;;  %v4652_v10 = vpop.f32.mrf.mxu0  ;;  %v4760_v12 = vpop.f32.mrf.mxu1  ;;  %v2106_v14 = vmax.f32 %v1627_v6, 0.0 }
  0xeb   :  { %4421 = vst [vmem:[%s5962_s3 + $0x20] sm:$0xff] %v3916_v8   ;;  %v1198_v15 = vadd.f32 %v4652_v10, %v5403_v42  ;;  %v1630_v16 = vadd.f32 %v4760_v12, %v5403_v42  ;;  %v2104_v24 = vmax.f32 %v1619_v11, 0.0  ;;  %v1996_v27 = vmax.f32 %v1187_v13, 0.0 }
  0xec   :  { %4475 = vst [vmem:[%s5962_s3 + $0x1d0] sm:$0xff] %v4186_v9   ;;  %v1189_v18 = vpop.f32.mrf.mxu0  ;;  %v1621_v19 = vpop.f32.mrf.mxu1 }
  0xed   :  { %v1999_v20 = vmax.f32 %v1198_v15, 0.0  ;;  %v1190_v21 = vadd.f32 %v5403_v42, %v1189_v18  ;;  %v2107_v22 = vmax.f32 %v1630_v16, 0.0  ;;  %v1622_v23 = vadd.f32 %v5403_v42, %v1621_v19 }
  0xee   :  { %v4655_v25 = vpop.f32.mrf.mxu0  ;;  %v4763_v26 = vpop.f32.mrf.mxu1 }
  0xef   :  { %v3931_v28 = vpack.c.bf16 %v1999_v20, %v1998_v17  ;;  %v1997_v29 = vmax.f32 %v1190_v21, 0.0  ;;  %v4201_v30 = vpack.c.bf16 %v2107_v22, %v2106_v14  ;;  %v1211_v31 = vadd.f32 %v4655_v25, %v5403_v42 }
  0xf0   :  { %v2105_v32 = vmax.f32 %v1622_v23, 0.0  ;;  %v1202_v33 = vpop.f32.mrf.mxu0  ;;  %v1643_v34 = vadd.f32 %v4763_v26, %v5403_v42  ;;  %v1634_v35 = vpop.f32.mrf.mxu1 }
  0xf1   :  { %4424 = vst [vmem:[%s5962_s3 + $0x38] sm:$0xff] %v3931_v28   ;;  %v3926_v36 = vpack.c.bf16 %v1997_v29, %v1996_v27  ;;  %4478 = vst [vmem:[%s5962_s3 + $0x1e8] sm:$0xff] %v4201_v30   ;;  %v1635_v39 = vadd.f32 %v5403_v42, %v1634_v35  ;;  %v1203_v41 = vadd.f32 %v5403_v42, %v1202_v33  ;;  %v2002_v46 = vmax.f32 %v1211_v31, 0.0 }
  0xf2   :  { %v4196_v37 = vpack.c.bf16 %v2105_v32, %v2104_v24  ;;  %v4656_v38 = vpop.f32.mrf.mxu0  ;;  %v4764_v40 = vpop.f32.mrf.mxu1  ;;  %v2110_v43 = vmax.f32 %v1643_v34, 0.0 }
  0xf3   :  { %4423 = vst [vmem:[%s5962_s3 + $0x30] sm:$0xff] %v3926_v36   ;;  %v1214_v44 = vadd.f32 %v4656_v38, %v5403_v42  ;;  %v1646_v45 = vadd.f32 %v4764_v40, %v5403_v42  ;;  %v2108_v53 = vmax.f32 %v1635_v39, 0.0  ;;  %v2000_v56 = vmax.f32 %v1203_v41, 0.0 }
  0xf4   :  { %4477 = vst [vmem:[%s5962_s3 + $0x1e0] sm:$0xff] %v4196_v37   ;;  %v1205_v47 = vpop.f32.mrf.mxu0  ;;  %v1637_v48 = vpop.f32.mrf.mxu1 }
  0xf5   :  { %v2003_v49 = vmax.f32 %v1214_v44, 0.0  ;;  %v1206_v50 = vadd.f32 %v5403_v42, %v1205_v47  ;;  %v2111_v51 = vmax.f32 %v1646_v45, 0.0  ;;  %v1638_v52 = vadd.f32 %v5403_v42, %v1637_v48 }
  0xf6   :  { %v4659_v54 = vpop.f32.mrf.mxu0  ;;  %v4767_v55 = vpop.f32.mrf.mxu1 }
  0xf7   :  { %v3941_v57 = vpack.c.bf16 %v2003_v49, %v2002_v46  ;;  %v2001_v58 = vmax.f32 %v1206_v50, 0.0  ;;  %v4211_v59 = vpack.c.bf16 %v2111_v51, %v2110_v43  ;;  %v1227_v60 = vadd.f32 %v4659_v54, %v5403_v42 }
  0xf8   :  { %v2109_v61 = vmax.f32 %v1638_v52, 0.0  ;;  %v1218_v62 = vpop.f32.mrf.mxu0  ;;  %v1659_v63 = vadd.f32 %v4767_v55, %v5403_v42  ;;  %v1650_v0 = vpop.f32.mrf.mxu1 }
  0xf9   :  { %4426 = vst [vmem:[%s5962_s3 + $0x48] sm:$0xff] %v3941_v57   ;;  %v3936_v1 = vpack.c.bf16 %v2001_v58, %v2000_v56  ;;  %4480 = vst [vmem:[%s5962_s3 + $0x1f8] sm:$0xff] %v4211_v59   ;;  %v1651_v4 = vadd.f32 %v5403_v42, %v1650_v0  ;;  %v1219_v6 = vadd.f32 %v5403_v42, %v1218_v62  ;;  %v2006_v10 = vmax.f32 %v1227_v60, 0.0 }
  0xfa   :  { %v4206_v2 = vpack.c.bf16 %v2109_v61, %v2108_v53  ;;  %v4660_v3 = vpop.f32.mrf.mxu0  ;;  %v4768_v5 = vpop.f32.mrf.mxu1  ;;  %v2114_v7 = vmax.f32 %v1659_v63, 0.0 }
  0xfb   :  { %4425 = vst [vmem:[%s5962_s3 + $0x40] sm:$0xff] %v3936_v1   ;;  %v1230_v8 = vadd.f32 %v4660_v3, %v5403_v42  ;;  %v1662_v9 = vadd.f32 %v4768_v5, %v5403_v42  ;;  %v2112_v17 = vmax.f32 %v1651_v4, 0.0  ;;  %v2004_v20 = vmax.f32 %v1219_v6, 0.0 }
  0xfc   :  { %4479 = vst [vmem:[%s5962_s3 + $0x1f0] sm:$0xff] %v4206_v2   ;;  %v1221_v11 = vpop.f32.mrf.mxu0  ;;  %v1653_v12 = vpop.f32.mrf.mxu1 }
  0xfd   :  { %v2007_v13 = vmax.f32 %v1230_v8, 0.0  ;;  %v1222_v14 = vadd.f32 %v5403_v42, %v1221_v11  ;;  %v2115_v15 = vmax.f32 %v1662_v9, 0.0  ;;  %v1654_v16 = vadd.f32 %v5403_v42, %v1653_v12 }
  0xfe   :  { %v4663_v18 = vpop.f32.mrf.mxu0  ;;  %v4771_v19 = vpop.f32.mrf.mxu1 }
  0xff   :  { %v3951_v21 = vpack.c.bf16 %v2007_v13, %v2006_v10  ;;  %v2005_v22 = vmax.f32 %v1222_v14, 0.0  ;;  %v4221_v23 = vpack.c.bf16 %v2115_v15, %v2114_v7  ;;  %v1243_v24 = vadd.f32 %v4663_v18, %v5403_v42 }
 0x100   :  { %v2113_v25 = vmax.f32 %v1654_v16, 0.0  ;;  %v1234_v26 = vpop.f32.mrf.mxu0  ;;  %v1675_v27 = vadd.f32 %v4771_v19, %v5403_v42  ;;  %v1666_v28 = vpop.f32.mrf.mxu1 }
 0x101   :  { %4428 = vst [vmem:[%s5962_s3 + $0x58] sm:$0xff] %v3951_v21   ;;  %v3946_v29 = vpack.c.bf16 %v2005_v22, %v2004_v20  ;;  %4482 = vst [vmem:[%s5962_s3 + $0x208] sm:$0xff] %v4221_v23   ;;  %v1667_v32 = vadd.f32 %v5403_v42, %v1666_v28  ;;  %v1235_v34 = vadd.f32 %v5403_v42, %v1234_v26  ;;  %v2010_v38 = vmax.f32 %v1243_v24, 0.0 }
 0x102   :  { %v4216_v30 = vpack.c.bf16 %v2113_v25, %v2112_v17  ;;  %v4664_v31 = vpop.f32.mrf.mxu0  ;;  %v4772_v33 = vpop.f32.mrf.mxu1  ;;  %v2118_v35 = vmax.f32 %v1675_v27, 0.0 }
 0x103   :  { %4427 = vst [vmem:[%s5962_s3 + $0x50] sm:$0xff] %v3946_v29   ;;  %v1246_v36 = vadd.f32 %v4664_v31, %v5403_v42  ;;  %v1678_v37 = vadd.f32 %v4772_v33, %v5403_v42  ;;  %v2116_v46 = vmax.f32 %v1667_v32, 0.0  ;;  %v2008_v49 = vmax.f32 %v1235_v34, 0.0 }
 0x104   :  { %4481 = vst [vmem:[%s5962_s3 + $0x200] sm:$0xff] %v4216_v30   ;;  %v1237_v39 = vpop.f32.mrf.mxu0  ;;  %v1669_v40 = vpop.f32.mrf.mxu1 }
 0x105   :  { %v2011_v41 = vmax.f32 %v1246_v36, 0.0  ;;  %v1238_v43 = vadd.f32 %v5403_v42, %v1237_v39  ;;  %v2119_v44 = vmax.f32 %v1678_v37, 0.0  ;;  %v1670_v45 = vadd.f32 %v5403_v42, %v1669_v40 }
 0x106   :  { %v4667_v47 = vpop.f32.mrf.mxu0  ;;  %v4775_v48 = vpop.f32.mrf.mxu1 }
 0x107   :  { %v3961_v50 = vpack.c.bf16 %v2011_v41, %v2010_v38  ;;  %v2009_v51 = vmax.f32 %v1238_v43, 0.0  ;;  %v4231_v52 = vpack.c.bf16 %v2119_v44, %v2118_v35  ;;  %v1259_v53 = vadd.f32 %v4667_v47, %v5403_v42 }
 0x108   :  { %v2117_v54 = vmax.f32 %v1670_v45, 0.0  ;;  %v1250_v55 = vpop.f32.mrf.mxu0  ;;  %v1691_v56 = vadd.f32 %v4775_v48, %v5403_v42  ;;  %v1682_v57 = vpop.f32.mrf.mxu1 }
 0x109   :  { %4430 = vst [vmem:[%s5962_s3 + $0x68] sm:$0xff] %v3961_v50   ;;  %v3956_v58 = vpack.c.bf16 %v2009_v51, %v2008_v49  ;;  %4484 = vst [vmem:[%s5962_s3 + $0x218] sm:$0xff] %v4231_v52   ;;  %v1683_v61 = vadd.f32 %v5403_v42, %v1682_v57  ;;  %v1251_v63 = vadd.f32 %v5403_v42, %v1250_v55  ;;  %v2014_v3 = vmax.f32 %v1259_v53, 0.0 }
 0x10a   :  { %v4226_v59 = vpack.c.bf16 %v2117_v54, %v2116_v46  ;;  %v4668_v60 = vpop.f32.mrf.mxu0  ;;  %v4776_v62 = vpop.f32.mrf.mxu1  ;;  %v2122_v0 = vmax.f32 %v1691_v56, 0.0 }
 0x10b   :  { %4429 = vst [vmem:[%s5962_s3 + $0x60] sm:$0xff] %v3956_v58   ;;  %v1262_v1 = vadd.f32 %v4668_v60, %v5403_v42  ;;  %v1694_v2 = vadd.f32 %v4776_v62, %v5403_v42  ;;  %v2120_v10 = vmax.f32 %v1683_v61, 0.0  ;;  %v2012_v13 = vmax.f32 %v1251_v63, 0.0 }
 0x10c   :  { %4483 = vst [vmem:[%s5962_s3 + $0x210] sm:$0xff] %v4226_v59   ;;  %v1253_v4 = vpop.f32.mrf.mxu0  ;;  %v1685_v5 = vpop.f32.mrf.mxu1 }
 0x10d   :  { %v2015_v6 = vmax.f32 %v1262_v1, 0.0  ;;  %v1254_v7 = vadd.f32 %v5403_v42, %v1253_v4  ;;  %v2123_v8 = vmax.f32 %v1694_v2, 0.0  ;;  %v1686_v9 = vadd.f32 %v5403_v42, %v1685_v5 }
 0x10e   :  { %v4671_v11 = vpop.f32.mrf.mxu0  ;;  %v4779_v12 = vpop.f32.mrf.mxu1 }
 0x10f   :  { %v3971_v14 = vpack.c.bf16 %v2015_v6, %v2014_v3  ;;  %v2013_v15 = vmax.f32 %v1254_v7, 0.0  ;;  %v4241_v16 = vpack.c.bf16 %v2123_v8, %v2122_v0  ;;  %v1275_v17 = vadd.f32 %v4671_v11, %v5403_v42 }
 0x110   :  { %v2121_v18 = vmax.f32 %v1686_v9, 0.0  ;;  %v1266_v19 = vpop.f32.mrf.mxu0  ;;  %v1707_v20 = vadd.f32 %v4779_v12, %v5403_v42  ;;  %v1698_v21 = vpop.f32.mrf.mxu1 }
 0x111   :  { %4432 = vst [vmem:[%s5962_s3 + $0x78] sm:$0xff] %v3971_v14   ;;  %v3966_v22 = vpack.c.bf16 %v2013_v15, %v2012_v13  ;;  %4486 = vst [vmem:[%s5962_s3 + $0x228] sm:$0xff] %v4241_v16   ;;  %v1699_v25 = vadd.f32 %v5403_v42, %v1698_v21  ;;  %v1267_v27 = vadd.f32 %v5403_v42, %v1266_v19  ;;  %v2018_v31 = vmax.f32 %v1275_v17, 0.0 }
 0x112   :  { %v4236_v23 = vpack.c.bf16 %v2121_v18, %v2120_v10  ;;  %v4672_v24 = vpop.f32.mrf.mxu0  ;;  %v4780_v26 = vpop.f32.mrf.mxu1  ;;  %v2126_v28 = vmax.f32 %v1707_v20, 0.0 }
 0x113   :  { %4431 = vst [vmem:[%s5962_s3 + $0x70] sm:$0xff] %v3966_v22   ;;  %v1278_v29 = vadd.f32 %v4672_v24, %v5403_v42  ;;  %v1710_v30 = vadd.f32 %v4780_v26, %v5403_v42  ;;  %v2124_v38 = vmax.f32 %v1699_v25, 0.0  ;;  %v2016_v41 = vmax.f32 %v1267_v27, 0.0 }
 0x114   :  { %4485 = vst [vmem:[%s5962_s3 + $0x220] sm:$0xff] %v4236_v23   ;;  %v1269_v32 = vpop.f32.mrf.mxu0  ;;  %v1701_v33 = vpop.f32.mrf.mxu1 }
 0x115   :  { %v2019_v34 = vmax.f32 %v1278_v29, 0.0  ;;  %v1270_v35 = vadd.f32 %v5403_v42, %v1269_v32  ;;  %v2127_v36 = vmax.f32 %v1710_v30, 0.0  ;;  %v1702_v37 = vadd.f32 %v5403_v42, %v1701_v33 }
 0x116   :  { %v4675_v39 = vpop.f32.mrf.mxu0  ;;  %v4783_v40 = vpop.f32.mrf.mxu1 }
 0x117   :  { %v3981_v43 = vpack.c.bf16 %v2019_v34, %v2018_v31  ;;  %v2017_v44 = vmax.f32 %v1270_v35, 0.0  ;;  %v4251_v45 = vpack.c.bf16 %v2127_v36, %v2126_v28  ;;  %v1291_v46 = vadd.f32 %v4675_v39, %v5403_v42 }
 0x118   :  { %v2125_v47 = vmax.f32 %v1702_v37, 0.0  ;;  %v1282_v48 = vpop.f32.mrf.mxu0  ;;  %v1723_v49 = vadd.f32 %v4783_v40, %v5403_v42  ;;  %v1714_v50 = vpop.f32.mrf.mxu1 }
 0x119   :  { %4434 = vst [vmem:[%s5962_s3 + $0x88] sm:$0xff] %v3981_v43   ;;  %v3976_v51 = vpack.c.bf16 %v2017_v44, %v2016_v41  ;;  %4488 = vst [vmem:[%s5962_s3 + $0x238] sm:$0xff] %v4251_v45   ;;  %v1715_v54 = vadd.f32 %v5403_v42, %v1714_v50  ;;  %v1283_v56 = vadd.f32 %v5403_v42, %v1282_v48  ;;  %v2022_v60 = vmax.f32 %v1291_v46, 0.0 }
 0x11a   :  { %v4246_v52 = vpack.c.bf16 %v2125_v47, %v2124_v38  ;;  %v4676_v53 = vpop.f32.mrf.mxu0  ;;  %v4784_v55 = vpop.f32.mrf.mxu1  ;;  %v2130_v57 = vmax.f32 %v1723_v49, 0.0 }
 0x11b   :  { %4433 = vst [vmem:[%s5962_s3 + $0x80] sm:$0xff] %v3976_v51   ;;  %v1294_v58 = vadd.f32 %v4676_v53, %v5403_v42  ;;  %v1726_v59 = vadd.f32 %v4784_v55, %v5403_v42  ;;  %v2128_v3 = vmax.f32 %v1715_v54, 0.0  ;;  %v2020_v6 = vmax.f32 %v1283_v56, 0.0 }
 0x11c   :  { %4487 = vst [vmem:[%s5962_s3 + $0x230] sm:$0xff] %v4246_v52   ;;  %v1285_v61 = vpop.f32.mrf.mxu0  ;;  %v1717_v62 = vpop.f32.mrf.mxu1 }
 0x11d   :  { %v2023_v63 = vmax.f32 %v1294_v58, 0.0  ;;  %v1286_v0 = vadd.f32 %v5403_v42, %v1285_v61  ;;  %v2131_v1 = vmax.f32 %v1726_v59, 0.0  ;;  %v1718_v2 = vadd.f32 %v5403_v42, %v1717_v62 }
 0x11e   :  { %v4679_v4 = vpop.f32.mrf.mxu0  ;;  %v4787_v5 = vpop.f32.mrf.mxu1 }
 0x11f   :  { %v3991_v7 = vpack.c.bf16 %v2023_v63, %v2022_v60  ;;  %v2021_v8 = vmax.f32 %v1286_v0, 0.0  ;;  %v4261_v9 = vpack.c.bf16 %v2131_v1, %v2130_v57  ;;  %v1307_v10 = vadd.f32 %v4679_v4, %v5403_v42 }
 0x120   :  { %v2129_v11 = vmax.f32 %v1718_v2, 0.0  ;;  %v1298_v12 = vpop.f32.mrf.mxu0  ;;  %v1739_v13 = vadd.f32 %v4787_v5, %v5403_v42  ;;  %v1730_v14 = vpop.f32.mrf.mxu1 }
 0x121   :  { %4436 = vst [vmem:[%s5962_s3 + $0x98] sm:$0xff] %v3991_v7   ;;  %v3986_v15 = vpack.c.bf16 %v2021_v8, %v2020_v6  ;;  %4490 = vst [vmem:[%s5962_s3 + $0x248] sm:$0xff] %v4261_v9   ;;  %v1731_v18 = vadd.f32 %v5403_v42, %v1730_v14  ;;  %v1299_v20 = vadd.f32 %v5403_v42, %v1298_v12  ;;  %v2026_v24 = vmax.f32 %v1307_v10, 0.0 }
 0x122   :  { %v4256_v16 = vpack.c.bf16 %v2129_v11, %v2128_v3  ;;  %v4680_v17 = vpop.f32.mrf.mxu0  ;;  %v4788_v19 = vpop.f32.mrf.mxu1  ;;  %v2134_v21 = vmax.f32 %v1739_v13, 0.0 }
 0x123   :  { %4435 = vst [vmem:[%s5962_s3 + $0x90] sm:$0xff] %v3986_v15   ;;  %v1310_v22 = vadd.f32 %v4680_v17, %v5403_v42  ;;  %v1742_v23 = vadd.f32 %v4788_v19, %v5403_v42  ;;  %v2132_v31 = vmax.f32 %v1731_v18, 0.0  ;;  %v2024_v34 = vmax.f32 %v1299_v20, 0.0 }
 0x124   :  { %4489 = vst [vmem:[%s5962_s3 + $0x240] sm:$0xff] %v4256_v16   ;;  %v1301_v25 = vpop.f32.mrf.mxu0  ;;  %v1733_v26 = vpop.f32.mrf.mxu1 }
 0x125   :  { %v2027_v27 = vmax.f32 %v1310_v22, 0.0  ;;  %v1302_v28 = vadd.f32 %v5403_v42, %v1301_v25  ;;  %v2135_v29 = vmax.f32 %v1742_v23, 0.0  ;;  %v1734_v30 = vadd.f32 %v5403_v42, %v1733_v26 }
 0x126   :  { %v4683_v32 = vpop.f32.mrf.mxu0  ;;  %v4791_v33 = vpop.f32.mrf.mxu1 }
 0x127   :  { %v4001_v35 = vpack.c.bf16 %v2027_v27, %v2026_v24  ;;  %v2025_v36 = vmax.f32 %v1302_v28, 0.0  ;;  %v4271_v37 = vpack.c.bf16 %v2135_v29, %v2134_v21  ;;  %v1323_v38 = vadd.f32 %v4683_v32, %v5403_v42 }
 0x128   :  { %v2133_v39 = vmax.f32 %v1734_v30, 0.0  ;;  %v1314_v40 = vpop.f32.mrf.mxu0  ;;  %v1755_v41 = vadd.f32 %v4791_v33, %v5403_v42  ;;  %v1746_v43 = vpop.f32.mrf.mxu1 }
 0x129   :  { %4438 = vst [vmem:[%s5962_s3 + $0xa8] sm:$0xff] %v4001_v35   ;;  %v3996_v44 = vpack.c.bf16 %v2025_v36, %v2024_v34  ;;  %4492 = vst [vmem:[%s5962_s3 + $0x258] sm:$0xff] %v4271_v37   ;;  %v1747_v47 = vadd.f32 %v5403_v42, %v1746_v43  ;;  %v1315_v49 = vadd.f32 %v5403_v42, %v1314_v40  ;;  %v2030_v53 = vmax.f32 %v1323_v38, 0.0 }
 0x12a   :  { %v4266_v45 = vpack.c.bf16 %v2133_v39, %v2132_v31  ;;  %v4684_v46 = vpop.f32.mrf.mxu0  ;;  %v4792_v48 = vpop.f32.mrf.mxu1  ;;  %v2138_v50 = vmax.f32 %v1755_v41, 0.0 }
 0x12b   :  { %4437 = vst [vmem:[%s5962_s3 + $0xa0] sm:$0xff] %v3996_v44   ;;  %v1326_v51 = vadd.f32 %v4684_v46, %v5403_v42  ;;  %v1758_v52 = vadd.f32 %v4792_v48, %v5403_v42  ;;  %v2136_v60 = vmax.f32 %v1747_v47, 0.0  ;;  %v2028_v63 = vmax.f32 %v1315_v49, 0.0 }
 0x12c   :  { %4491 = vst [vmem:[%s5962_s3 + $0x250] sm:$0xff] %v4266_v45   ;;  %v1317_v54 = vpop.f32.mrf.mxu0  ;;  %v1749_v55 = vpop.f32.mrf.mxu1 }
 0x12d   :  { %v2031_v56 = vmax.f32 %v1326_v51, 0.0  ;;  %v1318_v57 = vadd.f32 %v5403_v42, %v1317_v54  ;;  %v2139_v58 = vmax.f32 %v1758_v52, 0.0  ;;  %v1750_v59 = vadd.f32 %v5403_v42, %v1749_v55 }
 0x12e   :  { %v4687_v61 = vpop.f32.mrf.mxu0  ;;  %v4795_v62 = vpop.f32.mrf.mxu1 }
 0x12f   :  { %v4011_v0 = vpack.c.bf16 %v2031_v56, %v2030_v53  ;;  %v2029_v1 = vmax.f32 %v1318_v57, 0.0  ;;  %v4281_v2 = vpack.c.bf16 %v2139_v58, %v2138_v50  ;;  %v1339_v3 = vadd.f32 %v4687_v61, %v5403_v42 }
 0x130   :  { %v2137_v4 = vmax.f32 %v1750_v59, 0.0  ;;  %v1330_v5 = vpop.f32.mrf.mxu0  ;;  %v1771_v6 = vadd.f32 %v4795_v62, %v5403_v42  ;;  %v1762_v7 = vpop.f32.mrf.mxu1 }
 0x131   :  { %4440 = vst [vmem:[%s5962_s3 + $0xb8] sm:$0xff] %v4011_v0   ;;  %v4006_v8 = vpack.c.bf16 %v2029_v1, %v2028_v63  ;;  %4494 = vst [vmem:[%s5962_s3 + $0x268] sm:$0xff] %v4281_v2   ;;  %v1763_v11 = vadd.f32 %v5403_v42, %v1762_v7  ;;  %v1331_v13 = vadd.f32 %v5403_v42, %v1330_v5  ;;  %v2034_v17 = vmax.f32 %v1339_v3, 0.0 }
 0x132   :  { %v4276_v9 = vpack.c.bf16 %v2137_v4, %v2136_v60  ;;  %v4688_v10 = vpop.f32.mrf.mxu0  ;;  %v4796_v12 = vpop.f32.mrf.mxu1  ;;  %v2142_v14 = vmax.f32 %v1771_v6, 0.0 }
 0x133   :  { %4439 = vst [vmem:[%s5962_s3 + $0xb0] sm:$0xff] %v4006_v8   ;;  %v1342_v15 = vadd.f32 %v4688_v10, %v5403_v42  ;;  %v1774_v16 = vadd.f32 %v4796_v12, %v5403_v42  ;;  %v2140_v24 = vmax.f32 %v1763_v11, 0.0  ;;  %v2032_v27 = vmax.f32 %v1331_v13, 0.0 }
 0x134   :  { %4493 = vst [vmem:[%s5962_s3 + $0x260] sm:$0xff] %v4276_v9   ;;  %v1333_v18 = vpop.f32.mrf.mxu0  ;;  %v1765_v19 = vpop.f32.mrf.mxu1 }
 0x135   :  { %v2035_v20 = vmax.f32 %v1342_v15, 0.0  ;;  %v1334_v21 = vadd.f32 %v5403_v42, %v1333_v18  ;;  %v2143_v22 = vmax.f32 %v1774_v16, 0.0  ;;  %v1766_v23 = vadd.f32 %v5403_v42, %v1765_v19 }
 0x136   :  { %v4691_v25 = vpop.f32.mrf.mxu0  ;;  %v4799_v26 = vpop.f32.mrf.mxu1 }
 0x137   :  { %v4021_v28 = vpack.c.bf16 %v2035_v20, %v2034_v17  ;;  %v2033_v29 = vmax.f32 %v1334_v21, 0.0  ;;  %v4291_v30 = vpack.c.bf16 %v2143_v22, %v2142_v14  ;;  %v1355_v31 = vadd.f32 %v4691_v25, %v5403_v42 }
 0x138   :  { %v2141_v32 = vmax.f32 %v1766_v23, 0.0  ;;  %v1346_v33 = vpop.f32.mrf.mxu0  ;;  %v1787_v34 = vadd.f32 %v4799_v26, %v5403_v42  ;;  %v1778_v35 = vpop.f32.mrf.mxu1 }
 0x139   :  { %4442 = vst [vmem:[%s5962_s3 + $0xc8] sm:$0xff] %v4021_v28   ;;  %v4016_v36 = vpack.c.bf16 %v2033_v29, %v2032_v27  ;;  %4496 = vst [vmem:[%s5962_s3 + $0x278] sm:$0xff] %v4291_v30   ;;  %v1779_v39 = vadd.f32 %v5403_v42, %v1778_v35  ;;  %v1347_v41 = vadd.f32 %v5403_v42, %v1346_v33  ;;  %v2038_v46 = vmax.f32 %v1355_v31, 0.0 }
 0x13a   :  { %v4286_v37 = vpack.c.bf16 %v2141_v32, %v2140_v24  ;;  %v4692_v38 = vpop.f32.mrf.mxu0  ;;  %v4800_v40 = vpop.f32.mrf.mxu1  ;;  %v2146_v43 = vmax.f32 %v1787_v34, 0.0 }
 0x13b   :  { %4441 = vst [vmem:[%s5962_s3 + $0xc0] sm:$0xff] %v4016_v36   ;;  %v1358_v44 = vadd.f32 %v4692_v38, %v5403_v42  ;;  %v1790_v45 = vadd.f32 %v4800_v40, %v5403_v42  ;;  %v2144_v53 = vmax.f32 %v1779_v39, 0.0  ;;  %v2036_v56 = vmax.f32 %v1347_v41, 0.0 }
 0x13c   :  { %4495 = vst [vmem:[%s5962_s3 + $0x270] sm:$0xff] %v4286_v37   ;;  %v1349_v47 = vpop.f32.mrf.mxu0  ;;  %v1781_v48 = vpop.f32.mrf.mxu1 }
 0x13d   :  { %v2039_v49 = vmax.f32 %v1358_v44, 0.0  ;;  %v1350_v50 = vadd.f32 %v5403_v42, %v1349_v47  ;;  %v2147_v51 = vmax.f32 %v1790_v45, 0.0  ;;  %v1782_v52 = vadd.f32 %v5403_v42, %v1781_v48  ;;  %v5735_v45 = vld [vmem:[%s5961_s2] ss:$0 sm:$0xff] }
 0x13e   :  { %v4695_v54 = vpop.f32.mrf.mxu0  ;;  %v4803_v55 = vpop.f32.mrf.mxu1 }
 0x13f   :  { %v4031_v57 = vpack.c.bf16 %v2039_v49, %v2038_v46  ;;  %v2037_v58 = vmax.f32 %v1350_v50, 0.0  ;;  %v4301_v59 = vpack.c.bf16 %v2147_v51, %v2146_v43  ;;  %v1371_v60 = vadd.f32 %v4695_v54, %v5403_v42 }
 0x140   :  { %v2145_v61 = vmax.f32 %v1782_v52, 0.0  ;;  %v1362_v62 = vpop.f32.mrf.mxu0  ;;  %v1803_v63 = vadd.f32 %v4803_v55, %v5403_v42  ;;  %v1794_v0 = vpop.f32.mrf.mxu1 }
 0x141   :  { %4444 = vst [vmem:[%s5962_s3 + $0xd8] sm:$0xff] %v4031_v57   ;;  %v4026_v1 = vpack.c.bf16 %v2037_v58, %v2036_v56  ;;  %4498 = vst [vmem:[%s5962_s3 + $0x288] sm:$0xff] %v4301_v59   ;;  %v1795_v4 = vadd.f32 %v5403_v42, %v1794_v0  ;;  %v1363_v6 = vadd.f32 %v5403_v42, %v1362_v62  ;;  %v2042_v10 = vmax.f32 %v1371_v60, 0.0 }
 0x142   :  { %v4296_v2 = vpack.c.bf16 %v2145_v61, %v2144_v53  ;;  %v4696_v3 = vpop.f32.mrf.mxu0  ;;  %v4804_v5 = vpop.f32.mrf.mxu1  ;;  %v2150_v7 = vmax.f32 %v1803_v63, 0.0 }
 0x143   :  { %4443 = vst [vmem:[%s5962_s3 + $0xd0] sm:$0xff] %v4026_v1   ;;  %v1374_v8 = vadd.f32 %v4696_v3, %v5403_v42  ;;  %v1806_v9 = vadd.f32 %v4804_v5, %v5403_v42  ;;  %v2148_v17 = vmax.f32 %v1795_v4, 0.0  ;;  %v2040_v20 = vmax.f32 %v1363_v6, 0.0 }
 0x144   :  { %4497 = vst [vmem:[%s5962_s3 + $0x280] sm:$0xff] %v4296_v2   ;;  %v1365_v11 = vpop.f32.mrf.mxu0  ;;  %v1797_v12 = vpop.f32.mrf.mxu1 }
 0x145   :  { %v2043_v13 = vmax.f32 %v1374_v8, 0.0  ;;  %v1366_v14 = vadd.f32 %v5403_v42, %v1365_v11  ;;  %v2151_v15 = vmax.f32 %v1806_v9, 0.0  ;;  %v1798_v16 = vadd.f32 %v5403_v42, %v1797_v12 }
 0x146   :  { %v4699_v18 = vpop.f32.mrf.mxu0  ;;  %v4807_v19 = vpop.f32.mrf.mxu1 }
 0x147   :  { %v4041_v21 = vpack.c.bf16 %v2043_v13, %v2042_v10  ;;  %v2041_v22 = vmax.f32 %v1366_v14, 0.0  ;;  %v4311_v23 = vpack.c.bf16 %v2151_v15, %v2150_v7  ;;  %v1387_v24 = vadd.f32 %v4699_v18, %v5403_v42 }
 0x148   :  { %v2149_v25 = vmax.f32 %v1798_v16, 0.0  ;;  %v1378_v26 = vpop.f32.mrf.mxu0  ;;  %v1819_v27 = vadd.f32 %v4807_v19, %v5403_v42  ;;  %v1810_v28 = vpop.f32.mrf.mxu1 }
 0x149   :  { %4446 = vst [vmem:[%s5962_s3 + $0xe8] sm:$0xff] %v4041_v21   ;;  %v4036_v29 = vpack.c.bf16 %v2041_v22, %v2040_v20  ;;  %4500 = vst [vmem:[%s5962_s3 + $0x298] sm:$0xff] %v4311_v23   ;;  %v1811_v32 = vadd.f32 %v5403_v42, %v1810_v28  ;;  %v1379_v34 = vadd.f32 %v5403_v42, %v1378_v26  ;;  %v2046_v38 = vmax.f32 %v1387_v24, 0.0 }
 0x14a   :  { %v4306_v30 = vpack.c.bf16 %v2149_v25, %v2148_v17  ;;  %v4700_v31 = vpop.f32.mrf.mxu0  ;;  %v4808_v33 = vpop.f32.mrf.mxu1  ;;  %v2154_v35 = vmax.f32 %v1819_v27, 0.0 }
 0x14b   :  { %4445 = vst [vmem:[%s5962_s3 + $0xe0] sm:$0xff] %v4036_v29   ;;  %v1390_v36 = vadd.f32 %v4700_v31, %v5403_v42  ;;  %v1822_v37 = vadd.f32 %v4808_v33, %v5403_v42  ;;  %v2152_v47 = vmax.f32 %v1811_v32, 0.0  ;;  %v2044_v50 = vmax.f32 %v1379_v34, 0.0 }
 0x14c   :  { %4499 = vst [vmem:[%s5962_s3 + $0x290] sm:$0xff] %v4306_v30   ;;  %v1381_v39 = vpop.f32.mrf.mxu0  ;;  %v1813_v40 = vpop.f32.mrf.mxu1 }
 0x14d   :  { %v2047_v41 = vmax.f32 %v1390_v36, 0.0  ;;  %v1382_v43 = vadd.f32 %v5403_v42, %v1381_v39  ;;  %v2155_v44 = vmax.f32 %v1822_v37, 0.0  ;;  %v1814_v46 = vadd.f32 %v5735_v45, %v1813_v40 }
 0x14e   :  { %v4703_v48 = vpop.f32.mrf.mxu0  ;;  %v4811_v49 = vpop.f32.mrf.mxu1 }
 0x14f   :  { %v4051_v51 = vpack.c.bf16 %v2047_v41, %v2046_v38  ;;  %v2045_v52 = vmax.f32 %v1382_v43, 0.0  ;;  %v4321_v53 = vpack.c.bf16 %v2155_v44, %v2154_v35  ;;  %v1403_v54 = vadd.f32 %v5735_v45, %v4703_v48 }
 0x150   :  { %v2153_v55 = vmax.f32 %v1814_v46, 0.0  ;;  %v1394_v56 = vpop.f32.mrf.mxu0  ;;  %v1835_v42 = vadd.f32 %v5735_v45, %v4811_v49  ;;  %v1826_v57 = vpop.f32.mrf.mxu1 }
 0x151   :  { %4448 = vst [vmem:[%s5962_s3 + $0xf8] sm:$0xff] %v4051_v51   ;;  %v4046_v58 = vpack.c.bf16 %v2045_v52, %v2044_v50  ;;  %4502 = vst [vmem:[%s5962_s3 + $0x2a8] sm:$0xff] %v4321_v53   ;;  %v1827_v61 = vadd.f32 %v5735_v45, %v1826_v57  ;;  %v1395_v63 = vadd.f32 %v5735_v45, %v1394_v56  ;;  %v2050_v3 = vmax.f32 %v1403_v54, 0.0 }
 0x152   :  { %v4316_v59 = vpack.c.bf16 %v2153_v55, %v2152_v47  ;;  %v4704_v60 = vpop.f32.mrf.mxu0  ;;  %v4812_v62 = vpop.f32.mrf.mxu1  ;;  %v2158_v0 = vmax.f32 %v1835_v42, 0.0 }
 0x153   :  { %4447 = vst [vmem:[%s5962_s3 + $0xf0] sm:$0xff] %v4046_v58   ;;  %v1406_v1 = vadd.f32 %v5735_v45, %v4704_v60  ;;  %v1838_v2 = vadd.f32 %v5735_v45, %v4812_v62  ;;  %v2156_v10 = vmax.f32 %v1827_v61, 0.0  ;;  %v2048_v13 = vmax.f32 %v1395_v63, 0.0 }
 0x154   :  { %4501 = vst [vmem:[%s5962_s3 + $0x2a0] sm:$0xff] %v4316_v59   ;;  %v1397_v4 = vpop.f32.mrf.mxu0  ;;  %v1829_v5 = vpop.f32.mrf.mxu1 }
 0x155   :  { %v2051_v6 = vmax.f32 %v1406_v1, 0.0  ;;  %v1398_v7 = vadd.f32 %v5735_v45, %v1397_v4  ;;  %v2159_v8 = vmax.f32 %v1838_v2, 0.0  ;;  %v1830_v9 = vadd.f32 %v5735_v45, %v1829_v5 }
 0x156   :  { %v4707_v11 = vpop.f32.mrf.mxu0  ;;  %v4815_v12 = vpop.f32.mrf.mxu1 }
 0x157   :  { %v4061_v14 = vpack.c.bf16 %v2051_v6, %v2050_v3  ;;  %v2049_v15 = vmax.f32 %v1398_v7, 0.0  ;;  %v4331_v16 = vpack.c.bf16 %v2159_v8, %v2158_v0  ;;  %v1419_v17 = vadd.f32 %v5735_v45, %v4707_v11 }
 0x158   :  { %v2157_v18 = vmax.f32 %v1830_v9, 0.0  ;;  %v1410_v19 = vpop.f32.mrf.mxu0  ;;  %v1851_v20 = vadd.f32 %v5735_v45, %v4815_v12  ;;  %v1842_v21 = vpop.f32.mrf.mxu1 }
 0x159   :  { %4450 = vst [vmem:[%s5962_s3 + $0x108] sm:$0xff] %v4061_v14   ;;  %v4056_v22 = vpack.c.bf16 %v2049_v15, %v2048_v13  ;;  %4504 = vst [vmem:[%s5962_s3 + $0x2b8] sm:$0xff] %v4331_v16   ;;  %v1843_v25 = vadd.f32 %v5735_v45, %v1842_v21  ;;  %v1411_v27 = vadd.f32 %v5735_v45, %v1410_v19  ;;  %v2054_v31 = vmax.f32 %v1419_v17, 0.0 }
 0x15a   :  { %v4326_v23 = vpack.c.bf16 %v2157_v18, %v2156_v10  ;;  %v4708_v24 = vpop.f32.mrf.mxu0  ;;  %v4816_v26 = vpop.f32.mrf.mxu1  ;;  %v2162_v28 = vmax.f32 %v1851_v20, 0.0 }
 0x15b   :  { %4449 = vst [vmem:[%s5962_s3 + $0x100] sm:$0xff] %v4056_v22   ;;  %v1422_v29 = vadd.f32 %v5735_v45, %v4708_v24  ;;  %v1854_v30 = vadd.f32 %v5735_v45, %v4816_v26  ;;  %v2160_v38 = vmax.f32 %v1843_v25, 0.0  ;;  %v2052_v41 = vmax.f32 %v1411_v27, 0.0 }
 0x15c   :  { %4503 = vst [vmem:[%s5962_s3 + $0x2b0] sm:$0xff] %v4326_v23   ;;  %v1413_v32 = vpop.f32.mrf.mxu0  ;;  %v1845_v33 = vpop.f32.mrf.mxu1 }
 0x15d   :  { %v2055_v34 = vmax.f32 %v1422_v29, 0.0  ;;  %v1414_v35 = vadd.f32 %v5735_v45, %v1413_v32  ;;  %v2163_v36 = vmax.f32 %v1854_v30, 0.0  ;;  %v1846_v37 = vadd.f32 %v5735_v45, %v1845_v33 }
 0x15e   :  { %v4711_v39 = vpop.f32.mrf.mxu0  ;;  %v4819_v40 = vpop.f32.mrf.mxu1 }
 0x15f   :  { %v4071_v43 = vpack.c.bf16 %v2055_v34, %v2054_v31  ;;  %v2053_v44 = vmax.f32 %v1414_v35, 0.0  ;;  %v4341_v46 = vpack.c.bf16 %v2163_v36, %v2162_v28  ;;  %v1435_v47 = vadd.f32 %v5735_v45, %v4711_v39 }
 0x160   :  { %v2161_v48 = vmax.f32 %v1846_v37, 0.0  ;;  %v1426_v49 = vpop.f32.mrf.mxu0  ;;  %v1867_v50 = vadd.f32 %v5735_v45, %v4819_v40  ;;  %v1858_v51 = vpop.f32.mrf.mxu1 }
 0x161   :  { %4452 = vst [vmem:[%s5962_s3 + $0x118] sm:$0xff] %v4071_v43   ;;  %v4066_v52 = vpack.c.bf16 %v2053_v44, %v2052_v41  ;;  %4506 = vst [vmem:[%s5962_s3 + $0x2c8] sm:$0xff] %v4341_v46   ;;  %v1859_v55 = vadd.f32 %v5735_v45, %v1858_v51  ;;  %v1427_v42 = vadd.f32 %v5735_v45, %v1426_v49  ;;  %v2058_v60 = vmax.f32 %v1435_v47, 0.0 }
 0x162   :  { %v4336_v53 = vpack.c.bf16 %v2161_v48, %v2160_v38  ;;  %v4712_v54 = vpop.f32.mrf.mxu0  ;;  %v4820_v56 = vpop.f32.mrf.mxu1  ;;  %v2166_v57 = vmax.f32 %v1867_v50, 0.0 }
 0x163   :  { %4451 = vst [vmem:[%s5962_s3 + $0x110] sm:$0xff] %v4066_v52   ;;  %v1438_v58 = vadd.f32 %v5735_v45, %v4712_v54  ;;  %v1870_v59 = vadd.f32 %v5735_v45, %v4820_v56  ;;  %v2164_v3 = vmax.f32 %v1859_v55, 0.0  ;;  %v2056_v6 = vmax.f32 %v1427_v42, 0.0 }
 0x164   :  { %4505 = vst [vmem:[%s5962_s3 + $0x2c0] sm:$0xff] %v4336_v53   ;;  %v1429_v61 = vpop.f32.mrf.mxu0  ;;  %v1861_v62 = vpop.f32.mrf.mxu1 }
 0x165   :  { %v2059_v63 = vmax.f32 %v1438_v58, 0.0  ;;  %v1430_v0 = vadd.f32 %v5735_v45, %v1429_v61  ;;  %v2167_v1 = vmax.f32 %v1870_v59, 0.0  ;;  %v1862_v2 = vadd.f32 %v5735_v45, %v1861_v62 }
 0x166   :  { %v4715_v4 = vpop.f32.mrf.mxu0  ;;  %v4823_v5 = vpop.f32.mrf.mxu1 }
 0x167   :  { %v4081_v7 = vpack.c.bf16 %v2059_v63, %v2058_v60  ;;  %v2057_v8 = vmax.f32 %v1430_v0, 0.0  ;;  %v4351_v9 = vpack.c.bf16 %v2167_v1, %v2166_v57  ;;  %v1451_v10 = vadd.f32 %v5735_v45, %v4715_v4 }
 0x168   :  { %v2165_v11 = vmax.f32 %v1862_v2, 0.0  ;;  %v1442_v12 = vpop.f32.mrf.mxu0  ;;  %v1883_v13 = vadd.f32 %v5735_v45, %v4823_v5  ;;  %v1874_v14 = vpop.f32.mrf.mxu1 }
 0x169   :  { %4454 = vst [vmem:[%s5962_s3 + $0x128] sm:$0xff] %v4081_v7   ;;  %v4076_v15 = vpack.c.bf16 %v2057_v8, %v2056_v6  ;;  %4508 = vst [vmem:[%s5962_s3 + $0x2d8] sm:$0xff] %v4351_v9   ;;  %v1875_v18 = vadd.f32 %v5735_v45, %v1874_v14  ;;  %v1443_v20 = vadd.f32 %v5735_v45, %v1442_v12  ;;  %v2062_v24 = vmax.f32 %v1451_v10, 0.0 }
 0x16a   :  { %v4346_v16 = vpack.c.bf16 %v2165_v11, %v2164_v3  ;;  %v4716_v17 = vpop.f32.mrf.mxu0  ;;  %v4824_v19 = vpop.f32.mrf.mxu1  ;;  %v2170_v21 = vmax.f32 %v1883_v13, 0.0 }
 0x16b   :  { %4453 = vst [vmem:[%s5962_s3 + $0x120] sm:$0xff] %v4076_v15   ;;  %v1454_v22 = vadd.f32 %v5735_v45, %v4716_v17  ;;  %v1886_v23 = vadd.f32 %v5735_v45, %v4824_v19  ;;  %v2168_v31 = vmax.f32 %v1875_v18, 0.0  ;;  %v2060_v34 = vmax.f32 %v1443_v20, 0.0 }
 0x16c   :  { %4507 = vst [vmem:[%s5962_s3 + $0x2d0] sm:$0xff] %v4346_v16   ;;  %v1445_v25 = vpop.f32.mrf.mxu0  ;;  %v1877_v26 = vpop.f32.mrf.mxu1 }
 0x16d   :  { %v2063_v27 = vmax.f32 %v1454_v22, 0.0  ;;  %v1446_v28 = vadd.f32 %v5735_v45, %v1445_v25  ;;  %v2171_v29 = vmax.f32 %v1886_v23, 0.0  ;;  %v1878_v30 = vadd.f32 %v5735_v45, %v1877_v26 }
 0x16e   :  { %v4719_v32 = vpop.f32.mrf.mxu0  ;;  %v4827_v33 = vpop.f32.mrf.mxu1 }
 0x16f   :  { %v4091_v35 = vpack.c.bf16 %v2063_v27, %v2062_v24  ;;  %v2061_v36 = vmax.f32 %v1446_v28, 0.0  ;;  %v4361_v37 = vpack.c.bf16 %v2171_v29, %v2170_v21  ;;  %v1467_v38 = vadd.f32 %v5735_v45, %v4719_v32 }
 0x170   :  { %v2169_v39 = vmax.f32 %v1878_v30, 0.0  ;;  %v1458_v40 = vpop.f32.mrf.mxu0  ;;  %v1899_v41 = vadd.f32 %v5735_v45, %v4827_v33  ;;  %v1890_v43 = vpop.f32.mrf.mxu1 }
 0x171   :  { %4456 = vst [vmem:[%s5962_s3 + $0x138] sm:$0xff] %v4091_v35   ;;  %v4086_v44 = vpack.c.bf16 %v2061_v36, %v2060_v34  ;;  %4510 = vst [vmem:[%s5962_s3 + $0x2e8] sm:$0xff] %v4361_v37   ;;  %v1891_v48 = vadd.f32 %v5735_v45, %v1890_v43  ;;  %v1459_v50 = vadd.f32 %v5735_v45, %v1458_v40  ;;  %v2066_v54 = vmax.f32 %v1467_v38, 0.0 }
 0x172   :  { %v4356_v46 = vpack.c.bf16 %v2169_v39, %v2168_v31  ;;  %v4720_v47 = vpop.f32.mrf.mxu0  ;;  %v4828_v49 = vpop.f32.mrf.mxu1  ;;  %v2174_v51 = vmax.f32 %v1899_v41, 0.0 }
 0x173   :  { %4455 = vst [vmem:[%s5962_s3 + $0x130] sm:$0xff] %v4086_v44   ;;  %v1470_v52 = vadd.f32 %v5735_v45, %v4720_v47  ;;  %v1902_v53 = vadd.f32 %v5735_v45, %v4828_v49  ;;  %v2172_v60 = vmax.f32 %v1891_v48, 0.0  ;;  %v2064_v63 = vmax.f32 %v1459_v50, 0.0 }
 0x174   :  { %4509 = vst [vmem:[%s5962_s3 + $0x2e0] sm:$0xff] %v4356_v46   ;;  %v1461_v55 = vpop.f32.mrf.mxu0  ;;  %v1893_v56 = vpop.f32.mrf.mxu1 }
 0x175   :  { %v2067_v42 = vmax.f32 %v1470_v52, 0.0  ;;  %v1462_v57 = vadd.f32 %v5735_v45, %v1461_v55  ;;  %v2175_v58 = vmax.f32 %v1902_v53, 0.0  ;;  %v1894_v59 = vadd.f32 %v5735_v45, %v1893_v56 }
 0x176   :  { %v4723_v61 = vpop.f32.mrf.mxu0  ;;  %v4831_v62 = vpop.f32.mrf.mxu1 }
 0x177   :  { %v4101_v0 = vpack.c.bf16 %v2067_v42, %v2066_v54  ;;  %v2065_v1 = vmax.f32 %v1462_v57, 0.0  ;;  %v4371_v2 = vpack.c.bf16 %v2175_v58, %v2174_v51  ;;  %v1483_v3 = vadd.f32 %v5735_v45, %v4723_v61 }
 0x178   :  { %v2173_v4 = vmax.f32 %v1894_v59, 0.0  ;;  %v1474_v5 = vpop.f32.mrf.mxu0  ;;  %v1915_v6 = vadd.f32 %v5735_v45, %v4831_v62  ;;  %v1906_v7 = vpop.f32.mrf.mxu1 }
 0x179   :  { %4458 = vst [vmem:[%s5962_s3 + $0x148] sm:$0xff] %v4101_v0   ;;  %v4096_v8 = vpack.c.bf16 %v2065_v1, %v2064_v63  ;;  %4512 = vst [vmem:[%s5962_s3 + $0x2f8] sm:$0xff] %v4371_v2   ;;  %v1907_v11 = vadd.f32 %v5735_v45, %v1906_v7  ;;  %v1475_v13 = vadd.f32 %v5735_v45, %v1474_v5  ;;  %v2070_v17 = vmax.f32 %v1483_v3, 0.0 }
 0x17a   :  { %v4366_v9 = vpack.c.bf16 %v2173_v4, %v2172_v60  ;;  %v4724_v10 = vpop.f32.mrf.mxu0  ;;  %v4832_v12 = vpop.f32.mrf.mxu1  ;;  %v2178_v14 = vmax.f32 %v1915_v6, 0.0 }
 0x17b   :  { %4457 = vst [vmem:[%s5962_s3 + $0x140] sm:$0xff] %v4096_v8   ;;  %v1486_v15 = vadd.f32 %v5735_v45, %v4724_v10  ;;  %v1918_v16 = vadd.f32 %v5735_v45, %v4832_v12  ;;  %v2176_v24 = vmax.f32 %v1907_v11, 0.0  ;;  %v2068_v27 = vmax.f32 %v1475_v13, 0.0 }
 0x17c   :  { %4511 = vst [vmem:[%s5962_s3 + $0x2f0] sm:$0xff] %v4366_v9   ;;  %v1477_v18 = vpop.f32.mrf.mxu0  ;;  %v1909_v19 = vpop.f32.mrf.mxu1 }
 0x17d   :  { %v2071_v20 = vmax.f32 %v1486_v15, 0.0  ;;  %v1478_v21 = vadd.f32 %v5735_v45, %v1477_v18  ;;  %v2179_v22 = vmax.f32 %v1918_v16, 0.0  ;;  %v1910_v23 = vadd.f32 %v5735_v45, %v1909_v19 }
 0x17e   :  { %v4727_v25 = vpop.f32.mrf.mxu0  ;;  %v4835_v26 = vpop.f32.mrf.mxu1 }
 0x17f   :  { %v4111_v28 = vpack.c.bf16 %v2071_v20, %v2070_v17  ;;  %v2069_v29 = vmax.f32 %v1478_v21, 0.0  ;;  %v4381_v30 = vpack.c.bf16 %v2179_v22, %v2178_v14  ;;  %v1499_v31 = vadd.f32 %v5735_v45, %v4727_v25 }
 0x180   :  { %v2177_v32 = vmax.f32 %v1910_v23, 0.0  ;;  %v1490_v33 = vpop.f32.mrf.mxu0  ;;  %v1931_v34 = vadd.f32 %v5735_v45, %v4835_v26  ;;  %v1922_v35 = vpop.f32.mrf.mxu1 }
 0x181   :  { %4460 = vst [vmem:[%s5962_s3 + $0x158] sm:$0xff] %v4111_v28   ;;  %v4106_v36 = vpack.c.bf16 %v2069_v29, %v2068_v27  ;;  %4514 = vst [vmem:[%s5962_s3 + $0x308] sm:$0xff] %v4381_v30   ;;  %v1923_v39 = vadd.f32 %v5735_v45, %v1922_v35  ;;  %v1491_v41 = vadd.f32 %v5735_v45, %v1490_v33  ;;  %v2074_v47 = vmax.f32 %v1499_v31, 0.0 }
 0x182   :  { %v4376_v37 = vpack.c.bf16 %v2177_v32, %v2176_v24  ;;  %v4728_v38 = vpop.f32.mrf.mxu0  ;;  %v4836_v40 = vpop.f32.mrf.mxu1  ;;  %v2182_v43 = vmax.f32 %v1931_v34, 0.0 }
 0x183   :  { %4459 = vst [vmem:[%s5962_s3 + $0x150] sm:$0xff] %v4106_v36   ;;  %v1502_v44 = vadd.f32 %v5735_v45, %v4728_v38  ;;  %v1934_v46 = vadd.f32 %v5735_v45, %v4836_v40  ;;  %v2180_v54 = vmax.f32 %v1923_v39, 0.0  ;;  %v2072_v42 = vmax.f32 %v1491_v41, 0.0 }
 0x184   :  { %4513 = vst [vmem:[%s5962_s3 + $0x300] sm:$0xff] %v4376_v37   ;;  %v1493_v48 = vpop.f32.mrf.mxu0  ;;  %v1925_v49 = vpop.f32.mrf.mxu1 }
 0x185   :  { %v2075_v50 = vmax.f32 %v1502_v44, 0.0  ;;  %v1494_v51 = vadd.f32 %v5735_v45, %v1493_v48  ;;  %v2183_v52 = vmax.f32 %v1934_v46, 0.0  ;;  %v1926_v53 = vadd.f32 %v5735_v45, %v1925_v49 }
 0x186   :  { %v4731_v55 = vpop.f32.mrf.mxu0  ;;  %v4839_v56 = vpop.f32.mrf.mxu1 }
 0x187   :  { %v4121_v57 = vpack.c.bf16 %v2075_v50, %v2074_v47  ;;  %v2073_v58 = vmax.f32 %v1494_v51, 0.0  ;;  %v4391_v59 = vpack.c.bf16 %v2183_v52, %v2182_v43  ;;  %v1515_v60 = vadd.f32 %v5735_v45, %v4731_v55 }
 0x188   :  { %v2181_v61 = vmax.f32 %v1926_v53, 0.0  ;;  %v1506_v62 = vpop.f32.mrf.mxu0  ;;  %v1947_v63 = vadd.f32 %v5735_v45, %v4839_v56  ;;  %v1938_v0 = vpop.f32.mrf.mxu1 }
 0x189   :  { %4462 = vst [vmem:[%s5962_s3 + $0x168] sm:$0xff] %v4121_v57   ;;  %v4116_v1 = vpack.c.bf16 %v2073_v58, %v2072_v42  ;;  %4516 = vst [vmem:[%s5962_s3 + $0x318] sm:$0xff] %v4391_v59   ;;  %v1939_v4 = vadd.f32 %v5735_v45, %v1938_v0  ;;  %v1507_v6 = vadd.f32 %v5735_v45, %v1506_v62  ;;  %v2078_v10 = vmax.f32 %v1515_v60, 0.0 }
 0x18a   :  { %v4386_v2 = vpack.c.bf16 %v2181_v61, %v2180_v54  ;;  %v4732_v3 = vpop.f32.mrf.mxu0  ;;  %v4840_v5 = vpop.f32.mrf.mxu1  ;;  %v2186_v7 = vmax.f32 %v1947_v63, 0.0 }
 0x18b   :  { %4461 = vst [vmem:[%s5962_s3 + $0x160] sm:$0xff] %v4116_v1   ;;  %v1518_v8 = vadd.f32 %v5735_v45, %v4732_v3  ;;  %v1950_v9 = vadd.f32 %v5735_v45, %v4840_v5  ;;  %v2184_v17 = vmax.f32 %v1939_v4, 0.0  ;;  %v2076_v20 = vmax.f32 %v1507_v6, 0.0 }
 0x18c   :  { %4515 = vst [vmem:[%s5962_s3 + $0x310] sm:$0xff] %v4386_v2   ;;  %v1509_v11 = vpop.f32.mrf.mxu0  ;;  %v1941_v12 = vpop.f32.mrf.mxu1 }
 0x18d   :  { %v2079_v13 = vmax.f32 %v1518_v8, 0.0  ;;  %v1510_v14 = vadd.f32 %v5735_v45, %v1509_v11  ;;  %v2187_v15 = vmax.f32 %v1950_v9, 0.0  ;;  %v1942_v16 = vadd.f32 %v5735_v45, %v1941_v12 }
 0x18e   :  { %v4735_v18 = vpop.f32.mrf.mxu0  ;;  %v4843_v19 = vpop.f32.mrf.mxu1 }
 0x18f   :  { %v4131_v21 = vpack.c.bf16 %v2079_v13, %v2078_v10  ;;  %v2077_v22 = vmax.f32 %v1510_v14, 0.0  ;;  %v4401_v23 = vpack.c.bf16 %v2187_v15, %v2186_v7  ;;  %v1531_v24 = vadd.f32 %v5735_v45, %v4735_v18 }
 0x190   :  { %v2185_v25 = vmax.f32 %v1942_v16, 0.0  ;;  %v1522_v26 = vpop.f32.mrf.mxu0  ;;  %v1963_v27 = vadd.f32 %v5735_v45, %v4843_v19  ;;  %v1954_v28 = vpop.f32.mrf.mxu1 }
 0x191   :  { %4464 = vst [vmem:[%s5962_s3 + $0x178] sm:$0xff] %v4131_v21   ;;  %v4126_v29 = vpack.c.bf16 %v2077_v22, %v2076_v20  ;;  %4518 = vst [vmem:[%s5962_s3 + $0x328] sm:$0xff] %v4401_v23   ;;  %v1955_v32 = vadd.f32 %v5735_v45, %v1954_v28  ;;  %v1523_v34 = vadd.f32 %v5735_v45, %v1522_v26  ;;  %v2082_v38 = vmax.f32 %v1531_v24, 0.0 }
 0x192   :  { %v4396_v30 = vpack.c.bf16 %v2185_v25, %v2184_v17  ;;  %v4736_v31 = vpop.f32.mrf.mxu0  ;;  %v4844_v33 = vpop.f32.mrf.mxu1  ;;  %v2190_v35 = vmax.f32 %v1963_v27, 0.0 }
 0x193   :  { %4463 = vst [vmem:[%s5962_s3 + $0x170] sm:$0xff] %v4126_v29   ;;  %v1534_v36 = vadd.f32 %v5735_v45, %v4736_v31  ;;  %v1966_v37 = vadd.f32 %v5735_v45, %v4844_v33  ;;  %v2188_v47 = vmax.f32 %v1955_v32, 0.0  ;;  %v2080_v50 = vmax.f32 %v1523_v34, 0.0 }
 0x194   :  { %4517 = vst [vmem:[%s5962_s3 + $0x320] sm:$0xff] %v4396_v30   ;;  %v1525_v39 = vpop.f32.mrf.mxu0  ;;  %v1957_v40 = vpop.f32.mrf.mxu1 }
 0x195   :  { %v2083_v41 = vmax.f32 %v1534_v36, 0.0  ;;  %v1526_v43 = vadd.f32 %v5735_v45, %v1525_v39  ;;  %v2191_v44 = vmax.f32 %v1966_v37, 0.0  ;;  %v1958_v46 = vadd.f32 %v5735_v45, %v1957_v40 }
 0x196   :  { %v4739_v48 = vpop.f32.mrf.mxu0  ;;  %v4847_v49 = vpop.f32.mrf.mxu1 }
 0x197   :  { %v4141_v51 = vpack.c.bf16 %v2083_v41, %v2082_v38  ;;  %v2081_v52 = vmax.f32 %v1526_v43, 0.0  ;;  %v4411_v53 = vpack.c.bf16 %v2191_v44, %v2190_v35  ;;  %v1547_v54 = vadd.f32 %v5735_v45, %v4739_v48 }
 0x198   :  { %v2189_v55 = vmax.f32 %v1958_v46, 0.0  ;;  %v1538_v56 = vpop.f32.mrf.mxu0  ;;  %v1979_v42 = vadd.f32 %v5735_v45, %v4847_v49  ;;  %v1970_v57 = vpop.f32.mrf.mxu1 }
 0x199   :  { %4466 = vst [vmem:[%s5962_s3 + $0x188] sm:$0xff] %v4141_v51   ;;  %v4136_v58 = vpack.c.bf16 %v2081_v52, %v2080_v50  ;;  %4520 = vst [vmem:[%s5962_s3 + $0x338] sm:$0xff] %v4411_v53   ;;  %v1971_v59 = vadd.f32 %v5735_v45, %v1970_v57  ;;  %v1539_v0 = vadd.f32 %v5735_v45, %v1538_v56  ;;  %v2086_v2 = vmax.f32 %v1547_v54, 0.0 }
 0x19a   :  { %v4406_v60 = vpack.c.bf16 %v2189_v55, %v2188_v47  ;;  %v2194_v61 = vmax.f32 %v1979_v42, 0.0  ;;  %v4740_v62 = vpop.f32.mrf.mxu0  ;;  %v4848_v63 = vpop.f32.mrf.mxu1 }
 0x19b   :  { %4465 = vst [vmem:[%s5962_s3 + $0x180] sm:$0xff] %v4136_v58   ;;  %v1550_v1 = vadd.f32 %v5735_v45, %v4740_v62  ;;  %v2192_v7 = vmax.f32 %v1971_v59, 0.0  ;;  %v2084_v11 = vmax.f32 %v1539_v0, 0.0 }
 0x19c   :  { %4519 = vst [vmem:[%s5962_s3 + $0x330] sm:$0xff] %v4406_v60   ;;  %v3892_v3 = vpack.c.bf16 %v2194_v61, %v2194_v61  ;;  %v1541_v4 = vpop.f32.mrf.mxu0  ;;  %v1973_v5 = vpop.f32.mrf.mxu1 }
 0x19d   :  { %v2087_v6 = vmax.f32 %v1550_v1, 0.0  ;;  %v1542_v8 = vadd.f32 %v5735_v45, %v1541_v4  ;;  %v1974_v9 = vadd.f32 %v5735_v45, %v1973_v5 }
 0x19e   :  { %3250 = vst [vmem:[%s5962_s3 + $0x348] sm:$0x1] %v3892_v3  ;;  %v4743_v10 = vpop.f32.mrf.mxu0 }
 0x19f   :  { %v4151_v12 = vpack.c.bf16 %v2087_v6, %v2086_v2  ;;  %v2085_v13 = vmax.f32 %v1542_v8, 0.0  ;;  %v2193_v14 = vmax.f32 %v1974_v9, 0.0  ;;  %v1563_v17 = vadd.f32 %v5735_v45, %v4743_v10 }
 0x1a0   :  { %v1554_v15 = vpop.f32.mrf.mxu0 }
 0x1a1   :  { %4468 = vst [vmem:[%s5962_s3 + $0x198] sm:$0xff] %v4151_v12   ;;  %v4146_v16 = vpack.c.bf16 %v2085_v13, %v2084_v11  ;;  %v4416_v18 = vpack.c.bf16 %v2193_v14, %v2192_v7  ;;  %v1555_v20 = vadd.f32 %v5735_v45, %v1554_v15  ;;  %v2090_v23 = vmax.f32 %v1563_v17, 0.0 }
 0x1a2   :  { %v4744_v19 = vpop.f32.mrf.mxu0 }
 0x1a3   :  { %4467 = vst [vmem:[%s5962_s3 + $0x190] sm:$0xff] %v4146_v16   ;;  %4521 = vst [vmem:[%s5962_s3 + $0x340] sm:$0xff] %v4416_v18   ;;  %v1566_v21 = vadd.f32 %v5735_v45, %v4744_v19  ;;  %v2088_v26 = vmax.f32 %v1555_v20, 0.0 }
 0x1a4   :  { %v1557_v22 = vpop.f32.mrf.mxu0 }
 0x1a5   :  { %v2091_v24 = vmax.f32 %v1566_v21, 0.0  ;;  %v1558_v25 = vadd.f32 %v5735_v45, %v1557_v22 }
 0x1a7   :  { %v4161_v27 = vpack.c.bf16 %v2091_v24, %v2090_v23  ;;  %v2089_v28 = vmax.f32 %v1558_v25, 0.0 }
 0x1a9   :  { %4470 = vst [vmem:[%s5962_s3 + $0x1a8] sm:$0xff] %v4161_v27   ;;  %v4156_v29 = vpack.c.bf16 %v2089_v28, %v2088_v26 }
 0x1ab   :  { %4469 = vst [vmem:[%s5962_s3 + $0x1a0] sm:$0xff] %v4156_v29  }

// kernel: model_forward.7
= control target key start
LH: loop header
LB: loop body
LE: loop exit
PB: predicated region body
PF: predicated region fallthrough
CT: control target
= control target key end

     0   :  { %s1946_s2 = inlined_call_operand.vmem [shape: bf16[512,128], index: 2, kind: input, shape index: {}]   ;;  %s1947_s1 = inlined_call_operand.vmem [shape: bf16[16,512], index: 1, kind: input, shape index: {}]   ;;  %s1948_s3 = inlined_call_operand.vmem [shape: bf16[256,256], index: 3, kind: input, shape index: {}]   ;;  %s1949_s0 = inlined_call_operand.vmem [shape: bf16[16,128], index: 0, kind: input, shape index: {}]   ;;  %s1950_s4 = inlined_call_operand.vmem [shape: bf16[256,128], index: 4, kind: input, shape index: {}]   ;;  %s1951_s7 = inlined_call_operand.vmem [shape: f32[8,256], index: 7, kind: input, shape index: {}]   ;;  %s1952_s5 = inlined_call_operand.vmem [shape: bf16[128,256], index: 5, kind: input, shape index: {}]   ;;  %s1953_s6 = inlined_call_operand.vmem [shape: bf16[256,128], index: 6, kind: input, shape index: {}]   ;;  %s1954_s8 = inlined_call_operand.vmem [shape: f32[16,128], index: 8, kind: output, shape index: {}]  }
   0x1   :  { %v1373_v0 = vld [vmem:[%s1946_s2 + $0x78] sm:$0xff]   ;;  %v1377_v4 = vld [vmem:[%s1946_s2 + $0x70] sm:$0xff]   ;;  %v1381_v8 = vld [vmem:[%s1946_s2 + $0x68] sm:$0xff]  }
   0x2   :  { %v1374_v1 = vld [vmem:[%s1946_s2 + $0xf8] sm:$0xff]   ;;  %1284 = vmatprep.subr.bf16.mxu0 %v1373_v0  ;;  %v1378_v5 = vld [vmem:[%s1946_s2 + $0xf0] sm:$0xff]   ;;  %v1382_v9 = vld [vmem:[%s1946_s2 + $0xe8] sm:$0xff]  }
   0x3   :  { %v1375_v2 = vld [vmem:[%s1946_s2 + $0x38] sm:$0xff]   ;;  %1306 = vmatprep.subr.bf16.mxu1 %v1374_v1  ;;  %v1379_v6 = vld [vmem:[%s1946_s2 + $0x30] sm:$0xff]   ;;  %v1383_v10 = vld [vmem:[%s1946_s2 + $0x28] sm:$0xff]  }
   0x4   :  { %v1376_v3 = vld [vmem:[%s1946_s2 + $0xb8] sm:$0xff]   ;;  %1285 = vmatpush3.bf16.msra.mxu0 %v1375_v2  ;;  %v1380_v7 = vld [vmem:[%s1946_s2 + $0xb0] sm:$0xff]   ;;  %v1384_v11 = vld [vmem:[%s1946_s2 + $0xa8] sm:$0xff]  }
   0x5   :  { %1307 = vmatpush3.bf16.msra.mxu1 %v1376_v3  ;;  %1286 = vmatprep.subr.bf16.mxu0 %v1377_v4  ;;  %v1385_v12 = vld [vmem:[%s1946_s2 + $0x60] sm:$0xff]   ;;  %v1389_v16 = vld [vmem:[%s1946_s2 + $0x58] sm:$0xff]   ;;  %v1393_v20 = vld [vmem:[%s1946_s2 + $0x50] sm:$0xff]  }
   0x6   :  { %1308 = vmatprep.subr.bf16.mxu1 %v1378_v5  ;;  %v1386_v13 = vld [vmem:[%s1946_s2 + $0xe0] sm:$0xff]   ;;  %v1390_v17 = vld [vmem:[%s1946_s2 + $0xd8] sm:$0xff]   ;;  %v1394_v21 = vld [vmem:[%s1946_s2 + $0xd0] sm:$0xff]  }
   0x7   :  { %v1387_v14 = vld [vmem:[%s1946_s2 + $0x20] sm:$0xff]   ;;  %v1391_v18 = vld [vmem:[%s1946_s2 + $0x18] sm:$0xff]   ;;  %v1395_v22 = vld [vmem:[%s1946_s2 + $0x10] sm:$0xff]  }
   0x8   :  { %1287 = vmatpush3.bf16.msra.mxu0 %v1379_v6  ;;  %v1388_v15 = vld [vmem:[%s1946_s2 + $0xa0] sm:$0xff]   ;;  %v1392_v19 = vld [vmem:[%s1946_s2 + $0x98] sm:$0xff]   ;;  %v1396_v23 = vld [vmem:[%s1946_s2 + $0x90] sm:$0xff]  }
   0x9   :  { %1309 = vmatpush3.bf16.msra.mxu1 %v1380_v7  ;;  %1288 = vmatprep.subr.bf16.mxu0 %v1381_v8  ;;  %v1397_v24 = vld [vmem:[%s1946_s2 + $0x48] sm:$0xff]   ;;  %v1401_v28 = vld [vmem:[%s1946_s2 + $0x40] sm:$0xff]   ;;  %v1411_v36 = vld [vmem:[%s1948_s3 + $0x70] ss:$8 sps:$4 sm:$0xff]  }
   0xa   :  { %1310 = vmatprep.subr.bf16.mxu1 %v1382_v9  ;;  %v1398_v25 = vld [vmem:[%s1946_s2 + $0xc8] sm:$0xff]   ;;  %v1402_v29 = vld [vmem:[%s1946_s2 + $0xc0] sm:$0xff]   ;;  %v1413_v37 = vld [vmem:[%s1948_s3 + $0x74] ss:$8 sps:$4 sm:$0xff]  }
   0xb   :  { %v1399_v26 = vld [vmem:[%s1946_s2 + $0x8] sm:$0xff]   ;;  %v1403_v30 = vld [vmem:[%s1946_s2] sm:$0xff]   ;;  %v1419_v40 = vld [vmem:[%s1948_s3 + $0x54] ss:$8 sps:$4 sm:$0xff]  }
   0xc   :  { %1289 = vmatpush3.bf16.msra.mxu0 %v1383_v10  ;;  %v1400_v27 = vld [vmem:[%s1946_s2 + $0x88] sm:$0xff]   ;;  %v1404_v31 = vld [vmem:[%s1946_s2 + $0x80] sm:$0xff]   ;;  %v1417_v41 = vld [vmem:[%s1948_s3 + $0x50] ss:$8 sps:$4 sm:$0xff]  }
   0xd   :  { %1311 = vmatpush3.bf16.msra.mxu1 %v1384_v11  ;;  %1290 = vmatprep.subr.bf16.mxu0 %v1385_v12  ;;  %v1405_v32 = vld [vmem:[%s1947_s1] ss:$16 sps:$4 sm:$0xff]   ;;  %v1407_v33 = vld [vmem:[%s1947_s1 + $0x4] ss:$16 sps:$4 sm:$0xff]   ;;  %v1408_v34 = vld [vmem:[%s1947_s1 + $0x8] ss:$16 sps:$4 sm:$0xff]  }
   0xe   :  { %1312 = vmatprep.subr.bf16.mxu1 %v1386_v13  ;;  %v1410_v35 = vld [vmem:[%s1947_s1 + $0xc] ss:$16 sps:$4 sm:$0xff]   ;;  %349 = vmatprep.mubr.bf16.mxu0 %v1407_v33  ;;  %v1414_v39 = vld [vmem:[%s1948_s3 + $0x60] ss:$8 sps:$4 sm:$0xff]   ;;  %v1423_v45 = vld [vmem:[%s1948_s3 + $0x30] ss:$8 sps:$4 sm:$0xff]  }
   0xf   :  { %390 = vmatprep.mubr.bf16.mxu1 %v1410_v35  ;;  %v1416_v38 = vld [vmem:[%s1948_s3 + $0x64] ss:$8 sps:$4 sm:$0xff]   ;;  %v1420_v43 = vld [vmem:[%s1948_s3 + $0x40] ss:$8 sps:$4 sm:$0xff]   ;;  %v1425_v44 = vld [vmem:[%s1948_s3 + $0x34] ss:$8 sps:$4 sm:$0xff]  }
  0x10   :  { %1291 = vmatpush3.bf16.msra.mxu0 %v1387_v14  ;;  %v1422_v42 = vld [vmem:[%s1948_s3 + $0x44] ss:$8 sps:$4 sm:$0xff]   ;;  %v1426_v47 = vld [vmem:[%s1948_s3 + $0x20] ss:$8 sps:$4 sm:$0xff]   ;;  %v1431_v48 = vld [vmem:[%s1948_s3 + $0x14] ss:$8 sps:$4 sm:$0xff]  }
  0x11   :  { %1313 = vmatpush3.bf16.msra.mxu1 %v1388_v15  ;;  %1292 = vmatprep.subr.bf16.mxu0 %v1389_v16  ;;  %v1428_v46 = vld [vmem:[%s1948_s3 + $0x24] ss:$8 sps:$4 sm:$0xff]   ;;  %v1429_v49 = vld [vmem:[%s1948_s3 + $0x10] ss:$8 sps:$4 sm:$0xff]   ;;  %v1432_v51 = vld [vmem:[%s1948_s3] ss:$8 sps:$4 sm:$0xff]  }
  0x12   :  { %1314 = vmatprep.subr.bf16.mxu1 %v1390_v17  ;;  %v1434_v50 = vld [vmem:[%s1948_s3 + $0x4] ss:$8 sps:$4 sm:$0xff]   ;;  %v1437_v52 = vld [vmem:[%s1948_s3 + $0xf4] ss:$8 sps:$4 sm:$0xff]   ;;  %v1435_v53 = vld [vmem:[%s1948_s3 + $0xf0] ss:$8 sps:$4 sm:$0xff]  }
  0x13   :  { %v1440_v54 = vld [vmem:[%s1948_s3 + $0xe4] ss:$8 sps:$4 sm:$0xff]   ;;  %v1438_v55 = vld [vmem:[%s1948_s3 + $0xe0] ss:$8 sps:$4 sm:$0xff]   ;;  %v1443_v56 = vld [vmem:[%s1948_s3 + $0xd4] ss:$8 sps:$4 sm:$0xff]  }
  0x14   :  { %1293 = vmatpush3.bf16.msra.mxu0 %v1391_v18  ;;  %v1441_v57 = vld [vmem:[%s1948_s3 + $0xd0] ss:$8 sps:$4 sm:$0xff]   ;;  %v1446_v58 = vld [vmem:[%s1948_s3 + $0xc4] ss:$8 sps:$4 sm:$0xff]   ;;  %v1444_v59 = vld [vmem:[%s1948_s3 + $0xc0] ss:$8 sps:$4 sm:$0xff]  }
  0x15   :  { %1315 = vmatpush3.bf16.msra.mxu1 %v1392_v19  ;;  %1294 = vmatprep.subr.bf16.mxu0 %v1393_v20  ;;  %v1449_v60 = vld [vmem:[%s1948_s3 + $0xb4] ss:$8 sps:$4 sm:$0xff]   ;;  %v1447_v61 = vld [vmem:[%s1948_s3 + $0xb0] ss:$8 sps:$4 sm:$0xff]   ;;  %v1452_v62 = vld [vmem:[%s1948_s3 + $0xa4] ss:$8 sps:$4 sm:$0xff]  }
  0x16   :  { %1316 = vmatprep.subr.bf16.mxu1 %v1394_v21  ;;  %v1450_v63 = vld [vmem:[%s1948_s3 + $0xa0] ss:$8 sps:$4 sm:$0xff]   ;;  %v1455_v0 = vld [vmem:[%s1948_s3 + $0x94] ss:$8 sps:$4 sm:$0xff]   ;;  %v1453_v1 = vld [vmem:[%s1948_s3 + $0x90] ss:$8 sps:$4 sm:$0xff]  }
  0x17   :  { %v1456_v2 = vld [vmem:[%s1948_s3 + $0x80] ss:$8 sps:$4 sm:$0xff]   ;;  %v1458_v3 = vld [vmem:[%s1948_s3 + $0x84] ss:$8 sps:$4 sm:$0xff]   ;;  %v1460_v4 = vld [vmem:[%s1950_s4 + $0x78] sm:$0xff]  }
  0x18   :  { %1295 = vmatpush3.bf16.msra.mxu0 %v1395_v22  ;;  %v1461_v5 = vld [vmem:[%s1950_s4 + $0x38] sm:$0xff]   ;;  %v1462_v6 = vld [vmem:[%s1950_s4 + $0x70] sm:$0xff]   ;;  %v1464_v8 = vld [vmem:[%s1950_s4 + $0x68] sm:$0xff]  }
  0x19   :  { %1317 = vmatpush3.bf16.msra.mxu1 %v1396_v23  ;;  %1296 = vmatprep.subr.bf16.mxu0 %v1397_v24  ;;  %v1463_v7 = vld [vmem:[%s1950_s4 + $0x30] sm:$0xff]   ;;  %v1465_v9 = vld [vmem:[%s1950_s4 + $0x28] sm:$0xff]   ;;  %v1466_v10 = vld [vmem:[%s1950_s4 + $0x60] sm:$0xff]  }
  0x1a   :  { %1318 = vmatprep.subr.bf16.mxu1 %v1398_v25  ;;  %v1467_v11 = vld [vmem:[%s1950_s4 + $0x20] sm:$0xff]   ;;  %v1468_v12 = vld [vmem:[%s1950_s4 + $0x58] sm:$0xff]   ;;  %v1470_v35 = vld [vmem:[%s1950_s4 + $0x50] sm:$0xff]  }
  0x1b   :  { %v1469_v13 = vld [vmem:[%s1950_s4 + $0x18] sm:$0xff]   ;;  %v30_v16 = vld [vmem:[%s1951_s7] ss:$0 sm:$0xff] }
  0x1c   :  { %1297 = vmatpush3.bf16.msra.mxu0 %v1399_v26  ;;  %v1459_v33 = vld [vmem:[%s1949_s0] sm:$0xff]  }
  0x1d   :  { %1319 = vmatpush3.bf16.msra.mxu1 %v1400_v27  ;;  %1298 = vmatprep.subr.bf16.mxu0 %v1401_v28 }
  0x1e   :  { %1320 = vmatprep.subr.bf16.mxu1 %v1402_v29 }
  0x20   :  { %1299 = vmatpush3.bf16.msra.mxu0 %v1403_v30 }
  0x21   :  { %1321 = vmatpush3.bf16.msra.mxu1 %v1404_v31  ;;  %613 = vmatprep.subr.bf16.mxu0 %v1413_v37  ;;  %v1472_v37 = vld [vmem:[%s1950_s4 + $0x48] sm:$0xff]  }
  0x22   :  { %1328 = vmatprep.subr.bf16.mxu1 %v1460_v4  ;;  %v1487_v4 = vld [vmem:[%s1952_s5 + $0x44] ss:$8 sps:$4 sm:$0xff]  }
  0x23   :  { %350 = vmatmul.mubr.bf16.vlgmr.msra.gmra.mxu0 %v1405_v32 }
  0x24   :  { %391 = vmatmul.mubr.bf16.vlgmr.msra.gmra.mxu1 %v1408_v34  ;;  %614 = vmatpush1.bf16.msra.mxu0 %v1411_v36  ;;  %v1471_v36 = vld [vmem:[%s1950_s4 + $0x10] sm:$0xff]  }
  0x25   :  { %615 = vmatprep.subr.bf16.mxu0 %v1416_v38  ;;  %1329 = vmatpush3.bf16.msra.mxu1 %v1461_v5  ;;  %v1473_v38 = vld [vmem:[%s1950_s4 + $0x8] sm:$0xff]  }
  0x26   :  { %1330 = vmatprep.subr.bf16.mxu1 %v1462_v6  ;;  %v1485_v5 = vld [vmem:[%s1952_s5 + $0x40] ss:$8 sps:$4 sm:$0xff]   ;;  %v1490_v6 = vld [vmem:[%s1952_s5 + $0x34] ss:$8 sps:$4 sm:$0xff]  }
  0x28   :  { %616 = vmatpush1.bf16.msra.mxu0 %v1414_v39  ;;  %v1474_v39 = vld [vmem:[%s1950_s4 + $0x40] sm:$0xff]  }
  0x29   :  { %617 = vmatprep.subr.bf16.mxu0 %v1419_v40  ;;  %1331 = vmatpush3.bf16.msra.mxu1 %v1463_v7  ;;  %v1475_v40 = vld [vmem:[%s1950_s4] sm:$0xff]   ;;  %v1488_v7 = vld [vmem:[%s1952_s5 + $0x30] ss:$8 sps:$4 sm:$0xff]  }
  0x2a   :  { %1332 = vmatprep.subr.bf16.mxu1 %v1464_v8  ;;  %v1493_v8 = vld [vmem:[%s1952_s5 + $0x24] ss:$8 sps:$4 sm:$0xff]  }
  0x2c   :  { %618 = vmatpush1.bf16.msra.mxu0 %v1417_v41  ;;  %v1478_v41 = vld [vmem:[%s1952_s5 + $0x74] ss:$8 sps:$4 sm:$0xff]  }
  0x2d   :  { %619 = vmatprep.subr.bf16.mxu0 %v1422_v42  ;;  %1333 = vmatpush3.bf16.msra.mxu1 %v1465_v9  ;;  %v443_v42 = vlaneseq  ;;  %v1491_v9 = vld [vmem:[%s1952_s5 + $0x20] ss:$8 sps:$4 sm:$0xff]  }
  0x2e   :  { %1334 = vmatprep.subr.bf16.mxu1 %v1466_v10  ;;  %v1496_v10 = vld [vmem:[%s1952_s5 + $0x14] ss:$8 sps:$4 sm:$0xff]  }
  0x30   :  { %620 = vmatpush1.bf16.msra.mxu0 %v1420_v43  ;;  %v1823_v43 = vshrl.u32 %v443_v42, 7  ;;  %v1515_v42 = vld [vmem:[%s1953_s6] sm:$0xff]  }
  0x31   :  { %621 = vmatprep.subr.bf16.mxu0 %v1425_v44  ;;  %1335 = vmatpush3.bf16.msra.mxu1 %v1467_v11  ;;  %v1494_v11 = vld [vmem:[%s1952_s5 + $0x10] ss:$8 sps:$4 sm:$0xff]  }
  0x32   :  { %1336 = vmatprep.subr.bf16.mxu1 %v1468_v12  ;;  %v449_v44 = vsub.s32 1, %v1823_v43  ;;  %v1499_v12 = vld [vmem:[%s1952_s5 + $0x4] ss:$8 sps:$4 sm:$0xff]  }
  0x34   :  { %622 = vmatpush1.bf16.msra.mxu0 %v1423_v45  ;;  %v445_v45 = vsub.s32 0, %v1823_v43  ;;  %v36_v43 = vld [vmem:[%s1951_s7 + $0x4] ss:$0 sm:$0xff] }
  0x35   :  { %623 = vmatprep.subr.bf16.mxu0 %v1428_v46  ;;  %1337 = vmatpush3.bf16.msra.mxu1 %v1469_v13  ;;  %v1165_v46 = vld [vmem:[%s1951_s7 + $0x1] ss:$8 sm:$0x3] }
  0x36   :  { %1338 = vmatprep.subr.bf16.mxu1 %v1470_v35  ;;  %v1497_v13 = vld [vmem:[%s1952_s5] ss:$8 sps:$4 sm:$0xff]  }
  0x38   :  { %624 = vmatpush1.bf16.msra.mxu0 %v1426_v47 }
  0x39   :  { %625 = vmatprep.subr.bf16.mxu0 %v1431_v48  ;;  %1339 = vmatpush3.bf16.msra.mxu1 %v1471_v36  ;;  %v450_v48 = vrot.slane %v1165_v46, %v449_v44 }
  0x3a   :  { %1340 = vmatprep.subr.bf16.mxu1 %v1472_v37  ;;  %v1510_v37 = vld [vmem:[%s1953_s6 + $0x50] sm:$0xff]  }
  0x3c   :  { %626 = vmatpush1.bf16.msra.mxu0 %v1429_v49  ;;  %v446_v49 = vrot.slane %v1165_v46, %v445_v45  ;;  %v1166_v46 = vld [vmem:[%s1951_s7 + $0x3] ss:$8 sm:$0x3] }
  0x3d   :  { %627 = vmatprep.subr.bf16.mxu0 %v1434_v50  ;;  %1341 = vmatpush3.bf16.msra.mxu1 %v1473_v38  ;;  %v1511_v38 = vld [vmem:[%s1953_s6 + $0x10] sm:$0xff]  }
  0x3e   :  { %1342 = vmatprep.subr.bf16.mxu1 %v1474_v39  ;;  %v1512_v39 = vld [vmem:[%s1953_s6 + $0x48] sm:$0xff]  }
  0x40   :  { %628 = vmatpush1.bf16.msra.mxu0 %v1432_v51 }
  0x41   :  { %629 = vmatprep.subr.bf16.mxu0 %v1437_v52  ;;  %1343 = vmatpush3.bf16.msra.mxu1 %v1475_v40  ;;  %v1513_v40 = vld [vmem:[%s1953_s6 + $0x8] sm:$0xff]  }
  0x42   :  { %941 = vmatprep.subr.bf16.mxu1 %v1478_v41  ;;  %v1514_v41 = vld [vmem:[%s1953_s6 + $0x40] sm:$0xff]  }
  0x44   :  { %630 = vmatpush2.bf16.msra.mxu0 %v1435_v53 }
  0x45   :  { %631 = vmatprep.subr.bf16.mxu0 %v1440_v54 }
  0x48   :  { %632 = vmatpush2.bf16.msra.mxu0 %v1438_v55 }
  0x49   :  { %633 = vmatprep.subr.bf16.mxu0 %v1443_v56 }
  0x4c   :  { %634 = vmatpush2.bf16.msra.mxu0 %v1441_v57 }
  0x4d   :  { %635 = vmatprep.subr.bf16.mxu0 %v1446_v58 }
  0x50   :  { %636 = vmatpush2.bf16.msra.mxu0 %v1444_v59 }
  0x51   :  { %637 = vmatprep.subr.bf16.mxu0 %v1449_v60 }
  0x54   :  { %638 = vmatpush2.bf16.msra.mxu0 %v1447_v61 }
  0x55   :  { %639 = vmatprep.subr.bf16.mxu0 %v1452_v62  ;;  %v1476_v62 = vld [vmem:[%s1952_s5 + $0x70] ss:$8 sps:$4 sm:$0xff]  }
  0x58   :  { %640 = vmatpush2.bf16.msra.mxu0 %v1450_v63 }
  0x59   :  { %641 = vmatprep.subr.bf16.mxu0 %v1455_v0  ;;  %v1481_v0 = vld [vmem:[%s1952_s5 + $0x64] ss:$8 sps:$4 sm:$0xff]  }
  0x5c   :  { %642 = vmatpush2.bf16.msra.mxu0 %v1453_v1  ;;  %v1479_v1 = vld [vmem:[%s1952_s5 + $0x60] ss:$8 sps:$4 sm:$0xff]  }
  0x5d   :  { %643 = vmatprep.subr.bf16.mxu0 %v1458_v3  ;;  %v1482_v3 = vld [vmem:[%s1952_s5 + $0x50] ss:$8 sps:$4 sm:$0xff]  }
  0x60   :  { %644 = vmatpush2.bf16.msra.mxu0 %v1456_v2  ;;  %v1484_v2 = vld [vmem:[%s1952_s5 + $0x54] ss:$8 sps:$4 sm:$0xff]  }
  0xe3   :  { %v1300_v14 = vpop.f32.mrf.mxu0 }
  0xe4   :  { %v1322_v15 = vpop.f32.mrf.mxu1 }
  0xe5   :  { %v1301_v17 = vpop.f32.mrf.mxu0 }
  0xe6   :  { %v1302_v18 = vadd.f32 %v1301_v17, %v1300_v14  ;;  %v1323_v19 = vpop.f32.mrf.mxu1  ;;  %v1516_v14 = vmov 0   ;;  %v1502_v17 = vld [vmem:[%s1953_s6 + $0x70] sm:$0xff]  }
  0xe7   :  { %v1303_v20 = vpop.f32.mrf.mxu0  ;;  %v1324_v24 = vadd.f32 %v1323_v19, %v1322_v15  ;;  %v1500_v15 = vld [vmem:[%s1953_s6 + $0x78] sm:$0xff]   ;;  %v1504_v19 = vld [vmem:[%s1953_s6 + $0x68] sm:$0xff]  }
  0xe8   :  { %v352_v21 = vadd.f32 %v1302_v18, %v30_v16  ;;  %v1325_v22 = vpop.f32.mrf.mxu1  ;;  %1350 = vmatprep.subr.bf16.mxu0 %v1500_v15  ;;  %v1503_v18 = vld [vmem:[%s1953_s6 + $0x30] sm:$0xff]  }
  0xe9   :  { %v1304_v23 = vpop.f32.mrf.mxu0 }
  0xea   :  { %v1305_v25 = vadd.f32 %v1304_v23, %v1303_v20  ;;  %v1326_v26 = vpop.f32.mrf.mxu1  ;;  %v393_v27 = vadd.f32 %v1324_v24, %v352_v21  ;;  %v1505_v20 = vld [vmem:[%s1953_s6 + $0x28] sm:$0xff]   ;;  %v1506_v21 = vld [vmem:[%s1953_s6 + $0x60] sm:$0xff]   ;;  %v1508_v23 = vld [vmem:[%s1953_s6 + $0x58] sm:$0xff]  }
  0xeb   :  { %v1327_v29 = vadd.f32 %v1326_v26, %v1325_v22  ;;  %v1507_v22 = vld [vmem:[%s1953_s6 + $0x20] sm:$0xff]   ;;  %v1509_v24 = vld [vmem:[%s1953_s6 + $0x18] sm:$0xff]  }
  0xec   :  { %v355_v28 = vadd.f32 %v1305_v25, %v30_v16  ;;  %v399_v31 = vmax.f32 %v393_v27, 0.0  ;;  %v1501_v16 = vld [vmem:[%s1953_s6 + $0x38] sm:$0xff]  }
  0xee   :  { %v396_v30 = vadd.f32 %v1327_v29, %v355_v28  ;;  %v33_v28 = vld [vmem:[%s1951_s7 + $0x2] ss:$0 sm:$0xff] }
  0xf0   :  { %v400_v32 = vmax.f32 %v396_v30, 0.0 }
  0xf2   :  { %v403_v34 = vpack.c.bf16 %v400_v32, %v399_v31 }
  0xf4   :  { %645 = vmatprep.mubr.bf16.mxu0 %v403_v34 }
  0xf5   :  { %646 = vmatmul.mubr.bf16.vlgmr.msra.gmra.mxu0 %v1459_v33 }
  0xf6   :  { %1351 = vmatpush3.bf16.msra.mxu0 %v1501_v16 }
  0xf7   :  { %1352 = vmatprep.subr.bf16.mxu0 %v1502_v17 }
  0xfa   :  { %1353 = vmatpush3.bf16.msra.mxu0 %v1503_v18 }
  0xfb   :  { %1354 = vmatprep.subr.bf16.mxu0 %v1504_v19 }
  0xfe   :  { %1355 = vmatpush3.bf16.msra.mxu0 %v1505_v20 }
  0xff   :  { %1356 = vmatprep.subr.bf16.mxu0 %v1506_v21 }
 0x102   :  { %1357 = vmatpush3.bf16.msra.mxu0 %v1507_v22 }
 0x103   :  { %1358 = vmatprep.subr.bf16.mxu0 %v1508_v23 }
 0x106   :  { %1359 = vmatpush3.bf16.msra.mxu0 %v1509_v24 }
 0x107   :  { %1360 = vmatprep.subr.bf16.mxu0 %v1510_v37 }
 0x10a   :  { %1361 = vmatpush3.bf16.msra.mxu0 %v1511_v38 }
 0x10b   :  { %1362 = vmatprep.subr.bf16.mxu0 %v1512_v39 }
 0x10e   :  { %1363 = vmatpush3.bf16.msra.mxu0 %v1513_v40 }
 0x10f   :  { %1364 = vmatprep.subr.bf16.mxu0 %v1514_v41 }
 0x112   :  { %1365 = vmatpush3.bf16.msra.mxu0 %v1515_v42 }
 0x1b5   :  { %v647_v47 = vpop.f32.mrf.mxu0 }
 0x1b6   :  { %v648_v54 = vadd.f32 %v647_v47, %v446_v49 }
 0x1b7   :  { %v649_v50 = vpop.f32.mrf.mxu0 }
 0x1b8   :  { %v650_v52 = vadd.f32 %v649_v50, %v450_v48  ;;  %v656_v60 = vmax.f32 %v648_v54, 0.0 }
 0x1b9   :  { %v651_v51 = vpop.f32.mrf.mxu0 }
 0x1ba   :  { %v652_v53 = vadd.f32 %v651_v51, %v446_v49  ;;  %v657_v58 = vmax.f32 %v650_v52, 0.0  ;;  %v854_v49 = vrot.slane %v1166_v46, %v445_v45 }
 0x1bb   :  { %v653_v55 = vpop.f32.mrf.mxu0 }
 0x1bc   :  { %v654_v56 = vadd.f32 %v653_v55, %v450_v48  ;;  %v658_v57 = vmax.f32 %v652_v53, 0.0  ;;  %v858_v48 = vrot.slane %v1166_v46, %v449_v44 }
 0x1be   :  { %v659_v59 = vmax.f32 %v654_v56, 0.0  ;;  %v660_v63 = vpack.c.bf16 %v658_v57, %v656_v60 }
 0x1c0   :  { %v661_v61 = vpack.c.bf16 %v659_v59, %v657_v58 }
 0x1c2   :  { %822 = vmatprep.mubr.bf16.mxu1 %v661_v61 }
 0x1c3   :  { %823 = vmatmul.mubr.bf16.vlgmr.msra.gmra.mxu1 %v660_v63 }
 0x1c4   :  { %942 = vmatpush1.bf16.msra.mxu1 %v1476_v62  ;;  %973 = vmatprep.mubr.bf16.mxu1 %v1516_v14 }
 0x1c5   :  { %943 = vmatprep.subr.bf16.mxu1 %v1481_v0 }
 0x1c8   :  { %944 = vmatpush1.bf16.msra.mxu1 %v1479_v1 }
 0x1c9   :  { %945 = vmatprep.subr.bf16.mxu1 %v1484_v2 }
 0x1cc   :  { %946 = vmatpush1.bf16.msra.mxu1 %v1482_v3 }
 0x1cd   :  { %947 = vmatprep.subr.bf16.mxu1 %v1487_v4 }
 0x1d0   :  { %948 = vmatpush1.bf16.msra.mxu1 %v1485_v5 }
 0x1d1   :  { %949 = vmatprep.subr.bf16.mxu1 %v1490_v6 }
 0x1d4   :  { %950 = vmatpush1.bf16.msra.mxu1 %v1488_v7 }
 0x1d5   :  { %951 = vmatprep.subr.bf16.mxu1 %v1493_v8 }
 0x1d8   :  { %952 = vmatpush1.bf16.msra.mxu1 %v1491_v9 }
 0x1d9   :  { %953 = vmatprep.subr.bf16.mxu1 %v1496_v10 }
 0x1dc   :  { %954 = vmatpush1.bf16.msra.mxu1 %v1494_v11 }
 0x1dd   :  { %955 = vmatprep.subr.bf16.mxu1 %v1499_v12 }
 0x1e0   :  { %956 = vmatpush1.bf16.msra.mxu1 %v1497_v13 }
 0x283   :  { %v1344_v25 = vpop.f32.mrf.mxu1 }
 0x285   :  { %v1345_v26 = vpop.f32.mrf.mxu1 }
 0x286   :  { %v1346_v27 = vadd.f32 %v1345_v26, %v1344_v25 }
 0x287   :  { %v1347_v29 = vpop.f32.mrf.mxu1 }
 0x288   :  { %v825_v31 = vadd.f32 %v1346_v27, %v33_v28 }
 0x289   :  { %v1348_v30 = vpop.f32.mrf.mxu1 }
 0x28a   :  { %v1349_v32 = vadd.f32 %v1348_v30, %v1347_v29  ;;  %v831_v34 = vmax.f32 %v825_v31, 0.0 }
 0x28c   :  { %v828_v33 = vadd.f32 %v1349_v32, %v33_v28 }
 0x28e   :  { %v832_v35 = vmax.f32 %v828_v33, 0.0 }
 0x290   :  { %v833_v36 = vpack.c.bf16 %v832_v35, %v831_v34 }
 0x292   :  { %974 = vmatmul.mubr.bf16.vlgmr.msra.gmra.mxu1 %v833_v36 }
 0x352   :  { %v975_v47 = vpop.f32.mrf.mxu1 }
 0x353   :  { %v976_v54 = vadd.f32 %v975_v47, %v854_v49 }
 0x354   :  { %v977_v50 = vpop.f32.mrf.mxu1 }
 0x355   :  { %v978_v52 = vadd.f32 %v977_v50, %v858_v48  ;;  %v984_v60 = vmax.f32 %v976_v54, 0.0 }
 0x356   :  { %v979_v51 = vpop.f32.mrf.mxu1 }
 0x357   :  { %v980_v53 = vadd.f32 %v979_v51, %v854_v49  ;;  %v985_v58 = vmax.f32 %v978_v52, 0.0 }
 0x358   :  { %v981_v55 = vpop.f32.mrf.mxu1 }
 0x359   :  { %v982_v56 = vadd.f32 %v981_v55, %v858_v48  ;;  %v986_v57 = vmax.f32 %v980_v53, 0.0 }
 0x35b   :  { %v987_v59 = vmax.f32 %v982_v56, 0.0  ;;  %v988_v62 = vpack.c.bf16 %v986_v57, %v984_v60 }
 0x35d   :  { %v989_v61 = vpack.c.bf16 %v987_v59, %v985_v58 }
 0x35f   :  { %1150 = vmatprep.mubr.bf16.mxu0 %v989_v61 }
 0x360   :  { %1151 = vmatmul.mubr.bf16.vlgmr.msra.gmra.mxu0 %v988_v62 }
 0x420   :  { %v1366_v63 = vpop.f32.mrf.mxu0 }
 0x422   :  { %v1367_v44 = vpop.f32.mrf.mxu0 }
 0x423   :  { %v1368_v45 = vadd.f32 %v1367_v44, %v1366_v63 }
 0x424   :  { %v1369_v0 = vpop.f32.mrf.mxu0 }
 0x425   :  { %v1153_v1 = vadd.f32 %v1368_v45, %v36_v43 }
 0x426   :  { %v1370_v2 = vpop.f32.mrf.mxu0 }
 0x427   :  { %1159 = vst [vmem:[%s1954_s8] sm:$0xff] %v1153_v1  ;;  %v1371_v3 = vadd.f32 %v1370_v2, %v1369_v0 }
 0x429   :  { %v1156_v4 = vadd.f32 %v1371_v3, %v36_v43 }
 0x42b   :  { %1160 = vst [vmem:[%s1954_s8 + $0x8] sm:$0xff] %v1156_v4 }

// kernel: model_forward.5
= control target key start
LH: loop header
LB: loop body
LE: loop exit
PB: predicated region body
PF: predicated region fallthrough
CT: control target
= control target key end

     0   :  { %v5545_v0 = vmov 0   ;;  %s7638_s1 = inlined_call_operand.vmem [shape: bf16[1152,128], index: 1, kind: input, shape index: {}]   ;;  %s7639_s0 = inlined_call_operand.vmem [shape: bf16[512,1152], index: 0, kind: input, shape index: {}]   ;;  %s7640_s2 = inlined_call_operand.vmem [shape: f32[1,128], index: 2, kind: input, shape index: {}]   ;;  %s7641_s3 = inlined_call_operand.vmem [shape: bf16[512,128], index: 3, kind: output, shape index: {}]  }
   0x1   :  { %2390 = vmatprep.subr.bf16.mxu0 %v5545_v0  ;;  %5023 = vmatprep.subr.bf16.mxu1 %v5545_v0  ;;  %v5056_v1 = vld [vmem:[%s7638_s1 + $0x38] sm:$0xff]   ;;  %v5057_v2 = vld [vmem:[%s7638_s1 + $0x30] sm:$0xff]   ;;  %v5058_v3 = vld [vmem:[%s7638_s1 + $0x28] sm:$0xff]  }
   0x2   :  { %2391 = vmatpush1.bf16.msra.mxu0 %v5056_v1  ;;  %5039 = vmatpush1.bf16.msra.mxu1 %v5056_v1  ;;  %v5059_v4 = vld [vmem:[%s7638_s1 + $0x20] sm:$0xff]   ;;  %v5060_v5 = vld [vmem:[%s7638_s1 + $0x18] sm:$0xff]   ;;  %v5061_v7 = vld [vmem:[%s7638_s1 + $0x10] sm:$0xff]  }
   0x3   :  { %2392 = vmatprep.subr.bf16.mxu0 %v5545_v0  ;;  %5024 = vmatprep.subr.bf16.mxu1 %v5545_v0  ;;  %v5074_v6 = vld [vmem:[%s7639_s0 + $0x4] ss:$36 sps:$4 sm:$0xff]   ;;  %v5064_v11 = vld [vmem:[%s7638_s1 + $0x78] sm:$0xff]   ;;  %v5065_v12 = vld [vmem:[%s7638_s1 + $0x70] sm:$0xff]  }
   0x4   :  { %v5077_v8 = vld [vmem:[%s7639_s0 + $0x6c4] ss:$36 sps:$4 sm:$0xff]   ;;  %2422 = vmatprep.mubr.bf16.mxu0 %v5074_v6  ;;  %v5068_v15 = vld [vmem:[%s7638_s1 + $0x58] sm:$0xff]   ;;  %v5069_v16 = vld [vmem:[%s7638_s1 + $0x50] sm:$0xff]  }
   0x5   :  { %2614 = vmatprep.mubr.bf16.mxu1 %v5077_v8  ;;  %v5062_v9 = vld [vmem:[%s7638_s1 + $0x8] sm:$0xff]   ;;  %v5063_v10 = vld [vmem:[%s7638_s1] sm:$0xff]   ;;  %v5078_v21 = vld [vmem:[%s7638_s1 + $0xb8] sm:$0xff]  }
   0x6   :  { %2393 = vmatpush1.bf16.msra.mxu0 %v5057_v2  ;;  %5040 = vmatpush1.bf16.msra.mxu1 %v5057_v2  ;;  %v5066_v13 = vld [vmem:[%s7638_s1 + $0x68] sm:$0xff]   ;;  %v5067_v14 = vld [vmem:[%s7638_s1 + $0x60] sm:$0xff]   ;;  %v5079_v22 = vld [vmem:[%s7638_s1 + $0x138] sm:$0xff]  }
   0x7   :  { %2394 = vmatprep.subr.bf16.mxu0 %v5545_v0  ;;  %5025 = vmatprep.subr.bf16.mxu1 %v5545_v0  ;;  %v5070_v17 = vld [vmem:[%s7638_s1 + $0x48] sm:$0xff]   ;;  %v5071_v18 = vld [vmem:[%s7638_s1 + $0x40] sm:$0xff]   ;;  %v5080_v25 = vld [vmem:[%s7638_s1 + $0xb0] sm:$0xff]  }
   0x8   :  { %v5072_v19 = vld [vmem:[%s7639_s0] ss:$36 sps:$4 sm:$0xff]   ;;  %v5081_v23 = vld [vmem:[%s7639_s0 + $0x4c] ss:$36 sps:$4 sm:$0xff]   ;;  %v5090_v30 = vld [vmem:[%s7639_s0 + $0x94] ss:$36 sps:$4 sm:$0xff]  }
   0x9   :  { %v5075_v20 = vld [vmem:[%s7639_s0 + $0x6c0] ss:$36 sps:$4 sm:$0xff]   ;;  %v5083_v24 = vld [vmem:[%s7639_s0 + $0x70c] ss:$36 sps:$4 sm:$0xff]   ;;  %v5092_v31 = vld [vmem:[%s7639_s0 + $0x754] ss:$36 sps:$4 sm:$0xff]  }
   0xa   :  { %2395 = vmatpush1.bf16.msra.mxu0 %v5058_v3  ;;  %5041 = vmatpush1.bf16.msra.mxu1 %v5058_v3  ;;  %v5089_v26 = vld [vmem:[%s7638_s1 + $0x130] sm:$0xff]   ;;  %v5085_v27 = vld [vmem:[%s7639_s0 + $0x48] ss:$36 sps:$4 sm:$0xff]   ;;  %v5088_v33 = vld [vmem:[%s7638_s1 + $0xa0] sm:$0xff]  }
   0xb   :  { %2396 = vmatprep.subr.bf16.mxu0 %v5545_v0  ;;  %5026 = vmatprep.subr.bf16.mxu1 %v5545_v0  ;;  %v5086_v28 = vld [vmem:[%s7639_s0 + $0x708] ss:$36 sps:$4 sm:$0xff]   ;;  %v5094_v34 = vld [vmem:[%s7639_s0 + $0x90] ss:$36 sps:$4 sm:$0xff]   ;;  %v5115_v36 = vld [vmem:[%s7638_s1 + $0x120] sm:$0xff]  }
   0xc   :  { %v5087_v29 = vld [vmem:[%s7638_s1 + $0xa8] sm:$0xff]   ;;  %v5095_v35 = vld [vmem:[%s7639_s0 + $0x750] ss:$36 sps:$4 sm:$0xff]   ;;  %v5096_v37 = vld [vmem:[%s7638_s1 + $0x98] sm:$0xff]  }
   0xd   :  { %v5105_v32 = vld [vmem:[%s7638_s1 + $0x128] sm:$0xff]   ;;  %v5098_v38 = vld [vmem:[%s7639_s0 + $0xdc] ss:$36 sps:$4 sm:$0xff]   ;;  %v5097_v41 = vld [vmem:[%s7638_s1 + $0x90] sm:$0xff]  }
   0xe   :  { %2397 = vmatpush1.bf16.msra.mxu0 %v5059_v4  ;;  %5042 = vmatpush1.bf16.msra.mxu1 %v5059_v4  ;;  %v5100_v39 = vld [vmem:[%s7639_s0 + $0x79c] ss:$36 sps:$4 sm:$0xff]   ;;  %v5104_v44 = vld [vmem:[%s7638_s1 + $0x88] sm:$0xff]   ;;  %v5141_v47 = vld [vmem:[%s7638_s1 + $0x110] sm:$0xff]  }
   0xf   :  { %2398 = vmatprep.subr.bf16.mxu0 %v5545_v0  ;;  %5027 = vmatprep.subr.bf16.mxu1 %v5545_v0  ;;  %v5131_v40 = vld [vmem:[%s7638_s1 + $0x118] sm:$0xff]   ;;  %v5107_v45 = vld [vmem:[%s7639_s0 + $0x124] ss:$36 sps:$4 sm:$0xff]   ;;  %v5116_v53 = vld [vmem:[%s7639_s0 + $0x16c] ss:$36 sps:$4 sm:$0xff]  }
  0x10   :  { %v5102_v42 = vld [vmem:[%s7639_s0 + $0xd8] ss:$36 sps:$4 sm:$0xff]   ;;  %v5109_v46 = vld [vmem:[%s7639_s0 + $0x7e4] ss:$36 sps:$4 sm:$0xff]   ;;  %v5118_v54 = vld [vmem:[%s7639_s0 + $0x82c] ss:$36 sps:$4 sm:$0xff]  }
  0x11   :  { %v5103_v43 = vld [vmem:[%s7639_s0 + $0x798] ss:$36 sps:$4 sm:$0xff]   ;;  %v5106_v48 = vld [vmem:[%s7638_s1 + $0x80] sm:$0xff]   ;;  %v5155_v51 = vld [vmem:[%s7638_s1 + $0x108] sm:$0xff]  }
  0x12   :  { %2399 = vmatpush1.bf16.msra.mxu0 %v5060_v5  ;;  %5043 = vmatpush1.bf16.msra.mxu1 %v5060_v5  ;;  %v5111_v49 = vld [vmem:[%s7639_s0 + $0x120] ss:$36 sps:$4 sm:$0xff]   ;;  %v5113_v52 = vld [vmem:[%s7638_s1 + $0xf8] sm:$0xff]   ;;  %v5114_v56 = vld [vmem:[%s7638_s1 + $0xf0] sm:$0xff]  }
  0x13   :  { %2400 = vmatprep.subr.bf16.mxu0 %v5545_v0  ;;  %5028 = vmatprep.subr.bf16.mxu1 %v5545_v0  ;;  %v5112_v50 = vld [vmem:[%s7639_s0 + $0x7e0] ss:$36 sps:$4 sm:$0xff]   ;;  %v5120_v57 = vld [vmem:[%s7639_s0 + $0x168] ss:$36 sps:$4 sm:$0xff]   ;;  %v5124_v60 = vld [vmem:[%s7639_s0 + $0x1b4] ss:$36 sps:$4 sm:$0xff]  }
  0x14   :  { %v5163_v55 = vld [vmem:[%s7638_s1 + $0x100] sm:$0xff]   ;;  %v5121_v58 = vld [vmem:[%s7639_s0 + $0x828] ss:$36 sps:$4 sm:$0xff]   ;;  %v5126_v61 = vld [vmem:[%s7639_s0 + $0x874] ss:$36 sps:$4 sm:$0xff]  }
  0x15   :  { %v5122_v59 = vld [vmem:[%s7638_s1 + $0xe8] sm:$0xff]   ;;  %v5176_v62 = vld [vmem:[%s7638_s1 + $0x178] sm:$0xff]   ;;  %v5123_v63 = vld [vmem:[%s7638_s1 + $0xe0] sm:$0xff]  }
  0x16   :  { %2401 = vmatpush1.bf16.msra.mxu0 %v5061_v7  ;;  %5044 = vmatpush1.bf16.msra.mxu1 %v5061_v7  ;;  %v5128_v1 = vld [vmem:[%s7639_s0 + $0x1b0] ss:$36 sps:$4 sm:$0xff]   ;;  %v5130_v4 = vld [vmem:[%s7638_s1 + $0xd8] sm:$0xff]   ;;  %v5198_v7 = vld [vmem:[%s7638_s1 + $0x168] sm:$0xff]  }
  0x17   :  { %2402 = vmatprep.subr.bf16.mxu0 %v5545_v0  ;;  %5029 = vmatprep.subr.bf16.mxu1 %v5545_v0  ;;  %v5129_v2 = vld [vmem:[%s7639_s0 + $0x870] ss:$36 sps:$4 sm:$0xff]   ;;  %v5133_v5 = vld [vmem:[%s7639_s0 + $0x1fc] ss:$36 sps:$4 sm:$0xff]  }
  0x18   :  { %v5184_v3 = vld [vmem:[%s7638_s1 + $0x170] sm:$0xff]   ;;  %v5135_v6 = vld [vmem:[%s7639_s0 + $0x8bc] ss:$36 sps:$4 sm:$0xff]  }
  0x19   :  { %v5132_v8 = vld [vmem:[%s7638_s1 + $0xd0] sm:$0xff]  }
  0x1a   :  { %2403 = vmatpush1.bf16.msra.mxu0 %v5062_v9  ;;  %5045 = vmatpush1.bf16.msra.mxu1 %v5062_v9  ;;  %v5137_v9 = vld [vmem:[%s7639_s0 + $0x1f8] ss:$36 sps:$4 sm:$0xff]  }
  0x1b   :  { %2404 = vmatprep.subr.bf16.mxu0 %v5545_v0  ;;  %5030 = vmatprep.subr.bf16.mxu1 %v5545_v0 }
  0x1e   :  { %2405 = vmatpush1.bf16.msra.mxu0 %v5063_v10  ;;  %5046 = vmatpush1.bf16.msra.mxu1 %v5063_v10  ;;  %v5138_v10 = vld [vmem:[%s7639_s0 + $0x8b8] ss:$36 sps:$4 sm:$0xff]  }
  0x1f   :  { %2406 = vmatprep.subr.bf16.mxu0 %v5545_v0  ;;  %5031 = vmatprep.subr.bf16.mxu1 %v5545_v0 }
  0x22   :  { %2407 = vmatpush2.bf16.msra.mxu0 %v5064_v11  ;;  %5047 = vmatpush2.bf16.msra.mxu1 %v5064_v11  ;;  %v5139_v11 = vld [vmem:[%s7638_s1 + $0xc8] sm:$0xff]  }
  0x23   :  { %2408 = vmatprep.subr.bf16.mxu0 %v5545_v0  ;;  %5032 = vmatprep.subr.bf16.mxu1 %v5545_v0 }
  0x26   :  { %2409 = vmatpush2.bf16.msra.mxu0 %v5065_v12  ;;  %5048 = vmatpush2.bf16.msra.mxu1 %v5065_v12  ;;  %v5142_v12 = vld [vmem:[%s7639_s0 + $0x244] ss:$36 sps:$4 sm:$0xff]  }
  0x27   :  { %2410 = vmatprep.subr.bf16.mxu0 %v5545_v0  ;;  %5033 = vmatprep.subr.bf16.mxu1 %v5545_v0 }
  0x2a   :  { %2411 = vmatpush2.bf16.msra.mxu0 %v5066_v13  ;;  %5049 = vmatpush2.bf16.msra.mxu1 %v5066_v13  ;;  %v5146_v13 = vld [vmem:[%s7639_s0 + $0xc] ss:$36 sps:$4 sm:$0xff]  }
  0x2b   :  { %2412 = vmatprep.subr.bf16.mxu0 %v5545_v0  ;;  %5034 = vmatprep.subr.bf16.mxu1 %v5545_v0 }
  0x2e   :  { %2413 = vmatpush2.bf16.msra.mxu0 %v5067_v14  ;;  %5050 = vmatpush2.bf16.msra.mxu1 %v5067_v14  ;;  %v5206_v14 = vld [vmem:[%s7638_s1 + $0x160] sm:$0xff]  }
  0x2f   :  { %2414 = vmatprep.subr.bf16.mxu0 %v5545_v0  ;;  %5035 = vmatprep.subr.bf16.mxu1 %v5545_v0 }
  0x32   :  { %2415 = vmatpush2.bf16.msra.mxu0 %v5068_v15  ;;  %5051 = vmatpush2.bf16.msra.mxu1 %v5068_v15  ;;  %v5140_v15 = vld [vmem:[%s7638_s1 + $0xc0] sm:$0xff]  }
  0x33   :  { %2416 = vmatprep.subr.bf16.mxu0 %v5545_v0  ;;  %5036 = vmatprep.subr.bf16.mxu1 %v5545_v0 }
  0x36   :  { %2417 = vmatpush2.bf16.msra.mxu0 %v5069_v16  ;;  %5052 = vmatpush2.bf16.msra.mxu1 %v5069_v16  ;;  %v5144_v16 = vld [vmem:[%s7639_s0 + $0x8] ss:$36 sps:$4 sm:$0xff]  }
  0x37   :  { %2418 = vmatprep.subr.bf16.mxu0 %v5545_v0  ;;  %5037 = vmatprep.subr.bf16.mxu1 %v5545_v0 }
  0x3a   :  { %2419 = vmatpush2.bf16.msra.mxu0 %v5070_v17  ;;  %5053 = vmatpush2.bf16.msra.mxu1 %v5070_v17  ;;  %v5147_v17 = vld [vmem:[%s7639_s0 + $0x240] ss:$36 sps:$4 sm:$0xff]  }
  0x3b   :  { %2420 = vmatprep.subr.bf16.mxu0 %v5545_v0  ;;  %5038 = vmatprep.subr.bf16.mxu1 %v5545_v0 }
  0x3e   :  { %2421 = vmatpush2.bf16.msra.mxu0 %v5071_v18  ;;  %5054 = vmatpush2.bf16.msra.mxu1 %v5071_v18  ;;  %v5219_v18 = vld [vmem:[%s7638_s1 + $0x158] sm:$0xff]  }
  0x3f   :  { %2679 = vmatprep.subr.bf16.mxu1 %v5545_v0  ;;  %2968 = vmatprep.subr.bf16.mxu0 %v5545_v0 }
  0x41   :  { %2423 = vmatmul.mubr.bf16.vlgmr.msra.gmra.mxu0 %v5072_v19  ;;  %2615 = vmatmul.mubr.bf16.vlgmr.msra.gmra.mxu1 %v5075_v20  ;;  %v5148_v19 = vld [vmem:[%s7638_s1 + $0x1b8] sm:$0xff]   ;;  %v5149_v20 = vld [vmem:[%s7639_s0 + $0x28c] ss:$36 sps:$4 sm:$0xff]  }
  0x42   :  { %2680 = vmatpush1.bf16.msra.mxu1 %v5078_v21  ;;  %2969 = vmatpush1.bf16.msra.mxu0 %v5079_v22  ;;  %v5151_v21 = vld [vmem:[%s7639_s0 + $0x54] ss:$36 sps:$4 sm:$0xff]  }
  0x43   :  { %2681 = vmatprep.subr.bf16.mxu1 %v5545_v0  ;;  %2430 = vmatprep.mubr.bf16.mxu0 %v5081_v23  ;;  %v5227_v22 = vld [vmem:[%s7638_s1 + $0x150] sm:$0xff]  }
  0x44   :  { %2622 = vmatprep.mubr.bf16.mxu1 %v5083_v24  ;;  %2970 = vmatprep.subr.bf16.mxu0 %v5545_v0  ;;  %v5162_v23 = vld [vmem:[%s7638_s1 + $0x1b0] sm:$0xff]   ;;  %v5153_v24 = vld [vmem:[%s7639_s0 + $0x288] ss:$36 sps:$4 sm:$0xff]  }
  0x46   :  { %2682 = vmatpush1.bf16.msra.mxu1 %v5080_v25  ;;  %2971 = vmatpush1.bf16.msra.mxu0 %v5089_v26  ;;  %v5154_v25 = vld [vmem:[%s7639_s0 + $0x50] ss:$36 sps:$4 sm:$0xff]  }
  0x47   :  { %2683 = vmatprep.subr.bf16.mxu1 %v5545_v0  ;;  %2972 = vmatprep.subr.bf16.mxu0 %v5545_v0  ;;  %v5156_v26 = vld [vmem:[%s7639_s0 + $0x2d4] ss:$36 sps:$4 sm:$0xff]  }
  0x49   :  { %2431 = vmatmul.mubr.bf16.gmra.mxu0 %v5085_v27  ;;  %2623 = vmatmul.mubr.bf16.gmra.mxu1 %v5086_v28  ;;  %v5158_v27 = vld [vmem:[%s7639_s0 + $0x9c] ss:$36 sps:$4 sm:$0xff]   ;;  %v5177_v28 = vld [vmem:[%s7638_s1 + $0x1a8] sm:$0xff]  }
  0x4a   :  { %2684 = vmatpush1.bf16.msra.mxu1 %v5087_v29  ;;  %2438 = vmatprep.mubr.bf16.mxu0 %v5090_v30  ;;  %v5241_v29 = vld [vmem:[%s7638_s1 + $0x148] sm:$0xff]   ;;  %v5191_v30 = vld [vmem:[%s7638_s1 + $0x1a0] sm:$0xff]  }
  0x4b   :  { %2685 = vmatprep.subr.bf16.mxu1 %v5545_v0  ;;  %2630 = vmatprep.mubr.bf16.mxu1 %v5092_v31  ;;  %v5249_v31 = vld [vmem:[%s7638_s1 + $0x140] sm:$0xff]  }
  0x4c   :  { %2973 = vmatpush1.bf16.msra.mxu0 %v5105_v32  ;;  %v5917_v32 = vld [vmem:[%s7638_s1 + $0x238] sm:$0xff]  }
  0x4d   :  { %2974 = vmatprep.subr.bf16.mxu0 %v5545_v0 }
  0x4e   :  { %2686 = vmatpush1.bf16.msra.mxu1 %v5088_v33  ;;  %v5160_v33 = vld [vmem:[%s7639_s0 + $0x2d0] ss:$36 sps:$4 sm:$0xff]  }
  0x4f   :  { %2687 = vmatprep.subr.bf16.mxu1 %v5545_v0 }
  0x50   :  { %2975 = vmatpush1.bf16.msra.mxu0 %v5115_v36  ;;  %v5166_v36 = vld [vmem:[%s7639_s0 + $0xe4] ss:$36 sps:$4 sm:$0xff]  }
  0x51   :  { %2439 = vmatmul.mubr.bf16.gmra.mxu0 %v5094_v34  ;;  %2631 = vmatmul.mubr.bf16.gmra.mxu1 %v5095_v35  ;;  %v5161_v34 = vld [vmem:[%s7639_s0 + $0x98] ss:$36 sps:$4 sm:$0xff]  }
  0x52   :  { %2688 = vmatpush1.bf16.msra.mxu1 %v5096_v37  ;;  %2446 = vmatprep.mubr.bf16.mxu0 %v5098_v38  ;;  %v5164_v35 = vld [vmem:[%s7639_s0 + $0x31c] ss:$36 sps:$4 sm:$0xff]   ;;  %v5220_v38 = vld [vmem:[%s7638_s1 + $0x190] sm:$0xff]  }
  0x53   :  { %2689 = vmatprep.subr.bf16.mxu1 %v5545_v0  ;;  %2638 = vmatprep.mubr.bf16.mxu1 %v5100_v39  ;;  %v5205_v37 = vld [vmem:[%s7638_s1 + $0x198] sm:$0xff]  }
  0x54   :  { %2976 = vmatprep.subr.bf16.mxu0 %v5545_v0  ;;  %v5168_v39 = vld [vmem:[%s7639_s0 + $0x318] ss:$36 sps:$4 sm:$0xff]  }
  0x55   :  { %2977 = vmatpush1.bf16.msra.mxu0 %v5131_v40  ;;  %v5169_v40 = vld [vmem:[%s7639_s0 + $0xe0] ss:$36 sps:$4 sm:$0xff]  }
  0x56   :  { %2690 = vmatpush1.bf16.msra.mxu1 %v5097_v41  ;;  %2978 = vmatprep.subr.bf16.mxu0 %v5545_v0  ;;  %v5170_v41 = vld [vmem:[%s7639_s0 + $0x364] ss:$36 sps:$4 sm:$0xff]  }
  0x57   :  { %2691 = vmatprep.subr.bf16.mxu1 %v5545_v0 }
  0x59   :  { %2447 = vmatmul.mubr.bf16.gmra.mxu0 %v5102_v42  ;;  %2639 = vmatmul.mubr.bf16.gmra.mxu1 %v5103_v43  ;;  %v5172_v42 = vld [vmem:[%s7639_s0 + $0x12c] ss:$36 sps:$4 sm:$0xff]  }
  0x5a   :  { %2692 = vmatpush1.bf16.msra.mxu1 %v5104_v44  ;;  %2454 = vmatprep.mubr.bf16.mxu0 %v5107_v45  ;;  %v5234_v43 = vld [vmem:[%s7638_s1 + $0x188] sm:$0xff]   ;;  %v5248_v44 = vld [vmem:[%s7638_s1 + $0x180] sm:$0xff]  }
  0x5b   :  { %2693 = vmatprep.subr.bf16.mxu1 %v5545_v0  ;;  %2646 = vmatprep.mubr.bf16.mxu1 %v5109_v46  ;;  %v5174_v45 = vld [vmem:[%s7639_s0 + $0x360] ss:$36 sps:$4 sm:$0xff]   ;;  %v5175_v46 = vld [vmem:[%s7639_s0 + $0x128] ss:$36 sps:$4 sm:$0xff]  }
  0x5c   :  { %2979 = vmatpush1.bf16.msra.mxu0 %v5141_v47  ;;  %v5178_v47 = vld [vmem:[%s7639_s0 + $0x3ac] ss:$36 sps:$4 sm:$0xff]  }
  0x5d   :  { %2980 = vmatprep.subr.bf16.mxu0 %v5545_v0 }
  0x5e   :  { %2694 = vmatpush1.bf16.msra.mxu1 %v5106_v48  ;;  %v5180_v48 = vld [vmem:[%s7639_s0 + $0x174] ss:$36 sps:$4 sm:$0xff]  }
  0x5f   :  { %2695 = vmatprep.subr.bf16.mxu1 %v5545_v0 }
  0x60   :  { %2981 = vmatpush1.bf16.msra.mxu0 %v5155_v51  ;;  %v5182_v51 = vld [vmem:[%s7639_s0 + $0x3a8] ss:$36 sps:$4 sm:$0xff]  }
  0x61   :  { %2455 = vmatmul.mubr.bf16.gmra.mxu0 %v5111_v49  ;;  %2647 = vmatmul.mubr.bf16.gmra.mxu1 %v5112_v50  ;;  %v5263_v49 = vld [vmem:[%s7638_s1 + $0x1f8] sm:$0xff]   ;;  %v5276_v50 = vld [vmem:[%s7638_s1 + $0x1f0] sm:$0xff]  }
  0x62   :  { %2696 = vmatpush2.bf16.msra.mxu1 %v5113_v52  ;;  %2462 = vmatprep.mubr.bf16.mxu0 %v5116_v53  ;;  %v5183_v52 = vld [vmem:[%s7639_s0 + $0x170] ss:$36 sps:$4 sm:$0xff]  }
  0x63   :  { %2697 = vmatprep.subr.bf16.mxu1 %v5545_v0  ;;  %2654 = vmatprep.mubr.bf16.mxu1 %v5118_v54  ;;  %v5185_v53 = vld [vmem:[%s7639_s0 + $0x3f4] ss:$36 sps:$4 sm:$0xff]   ;;  %v5187_v54 = vld [vmem:[%s7639_s0 + $0x1bc] ss:$36 sps:$4 sm:$0xff]  }
  0x64   :  { %2982 = vmatprep.subr.bf16.mxu0 %v5545_v0 }
  0x65   :  { %2983 = vmatpush1.bf16.msra.mxu0 %v5163_v55  ;;  %v5290_v55 = vld [vmem:[%s7638_s1 + $0x1e8] sm:$0xff]  }
  0x66   :  { %2698 = vmatpush2.bf16.msra.mxu1 %v5114_v56  ;;  %2984 = vmatprep.subr.bf16.mxu0 %v5545_v0  ;;  %v5189_v56 = vld [vmem:[%s7639_s0 + $0x3f0] ss:$36 sps:$4 sm:$0xff]  }
  0x67   :  { %2699 = vmatprep.subr.bf16.mxu1 %v5545_v0 }
  0x69   :  { %2463 = vmatmul.mubr.bf16.gmra.mxu0 %v5120_v57  ;;  %2655 = vmatmul.mubr.bf16.gmra.mxu1 %v5121_v58  ;;  %v5190_v57 = vld [vmem:[%s7639_s0 + $0x1b8] ss:$36 sps:$4 sm:$0xff]  }
  0x6a   :  { %2700 = vmatpush2.bf16.msra.mxu1 %v5122_v59  ;;  %2470 = vmatprep.mubr.bf16.mxu0 %v5124_v60  ;;  %v5192_v58 = vld [vmem:[%s7639_s0 + $0x43c] ss:$36 sps:$4 sm:$0xff]   ;;  %v5194_v59 = vld [vmem:[%s7639_s0 + $0x204] ss:$36 sps:$4 sm:$0xff]  }
  0x6b   :  { %2701 = vmatprep.subr.bf16.mxu1 %v5545_v0  ;;  %2662 = vmatprep.mubr.bf16.mxu1 %v5126_v61  ;;  %v5303_v60 = vld [vmem:[%s7638_s1 + $0x1e0] sm:$0xff]   ;;  %v5196_v61 = vld [vmem:[%s7639_s0 + $0x438] ss:$36 sps:$4 sm:$0xff]  }
  0x6c   :  { %2985 = vmatpush2.bf16.msra.mxu0 %v5176_v62  ;;  %v5197_v62 = vld [vmem:[%s7639_s0 + $0x200] ss:$36 sps:$4 sm:$0xff]  }
  0x6d   :  { %2986 = vmatprep.subr.bf16.mxu0 %v5545_v0 }
  0x6e   :  { %2702 = vmatpush2.bf16.msra.mxu1 %v5123_v63  ;;  %v5199_v63 = vld [vmem:[%s7639_s0 + $0x484] ss:$36 sps:$4 sm:$0xff]  }
  0x6f   :  { %2703 = vmatprep.subr.bf16.mxu1 %v5545_v0 }
  0x70   :  { %2987 = vmatpush2.bf16.msra.mxu0 %v5184_v3  ;;  %v5204_v3 = vld [vmem:[%s7639_s0 + $0x248] ss:$36 sps:$4 sm:$0xff]  }
  0x71   :  { %2471 = vmatmul.mubr.bf16.gmra.mxu0 %v5128_v1  ;;  %2663 = vmatmul.mubr.bf16.gmra.mxu1 %v5129_v2  ;;  %v5201_v1 = vld [vmem:[%s7639_s0 + $0x24c] ss:$36 sps:$4 sm:$0xff]   ;;  %v5203_v2 = vld [vmem:[%s7639_s0 + $0x480] ss:$36 sps:$4 sm:$0xff]  }
  0x72   :  { %2704 = vmatpush2.bf16.msra.mxu1 %v5130_v4  ;;  %2478 = vmatprep.mubr.bf16.mxu0 %v5133_v5  ;;  %v5207_v4 = vld [vmem:[%s7639_s0 + $0x4cc] ss:$36 sps:$4 sm:$0xff]   ;;  %v5209_v5 = vld [vmem:[%s7639_s0 + $0x294] ss:$36 sps:$4 sm:$0xff]  }
  0x73   :  { %2705 = vmatprep.subr.bf16.mxu1 %v5545_v0  ;;  %2670 = vmatprep.mubr.bf16.mxu1 %v5135_v6  ;;  %v5317_v6 = vld [vmem:[%s7638_s1 + $0x1d8] sm:$0xff]  }
  0x74   :  { %2988 = vmatprep.subr.bf16.mxu0 %v5545_v0 }
  0x75   :  { %2989 = vmatpush2.bf16.msra.mxu0 %v5198_v7  ;;  %v5211_v7 = vld [vmem:[%s7639_s0 + $0x4c8] ss:$36 sps:$4 sm:$0xff]  }
  0x76   :  { %2706 = vmatpush2.bf16.msra.mxu1 %v5132_v8  ;;  %2990 = vmatprep.subr.bf16.mxu0 %v5545_v0  ;;  %v5212_v8 = vld [vmem:[%s7639_s0 + $0x290] ss:$36 sps:$4 sm:$0xff]  }
  0x77   :  { %2707 = vmatprep.subr.bf16.mxu1 %v5545_v0 }
  0x79   :  { %2479 = vmatmul.mubr.bf16.gmra.mxu0 %v5137_v9  ;;  %2671 = vmatmul.mubr.bf16.gmra.mxu1 %v5138_v10  ;;  %v5213_v9 = vld [vmem:[%s7639_s0 + $0x514] ss:$36 sps:$4 sm:$0xff]   ;;  %v5215_v10 = vld [vmem:[%s7639_s0 + $0x2dc] ss:$36 sps:$4 sm:$0xff]  }
  0x7a   :  { %2708 = vmatpush2.bf16.msra.mxu1 %v5139_v11  ;;  %2486 = vmatprep.mubr.bf16.mxu0 %v5142_v12  ;;  %v5217_v11 = vld [vmem:[%s7639_s0 + $0x510] ss:$36 sps:$4 sm:$0xff]   ;;  %v5218_v12 = vld [vmem:[%s7639_s0 + $0x2d8] ss:$36 sps:$4 sm:$0xff]  }
  0x7b   :  { %2709 = vmatprep.subr.bf16.mxu1 %v5545_v0  ;;  %2711 = vmatprep.mubr.bf16.mxu1 %v5146_v13  ;;  %v5221_v13 = vld [vmem:[%s7639_s0 + $0x55c] ss:$36 sps:$4 sm:$0xff]  }
  0x7c   :  { %2991 = vmatpush2.bf16.msra.mxu0 %v5206_v14  ;;  %v5223_v14 = vld [vmem:[%s7639_s0 + $0x324] ss:$36 sps:$4 sm:$0xff]  }
  0x7d   :  { %2992 = vmatprep.subr.bf16.mxu0 %v5545_v0 }
  0x7e   :  { %2710 = vmatpush2.bf16.msra.mxu1 %v5140_v15  ;;  %v5330_v15 = vld [vmem:[%s7638_s1 + $0x1d0] sm:$0xff]  }
  0x7f   :  { %3257 = vmatprep.subr.bf16.mxu1 %v5545_v0 }
  0x80   :  { %2993 = vmatpush2.bf16.msra.mxu0 %v5219_v18  ;;  %v5228_v18 = vld [vmem:[%s7639_s0 + $0x5a4] ss:$36 sps:$4 sm:$0xff]  }
  0x81   :  { %2487 = vmatmul.mubr.bf16.gmra.mxu0 %v5147_v17  ;;  %2712 = vmatmul.mubr.bf16.vlgmr.msra.gmra.mxu1 %v5144_v16  ;;  %v5225_v16 = vld [vmem:[%s7639_s0 + $0x558] ss:$36 sps:$4 sm:$0xff]   ;;  %v5226_v17 = vld [vmem:[%s7639_s0 + $0x320] ss:$36 sps:$4 sm:$0xff]  }
  0x82   :  { %3258 = vmatpush1.bf16.msra.mxu1 %v5148_v19  ;;  %2494 = vmatprep.mubr.bf16.mxu0 %v5149_v20  ;;  %v5230_v19 = vld [vmem:[%s7639_s0 + $0x36c] ss:$36 sps:$4 sm:$0xff]   ;;  %v5232_v20 = vld [vmem:[%s7639_s0 + $0x5a0] ss:$36 sps:$4 sm:$0xff]  }
  0x83   :  { %2719 = vmatprep.mubr.bf16.mxu1 %v5151_v21  ;;  %3259 = vmatprep.subr.bf16.mxu1 %v5545_v0  ;;  %v5233_v21 = vld [vmem:[%s7639_s0 + $0x368] ss:$36 sps:$4 sm:$0xff]  }
  0x84   :  { %2994 = vmatprep.subr.bf16.mxu0 %v5545_v0 }
  0x85   :  { %2995 = vmatpush2.bf16.msra.mxu0 %v5227_v22  ;;  %v5235_v22 = vld [vmem:[%s7639_s0 + $0x5ec] ss:$36 sps:$4 sm:$0xff]  }
  0x86   :  { %3260 = vmatpush1.bf16.msra.mxu1 %v5162_v23  ;;  %2996 = vmatprep.subr.bf16.mxu0 %v5545_v0  ;;  %v5237_v23 = vld [vmem:[%s7639_s0 + $0x3b4] ss:$36 sps:$4 sm:$0xff]  }
  0x87   :  { %3261 = vmatprep.subr.bf16.mxu1 %v5545_v0 }
  0x89   :  { %2495 = vmatmul.mubr.bf16.gmra.mxu0 %v5153_v24  ;;  %2720 = vmatmul.mubr.bf16.gmra.mxu1 %v5154_v25  ;;  %v5344_v24 = vld [vmem:[%s7638_s1 + $0x1c8] sm:$0xff]  }
  0x8a   :  { %2502 = vmatprep.mubr.bf16.mxu0 %v5156_v26  ;;  %2727 = vmatprep.mubr.bf16.mxu1 %v5158_v27  ;;  %v5239_v25 = vld [vmem:[%s7639_s0 + $0x5e8] ss:$36 sps:$4 sm:$0xff]   ;;  %v5240_v26 = vld [vmem:[%s7639_s0 + $0x3b0] ss:$36 sps:$4 sm:$0xff]  }
  0x8b   :  { %3262 = vmatpush1.bf16.msra.mxu1 %v5177_v28  ;;  %2997 = vmatpush2.bf16.msra.mxu0 %v5241_v29  ;;  %v5242_v27 = vld [vmem:[%s7639_s0 + $0x634] ss:$36 sps:$4 sm:$0xff]   ;;  %v5244_v28 = vld [vmem:[%s7639_s0 + $0x3fc] ss:$36 sps:$4 sm:$0xff]  }
  0x8c   :  { %3263 = vmatprep.subr.bf16.mxu1 %v5545_v0  ;;  %2998 = vmatprep.subr.bf16.mxu0 %v5545_v0  ;;  %v5246_v29 = vld [vmem:[%s7639_s0 + $0x630] ss:$36 sps:$4 sm:$0xff]  }
  0x8f   :  { %3264 = vmatpush1.bf16.msra.mxu1 %v5191_v30  ;;  %2999 = vmatpush2.bf16.msra.mxu0 %v5249_v31  ;;  %v5250_v30 = vld [vmem:[%s7639_s0 + $0x67c] ss:$36 sps:$4 sm:$0xff]   ;;  %v5252_v31 = vld [vmem:[%s7639_s0 + $0x444] ss:$36 sps:$4 sm:$0xff]  }
  0x90   :  { %3265 = vmatprep.subr.bf16.mxu1 %v5545_v0  ;;  %4943 = vmatprep.subr.bf16.mxu0 %v5917_v32 }
  0x91   :  { %2503 = vmatmul.mubr.bf16.gmra.mxu0 %v5160_v33  ;;  %2728 = vmatmul.mubr.bf16.gmra.mxu1 %v5161_v34  ;;  %v5357_v33 = vld [vmem:[%s7638_s1 + $0x1c0] sm:$0xff]   ;;  %v5254_v34 = vld [vmem:[%s7639_s0 + $0x678] ss:$36 sps:$4 sm:$0xff]  }
  0x92   :  { %2510 = vmatprep.mubr.bf16.mxu0 %v5164_v35  ;;  %2735 = vmatprep.mubr.bf16.mxu1 %v5166_v36  ;;  %v5255_v35 = vld [vmem:[%s7639_s0 + $0x440] ss:$36 sps:$4 sm:$0xff]   ;;  %v5256_v36 = vld [vmem:[%s7639_s0 + $0x48c] ss:$36 sps:$4 sm:$0xff]  }
  0x93   :  { %3266 = vmatpush1.bf16.msra.mxu1 %v5205_v37  ;;  %v5260_v37 = vld [vmem:[%s7639_s0 + $0x14] ss:$36 sps:$4 sm:$0xff]  }
  0x94   :  { %3267 = vmatprep.subr.bf16.mxu1 %v5545_v0 }
  0x97   :  { %3268 = vmatpush1.bf16.msra.mxu1 %v5220_v38  ;;  %v5258_v38 = vld [vmem:[%s7639_s0 + $0x10] ss:$36 sps:$4 sm:$0xff]  }
  0x98   :  { %3269 = vmatprep.subr.bf16.mxu1 %v5545_v0 }
  0x99   :  { %2511 = vmatmul.mubr.bf16.gmra.mxu0 %v5168_v39  ;;  %2736 = vmatmul.mubr.bf16.gmra.mxu1 %v5169_v40  ;;  %v5261_v39 = vld [vmem:[%s7639_s0 + $0x488] ss:$36 sps:$4 sm:$0xff]   ;;  %v5264_v40 = vld [vmem:[%s7639_s0 + $0x4d4] ss:$36 sps:$4 sm:$0xff]  }
  0x9a   :  { %2518 = vmatprep.mubr.bf16.mxu0 %v5170_v41  ;;  %2743 = vmatprep.mubr.bf16.mxu1 %v5172_v42  ;;  %v5266_v41 = vld [vmem:[%s7639_s0 + $0x5c] ss:$36 sps:$4 sm:$0xff]   ;;  %v5289_v42 = vld [vmem:[%s7638_s1 + $0x230] sm:$0xff]  }
  0x9b   :  { %3270 = vmatpush1.bf16.msra.mxu1 %v5234_v43 }
  0x9c   :  { %3271 = vmatprep.subr.bf16.mxu1 %v5545_v0 }
  0x9f   :  { %3272 = vmatpush1.bf16.msra.mxu1 %v5248_v44 }
  0xa0   :  { %3273 = vmatprep.subr.bf16.mxu1 %v5545_v0 }
  0xa1   :  { %2519 = vmatmul.mubr.bf16.gmra.mxu0 %v5174_v45  ;;  %2744 = vmatmul.mubr.bf16.gmra.mxu1 %v5175_v46 }
  0xa2   :  { %2526 = vmatprep.mubr.bf16.mxu0 %v5178_v47  ;;  %2751 = vmatprep.mubr.bf16.mxu1 %v5180_v48  ;;  %v5316_v47 = vld [vmem:[%s7638_s1 + $0x228] sm:$0xff]  }
  0xa3   :  { %3274 = vmatpush2.bf16.msra.mxu1 %v5263_v49 }
  0xa4   :  { %3275 = vmatprep.subr.bf16.mxu1 %v5545_v0 }
  0xa7   :  { %3276 = vmatpush2.bf16.msra.mxu1 %v5276_v50  ;;  %v5268_v50 = vld [vmem:[%s7639_s0 + $0x4d0] ss:$36 sps:$4 sm:$0xff]  }
  0xa8   :  { %3277 = vmatprep.subr.bf16.mxu1 %v5545_v0 }
  0xa9   :  { %2527 = vmatmul.mubr.bf16.gmra.mxu0 %v5182_v51  ;;  %2752 = vmatmul.mubr.bf16.gmra.mxu1 %v5183_v52  ;;  %v5270_v51 = vld [vmem:[%s7639_s0 + $0x51c] ss:$36 sps:$4 sm:$0xff]   ;;  %v5272_v52 = vld [vmem:[%s7639_s0 + $0xa4] ss:$36 sps:$4 sm:$0xff]  }
  0xaa   :  { %2534 = vmatprep.mubr.bf16.mxu0 %v5185_v53  ;;  %2759 = vmatprep.mubr.bf16.mxu1 %v5187_v54 }
  0xab   :  { %3278 = vmatpush2.bf16.msra.mxu1 %v5290_v55  ;;  %v5343_v55 = vld [vmem:[%s7638_s1 + $0x220] sm:$0xff]  }
  0xac   :  { %3279 = vmatprep.subr.bf16.mxu1 %v5545_v0 }
  0xaf   :  { %3280 = vmatpush2.bf16.msra.mxu1 %v5303_v60  ;;  %v5370_v60 = vld [vmem:[%s7638_s1 + $0x218] sm:$0xff]  }
  0xb0   :  { %3281 = vmatprep.subr.bf16.mxu1 %v5545_v0 }
  0xb1   :  { %2535 = vmatmul.mubr.bf16.gmra.mxu0 %v5189_v56  ;;  %2760 = vmatmul.mubr.bf16.gmra.mxu1 %v5190_v57 }
  0xb2   :  { %2542 = vmatprep.mubr.bf16.mxu0 %v5192_v58  ;;  %2767 = vmatprep.mubr.bf16.mxu1 %v5194_v59 }
  0xb3   :  { %3282 = vmatpush2.bf16.msra.mxu1 %v5317_v6 }
  0xb4   :  { %3283 = vmatprep.subr.bf16.mxu1 %v5545_v0 }
  0xb7   :  { %3284 = vmatpush2.bf16.msra.mxu1 %v5330_v15  ;;  %v5288_v15 = vld [vmem:[%s7639_s0 + $0x134] ss:$36 sps:$4 sm:$0xff]  }
  0xb8   :  { %3285 = vmatprep.subr.bf16.mxu1 %v5545_v0 }
  0xb9   :  { %2543 = vmatmul.mubr.bf16.gmra.mxu0 %v5196_v61  ;;  %2768 = vmatmul.mubr.bf16.gmra.mxu1 %v5197_v62 }
  0xba   :  { %2550 = vmatprep.mubr.bf16.mxu0 %v5199_v63  ;;  %2775 = vmatprep.mubr.bf16.mxu1 %v5201_v1  ;;  %v5274_v63 = vld [vmem:[%s7639_s0 + $0x518] ss:$36 sps:$4 sm:$0xff]   ;;  %v5275_v1 = vld [vmem:[%s7639_s0 + $0xa0] ss:$36 sps:$4 sm:$0xff]  }
  0xbb   :  { %3286 = vmatpush2.bf16.msra.mxu1 %v5344_v24  ;;  %v5283_v24 = vld [vmem:[%s7639_s0 + $0x5a8] ss:$36 sps:$4 sm:$0xff]  }
  0xbc   :  { %3287 = vmatprep.subr.bf16.mxu1 %v5545_v0  ;;  %v5247_v0 = vld [vmem:[%s7639_s0 + $0x3f8] ss:$36 sps:$4 sm:$0xff]  }
  0xbf   :  { %3288 = vmatpush2.bf16.msra.mxu1 %v5357_v33 }
  0xc1   :  { %2551 = vmatmul.mubr.bf16.gmra.mxu0 %v5203_v2  ;;  %2776 = vmatmul.mubr.bf16.gmra.mxu1 %v5204_v3  ;;  %v5277_v2 = vld [vmem:[%s7639_s0 + $0x564] ss:$36 sps:$4 sm:$0xff]   ;;  %v5279_v3 = vld [vmem:[%s7639_s0 + $0xec] ss:$36 sps:$4 sm:$0xff]  }
  0xc2   :  { %2558 = vmatprep.mubr.bf16.mxu0 %v5207_v4  ;;  %2783 = vmatprep.mubr.bf16.mxu1 %v5209_v5 }
  0xc9   :  { %2559 = vmatmul.mubr.bf16.gmra.mxu0 %v5211_v7  ;;  %2784 = vmatmul.mubr.bf16.gmra.mxu1 %v5212_v8 }
  0xca   :  { %2566 = vmatprep.mubr.bf16.mxu0 %v5213_v9  ;;  %2791 = vmatprep.mubr.bf16.mxu1 %v5215_v10 }
  0xd1   :  { %2567 = vmatmul.mubr.bf16.gmra.mxu0 %v5217_v11  ;;  %2792 = vmatmul.mubr.bf16.gmra.mxu1 %v5218_v12  ;;  %v5281_v12 = vld [vmem:[%s7639_s0 + $0x560] ss:$36 sps:$4 sm:$0xff]  }
  0xd2   :  { %2574 = vmatprep.mubr.bf16.mxu0 %v5221_v13  ;;  %2799 = vmatprep.mubr.bf16.mxu1 %v5223_v14  ;;  %v5282_v13 = vld [vmem:[%s7639_s0 + $0xe8] ss:$36 sps:$4 sm:$0xff]  }
  0xd3   :  { %v5285_v14 = vld [vmem:[%s7639_s0 + $0x5ac] ss:$36 sps:$4 sm:$0xff]  }
  0xd9   :  { %2575 = vmatmul.mubr.bf16.gmra.mxu0 %v5225_v16  ;;  %2800 = vmatmul.mubr.bf16.gmra.mxu1 %v5226_v17 }
  0xda   :  { %2582 = vmatprep.mubr.bf16.mxu0 %v5228_v18  ;;  %2807 = vmatprep.mubr.bf16.mxu1 %v5230_v19 }
  0xe1   :  { %2583 = vmatmul.mubr.bf16.gmra.mxu0 %v5232_v20  ;;  %2808 = vmatmul.mubr.bf16.gmra.mxu1 %v5233_v21 }
  0xe2   :  { %2590 = vmatprep.mubr.bf16.mxu0 %v5235_v22  ;;  %2815 = vmatprep.mubr.bf16.mxu1 %v5237_v23 }
  0xe9   :  { %2591 = vmatmul.mubr.bf16.gmra.mxu0 %v5239_v25  ;;  %2816 = vmatmul.mubr.bf16.gmra.mxu1 %v5240_v26  ;;  %v5286_v25 = vld [vmem:[%s7639_s0 + $0x130] ss:$36 sps:$4 sm:$0xff]  }
  0xea   :  { %2598 = vmatprep.mubr.bf16.mxu0 %v5242_v27  ;;  %2823 = vmatprep.mubr.bf16.mxu1 %v5244_v28  ;;  %v5293_v26 = vld [vmem:[%s7639_s0 + $0x5f4] ss:$36 sps:$4 sm:$0xff]   ;;  %v5296_v27 = vld [vmem:[%s7639_s0 + $0x17c] ss:$36 sps:$4 sm:$0xff]  }
  0xf1   :  { %2599 = vmatmul.mubr.bf16.gmra.mxu0 %v5246_v29  ;;  %2824 = vmatmul.mubr.bf16.gmra.mxu1 %v5247_v0 }
  0xf2   :  { %2606 = vmatprep.mubr.bf16.mxu0 %v5250_v30  ;;  %2831 = vmatprep.mubr.bf16.mxu1 %v5252_v31  ;;  %v5395_v31 = vld [vmem:[%s7638_s1 + $0x210] sm:$0xff]  }
  0xf9   :  { %2607 = vmatmul.mubr.bf16.gmra.mxu0 %v5254_v34  ;;  %2832 = vmatmul.mubr.bf16.gmra.mxu1 %v5255_v35 }
  0xfa   :  { %2839 = vmatprep.mubr.bf16.mxu1 %v5256_v36  ;;  %3000 = vmatprep.mubr.bf16.mxu0 %v5260_v37  ;;  %v5291_v37 = vld [vmem:[%s7639_s0 + $0x5f0] ss:$36 sps:$4 sm:$0xff]  }
 0x101   :  { %v6153_v43 = vpop.f32.mrf.mxu0  ;;  %v6155_v44 = vpop.f32.mrf.mxu1  ;;  %2840 = vmatmul.mubr.bf16.gmra.mxu1 %v5261_v39  ;;  %3001 = vmatmul.mubr.bf16.vlgmr.msra.gmra.mxu0 %v5258_v38  ;;  %v5294_v38 = vld [vmem:[%s7639_s0 + $0x178] ss:$36 sps:$4 sm:$0xff]  }
 0x102   :  { %4944 = vmatpush3.bf16.msra.mxu0 %v5917_v32  ;;  %2847 = vmatprep.mubr.bf16.mxu1 %v5264_v40  ;;  %v5269_v32 = vld [vmem:[%s7639_s0 + $0x58] ss:$36 sps:$4 sm:$0xff]   ;;  %v5302_v40 = vld [vmem:[%s7639_s0 + $0x1c4] ss:$36 sps:$4 sm:$0xff]  }
 0x103   :  { %v2426_v45 = vpop.f32.mrf.mxu0  ;;  %v2618_v46 = vpop.f32.mrf.mxu1  ;;  %3008 = vmatprep.mubr.bf16.mxu0 %v5266_v41  ;;  %4945 = vmatprep.subr.bf16.mxu0 %v5289_v42  ;;  %v5299_v39 = vld [vmem:[%s7639_s0 + $0x63c] ss:$36 sps:$4 sm:$0xff]  }
 0x105   :  { %v6161_v48 = vpop.f32.mrf.mxu0  ;;  %v6163_v49 = vpop.f32.mrf.mxu1 }
 0x106   :  { %4946 = vmatpush3.bf16.msra.mxu0 %v5289_v42 }
 0x107   :  { %v2429_v53 = vpop.f32.mrf.mxu0  ;;  %v2621_v54 = vpop.f32.mrf.mxu1  ;;  %4947 = vmatprep.subr.bf16.mxu0 %v5316_v47 }
 0x108   :  { %v5300_v53 = vld [vmem:[%s7639_s0 + $0x1c0] ss:$36 sps:$4 sm:$0xff]  }
 0x109   :  { %v6180_v56 = vpop.f32.mrf.mxu0  ;;  %v6182_v57 = vpop.f32.mrf.mxu1  ;;  %2848 = vmatmul.mubr.bf16.gmra.mxu1 %v5268_v50  ;;  %3009 = vmatmul.mubr.bf16.gmra.mxu0 %v5269_v32  ;;  %v5306_v54 = vld [vmem:[%s7639_s0 + $0x684] ss:$36 sps:$4 sm:$0xff]  }
 0x10a   :  { %2855 = vmatprep.mubr.bf16.mxu1 %v5270_v51  ;;  %3016 = vmatprep.mubr.bf16.mxu0 %v5272_v52  ;;  %v5297_v52 = vld [vmem:[%s7639_s0 + $0x638] ss:$36 sps:$4 sm:$0xff]  }
 0x10b   :  { %v2434_v58 = vpop.f32.mrf.mxu0  ;;  %v2626_v59 = vpop.f32.mrf.mxu1  ;;  %4948 = vmatpush3.bf16.msra.mxu0 %v5316_v47 }
 0x10c   :  { %4949 = vmatprep.subr.bf16.mxu0 %v5343_v55 }
 0x10d   :  { %v6187_v61 = vpop.f32.mrf.mxu0  ;;  %v6189_v62 = vpop.f32.mrf.mxu1 }
 0x10f   :  { %v2437_v4 = vpop.f32.mrf.mxu0  ;;  %v2629_v5 = vpop.f32.mrf.mxu1  ;;  %4950 = vmatpush3.bf16.msra.mxu0 %v5343_v55  ;;  %v5309_v55 = vld [vmem:[%s7639_s0 + $0x20c] ss:$36 sps:$4 sm:$0xff]  }
 0x110   :  { %4951 = vmatprep.subr.bf16.mxu0 %v5370_v60  ;;  %v5304_v5 = vld [vmem:[%s7639_s0 + $0x680] ss:$36 sps:$4 sm:$0xff]  }
 0x111   :  { %v6203_v6 = vpop.f32.mrf.mxu0  ;;  %v6205_v7 = vpop.f32.mrf.mxu1  ;;  %2856 = vmatmul.mubr.bf16.gmra.mxu1 %v5274_v63  ;;  %3017 = vmatmul.mubr.bf16.gmra.mxu0 %v5275_v1 }
 0x112   :  { %2863 = vmatprep.mubr.bf16.mxu1 %v5277_v2  ;;  %3024 = vmatprep.mubr.bf16.mxu0 %v5279_v3 }
 0x113   :  { %v2442_v8 = vpop.f32.mrf.mxu0  ;;  %v2634_v9 = vpop.f32.mrf.mxu1  ;;  %4952 = vmatpush3.bf16.msra.mxu0 %v5370_v60 }
 0x114   :  { %4953 = vmatprep.subr.bf16.mxu0 %v5395_v31  ;;  %v5307_v8 = vld [vmem:[%s7639_s0 + $0x208] ss:$36 sps:$4 sm:$0xff]  }
 0x115   :  { %v6207_v10 = vpop.f32.mrf.mxu0  ;;  %v6209_v11 = vpop.f32.mrf.mxu1  ;;  %v5312_v9 = vld [vmem:[%s7639_s0 + $0x6cc] ss:$36 sps:$4 sm:$0xff]  }
 0x117   :  { %v2445_v16 = vpop.f32.mrf.mxu0  ;;  %v2637_v17 = vpop.f32.mrf.mxu1  ;;  %4954 = vmatpush3.bf16.msra.mxu0 %v5395_v31 }
 0x119   :  { %v6223_v18 = vpop.f32.mrf.mxu0  ;;  %v6225_v19 = vpop.f32.mrf.mxu1  ;;  %2864 = vmatmul.mubr.bf16.gmra.mxu1 %v5281_v12  ;;  %3025 = vmatmul.mubr.bf16.gmra.mxu0 %v5282_v13  ;;  %v5315_v12 = vld [vmem:[%s7639_s0 + $0x254] ss:$36 sps:$4 sm:$0xff]  }
 0x11a   :  { %2871 = vmatprep.mubr.bf16.mxu1 %v5285_v14  ;;  %3032 = vmatprep.mubr.bf16.mxu0 %v5288_v15 }
 0x11b   :  { %v2450_v20 = vpop.f32.mrf.mxu0  ;;  %v2642_v21 = vpop.f32.mrf.mxu1 }
 0x11c   :  { %v6313_v21 = vld [vmem:[%s7640_s2] ss:$0 sm:$0xff] }
 0x11d   :  { %v6227_v22 = vpop.f32.mrf.mxu0  ;;  %v6229_v23 = vpop.f32.mrf.mxu1 }
 0x11f   :  { %v2453_v28 = vpop.f32.mrf.mxu0  ;;  %v2645_v29 = vpop.f32.mrf.mxu1 }
 0x120   :  { %v5320_v28 = vld [vmem:[%s7639_s0 + $0x714] ss:$36 sps:$4 sm:$0xff]   ;;  %v5323_v29 = vld [vmem:[%s7639_s0 + $0x29c] ss:$36 sps:$4 sm:$0xff]  }
 0x121   :  { %v6243_v0 = vpop.f32.mrf.mxu0  ;;  %v6245_v30 = vpop.f32.mrf.mxu1  ;;  %2872 = vmatmul.mubr.bf16.gmra.mxu1 %v5283_v24  ;;  %3033 = vmatmul.mubr.bf16.gmra.mxu0 %v5286_v25 }
 0x122   :  { %2879 = vmatprep.mubr.bf16.mxu1 %v5293_v26  ;;  %3040 = vmatprep.mubr.bf16.mxu0 %v5296_v27  ;;  %v5310_v26 = vld [vmem:[%s7639_s0 + $0x6c8] ss:$36 sps:$4 sm:$0xff]   ;;  %v5313_v27 = vld [vmem:[%s7639_s0 + $0x250] ss:$36 sps:$4 sm:$0xff]  }
 0x123   :  { %v2458_v33 = vpop.f32.mrf.mxu0  ;;  %v2650_v34 = vpop.f32.mrf.mxu1 }
 0x124   :  { %v2425_v34 = vadd.f32 %v6313_v21, %v6153_v43 }
 0x125   :  { %v6250_v35 = vpop.f32.mrf.mxu0  ;;  %v6252_v36 = vpop.f32.mrf.mxu1 }
 0x126   :  { %7642 = vst [vmem:[#allocation2_spill] sm:$0xff] %v6252_v36 }
 0x127   :  { %v2461_v41 = vpop.f32.mrf.mxu0  ;;  %v2653_v42 = vpop.f32.mrf.mxu1 }
 0x129   :  { %v6266_v45 = vpop.f32.mrf.mxu0  ;;  %v6268_v46 = vpop.f32.mrf.mxu1  ;;  %2880 = vmatmul.mubr.bf16.gmra.mxu1 %v5291_v37  ;;  %3041 = vmatmul.mubr.bf16.gmra.mxu0 %v5294_v38 }
 0x12a   :  { %7643 = vst [vmem:[#allocation3_spill] sm:$0xff] %v6268_v46  ;;  %2887 = vmatprep.mubr.bf16.mxu1 %v5299_v39  ;;  %3048 = vmatprep.mubr.bf16.mxu0 %v5302_v40  ;;  %v5420_v40 = vld [vmem:[%s7638_s1 + $0x208] sm:$0xff]  }
 0x12b   :  { %v2466_v47 = vpop.f32.mrf.mxu0  ;;  %v2658_v50 = vpop.f32.mrf.mxu1  ;;  %4955 = vmatprep.subr.bf16.mxu0 %v5420_v40 }
 0x12c   :  { %v2428_v47 = vadd.f32 %v6313_v21, %v6161_v48  ;;  %4956 = vmatpush3.bf16.msra.mxu0 %v5420_v40  ;;  %v5329_v48 = vld [vmem:[%s7639_s0 + $0x2e4] ss:$36 sps:$4 sm:$0xff]  }
 0x12d   :  { %v6270_v32 = vpop.f32.mrf.mxu0  ;;  %v6272_v51 = vpop.f32.mrf.mxu1 }
 0x12e   :  { %7644 = vst [vmem:[#allocation4_spill] sm:$0xff] %v6272_v51 }
 0x12f   :  { %v2469_v58 = vpop.f32.mrf.mxu0  ;;  %v2661_v59 = vpop.f32.mrf.mxu1 }
 0x131   :  { %v6286_v60 = vpop.f32.mrf.mxu0  ;;  %v6288_v63 = vpop.f32.mrf.mxu1  ;;  %2888 = vmatmul.mubr.bf16.gmra.mxu1 %v5297_v52  ;;  %3049 = vmatmul.mubr.bf16.gmra.mxu0 %v5300_v53  ;;  %v5318_v52 = vld [vmem:[%s7639_s0 + $0x710] ss:$36 sps:$4 sm:$0xff]   ;;  %v5321_v53 = vld [vmem:[%s7639_s0 + $0x298] ss:$36 sps:$4 sm:$0xff]  }
 0x132   :  { %7645 = vst [vmem:[#allocation5_spill] sm:$0xff] %v6288_v63  ;;  %2895 = vmatprep.mubr.bf16.mxu1 %v5306_v54  ;;  %3056 = vmatprep.mubr.bf16.mxu0 %v5309_v55  ;;  %v5326_v55 = vld [vmem:[%s7639_s0 + $0x75c] ss:$36 sps:$4 sm:$0xff]  }
 0x133   :  { %v2474_v1 = vpop.f32.mrf.mxu0  ;;  %v2666_v2 = vpop.f32.mrf.mxu1 }
 0x134   :  { %v2433_v1 = vadd.f32 %v6313_v21, %v6180_v56  ;;  %v5324_v56 = vld [vmem:[%s7639_s0 + $0x758] ss:$36 sps:$4 sm:$0xff]  }
 0x135   :  { %v6290_v3 = vpop.f32.mrf.mxu0  ;;  %v6292_v4 = vpop.f32.mrf.mxu1 }
 0x136   :  { %7646 = vst [vmem:[#allocation6_spill] sm:$0xff] %v6292_v4 }
 0x137   :  { %v2477_v13 = vpop.f32.mrf.mxu0  ;;  %v2669_v14 = vpop.f32.mrf.mxu1 }
 0x138   :  { %v2436_v13 = vadd.f32 %v6313_v21, %v6187_v61  ;;  %v5336_v61 = vld [vmem:[%s7639_s0 + $0x32c] ss:$36 sps:$4 sm:$0xff]  }
 0x139   :  { %v6306_v15 = vpop.f32.mrf.mxu0  ;;  %v6308_v16 = vpop.f32.mrf.mxu1  ;;  %2896 = vmatmul.mubr.bf16.gmra.mxu1 %v5304_v5  ;;  %3057 = vmatmul.mubr.bf16.gmra.mxu0 %v5307_v8 }
 0x13a   :  { %7647 = vst [vmem:[#allocation7_spill] sm:$0xff] %v6308_v16  ;;  %2903 = vmatprep.mubr.bf16.mxu1 %v5312_v9  ;;  %3064 = vmatprep.mubr.bf16.mxu0 %v5315_v12 }
 0x13b   :  { %v2482_v17 = vpop.f32.mrf.mxu0  ;;  %v2674_v20 = vpop.f32.mrf.mxu1 }
 0x13c   :  { %v5327_v20 = vld [vmem:[%s7639_s0 + $0x2e0] ss:$36 sps:$4 sm:$0xff]  }
 0x13d   :  { %v6315_v24 = vpop.f32.mrf.mxu0  ;;  %v6317_v25 = vpop.f32.mrf.mxu1 }
 0x13e   :  { %7648 = vst [vmem:[#allocation8_spill] sm:$0xff] %v6317_v25 }
 0x13f   :  { %v2485_v31 = vpop.f32.mrf.mxu0  ;;  %v2677_v33 = vpop.f32.mrf.mxu1 }
 0x140   :  { %v2441_v31 = vadd.f32 %v6313_v21, %v6203_v6  ;;  %v5331_v6 = vld [vmem:[%s7639_s0 + $0x7a0] ss:$36 sps:$4 sm:$0xff]  }
 0x141   :  { %v6333_v37 = vpop.f32.mrf.mxu0  ;;  %v2713_v38 = vpop.f32.mrf.mxu1  ;;  %2904 = vmatmul.mubr.bf16.gmra.mxu1 %v5310_v26  ;;  %3065 = vmatmul.mubr.bf16.gmra.mxu0 %v5313_v27  ;;  %v5333_v27 = vld [vmem:[%s7639_s0 + $0x7a4] ss:$36 sps:$4 sm:$0xff]  }
 0x142   :  { %v6335_v39 = vadd.f32 %v2713_v38, %v2425_v34  ;;  %2911 = vmatprep.mubr.bf16.mxu1 %v5320_v28  ;;  %3072 = vmatprep.mubr.bf16.mxu0 %v5323_v29 }
 0x143   :  { %v2490_v41 = vpop.f32.mrf.mxu0  ;;  %v2715_v42 = vpop.f32.mrf.mxu1 }
 0x144   :  { %v2444_v42 = vadd.f32 %v6313_v21, %v6207_v10  ;;  %v5342_v10 = vld [vmem:[%s7639_s0 + $0x374] ss:$36 sps:$4 sm:$0xff]  }
 0x145   :  { %v6342_v43 = vpop.f32.mrf.mxu0  ;;  %v2716_v50 = vpop.f32.mrf.mxu1 }
 0x146   :  { %v6350_v54 = vadd.f32 %v2716_v50, %v2428_v47 }
 0x147   :  { %v2493_v58 = vpop.f32.mrf.mxu0  ;;  %v2718_v59 = vpop.f32.mrf.mxu1 }
 0x148   :  { %v2449_v59 = vadd.f32 %v6313_v21, %v6223_v18  ;;  %v5337_v18 = vld [vmem:[%s7639_s0 + $0x7e8] ss:$36 sps:$4 sm:$0xff]  }
 0x149   :  { %v6360_v2 = vpop.f32.mrf.mxu0  ;;  %v2721_v5 = vpop.f32.mrf.mxu1  ;;  %2912 = vmatmul.mubr.bf16.gmra.mxu1 %v5318_v52  ;;  %3073 = vmatmul.mubr.bf16.gmra.mxu0 %v5321_v53  ;;  %v5334_v52 = vld [vmem:[%s7639_s0 + $0x328] ss:$36 sps:$4 sm:$0xff]  }
 0x14a   :  { %v6362_v8 = vadd.f32 %v2721_v5, %v2433_v1  ;;  %2919 = vmatprep.mubr.bf16.mxu1 %v5326_v55  ;;  %3080 = vmatprep.mubr.bf16.mxu0 %v5329_v48  ;;  %v5339_v55 = vld [vmem:[%s7639_s0 + $0x7ec] ss:$36 sps:$4 sm:$0xff]  }
 0x14b   :  { %v2498_v9 = vpop.f32.mrf.mxu0  ;;  %v2723_v12 = vpop.f32.mrf.mxu1 }
 0x14d   :  { %v6366_v14 = vpop.f32.mrf.mxu0  ;;  %v2724_v17 = vpop.f32.mrf.mxu1 }
 0x14e   :  { %v6374_v26 = vadd.f32 %v2724_v17, %v2436_v13  ;;  %v2452_v17 = vadd.f32 %v6313_v21, %v6227_v22  ;;  %v5350_v22 = vld [vmem:[%s7639_s0 + $0x3bc] ss:$36 sps:$4 sm:$0xff]  }
 0x14f   :  { %v2501_v28 = vpop.f32.mrf.mxu0  ;;  %v2726_v29 = vpop.f32.mrf.mxu1 }
 0x150   :  { %v5347_v28 = vld [vmem:[%s7639_s0 + $0x834] ss:$36 sps:$4 sm:$0xff]  }
 0x151   :  { %v6384_v33 = vpop.f32.mrf.mxu0  ;;  %v2729_v34 = vpop.f32.mrf.mxu1  ;;  %2920 = vmatmul.mubr.bf16.gmra.mxu1 %v5324_v56  ;;  %3081 = vmatmul.mubr.bf16.gmra.mxu0 %v5327_v20 }
 0x152   :  { %v6386_v38 = vadd.f32 %v2729_v34, %v2441_v31  ;;  %2927 = vmatprep.mubr.bf16.mxu1 %v5333_v27  ;;  %3088 = vmatprep.mubr.bf16.mxu0 %v5336_v61  ;;  %v5340_v27 = vld [vmem:[%s7639_s0 + $0x370] ss:$36 sps:$4 sm:$0xff]   ;;  %v2457_v34 = vadd.f32 %v6313_v21, %v6243_v0 }
 0x153   :  { %v2506_v40 = vpop.f32.mrf.mxu0  ;;  %v2731_v41 = vpop.f32.mrf.mxu1 }
 0x155   :  { %v6390_v47 = vpop.f32.mrf.mxu0  ;;  %v2732_v50 = vpop.f32.mrf.mxu1 }
 0x156   :  { %v6398_v53 = vadd.f32 %v2732_v50, %v2444_v42  ;;  %v5445_v50 = vld [vmem:[%s7638_s1 + $0x200] sm:$0xff]   ;;  %v2508_v16 = vadd.f32 %v6313_v21, %v6390_v47 }
 0x157   :  { %v2509_v48 = vpop.f32.mrf.mxu0  ;;  %v2734_v58 = vpop.f32.mrf.mxu1  ;;  %4957 = vmatprep.subr.bf16.mxu0 %v5445_v50  ;;  %v5394_v47 = vld [vmem:[%s7639_s0 + $0x13c] ss:$36 sps:$4 sm:$0xff]  }
 0x158   :  { %v5345_v48 = vld [vmem:[%s7639_s0 + $0x830] ss:$36 sps:$4 sm:$0xff]   ;;  %v5348_v58 = vld [vmem:[%s7639_s0 + $0x3b8] ss:$36 sps:$4 sm:$0xff]   ;;  %4958 = vmatpush3.bf16.msra.mxu0 %v5445_v50 }
 0x159   :  { %v6408_v1 = vpop.f32.mrf.mxu0  ;;  %v2737_v5 = vpop.f32.mrf.mxu1  ;;  %2928 = vmatmul.mubr.bf16.gmra.mxu1 %v5331_v6  ;;  %3089 = vmatmul.mubr.bf16.gmra.mxu0 %v5334_v52 }
 0x15a   :  { %v6410_v9 = vadd.f32 %v2737_v5, %v2449_v59  ;;  %2935 = vmatprep.mubr.bf16.mxu1 %v5339_v55  ;;  %3096 = vmatprep.mubr.bf16.mxu0 %v5342_v10  ;;  %v2460_v55 = vadd.f32 %v6313_v21, %v6250_v35  ;;  %v5353_v5 = vld [vmem:[%s7639_s0 + $0x87c] ss:$36 sps:$4 sm:$0xff]   ;;  %v5356_v35 = vld [vmem:[%s7639_s0 + $0x404] ss:$36 sps:$4 sm:$0xff]  }
 0x15b   :  { %v2514_v12 = vpop.f32.mrf.mxu0  ;;  %v2739_v13 = vpop.f32.mrf.mxu1 }
 0x15d   :  { %v6414_v56 = vpop.f32.mrf.mxu0  ;;  %v2740_v20 = vpop.f32.mrf.mxu1 }
 0x15e   :  { %v6422_v61 = vadd.f32 %v2740_v20, %v2452_v17  ;;  %v2465_v17 = vadd.f32 %v6313_v21, %v6266_v45  ;;  %v5351_v45 = vld [vmem:[%s7639_s0 + $0x878] ss:$36 sps:$4 sm:$0xff]   ;;  %v2516_v63 = vadd.f32 %v6313_v21, %v6414_v56  ;;  %v5401_v56 = vld [vmem:[%s7639_s0 + $0x184] ss:$36 sps:$4 sm:$0xff]  }
 0x15f   :  { %v2517_v29 = vpop.f32.mrf.mxu0  ;;  %v2742_v31 = vpop.f32.mrf.mxu1 }
 0x160   :  { %v2468_v29 = vadd.f32 %v6313_v21, %v6270_v32  ;;  %v5363_v32 = vld [vmem:[%s7639_s0 + $0x44c] ss:$36 sps:$4 sm:$0xff]  }
 0x161   :  { %v6432_v40 = vpop.f32.mrf.mxu0  ;;  %v2745_v41 = vpop.f32.mrf.mxu1  ;;  %2936 = vmatmul.mubr.bf16.gmra.mxu1 %v5337_v18  ;;  %3097 = vmatmul.mubr.bf16.gmra.mxu0 %v5340_v27 }
 0x162   :  { %v6434_v42 = vadd.f32 %v2745_v41, %v2457_v34  ;;  %2943 = vmatprep.mubr.bf16.mxu1 %v5347_v28  ;;  %3104 = vmatprep.mubr.bf16.mxu0 %v5350_v22  ;;  %v5354_v41 = vld [vmem:[%s7639_s0 + $0x400] ss:$36 sps:$4 sm:$0xff]  }
 0x163   :  { %v2522_v6 = vpop.f32.mrf.mxu0  ;;  %v2747_v52 = vpop.f32.mrf.mxu1 }
 0x164   :  { %v5360_v6 = vld [vmem:[%s7639_s0 + $0x8c4] ss:$36 sps:$4 sm:$0xff]  }
 0x165   :  { %v6441_v0 = vpop.f32.mrf.mxu0  ;;  %v2748_v10 = vpop.f32.mrf.mxu1 }
 0x166   :  { %v6449_v59 = vadd.f32 %v2748_v10, %v2460_v55  ;;  %v2473_v10 = vadd.f32 %v6313_v21, %v6286_v60  ;;  %v5358_v60 = vld [vmem:[%s7639_s0 + $0x8c0] ss:$36 sps:$4 sm:$0xff]   ;;  %v2524_v46 = vadd.f32 %v6313_v21, %v6441_v0  ;;  %v5407_v0 = vld [vmem:[%s7639_s0 + $0x1cc] ss:$36 sps:$4 sm:$0xff]  }
 0x167   :  { %v2525_v12 = vpop.f32.mrf.mxu0  ;;  %v2750_v13 = vpop.f32.mrf.mxu1 }
 0x168   :  { %v2476_v13 = vadd.f32 %v6313_v21, %v6290_v3  ;;  %v5369_v3 = vld [vmem:[%s7639_s0 + $0x1c] ss:$36 sps:$4 sm:$0xff]  }
 0x169   :  { %v6459_v20 = vpop.f32.mrf.mxu0  ;;  %v2753_v18 = vpop.f32.mrf.mxu1  ;;  %2944 = vmatmul.mubr.bf16.gmra.mxu1 %v5345_v48  ;;  %3105 = vmatmul.mubr.bf16.gmra.mxu0 %v5348_v58 }
 0x16a   :  { %v6461_v27 = vadd.f32 %v2753_v18, %v2465_v17  ;;  %2951 = vmatprep.mubr.bf16.mxu1 %v5353_v5  ;;  %3112 = vmatprep.mubr.bf16.mxu0 %v5356_v35 }
 0x16b   :  { %v2530_v28 = vpop.f32.mrf.mxu0  ;;  %v2755_v22 = vpop.f32.mrf.mxu1 }
 0x16c   :  { %v5361_v28 = vld [vmem:[%s7639_s0 + $0x448] ss:$36 sps:$4 sm:$0xff]  }
 0x16d   :  { %v6465_v31 = vpop.f32.mrf.mxu0  ;;  %v2756_v34 = vpop.f32.mrf.mxu1 }
 0x16e   :  { %v6473_v50 = vadd.f32 %v2756_v34, %v2468_v29  ;;  %v5366_v29 = vld [vmem:[%s7639_s0 + $0x494] ss:$36 sps:$4 sm:$0xff]  }
 0x16f   :  { %v2533_v52 = vpop.f32.mrf.mxu0  ;;  %v2758_v55 = vpop.f32.mrf.mxu1 }
 0x171   :  { %v6483_v48 = vpop.f32.mrf.mxu0  ;;  %v2761_v58 = vpop.f32.mrf.mxu1  ;;  %2952 = vmatmul.mubr.bf16.gmra.mxu1 %v5351_v45  ;;  %3113 = vmatmul.mubr.bf16.gmra.mxu0 %v5354_v41  ;;  %v2481_v41 = vadd.f32 %v6313_v21, %v6306_v15  ;;  %v5364_v15 = vld [vmem:[%s7639_s0 + $0x490] ss:$36 sps:$4 sm:$0xff]  }
 0x172   :  { %v6485_v5 = vadd.f32 %v2761_v58, %v2473_v10  ;;  %2959 = vmatprep.mubr.bf16.mxu1 %v5360_v6  ;;  %3120 = vmatprep.mubr.bf16.mxu0 %v5363_v32  ;;  %v2484_v58 = vadd.f32 %v6313_v21, %v6315_v24  ;;  %v5376_v24 = vld [vmem:[%s7639_s0 + $0x64] ss:$36 sps:$4 sm:$0xff]  }
 0x173   :  { %v2538_v35 = vpop.f32.mrf.mxu0  ;;  %v2763_v12 = vpop.f32.mrf.mxu1 }
 0x175   :  { %v6489_v17 = vpop.f32.mrf.mxu0  ;;  %v2764_v18 = vpop.f32.mrf.mxu1 }
 0x176   :  { %v6497_v22 = vadd.f32 %v2764_v18, %v2476_v13  ;;  %v5367_v13 = vld [vmem:[%s7639_s0 + $0x18] ss:$36 sps:$4 sm:$0xff]  }
 0x177   :  { %v2541_v34 = vpop.f32.mrf.mxu0  ;;  %v2766_v45 = vpop.f32.mrf.mxu1 }
 0x179   :  { %v6507_v6 = vpop.f32.mrf.mxu0  ;;  %v2769_v32 = vpop.f32.mrf.mxu1  ;;  %2960 = vmatmul.mubr.bf16.gmra.mxu1 %v5358_v60  ;;  %3121 = vmatmul.mubr.bf16.gmra.mxu0 %v5361_v28  ;;  %v5373_v60 = vld [vmem:[%s7639_s0 + $0x4dc] ss:$36 sps:$4 sm:$0xff]  }
 0x17a   :  { %v6509_v52 = vadd.f32 %v2769_v32, %v2481_v41  ;;  %3128 = vmatprep.mubr.bf16.mxu0 %v5366_v29  ;;  %3289 = vmatprep.mubr.bf16.mxu1 %v5369_v3  ;;  %v2489_v3 = vadd.f32 %v6313_v21, %v6333_v37  ;;  %v5371_v37 = vld [vmem:[%s7639_s0 + $0x4d8] ss:$36 sps:$4 sm:$0xff]  }
 0x17b   :  { %v2546_v55 = vpop.f32.mrf.mxu0  ;;  %v2771_v10 = vpop.f32.mrf.mxu1 }
 0x17c   :  { %v2492_v10 = vadd.f32 %v6313_v21, %v6342_v43  ;;  %v5382_v43 = vld [vmem:[%s7639_s0 + $0xac] ss:$36 sps:$4 sm:$0xff]  }
 0x17d   :  { %v6513_v35 = vpop.f32.mrf.mxu0  ;;  %v2772_v12 = vpop.f32.mrf.mxu1 }
 0x17e   :  { %v6521_v18 = vadd.f32 %v2772_v12, %v2484_v58 }
 0x17f   :  { %v2549_v28 = vpop.f32.mrf.mxu0  ;;  %v2774_v29 = vpop.f32.mrf.mxu1 }
 0x180   :  { %v2497_v29 = vadd.f32 %v6313_v21, %v6360_v2  ;;  %v5377_v2 = vld [vmem:[%s7639_s0 + $0x520] ss:$36 sps:$4 sm:$0xff]  }
 0x181   :  { %v6531_v34 = vpop.f32.mrf.mxu0  ;;  %v2777_v45 = vpop.f32.mrf.mxu1  ;;  %3129 = vmatmul.mubr.bf16.gmra.mxu0 %v5364_v15  ;;  %3290 = vmatmul.mubr.bf16.vlgmr.msra.gmra.mxu1 %v5367_v13  ;;  %v5374_v15 = vld [vmem:[%s7639_s0 + $0x60] ss:$36 sps:$4 sm:$0xff]  }
 0x182   :  { %v6533_v41 = vadd.f32 %v2777_v45, %v2489_v3  ;;  %3136 = vmatprep.mubr.bf16.mxu0 %v5373_v60  ;;  %3297 = vmatprep.mubr.bf16.mxu1 %v5376_v24  ;;  %v5379_v60 = vld [vmem:[%s7639_s0 + $0x524] ss:$36 sps:$4 sm:$0xff]  }
 0x183   :  { %v2554_v32 = vpop.f32.mrf.mxu0  ;;  %v2779_v55 = vpop.f32.mrf.mxu1 }
 0x185   :  { %v6537_v58 = vpop.f32.mrf.mxu0  ;;  %v2780_v12 = vpop.f32.mrf.mxu1 }
 0x186   :  { %v6545_v13 = vadd.f32 %v2780_v12, %v2492_v10  ;;  %v2500_v12 = vadd.f32 %v6313_v21, %v6366_v14  ;;  %v5388_v14 = vld [vmem:[%s7639_s0 + $0xf4] ss:$36 sps:$4 sm:$0xff]  }
 0x187   :  { %v2557_v24 = vpop.f32.mrf.mxu0  ;;  %v2782_v28 = vpop.f32.mrf.mxu1 }
 0x189   :  { %v6555_v3 = vpop.f32.mrf.mxu0  ;;  %v2785_v45 = vpop.f32.mrf.mxu1  ;;  %3137 = vmatmul.mubr.bf16.gmra.mxu0 %v5371_v37  ;;  %3298 = vmatmul.mubr.bf16.gmra.mxu1 %v5374_v15  ;;  %v5380_v37 = vld [vmem:[%s7639_s0 + $0xa8] ss:$36 sps:$4 sm:$0xff]  }
 0x18a   :  { %v6557_v32 = vadd.f32 %v2785_v45, %v2497_v29  ;;  %3144 = vmatprep.mubr.bf16.mxu0 %v5379_v60  ;;  %3305 = vmatprep.mubr.bf16.mxu1 %v5382_v43  ;;  %v5385_v60 = vld [vmem:[%s7639_s0 + $0x56c] ss:$36 sps:$4 sm:$0xff]   ;;  %v2505_v29 = vadd.f32 %v6313_v21, %v6384_v33 }
 0x18b   :  { %v2562_v55 = vpop.f32.mrf.mxu0  ;;  %v2787_v10 = vpop.f32.mrf.mxu1  ;;  %v5383_v33 = vld [vmem:[%s7639_s0 + $0x568] ss:$36 sps:$4 sm:$0xff]  }
 0x18d   :  { %v6561_v25 = vpop.f32.mrf.mxu0  ;;  %v2788_v24 = vpop.f32.mrf.mxu1 }
 0x18e   :  { %v6569_v15 = vadd.f32 %v2788_v24, %v2500_v12 }
 0x18f   :  { %v2565_v43 = vpop.f32.mrf.mxu0  ;;  %v2790_v28 = vpop.f32.mrf.mxu1 }
 0x191   :  { %v6579_v45 = vpop.f32.mrf.mxu0  ;;  %v2793_v55 = vpop.f32.mrf.mxu1  ;;  %3145 = vmatmul.mubr.bf16.gmra.mxu0 %v5377_v2  ;;  %3306 = vmatmul.mubr.bf16.gmra.mxu1 %v5380_v37  ;;  %v5386_v2 = vld [vmem:[%s7639_s0 + $0xf0] ss:$36 sps:$4 sm:$0xff]  }
 0x192   :  { %v6581_v10 = vadd.f32 %v2793_v55, %v2505_v29  ;;  %3152 = vmatprep.mubr.bf16.mxu0 %v5385_v60  ;;  %3313 = vmatprep.mubr.bf16.mxu1 %v5388_v14  ;;  %v5391_v60 = vld [vmem:[%s7639_s0 + $0x5b4] ss:$36 sps:$4 sm:$0xff]   ;;  %v2513_v29 = vadd.f32 %v6313_v21, %v6408_v1 }
 0x193   :  { %v2570_v12 = vpop.f32.mrf.mxu0  ;;  %v2795_v24 = vpop.f32.mrf.mxu1  ;;  %v5389_v1 = vld [vmem:[%s7639_s0 + $0x5b0] ss:$36 sps:$4 sm:$0xff]  }
 0x195   :  { %v6585_v4 = vpop.f32.mrf.mxu0  ;;  %v2796_v43 = vpop.f32.mrf.mxu1 }
 0x196   :  { %v6593_v37 = vadd.f32 %v2796_v43, %v2508_v16 }
 0x197   :  { %v2573_v14 = vpop.f32.mrf.mxu0  ;;  %v2798_v28 = vpop.f32.mrf.mxu1 }
 0x199   :  { %v6603_v55 = vpop.f32.mrf.mxu0  ;;  %v2801_v12 = vpop.f32.mrf.mxu1  ;;  %3153 = vmatmul.mubr.bf16.gmra.mxu0 %v5383_v33  ;;  %3314 = vmatmul.mubr.bf16.gmra.mxu1 %v5386_v2  ;;  %v5392_v33 = vld [vmem:[%s7639_s0 + $0x138] ss:$36 sps:$4 sm:$0xff]  }
 0x19a   :  { %v6605_v16 = vadd.f32 %v2801_v12, %v2513_v29  ;;  %3160 = vmatprep.mubr.bf16.mxu0 %v5391_v60  ;;  %3321 = vmatprep.mubr.bf16.mxu1 %v5394_v47  ;;  %v5398_v60 = vld [vmem:[%s7639_s0 + $0x5fc] ss:$36 sps:$4 sm:$0xff]   ;;  %v2521_v29 = vadd.f32 %v6313_v21, %v6432_v40 }
 0x19b   :  { %v2578_v24 = vpop.f32.mrf.mxu0  ;;  %v2803_v43 = vpop.f32.mrf.mxu1  ;;  %v5396_v40 = vld [vmem:[%s7639_s0 + $0x5f8] ss:$36 sps:$4 sm:$0xff]  }
 0x19d   :  { %v6609_v51 = vpop.f32.mrf.mxu0  ;;  %v2804_v14 = vpop.f32.mrf.mxu1 }
 0x19e   :  { %v6617_v2 = vadd.f32 %v2804_v14, %v2516_v63 }
 0x19f   :  { %v2581_v47 = vpop.f32.mrf.mxu0  ;;  %v2806_v28 = vpop.f32.mrf.mxu1 }
 0x1a1   :  { %v6627_v12 = vpop.f32.mrf.mxu0  ;;  %v2809_v24 = vpop.f32.mrf.mxu1  ;;  %3161 = vmatmul.mubr.bf16.gmra.mxu0 %v5389_v1  ;;  %3322 = vmatmul.mubr.bf16.gmra.mxu1 %v5392_v33  ;;  %v5399_v1 = vld [vmem:[%s7639_s0 + $0x180] ss:$36 sps:$4 sm:$0xff]  }
 0x1a2   :  { %v6629_v63 = vadd.f32 %v2809_v24, %v2521_v29  ;;  %3168 = vmatprep.mubr.bf16.mxu0 %v5398_v60  ;;  %3329 = vmatprep.mubr.bf16.mxu1 %v5401_v56  ;;  %v5404_v60 = vld [vmem:[%s7639_s0 + $0x644] ss:$36 sps:$4 sm:$0xff]   ;;  %v2529_v29 = vadd.f32 %v6313_v21, %v6459_v20 }
 0x1a3   :  { %v2586_v43 = vpop.f32.mrf.mxu0  ;;  %v2811_v14 = vpop.f32.mrf.mxu1  ;;  %v5402_v20 = vld [vmem:[%s7639_s0 + $0x640] ss:$36 sps:$4 sm:$0xff]  }
 0x1a4   :  { %7649 = vst [vmem:[#allocation9_spill] sm:$0xff] %v6629_v63 }
 0x1a5   :  { %v6633_v36 = vpop.f32.mrf.mxu0  ;;  %v2812_v47 = vpop.f32.mrf.mxu1 }
 0x1a6   :  { %v6641_v33 = vadd.f32 %v2812_v47, %v2524_v46 }
 0x1a7   :  { %v2589_v56 = vpop.f32.mrf.mxu0  ;;  %v2814_v28 = vpop.f32.mrf.mxu1 }
 0x1a8   :  { %7650 = vst [vmem:[#allocation10_spill] sm:$0xff] %v6641_v33  ;;  %v2532_v33 = vadd.f32 %v6313_v21, %v6465_v31  ;;  %v5413_v31 = vld [vmem:[%s7639_s0 + $0x214] ss:$36 sps:$4 sm:$0xff]  }
 0x1a9   :  { %v6651_v24 = vpop.f32.mrf.mxu0  ;;  %v2817_v43 = vpop.f32.mrf.mxu1  ;;  %3169 = vmatmul.mubr.bf16.gmra.mxu0 %v5396_v40  ;;  %3330 = vmatmul.mubr.bf16.gmra.mxu1 %v5399_v1  ;;  %v5405_v40 = vld [vmem:[%s7639_s0 + $0x1c8] ss:$36 sps:$4 sm:$0xff]  }
 0x1aa   :  { %v6653_v46 = vadd.f32 %v2817_v43, %v2529_v29  ;;  %3176 = vmatprep.mubr.bf16.mxu0 %v5404_v60  ;;  %3337 = vmatprep.mubr.bf16.mxu1 %v5407_v0  ;;  %v5410_v60 = vld [vmem:[%s7639_s0 + $0x68c] ss:$36 sps:$4 sm:$0xff]   ;;  %v2537_v29 = vadd.f32 %v6313_v21, %v6483_v48 }
 0x1ab   :  { %v2594_v14 = vpop.f32.mrf.mxu0  ;;  %v2819_v47 = vpop.f32.mrf.mxu1  ;;  %v5408_v48 = vld [vmem:[%s7639_s0 + $0x688] ss:$36 sps:$4 sm:$0xff]  }
 0x1ac   :  { %7651 = vst [vmem:[#allocation11_spill] sm:$0xff] %v6653_v46 }
 0x1ad   :  { %v6657_v63 = vpop.f32.mrf.mxu0  ;;  %v2820_v56 = vpop.f32.mrf.mxu1 }
 0x1ae   :  { %v6665_v1 = vadd.f32 %v2820_v56, %v2532_v33 }
 0x1af   :  { %v2597_v0 = vpop.f32.mrf.mxu0  ;;  %v2822_v28 = vpop.f32.mrf.mxu1 }
 0x1b0   :  { %7652 = vst [vmem:[#allocation12_spill] sm:$0xff] %v6665_v1  ;;  %v2540_v1 = vadd.f32 %v6313_v21, %v6489_v17  ;;  %v5419_v17 = vld [vmem:[%s7639_s0 + $0x25c] ss:$36 sps:$4 sm:$0xff]  }
 0x1b1   :  { %v6675_v43 = vpop.f32.mrf.mxu0  ;;  %v2825_v14 = vpop.f32.mrf.mxu1  ;;  %3177 = vmatmul.mubr.bf16.gmra.mxu0 %v5402_v20  ;;  %3338 = vmatmul.mubr.bf16.gmra.mxu1 %v5405_v40  ;;  %v5411_v20 = vld [vmem:[%s7639_s0 + $0x210] ss:$36 sps:$4 sm:$0xff]  }
 0x1b2   :  { %v6677_v33 = vadd.f32 %v2825_v14, %v2537_v29  ;;  %3184 = vmatprep.mubr.bf16.mxu0 %v5410_v60  ;;  %3345 = vmatprep.mubr.bf16.mxu1 %v5413_v31  ;;  %v5416_v60 = vld [vmem:[%s7639_s0 + $0x6d4] ss:$36 sps:$4 sm:$0xff]   ;;  %v2545_v29 = vadd.f32 %v6313_v21, %v6507_v6 }
 0x1b3   :  { %v2602_v47 = vpop.f32.mrf.mxu0  ;;  %v2827_v56 = vpop.f32.mrf.mxu1  ;;  %v5414_v6 = vld [vmem:[%s7639_s0 + $0x6d0] ss:$36 sps:$4 sm:$0xff]  }
 0x1b4   :  { %7653 = vst [vmem:[#allocation13_spill] sm:$0xff] %v6677_v33 }
 0x1b5   :  { %v6681_v46 = vpop.f32.mrf.mxu0  ;;  %v2828_v0 = vpop.f32.mrf.mxu1 }
 0x1b6   :  { %v6689_v40 = vadd.f32 %v2828_v0, %v2540_v1 }
 0x1b7   :  { %v2605_v31 = vpop.f32.mrf.mxu0  ;;  %v2830_v28 = vpop.f32.mrf.mxu1 }
 0x1b8   :  { %7654 = vst [vmem:[#allocation14_spill] sm:$0xff] %v6689_v40  ;;  %v2548_v40 = vadd.f32 %v6313_v21, %v6513_v35  ;;  %v5426_v35 = vld [vmem:[%s7639_s0 + $0x2a4] ss:$36 sps:$4 sm:$0xff]  }
 0x1b9   :  { %v6699_v14 = vpop.f32.mrf.mxu0  ;;  %v2833_v47 = vpop.f32.mrf.mxu1  ;;  %3185 = vmatmul.mubr.bf16.gmra.mxu0 %v5408_v48  ;;  %3346 = vmatmul.mubr.bf16.gmra.mxu1 %v5411_v20  ;;  %v5417_v48 = vld [vmem:[%s7639_s0 + $0x258] ss:$36 sps:$4 sm:$0xff]  }
 0x1ba   :  { %v6701_v1 = vadd.f32 %v2833_v47, %v2545_v29  ;;  %3192 = vmatprep.mubr.bf16.mxu0 %v5416_v60  ;;  %3353 = vmatprep.mubr.bf16.mxu1 %v5419_v17  ;;  %v5423_v60 = vld [vmem:[%s7639_s0 + $0x71c] ss:$36 sps:$4 sm:$0xff]   ;;  %v2553_v29 = vadd.f32 %v6313_v21, %v6531_v34 }
 0x1bb   :  { %v2610_v56 = vpop.f32.mrf.mxu0  ;;  %v2835_v0 = vpop.f32.mrf.mxu1  ;;  %v5421_v34 = vld [vmem:[%s7639_s0 + $0x718] ss:$36 sps:$4 sm:$0xff]  }
 0x1bc   :  { %7655 = vst [vmem:[#allocation15_spill] sm:$0xff] %v6701_v1 }
 0x1bd   :  { %v6705_v33 = vpop.f32.mrf.mxu0  ;;  %v2836_v31 = vpop.f32.mrf.mxu1 }
 0x1be   :  { %v6713_v20 = vadd.f32 %v2836_v31, %v2548_v40 }
 0x1bf   :  { %v2613_v17 = vpop.f32.mrf.mxu0  ;;  %v2838_v28 = vpop.f32.mrf.mxu1 }
 0x1c0   :  { %7656 = vst [vmem:[#allocation16_spill] sm:$0xff] %v6713_v20  ;;  %v2556_v17 = vadd.f32 %v6313_v21, %v6537_v58  ;;  %v5432_v58 = vld [vmem:[%s7639_s0 + $0x2ec] ss:$36 sps:$4 sm:$0xff]  }
 0x1c1   :  { %v2841_v47 = vpop.f32.mrf.mxu1  ;;  %v3002_v56 = vpop.f32.mrf.mxu0  ;;  %3193 = vmatmul.mubr.bf16.gmra.mxu0 %v5414_v6  ;;  %3354 = vmatmul.mubr.bf16.gmra.mxu1 %v5417_v48  ;;  %v5424_v6 = vld [vmem:[%s7639_s0 + $0x2a0] ss:$36 sps:$4 sm:$0xff]  }
 0x1c2   :  { %v6723_v0 = vadd.f32 %v2841_v47, %v2553_v29  ;;  %v6726_v40 = vadd.f32 %v3002_v56, %v6335_v39  ;;  %3200 = vmatprep.mubr.bf16.mxu0 %v5423_v60  ;;  %3361 = vmatprep.mubr.bf16.mxu1 %v5426_v35  ;;  %v2561_v29 = vadd.f32 %v6313_v21, %v6555_v3  ;;  %v5427_v3 = vld [vmem:[%s7639_s0 + $0x760] ss:$36 sps:$4 sm:$0xff]  }
 0x1c3   :  { %v2843_v31 = vpop.f32.mrf.mxu1  ;;  %v3004_v20 = vpop.f32.mrf.mxu0 }
 0x1c4   :  { %v5429_v20 = vld [vmem:[%s7639_s0 + $0x764] ss:$36 sps:$4 sm:$0xff]  }
 0x1c5   :  { %v2844_v28 = vpop.f32.mrf.mxu1  ;;  %v3005_v1 = vpop.f32.mrf.mxu0 }
 0x1c6   :  { %v6736_v48 = vadd.f32 %v2844_v28, %v2556_v17  ;;  %v6739_v39 = vadd.f32 %v3005_v1, %v6350_v54  ;;  %v2564_v28 = vadd.f32 %v6313_v21, %v6561_v25  ;;  %v5438_v25 = vld [vmem:[%s7639_s0 + $0x334] ss:$36 sps:$4 sm:$0xff]  }
 0x1c7   :  { %v2846_v60 = vpop.f32.mrf.mxu1  ;;  %v3007_v35 = vpop.f32.mrf.mxu0 }
 0x1c9   :  { %v2849_v47 = vpop.f32.mrf.mxu1  ;;  %v3010_v56 = vpop.f32.mrf.mxu0  ;;  %3201 = vmatmul.mubr.bf16.gmra.mxu0 %v5421_v34  ;;  %3362 = vmatmul.mubr.bf16.gmra.mxu1 %v5424_v6  ;;  %v5430_v34 = vld [vmem:[%s7639_s0 + $0x2e8] ss:$36 sps:$4 sm:$0xff]  }
 0x1ca   :  { %v6749_v31 = vadd.f32 %v2849_v47, %v2561_v29  ;;  %v6752_v54 = vadd.f32 %v3010_v56, %v6362_v8  ;;  %3208 = vmatprep.mubr.bf16.mxu0 %v5429_v20  ;;  %3369 = vmatprep.mubr.bf16.mxu1 %v5432_v58  ;;  %v5435_v20 = vld [vmem:[%s7639_s0 + $0x7ac] ss:$36 sps:$4 sm:$0xff]   ;;  %v2569_v47 = vadd.f32 %v6313_v21, %v6579_v45 }
 0x1cb   :  { %v2851_v1 = vpop.f32.mrf.mxu1  ;;  %v3012_v17 = vpop.f32.mrf.mxu0  ;;  %v5433_v45 = vld [vmem:[%s7639_s0 + $0x7a8] ss:$36 sps:$4 sm:$0xff]  }
 0x1cd   :  { %v2852_v60 = vpop.f32.mrf.mxu1  ;;  %v3013_v35 = vpop.f32.mrf.mxu0 }
 0x1ce   :  { %v6762_v6 = vadd.f32 %v2852_v60, %v2564_v28  ;;  %v6765_v8 = vadd.f32 %v3013_v35, %v6374_v26  ;;  %v2572_v35 = vadd.f32 %v6313_v21, %v6585_v4  ;;  %v5444_v4 = vld [vmem:[%s7639_s0 + $0x37c] ss:$36 sps:$4 sm:$0xff]  }
 0x1cf   :  { %v2854_v58 = vpop.f32.mrf.mxu1  ;;  %v3015_v29 = vpop.f32.mrf.mxu0 }
 0x1d1   :  { %v2857_v56 = vpop.f32.mrf.mxu1  ;;  %v3018_v1 = vpop.f32.mrf.mxu0  ;;  %3209 = vmatmul.mubr.bf16.gmra.mxu0 %v5427_v3  ;;  %3370 = vmatmul.mubr.bf16.gmra.mxu1 %v5430_v34  ;;  %v5436_v3 = vld [vmem:[%s7639_s0 + $0x330] ss:$36 sps:$4 sm:$0xff]  }
 0x1d2   :  { %v6775_v17 = vadd.f32 %v2857_v56, %v2569_v47  ;;  %v6778_v26 = vadd.f32 %v3018_v1, %v6386_v38  ;;  %3216 = vmatprep.mubr.bf16.mxu0 %v5435_v20  ;;  %3377 = vmatprep.mubr.bf16.mxu1 %v5438_v25  ;;  %v5441_v20 = vld [vmem:[%s7639_s0 + $0x7f4] ss:$36 sps:$4 sm:$0xff]   ;;  %v2577_v56 = vadd.f32 %v6313_v21, %v6603_v55 }
 0x1d3   :  { %v2859_v28 = vpop.f32.mrf.mxu1  ;;  %v3020_v60 = vpop.f32.mrf.mxu0  ;;  %v5439_v55 = vld [vmem:[%s7639_s0 + $0x7f0] ss:$36 sps:$4 sm:$0xff]  }
 0x1d5   :  { %v2860_v58 = vpop.f32.mrf.mxu1  ;;  %v3021_v29 = vpop.f32.mrf.mxu0 }
 0x1d6   :  { %v6788_v34 = vadd.f32 %v2860_v58, %v2572_v35  ;;  %v6791_v38 = vadd.f32 %v3021_v29, %v6398_v53  ;;  %v2580_v29 = vadd.f32 %v6313_v21, %v6609_v51  ;;  %v5451_v51 = vld [vmem:[%s7639_s0 + $0x3c4] ss:$36 sps:$4 sm:$0xff]  }
 0x1d7   :  { %v2862_v25 = vpop.f32.mrf.mxu1  ;;  %v3023_v47 = vpop.f32.mrf.mxu0 }
 0x1d9   :  { %v2865_v1 = vpop.f32.mrf.mxu1  ;;  %v3026_v28 = vpop.f32.mrf.mxu0  ;;  %3217 = vmatmul.mubr.bf16.gmra.mxu0 %v5433_v45  ;;  %3378 = vmatmul.mubr.bf16.gmra.mxu1 %v5436_v3  ;;  %v5442_v45 = vld [vmem:[%s7639_s0 + $0x378] ss:$36 sps:$4 sm:$0xff]  }
 0x1da   :  { %v6801_v60 = vadd.f32 %v2865_v1, %v2577_v56  ;;  %v6804_v53 = vadd.f32 %v3026_v28, %v6410_v9  ;;  %3224 = vmatprep.mubr.bf16.mxu0 %v5441_v20  ;;  %3385 = vmatprep.mubr.bf16.mxu1 %v5444_v4  ;;  %v5448_v20 = vld [vmem:[%s7639_s0 + $0x83c] ss:$36 sps:$4 sm:$0xff]   ;;  %v2585_v1 = vadd.f32 %v6313_v21, %v6627_v12 }
 0x1db   :  { %v2867_v35 = vpop.f32.mrf.mxu1  ;;  %v3028_v58 = vpop.f32.mrf.mxu0  ;;  %v5446_v12 = vld [vmem:[%s7639_s0 + $0x838] ss:$36 sps:$4 sm:$0xff]  }
 0x1dd   :  { %v2868_v25 = vpop.f32.mrf.mxu1  ;;  %v3029_v47 = vpop.f32.mrf.mxu0 }
 0x1de   :  { %v6814_v3 = vadd.f32 %v2868_v25, %v2580_v29  ;;  %v6817_v9 = vadd.f32 %v3029_v47, %v6422_v61  ;;  %v2588_v47 = vadd.f32 %v6313_v21, %v6633_v36  ;;  %v5457_v36 = vld [vmem:[%s7639_s0 + $0x40c] ss:$36 sps:$4 sm:$0xff]  }
 0x1df   :  { %v2870_v4 = vpop.f32.mrf.mxu1  ;;  %v3031_v56 = vpop.f32.mrf.mxu0 }
 0x1e1   :  { %v2873_v28 = vpop.f32.mrf.mxu1  ;;  %v3034_v35 = vpop.f32.mrf.mxu0  ;;  %3225 = vmatmul.mubr.bf16.gmra.mxu0 %v5439_v55  ;;  %3386 = vmatmul.mubr.bf16.gmra.mxu1 %v5442_v45  ;;  %v5449_v55 = vld [vmem:[%s7639_s0 + $0x3c0] ss:$36 sps:$4 sm:$0xff]  }
 0x1e2   :  { %v6827_v58 = vadd.f32 %v2873_v28, %v2585_v1  ;;  %v6830_v61 = vadd.f32 %v3034_v35, %v6434_v42  ;;  %3232 = vmatprep.mubr.bf16.mxu0 %v5448_v20  ;;  %3393 = vmatprep.mubr.bf16.mxu1 %v5451_v51  ;;  %v5454_v20 = vld [vmem:[%s7639_s0 + $0x884] ss:$36 sps:$4 sm:$0xff]   ;;  %v2593_v28 = vadd.f32 %v6313_v21, %v6651_v24 }
 0x1e3   :  { %v2875_v29 = vpop.f32.mrf.mxu1  ;;  %v3036_v25 = vpop.f32.mrf.mxu0  ;;  %v5452_v24 = vld [vmem:[%s7639_s0 + $0x880] ss:$36 sps:$4 sm:$0xff]  }
 0x1e5   :  { %v2876_v4 = vpop.f32.mrf.mxu1  ;;  %v3037_v56 = vpop.f32.mrf.mxu0 }
 0x1e6   :  { %v6840_v45 = vadd.f32 %v2876_v4, %v2588_v47  ;;  %v6843_v42 = vadd.f32 %v3037_v56, %v6449_v59  ;;  %v2596_v56 = vadd.f32 %v6313_v21, %v6657_v63  ;;  %v5463_v63 = vld [vmem:[%s7639_s0 + $0x454] ss:$36 sps:$4 sm:$0xff]  }
 0x1e7   :  { %v2878_v51 = vpop.f32.mrf.mxu1  ;;  %v3039_v1 = vpop.f32.mrf.mxu0 }
 0x1e9   :  { %v2881_v35 = vpop.f32.mrf.mxu1  ;;  %v3042_v29 = vpop.f32.mrf.mxu0  ;;  %3233 = vmatmul.mubr.bf16.gmra.mxu0 %v5446_v12  ;;  %3394 = vmatmul.mubr.bf16.gmra.mxu1 %v5449_v55  ;;  %v5455_v12 = vld [vmem:[%s7639_s0 + $0x408] ss:$36 sps:$4 sm:$0xff]  }
 0x1ea   :  { %v6853_v25 = vadd.f32 %v2881_v35, %v2593_v28  ;;  %v6856_v59 = vadd.f32 %v3042_v29, %v6461_v27  ;;  %3240 = vmatprep.mubr.bf16.mxu0 %v5454_v20  ;;  %3401 = vmatprep.mubr.bf16.mxu1 %v5457_v36  ;;  %v5460_v20 = vld [vmem:[%s7639_s0 + $0x8cc] ss:$36 sps:$4 sm:$0xff]   ;;  %v2601_v35 = vadd.f32 %v6313_v21, %v6675_v43 }
 0x1eb   :  { %v2883_v47 = vpop.f32.mrf.mxu1  ;;  %v3044_v4 = vpop.f32.mrf.mxu0  ;;  %v5458_v43 = vld [vmem:[%s7639_s0 + $0x8c8] ss:$36 sps:$4 sm:$0xff]  }
 0x1ed   :  { %v2884_v51 = vpop.f32.mrf.mxu1  ;;  %v3045_v1 = vpop.f32.mrf.mxu0 }
 0x1ee   :  { %v6866_v55 = vadd.f32 %v2884_v51, %v2596_v56  ;;  %v6869_v27 = vadd.f32 %v3045_v1, %v6473_v50  ;;  %v2604_v1 = vadd.f32 %v6313_v21, %v6681_v46  ;;  %v5467_v46 = vld [vmem:[%s7639_s0 + $0x20] ss:$36 sps:$4 sm:$0xff]  }
 0x1ef   :  { %v2886_v36 = vpop.f32.mrf.mxu1  ;;  %v3047_v28 = vpop.f32.mrf.mxu0 }
 0x1f1   :  { %v2889_v29 = vpop.f32.mrf.mxu1  ;;  %v3050_v47 = vpop.f32.mrf.mxu0  ;;  %3241 = vmatmul.mubr.bf16.gmra.mxu0 %v5452_v24  ;;  %3402 = vmatmul.mubr.bf16.gmra.mxu1 %v5455_v12  ;;  %v5461_v24 = vld [vmem:[%s7639_s0 + $0x450] ss:$36 sps:$4 sm:$0xff]  }
 0x1f2   :  { %v6879_v4 = vadd.f32 %v2889_v29, %v2601_v35  ;;  %v6882_v50 = vadd.f32 %v3050_v47, %v6485_v5  ;;  %3248 = vmatprep.mubr.bf16.mxu0 %v5460_v20  ;;  %3409 = vmatprep.mubr.bf16.mxu1 %v5463_v63  ;;  %v5466_v20 = vld [vmem:[%s7639_s0 + $0x49c] ss:$36 sps:$4 sm:$0xff]   ;;  %v2609_v29 = vadd.f32 %v6313_v21, %v6699_v14 }
 0x1f3   :  { %v2891_v56 = vpop.f32.mrf.mxu1  ;;  %v3052_v51 = vpop.f32.mrf.mxu0  ;;  %v5464_v14 = vld [vmem:[%s7639_s0 + $0x498] ss:$36 sps:$4 sm:$0xff]  }
 0x1f5   :  { %v2892_v36 = vpop.f32.mrf.mxu1  ;;  %v3053_v28 = vpop.f32.mrf.mxu0 }
 0x1f6   :  { %v6892_v12 = vadd.f32 %v2892_v36, %v2604_v1  ;;  %v6895_v5 = vadd.f32 %v3053_v28, %v6497_v22  ;;  %v2612_v28 = vadd.f32 %v6313_v21, %v6705_v33  ;;  %v5472_v33 = vld [vmem:[%s7639_s0 + $0xb0] ss:$36 sps:$4 sm:$0xff]  }
 0x1f7   :  { %v2894_v63 = vpop.f32.mrf.mxu1  ;;  %v3055_v35 = vpop.f32.mrf.mxu0 }
 0x1f9   :  { %v2897_v47 = vpop.f32.mrf.mxu1  ;;  %v3058_v56 = vpop.f32.mrf.mxu0  ;;  %3249 = vmatmul.mubr.bf16.gmra.mxu0 %v5458_v43  ;;  %3410 = vmatmul.mubr.bf16.gmra.mxu1 %v5461_v24  ;;  %v5468_v43 = vld [vmem:[%s7639_s0 + $0x68] ss:$36 sps:$4 sm:$0xff]  }
 0x1fa   :  { %v6905_v51 = vadd.f32 %v2897_v47, %v2609_v29  ;;  %v6908_v22 = vadd.f32 %v3058_v56, %v6509_v52  ;;  %3417 = vmatprep.mubr.bf16.mxu1 %v5466_v20  ;;  %4959 = vmatprep.mubr.bf16.mxu0 %v5467_v46  ;;  %v5471_v20 = vld [vmem:[%s7639_s0 + $0x4e4] ss:$36 sps:$4 sm:$0xff]   ;;  %v2617_v47 = vadd.f32 %v6313_v21, %v6155_v44 }
 0x1fb   :  { %v2899_v1 = vpop.f32.mrf.mxu1  ;;  %v3060_v36 = vpop.f32.mrf.mxu0 }
 0x1fd   :  { %v2900_v63 = vpop.f32.mrf.mxu1  ;;  %v3061_v35 = vpop.f32.mrf.mxu0 }
 0x1fe   :  { %v6918_v24 = vadd.f32 %v2900_v63, %v2612_v28  ;;  %v6921_v52 = vadd.f32 %v3061_v35, %v6521_v18  ;;  %v6939_v35 = vld [vmem:[%s7640_s2] ss:$0 sm:$0xff] }
 0x1ff   :  { %v2902_v46 = vpop.f32.mrf.mxu1  ;;  %v3063_v29 = vpop.f32.mrf.mxu0  ;;  %v2620_v44 = vadd.f32 %v6939_v35, %v6163_v49  ;;  %v5477_v49 = vld [vmem:[%s7639_s0 + $0x140] ss:$36 sps:$4 sm:$0xff]  }
 0x200   :  { %v5476_v46 = vld [vmem:[%s7639_s0 + $0x52c] ss:$36 sps:$4 sm:$0xff]  }
 0x201   :  { %v2905_v56 = vpop.f32.mrf.mxu1  ;;  %v3066_v1 = vpop.f32.mrf.mxu0  ;;  %3418 = vmatmul.mubr.bf16.gmra.mxu1 %v5464_v14  ;;  %4960 = vmatmul.mubr.bf16.vlgmr.msra.gmra.mxu0 %v5468_v43  ;;  %v5469_v43 = vld [vmem:[%s7639_s0 + $0x4e0] ss:$36 sps:$4 sm:$0xff]  }
 0x202   :  { %v6931_v36 = vadd.f32 %v2905_v56, %v2617_v47  ;;  %v6934_v18 = vadd.f32 %v3066_v1, %v6533_v41  ;;  %3425 = vmatprep.mubr.bf16.mxu1 %v5471_v20  ;;  %4963 = vmatprep.mubr.bf16.mxu0 %v5472_v33  ;;  %v5473_v41 = vld [vmem:[%s7639_s0 + $0xf8] ss:$36 sps:$4 sm:$0xff]   ;;  %v2625_v56 = vadd.f32 %v6939_v35, %v6182_v57  ;;  %v5474_v57 = vld [vmem:[%s7639_s0 + $0x528] ss:$36 sps:$4 sm:$0xff]  }
 0x203   :  { %v2907_v28 = vpop.f32.mrf.mxu1  ;;  %v3068_v63 = vpop.f32.mrf.mxu0 }
 0x205   :  { %v2908_v21 = vpop.f32.mrf.mxu1  ;;  %v3069_v14 = vpop.f32.mrf.mxu0 }
 0x206   :  { %v6949_v20 = vadd.f32 %v2908_v21, %v2620_v44  ;;  %v6952_v33 = vadd.f32 %v3069_v14, %v6545_v13  ;;  %v2628_v14 = vadd.f32 %v6939_v35, %v6189_v62  ;;  %v5482_v62 = vld [vmem:[%s7639_s0 + $0x1d0] ss:$36 sps:$4 sm:$0xff]  }
 0x207   :  { %v2910_v29 = vpop.f32.mrf.mxu1  ;;  %v3071_v47 = vpop.f32.mrf.mxu0 }
 0x209   :  { %v2913_v1 = vpop.f32.mrf.mxu1  ;;  %v3074_v28 = vpop.f32.mrf.mxu0  ;;  %3426 = vmatmul.mubr.bf16.gmra.mxu1 %v5469_v43  ;;  %4964 = vmatmul.mubr.bf16.gmra.mxu0 %v5473_v41  ;;  %v5478_v43 = vld [vmem:[%s7639_s0 + $0x188] ss:$36 sps:$4 sm:$0xff]  }
 0x20a   :  { %v6962_v63 = vadd.f32 %v2913_v1, %v2625_v56  ;;  %v6965_v13 = vadd.f32 %v3074_v28, %v6557_v32  ;;  %3433 = vmatprep.mubr.bf16.mxu1 %v5476_v46  ;;  %4967 = vmatprep.mubr.bf16.mxu0 %v5477_v49  ;;  %v5481_v46 = vld [vmem:[%s7639_s0 + $0x574] ss:$36 sps:$4 sm:$0xff]   ;;  %v2633_v1 = vadd.f32 %v6939_v35, %v6205_v7 }
 0x20b   :  { %v2915_v44 = vpop.f32.mrf.mxu1  ;;  %v3076_v21 = vpop.f32.mrf.mxu0  ;;  %v5479_v7 = vld [vmem:[%s7639_s0 + $0x570] ss:$36 sps:$4 sm:$0xff]  }
 0x20d   :  { %v2916_v29 = vpop.f32.mrf.mxu1  ;;  %v3077_v47 = vpop.f32.mrf.mxu0 }
 0x20e   :  { %v6975_v41 = vadd.f32 %v2916_v29, %v2628_v14  ;;  %v6978_v32 = vadd.f32 %v3077_v47, %v6569_v15  ;;  %v2636_v47 = vadd.f32 %v6939_v35, %v6209_v11  ;;  %v5487_v11 = vld [vmem:[%s7639_s0 + $0x260] ss:$36 sps:$4 sm:$0xff]  }
 0x20f   :  { %v2918_v49 = vpop.f32.mrf.mxu1  ;;  %v3079_v56 = vpop.f32.mrf.mxu0 }
 0x211   :  { %v2921_v28 = vpop.f32.mrf.mxu1  ;;  %v3082_v44 = vpop.f32.mrf.mxu0  ;;  %3434 = vmatmul.mubr.bf16.gmra.mxu1 %v5474_v57  ;;  %4968 = vmatmul.mubr.bf16.gmra.mxu0 %v5478_v43  ;;  %v5483_v57 = vld [vmem:[%s7639_s0 + $0x218] ss:$36 sps:$4 sm:$0xff]  }
 0x212   :  { %v6988_v21 = vadd.f32 %v2921_v28, %v2633_v1  ;;  %v6991_v15 = vadd.f32 %v3082_v44, %v6581_v10  ;;  %3441 = vmatprep.mubr.bf16.mxu1 %v5481_v46  ;;  %4971 = vmatprep.mubr.bf16.mxu0 %v5482_v62  ;;  %v5486_v46 = vld [vmem:[%s7639_s0 + $0x5bc] ss:$36 sps:$4 sm:$0xff]   ;;  %v2641_v28 = vadd.f32 %v6939_v35, %v6225_v19 }
 0x213   :  { %v2923_v14 = vpop.f32.mrf.mxu1  ;;  %v3084_v29 = vpop.f32.mrf.mxu0  ;;  %v5484_v19 = vld [vmem:[%s7639_s0 + $0x5b8] ss:$36 sps:$4 sm:$0xff]  }
 0x215   :  { %v2924_v49 = vpop.f32.mrf.mxu1  ;;  %v3085_v56 = vpop.f32.mrf.mxu0 }
 0x216   :  { %v7001_v43 = vadd.f32 %v2924_v49, %v2636_v47  ;;  %v7004_v10 = vadd.f32 %v3085_v56, %v6593_v37  ;;  %v2644_v56 = vadd.f32 %v6939_v35, %v6229_v23  ;;  %v5492_v23 = vld [vmem:[%s7639_s0 + $0x2f0] ss:$36 sps:$4 sm:$0xff]  }
 0x217   :  { %v2926_v62 = vpop.f32.mrf.mxu1  ;;  %v3087_v1 = vpop.f32.mrf.mxu0 }
 0x219   :  { %v2929_v44 = vpop.f32.mrf.mxu1  ;;  %v3090_v14 = vpop.f32.mrf.mxu0  ;;  %3442 = vmatmul.mubr.bf16.gmra.mxu1 %v5479_v7  ;;  %4972 = vmatmul.mubr.bf16.gmra.mxu0 %v5483_v57  ;;  %v5488_v7 = vld [vmem:[%s7639_s0 + $0x2a8] ss:$36 sps:$4 sm:$0xff]  }
 0x21a   :  { %v7014_v29 = vadd.f32 %v2929_v44, %v2641_v28  ;;  %v7017_v37 = vadd.f32 %v3090_v14, %v6605_v16  ;;  %3449 = vmatprep.mubr.bf16.mxu1 %v5486_v46  ;;  %4975 = vmatprep.mubr.bf16.mxu0 %v5487_v11  ;;  %v5491_v46 = vld [vmem:[%s7639_s0 + $0x604] ss:$36 sps:$4 sm:$0xff]   ;;  %v2649_v44 = vadd.f32 %v6939_v35, %v6245_v30 }
 0x21b   :  { %v2931_v47 = vpop.f32.mrf.mxu1  ;;  %v3092_v49 = vpop.f32.mrf.mxu0  ;;  %v5489_v30 = vld [vmem:[%s7639_s0 + $0x600] ss:$36 sps:$4 sm:$0xff]  }
 0x21d   :  { %v2932_v62 = vpop.f32.mrf.mxu1  ;;  %v3093_v1 = vpop.f32.mrf.mxu0 }
 0x21e   :  { %v7027_v57 = vadd.f32 %v2932_v62, %v2644_v56  ;;  %v7030_v16 = vadd.f32 %v3093_v1, %v6617_v2  ;;  %v7660_v2 = vld [vmem:[#allocation9_spill] sm:$0xff] }
 0x21f   :  { %v2934_v11 = vpop.f32.mrf.mxu1  ;;  %v3095_v28 = vpop.f32.mrf.mxu0 }
 0x220   :  { %7657 = vst [vmem:[#allocation17_spill] sm:$0xff] %v7027_v57  ;;  %7658 = vst [vmem:[#allocation18_spill] sm:$0xff] %v7030_v16  ;;  %v7662_v16 = vld [vmem:[#allocation2_spill] sm:$0xff] }
 0x221   :  { %v2937_v14 = vpop.f32.mrf.mxu1  ;;  %v3098_v47 = vpop.f32.mrf.mxu0  ;;  %3450 = vmatmul.mubr.bf16.gmra.mxu1 %v5484_v19  ;;  %4976 = vmatmul.mubr.bf16.gmra.mxu0 %v5488_v7  ;;  %v2652_v11 = vadd.f32 %v6939_v35, %v7662_v16  ;;  %v5493_v19 = vld [vmem:[%s7639_s0 + $0x338] ss:$36 sps:$4 sm:$0xff]   ;;  %v5497_v16 = vld [vmem:[%s7639_s0 + $0x380] ss:$36 sps:$4 sm:$0xff]  }
 0x222   :  { %v7040_v49 = vadd.f32 %v2937_v14, %v2649_v44  ;;  %v7043_v56 = vadd.f32 %v3098_v47, %v7660_v2  ;;  %3457 = vmatprep.mubr.bf16.mxu1 %v5491_v46  ;;  %4979 = vmatprep.mubr.bf16.mxu0 %v5492_v23  ;;  %v7664_v44 = vld [vmem:[#allocation10_spill] sm:$0xff]  ;;  %v5496_v23 = vld [vmem:[%s7639_s0 + $0x64c] ss:$36 sps:$4 sm:$0xff]  }
 0x223   :  { %v2939_v62 = vpop.f32.mrf.mxu1  ;;  %v3100_v1 = vpop.f32.mrf.mxu0  ;;  %v7666_v2 = vld [vmem:[#allocation3_spill] sm:$0xff] }
 0x224   :  { %7659 = vst [vmem:[#allocation19_spill] sm:$0xff] %v7040_v49  ;;  %7661 = vst [vmem:[#allocation9_spill] sm:$0xff] %v7043_v56  ;;  %v2657_v62 = vadd.f32 %v6939_v35, %v7666_v2  ;;  %v5494_v2 = vld [vmem:[%s7639_s0 + $0x648] ss:$36 sps:$4 sm:$0xff]  }
 0x225   :  { %v2940_v28 = vpop.f32.mrf.mxu1  ;;  %v3101_v57 = vpop.f32.mrf.mxu0 }
 0x226   :  { %v7053_v7 = vadd.f32 %v2940_v28, %v2652_v11  ;;  %v7056_v46 = vadd.f32 %v3101_v57, %v7664_v44  ;;  %v7668_v57 = vld [vmem:[#allocation11_spill] sm:$0xff] }
 0x227   :  { %v2942_v14 = vpop.f32.mrf.mxu1  ;;  %v3103_v47 = vpop.f32.mrf.mxu0 }
 0x228   :  { %7663 = vst [vmem:[#allocation2_spill] sm:$0xff] %v7053_v7  ;;  %7665 = vst [vmem:[#allocation10_spill] sm:$0xff] %v7056_v46  ;;  %v7670_v7 = vld [vmem:[#allocation4_spill] sm:$0xff] }
 0x229   :  { %v2945_v1 = vpop.f32.mrf.mxu1  ;;  %v3106_v56 = vpop.f32.mrf.mxu0  ;;  %3458 = vmatmul.mubr.bf16.gmra.mxu1 %v5489_v30  ;;  %4980 = vmatmul.mubr.bf16.gmra.mxu0 %v5493_v19  ;;  %v2660_v14 = vadd.f32 %v6939_v35, %v7670_v7  ;;  %v5498_v30 = vld [vmem:[%s7639_s0 + $0x3c8] ss:$36 sps:$4 sm:$0xff]   ;;  %v5502_v7 = vld [vmem:[%s7639_s0 + $0x410] ss:$36 sps:$4 sm:$0xff]  }
 0x22a   :  { %v7066_v11 = vadd.f32 %v2945_v1, %v2657_v62  ;;  %v7069_v28 = vadd.f32 %v3106_v56, %v7668_v57  ;;  %3465 = vmatprep.mubr.bf16.mxu1 %v5496_v23  ;;  %4983 = vmatprep.mubr.bf16.mxu0 %v5497_v16  ;;  %v7672_v56 = vld [vmem:[#allocation12_spill] sm:$0xff]  ;;  %v7674_v1 = vld [vmem:[#allocation5_spill] sm:$0xff] }
 0x22b   :  { %v2947_v44 = vpop.f32.mrf.mxu1  ;;  %v3108_v46 = vpop.f32.mrf.mxu0  ;;  %v2665_v57 = vadd.f32 %v6939_v35, %v7674_v1  ;;  %v5499_v1 = vld [vmem:[%s7639_s0 + $0x690] ss:$36 sps:$4 sm:$0xff]  }
 0x22c   :  { %7667 = vst [vmem:[#allocation3_spill] sm:$0xff] %v7066_v11  ;;  %7669 = vst [vmem:[#allocation11_spill] sm:$0xff] %v7069_v28  ;;  %v5501_v46 = vld [vmem:[%s7639_s0 + $0x694] ss:$36 sps:$4 sm:$0xff]  }
 0x22d   :  { %v2948_v47 = vpop.f32.mrf.mxu1  ;;  %v3109_v49 = vpop.f32.mrf.mxu0 }
 0x22e   :  { %v7079_v19 = vadd.f32 %v2948_v47, %v2660_v14  ;;  %v7082_v23 = vadd.f32 %v3109_v49, %v7672_v56  ;;  %v7676_v49 = vld [vmem:[#allocation13_spill] sm:$0xff] }
 0x22f   :  { %v2950_v16 = vpop.f32.mrf.mxu1  ;;  %v3111_v62 = vpop.f32.mrf.mxu0 }
 0x230   :  { %7671 = vst [vmem:[#allocation4_spill] sm:$0xff] %v7079_v19  ;;  %7673 = vst [vmem:[#allocation12_spill] sm:$0xff] %v7082_v23  ;;  %v7678_v19 = vld [vmem:[#allocation6_spill] sm:$0xff] }
 0x231   :  { %v2953_v44 = vpop.f32.mrf.mxu1  ;;  %v3114_v28 = vpop.f32.mrf.mxu0  ;;  %3466 = vmatmul.mubr.bf16.gmra.mxu1 %v5494_v2  ;;  %4984 = vmatmul.mubr.bf16.gmra.mxu0 %v5498_v30  ;;  %v2668_v16 = vadd.f32 %v6939_v35, %v7678_v19  ;;  %v5503_v2 = vld [vmem:[%s7639_s0 + $0x458] ss:$36 sps:$4 sm:$0xff]   ;;  %v5507_v19 = vld [vmem:[%s7639_s0 + $0x4a0] ss:$36 sps:$4 sm:$0xff]  }
 0x232   :  { %v7092_v14 = vadd.f32 %v2953_v44, %v2665_v57  ;;  %v7095_v47 = vadd.f32 %v3114_v28, %v7676_v49  ;;  %3473 = vmatprep.mubr.bf16.mxu1 %v5501_v46  ;;  %4987 = vmatprep.mubr.bf16.mxu0 %v5502_v7  ;;  %v7680_v28 = vld [vmem:[#allocation14_spill] sm:$0xff]  ;;  %v7682_v44 = vld [vmem:[#allocation7_spill] sm:$0xff] }
 0x233   :  { %v2955_v56 = vpop.f32.mrf.mxu1  ;;  %v3116_v23 = vpop.f32.mrf.mxu0  ;;  %v2673_v49 = vadd.f32 %v6939_v35, %v7682_v44  ;;  %v5504_v44 = vld [vmem:[%s7639_s0 + $0x6d8] ss:$36 sps:$4 sm:$0xff]  }
 0x234   :  { %7675 = vst [vmem:[#allocation5_spill] sm:$0xff] %v7092_v14  ;;  %7677 = vst [vmem:[#allocation13_spill] sm:$0xff] %v7095_v47  ;;  %v5506_v23 = vld [vmem:[%s7639_s0 + $0x6dc] ss:$36 sps:$4 sm:$0xff]  }
 0x235   :  { %v2956_v62 = vpop.f32.mrf.mxu1  ;;  %v3117_v11 = vpop.f32.mrf.mxu0 }
 0x236   :  { %v7105_v30 = vadd.f32 %v2956_v62, %v2668_v16  ;;  %v7108_v46 = vadd.f32 %v3117_v11, %v7680_v28  ;;  %v7683_v11 = vld [vmem:[#allocation15_spill] sm:$0xff] }
 0x237   :  { %v2958_v7 = vpop.f32.mrf.mxu1  ;;  %v3119_v57 = vpop.f32.mrf.mxu0 }
 0x238   :  { %7679 = vst [vmem:[#allocation6_spill] sm:$0xff] %v7105_v30  ;;  %7681 = vst [vmem:[#allocation14_spill] sm:$0xff] %v7108_v46  ;;  %v7684_v30 = vld [vmem:[#allocation8_spill] sm:$0xff] }
 0x239   :  { %v2961_v56 = vpop.f32.mrf.mxu1  ;;  %v3122_v47 = vpop.f32.mrf.mxu0  ;;  %3474 = vmatmul.mubr.bf16.gmra.mxu1 %v5499_v1  ;;  %4988 = vmatmul.mubr.bf16.gmra.mxu0 %v5503_v2  ;;  %v2676_v7 = vadd.f32 %v6939_v35, %v7684_v30  ;;  %v5508_v1 = vld [vmem:[%s7639_s0 + $0x4e8] ss:$36 sps:$4 sm:$0xff]   ;;  %v5512_v35 = vld [vmem:[%s7639_s0 + $0x530] ss:$36 sps:$4 sm:$0xff]  }
 0x23a   :  { %v7118_v16 = vadd.f32 %v2961_v56, %v2673_v49  ;;  %v7121_v62 = vadd.f32 %v3122_v47, %v7683_v11  ;;  %3481 = vmatprep.mubr.bf16.mxu1 %v5506_v23  ;;  %4991 = vmatprep.mubr.bf16.mxu0 %v5507_v19  ;;  %v7685_v47 = vld [vmem:[#allocation16_spill] sm:$0xff] }
 0x23b   :  { %v2963_v28 = vpop.f32.mrf.mxu1  ;;  %v3124_v46 = vpop.f32.mrf.mxu0 }
 0x23c   :  { %v5511_v46 = vld [vmem:[%s7639_s0 + $0x724] ss:$36 sps:$4 sm:$0xff]  }
 0x23d   :  { %v2964_v57 = vpop.f32.mrf.mxu1  ;;  %v3125_v14 = vpop.f32.mrf.mxu0 }
 0x23e   :  { %v7131_v2 = vadd.f32 %v2964_v57, %v2676_v7  ;;  %v7134_v23 = vadd.f32 %v3125_v14, %v7685_v47 }
 0x23f   :  { %v2966_v30 = vpop.f32.mrf.mxu1  ;;  %v3127_v19 = vpop.f32.mrf.mxu0 }
 0x240   :  { %v5509_v30 = vld [vmem:[%s7639_s0 + $0x720] ss:$36 sps:$4 sm:$0xff]  }
 0x241   :  { %v3130_v49 = vpop.f32.mrf.mxu0  ;;  %v3291_v56 = vpop.f32.mrf.mxu1  ;;  %3482 = vmatmul.mubr.bf16.gmra.mxu1 %v5504_v44  ;;  %4992 = vmatmul.mubr.bf16.gmra.mxu0 %v5508_v1  ;;  %v5513_v44 = vld [vmem:[%s7639_s0 + $0x578] ss:$36 sps:$4 sm:$0xff]   ;;  %v5516_v1 = vld [vmem:[%s7639_s0 + $0x76c] ss:$36 sps:$4 sm:$0xff]  }
 0x242   :  { %v7143_v11 = vadd.f32 %v3130_v49, %v6723_v0  ;;  %v7146_v14 = vadd.f32 %v3291_v56, %v6726_v40  ;;  %3489 = vmatprep.mubr.bf16.mxu1 %v5511_v46  ;;  %4995 = vmatprep.mubr.bf16.mxu0 %v5512_v35  ;;  %v5517_v46 = vld [vmem:[%s7639_s0 + $0x5c0] ss:$36 sps:$4 sm:$0xff]  }
 0x243   :  { %v3132_v28 = vpop.f32.mrf.mxu0  ;;  %v3293_v7 = vpop.f32.mrf.mxu1 }
 0x245   :  { %v3133_v57 = vpop.f32.mrf.mxu0  ;;  %v3294_v47 = vpop.f32.mrf.mxu1 }
 0x246   :  { %v7155_v0 = vadd.f32 %v3133_v57, %v6736_v48  ;;  %v7158_v40 = vadd.f32 %v3294_v47, %v6739_v39 }
 0x247   :  { %v3135_v35 = vpop.f32.mrf.mxu0  ;;  %v3296_v19 = vpop.f32.mrf.mxu1 }
 0x248   :  { %v5514_v35 = vld [vmem:[%s7639_s0 + $0x768] ss:$36 sps:$4 sm:$0xff]  }
 0x249   :  { %v3138_v49 = vpop.f32.mrf.mxu0  ;;  %v3299_v56 = vpop.f32.mrf.mxu1  ;;  %3490 = vmatmul.mubr.bf16.gmra.mxu1 %v5509_v30  ;;  %4996 = vmatmul.mubr.bf16.gmra.mxu0 %v5513_v44  ;;  %v5518_v30 = vld [vmem:[%s7639_s0 + $0x608] ss:$36 sps:$4 sm:$0xff]   ;;  %v5521_v44 = vld [vmem:[%s7639_s0 + $0x7b4] ss:$36 sps:$4 sm:$0xff]  }
 0x24a   :  { %v7167_v48 = vadd.f32 %v3138_v49, %v6749_v31  ;;  %v7170_v39 = vadd.f32 %v3299_v56, %v6752_v54  ;;  %3497 = vmatprep.mubr.bf16.mxu1 %v5516_v1  ;;  %4999 = vmatprep.mubr.bf16.mxu0 %v5517_v46  ;;  %v5522_v1 = vld [vmem:[%s7639_s0 + $0x650] ss:$36 sps:$4 sm:$0xff]  }
 0x24b   :  { %v3140_v28 = vpop.f32.mrf.mxu0  ;;  %v3301_v7 = vpop.f32.mrf.mxu1 }
 0x24d   :  { %v3141_v57 = vpop.f32.mrf.mxu0  ;;  %v3302_v47 = vpop.f32.mrf.mxu1 }
 0x24e   :  { %v7179_v31 = vadd.f32 %v3141_v57, %v6762_v6  ;;  %v7182_v54 = vadd.f32 %v3302_v47, %v6765_v8 }
 0x24f   :  { %v3143_v46 = vpop.f32.mrf.mxu0  ;;  %v3304_v19 = vpop.f32.mrf.mxu1 }
 0x250   :  { %v5519_v46 = vld [vmem:[%s7639_s0 + $0x7b0] ss:$36 sps:$4 sm:$0xff]  }
 0x251   :  { %v3146_v49 = vpop.f32.mrf.mxu0  ;;  %v3307_v56 = vpop.f32.mrf.mxu1  ;;  %3498 = vmatmul.mubr.bf16.gmra.mxu1 %v5514_v35  ;;  %5000 = vmatmul.mubr.bf16.gmra.mxu0 %v5518_v30  ;;  %v5523_v35 = vld [vmem:[%s7639_s0 + $0x698] ss:$36 sps:$4 sm:$0xff]  }
 0x252   :  { %v7191_v6 = vadd.f32 %v3146_v49, %v6775_v17  ;;  %v7194_v8 = vadd.f32 %v3307_v56, %v6778_v26  ;;  %3505 = vmatprep.mubr.bf16.mxu1 %v5521_v44  ;;  %5003 = vmatprep.mubr.bf16.mxu0 %v5522_v1  ;;  %v5526_v30 = vld [vmem:[%s7639_s0 + $0x7fc] ss:$36 sps:$4 sm:$0xff]  }
 0x253   :  { %v3148_v28 = vpop.f32.mrf.mxu0  ;;  %v3309_v7 = vpop.f32.mrf.mxu1  ;;  %v5527_v44 = vld [vmem:[%s7639_s0 + $0x6e0] ss:$36 sps:$4 sm:$0xff]  }
 0x255   :  { %v3149_v57 = vpop.f32.mrf.mxu0  ;;  %v3310_v47 = vpop.f32.mrf.mxu1 }
 0x256   :  { %v7203_v17 = vadd.f32 %v3149_v57, %v6788_v34  ;;  %v7206_v26 = vadd.f32 %v3310_v47, %v6791_v38 }
 0x257   :  { %v3151_v1 = vpop.f32.mrf.mxu0  ;;  %v3312_v19 = vpop.f32.mrf.mxu1 }
 0x258   :  { %v5524_v1 = vld [vmem:[%s7639_s0 + $0x7f8] ss:$36 sps:$4 sm:$0xff]  }
 0x259   :  { %v3154_v49 = vpop.f32.mrf.mxu0  ;;  %v3315_v56 = vpop.f32.mrf.mxu1  ;;  %3506 = vmatmul.mubr.bf16.gmra.mxu1 %v5519_v46  ;;  %5004 = vmatmul.mubr.bf16.gmra.mxu0 %v5523_v35  ;;  %v5528_v46 = vld [vmem:[%s7639_s0 + $0x728] ss:$36 sps:$4 sm:$0xff]  }
 0x25a   :  { %v7215_v34 = vadd.f32 %v3154_v49, %v6801_v60  ;;  %v7218_v38 = vadd.f32 %v3315_v56, %v6804_v53  ;;  %3513 = vmatprep.mubr.bf16.mxu1 %v5526_v30  ;;  %5007 = vmatprep.mubr.bf16.mxu0 %v5527_v44  ;;  %v5531_v35 = vld [vmem:[%s7639_s0 + $0x844] ss:$36 sps:$4 sm:$0xff]   ;;  %v5532_v30 = vld [vmem:[%s7639_s0 + $0x770] ss:$36 sps:$4 sm:$0xff]  }
 0x25b   :  { %v3156_v28 = vpop.f32.mrf.mxu0  ;;  %v3317_v7 = vpop.f32.mrf.mxu1 }
 0x25d   :  { %v3157_v57 = vpop.f32.mrf.mxu0  ;;  %v3318_v47 = vpop.f32.mrf.mxu1 }
 0x25e   :  { %v7227_v60 = vadd.f32 %v3157_v57, %v6814_v3  ;;  %v7230_v53 = vadd.f32 %v3318_v47, %v6817_v9 }
 0x25f   :  { %v3159_v44 = vpop.f32.mrf.mxu0  ;;  %v3320_v19 = vpop.f32.mrf.mxu1 }
 0x260   :  { %v5529_v44 = vld [vmem:[%s7639_s0 + $0x840] ss:$36 sps:$4 sm:$0xff]  }
 0x261   :  { %v3162_v49 = vpop.f32.mrf.mxu0  ;;  %v3323_v56 = vpop.f32.mrf.mxu1  ;;  %3514 = vmatmul.mubr.bf16.gmra.mxu1 %v5524_v1  ;;  %5008 = vmatmul.mubr.bf16.gmra.mxu0 %v5528_v46  ;;  %v5533_v1 = vld [vmem:[%s7639_s0 + $0x7b8] ss:$36 sps:$4 sm:$0xff]   ;;  %v5536_v46 = vld [vmem:[%s7639_s0 + $0x88c] ss:$36 sps:$4 sm:$0xff]  }
 0x262   :  { %v7239_v3 = vadd.f32 %v3162_v49, %v6827_v58  ;;  %v7242_v9 = vadd.f32 %v3323_v56, %v6830_v61  ;;  %3521 = vmatprep.mubr.bf16.mxu1 %v5531_v35  ;;  %5011 = vmatprep.mubr.bf16.mxu0 %v5532_v30  ;;  %v5537_v35 = vld [vmem:[%s7639_s0 + $0x800] ss:$36 sps:$4 sm:$0xff]  }
 0x263   :  { %v3164_v28 = vpop.f32.mrf.mxu0  ;;  %v3325_v7 = vpop.f32.mrf.mxu1 }
 0x265   :  { %v3165_v57 = vpop.f32.mrf.mxu0  ;;  %v3326_v47 = vpop.f32.mrf.mxu1 }
 0x266   :  { %v7251_v58 = vadd.f32 %v3165_v57, %v6840_v45  ;;  %v7254_v61 = vadd.f32 %v3326_v47, %v6843_v42 }
 0x267   :  { %v3167_v30 = vpop.f32.mrf.mxu0  ;;  %v3328_v19 = vpop.f32.mrf.mxu1 }
 0x268   :  { %v5534_v30 = vld [vmem:[%s7639_s0 + $0x888] ss:$36 sps:$4 sm:$0xff]  }
 0x269   :  { %v3170_v49 = vpop.f32.mrf.mxu0  ;;  %v3331_v56 = vpop.f32.mrf.mxu1  ;;  %3522 = vmatmul.mubr.bf16.gmra.mxu1 %v5529_v44  ;;  %5012 = vmatmul.mubr.bf16.gmra.mxu0 %v5533_v1  ;;  %v5538_v44 = vld [vmem:[%s7639_s0 + $0x848] ss:$36 sps:$4 sm:$0xff]   ;;  %v5541_v1 = vld [vmem:[%s7639_s0 + $0x8d4] ss:$36 sps:$4 sm:$0xff]  }
 0x26a   :  { %v7263_v45 = vadd.f32 %v3170_v49, %v6853_v25  ;;  %v7266_v42 = vadd.f32 %v3331_v56, %v6856_v59  ;;  %3529 = vmatprep.mubr.bf16.mxu1 %v5536_v46  ;;  %5015 = vmatprep.mubr.bf16.mxu0 %v5537_v35  ;;  %v5542_v46 = vld [vmem:[%s7639_s0 + $0x890] ss:$36 sps:$4 sm:$0xff]  }
 0x26b   :  { %v3172_v28 = vpop.f32.mrf.mxu0  ;;  %v3333_v7 = vpop.f32.mrf.mxu1 }
 0x26d   :  { %v3173_v57 = vpop.f32.mrf.mxu0  ;;  %v3334_v47 = vpop.f32.mrf.mxu1 }
 0x26e   :  { %v7275_v25 = vadd.f32 %v3173_v57, %v6866_v55  ;;  %v7278_v59 = vadd.f32 %v3334_v47, %v6869_v27 }
 0x26f   :  { %v3175_v35 = vpop.f32.mrf.mxu0  ;;  %v3336_v19 = vpop.f32.mrf.mxu1 }
 0x270   :  { %v5539_v35 = vld [vmem:[%s7639_s0 + $0x8d0] ss:$36 sps:$4 sm:$0xff]  }
 0x271   :  { %v3178_v49 = vpop.f32.mrf.mxu0  ;;  %v3339_v56 = vpop.f32.mrf.mxu1  ;;  %3530 = vmatmul.mubr.bf16.gmra.mxu1 %v5534_v30  ;;  %5016 = vmatmul.mubr.bf16.gmra.mxu0 %v5538_v44  ;;  %v5543_v30 = vld [vmem:[%s7639_s0 + $0x8d8] ss:$36 sps:$4 sm:$0xff]  }
 0x272   :  { %v7287_v55 = vadd.f32 %v3178_v49, %v6879_v4  ;;  %v7290_v27 = vadd.f32 %v3339_v56, %v6882_v50  ;;  %3537 = vmatprep.mubr.bf16.mxu1 %v5541_v1  ;;  %5019 = vmatprep.mubr.bf16.mxu0 %v5542_v46 }
 0x273   :  { %v3180_v28 = vpop.f32.mrf.mxu0  ;;  %v3341_v7 = vpop.f32.mrf.mxu1 }
 0x274   :  { %7686 = vst [vmem:[#allocation7_spill] sm:$0xff] %v7287_v55 }
 0x275   :  { %v3181_v57 = vpop.f32.mrf.mxu0  ;;  %v3342_v47 = vpop.f32.mrf.mxu1 }
 0x276   :  { %v7299_v4 = vadd.f32 %v3181_v57, %v6892_v12  ;;  %v7302_v50 = vadd.f32 %v3342_v47, %v6895_v5 }
 0x277   :  { %v3183_v44 = vpop.f32.mrf.mxu0  ;;  %v3344_v1 = vpop.f32.mrf.mxu1 }
 0x278   :  { %7687 = vst [vmem:[#allocation15_spill] sm:$0xff] %v7299_v4  ;;  %v7714_v4 = vld [vmem:[#allocation6_spill] sm:$0xff] }
 0x279   :  { %v3186_v46 = vpop.f32.mrf.mxu0  ;;  %v3347_v19 = vpop.f32.mrf.mxu1  ;;  %3538 = vmatmul.mubr.bf16.gmra.mxu1 %v5539_v35  ;;  %5020 = vmatmul.mubr.bf16.gmra.mxu0 %v5543_v30 }
 0x27a   :  { %v7305_v49 = vadd.f32 %v3186_v46, %v6905_v51  ;;  %v7308_v56 = vadd.f32 %v3347_v19, %v6908_v22 }
 0x27b   :  { %v3188_v28 = vpop.f32.mrf.mxu0  ;;  %v3349_v7 = vpop.f32.mrf.mxu1 }
 0x27d   :  { %v3189_v55 = vpop.f32.mrf.mxu0  ;;  %v3350_v12 = vpop.f32.mrf.mxu1 }
 0x27e   :  { %v7311_v57 = vadd.f32 %v3189_v55, %v6918_v24  ;;  %v7314_v5 = vadd.f32 %v3350_v12, %v6921_v52 }
 0x27f   :  { %v3191_v47 = vpop.f32.mrf.mxu0  ;;  %v3352_v44 = vpop.f32.mrf.mxu1 }
 0x280   :  { %7688 = vst [vmem:[#allocation8_spill] sm:$0xff] %v7311_v57 }
 0x281   :  { %v3194_v35 = vpop.f32.mrf.mxu0  ;;  %v3355_v30 = vpop.f32.mrf.mxu1 }
 0x282   :  { %v7317_v51 = vadd.f32 %v3194_v35, %v6931_v36  ;;  %v7320_v22 = vadd.f32 %v3355_v30, %v6934_v18 }
 0x283   :  { %v3196_v1 = vpop.f32.mrf.mxu0  ;;  %v3357_v46 = vpop.f32.mrf.mxu1 }
 0x284   :  { %7689 = vst [vmem:[#allocation16_spill] sm:$0xff] %v7317_v51  ;;  %v7708_v51 = vld [vmem:[#allocation4_spill] sm:$0xff] }
 0x285   :  { %v3197_v19 = vpop.f32.mrf.mxu0  ;;  %v3358_v28 = vpop.f32.mrf.mxu1 }
 0x286   :  { %v7323_v24 = vadd.f32 %v3197_v19, %v6949_v20  ;;  %v7326_v52 = vadd.f32 %v3358_v28, %v6952_v33 }
 0x287   :  { %v3199_v55 = vpop.f32.mrf.mxu0  ;;  %v3360_v7 = vpop.f32.mrf.mxu1 }
 0x288   :  { %7690 = vst [vmem:[#allocation20_spill] sm:$0xff] %v7323_v24  ;;  %v7702_v24 = vld [vmem:[#allocation2_spill] sm:$0xff] }
 0x289   :  { %v3202_v12 = vpop.f32.mrf.mxu0  ;;  %v3363_v47 = vpop.f32.mrf.mxu1 }
 0x28a   :  { %v7329_v36 = vadd.f32 %v3202_v12, %v6962_v63  ;;  %v7332_v18 = vadd.f32 %v3363_v47, %v6965_v13 }
 0x28b   :  { %v3204_v44 = vpop.f32.mrf.mxu0  ;;  %v3365_v35 = vpop.f32.mrf.mxu1 }
 0x28c   :  { %7691 = vst [vmem:[#allocation21_spill] sm:$0xff] %v7329_v36  ;;  %v7711_v36 = vld [vmem:[#allocation5_spill] sm:$0xff] }
 0x28d   :  { %v3205_v30 = vpop.f32.mrf.mxu0  ;;  %v3366_v1 = vpop.f32.mrf.mxu1 }
 0x28e   :  { %v7335_v20 = vadd.f32 %v3205_v30, %v6975_v41  ;;  %v7338_v33 = vadd.f32 %v3366_v1, %v6978_v32 }
 0x28f   :  { %v3207_v46 = vpop.f32.mrf.mxu0  ;;  %v3368_v19 = vpop.f32.mrf.mxu1 }
 0x290   :  { %7692 = vst [vmem:[#allocation22_spill] sm:$0xff] %v7335_v20  ;;  %v7705_v20 = vld [vmem:[#allocation3_spill] sm:$0xff] }
 0x291   :  { %v3210_v28 = vpop.f32.mrf.mxu0  ;;  %v3371_v55 = vpop.f32.mrf.mxu1 }
 0x292   :  { %v7341_v63 = vadd.f32 %v3210_v28, %v6988_v21  ;;  %v7344_v13 = vadd.f32 %v3371_v55, %v6991_v15 }
 0x293   :  { %v3212_v7 = vpop.f32.mrf.mxu0  ;;  %v3373_v12 = vpop.f32.mrf.mxu1 }
 0x294   :  { %7693 = vst [vmem:[#allocation23_spill] sm:$0xff] %v7341_v63  ;;  %v7696_v12 = vld [vmem:[#allocation17_spill] sm:$0xff]  ;;  %v7699_v63 = vld [vmem:[#allocation19_spill] sm:$0xff] }
 0x295   :  { %v3213_v47 = vpop.f32.mrf.mxu0  ;;  %v3374_v44 = vpop.f32.mrf.mxu1 }
 0x296   :  { %v7347_v41 = vadd.f32 %v3213_v47, %v7001_v43  ;;  %v7350_v32 = vadd.f32 %v3374_v44, %v7004_v10  ;;  %v7698_v47 = vld [vmem:[#allocation18_spill] sm:$0xff] }
 0x297   :  { %v3215_v35 = vpop.f32.mrf.mxu0  ;;  %v3376_v30 = vpop.f32.mrf.mxu1 }
 0x298   :  { %7694 = vst [vmem:[#allocation24_spill] sm:$0xff] %v7347_v41 }
 0x299   :  { %v3218_v1 = vpop.f32.mrf.mxu0  ;;  %v3379_v46 = vpop.f32.mrf.mxu1 }
 0x29a   :  { %v7353_v21 = vadd.f32 %v3218_v1, %v7014_v29  ;;  %v7356_v15 = vadd.f32 %v3379_v46, %v7017_v37  ;;  %v7701_v1 = vld [vmem:[#allocation9_spill] sm:$0xff] }
 0x29b   :  { %v3220_v19 = vpop.f32.mrf.mxu0  ;;  %v3381_v28 = vpop.f32.mrf.mxu1 }
 0x29c   :  { %7695 = vst [vmem:[#allocation25_spill] sm:$0xff] %v7353_v21 }
 0x29d   :  { %v3221_v55 = vpop.f32.mrf.mxu0  ;;  %v3382_v7 = vpop.f32.mrf.mxu1 }
 0x29e   :  { %v7359_v43 = vadd.f32 %v3221_v55, %v7696_v12  ;;  %v7362_v10 = vadd.f32 %v3382_v7, %v7698_v47  ;;  %v7704_v12 = vld [vmem:[#allocation10_spill] sm:$0xff] }
 0x29f   :  { %v3223_v44 = vpop.f32.mrf.mxu0  ;;  %v3384_v35 = vpop.f32.mrf.mxu1 }
 0x2a0   :  { %7697 = vst [vmem:[#allocation17_spill] sm:$0xff] %v7359_v43 }
 0x2a1   :  { %v3226_v30 = vpop.f32.mrf.mxu0  ;;  %v3387_v41 = vpop.f32.mrf.mxu1 }
 0x2a2   :  { %v7365_v29 = vadd.f32 %v3226_v30, %v7699_v63  ;;  %v7368_v37 = vadd.f32 %v3387_v41, %v7701_v1  ;;  %v7707_v30 = vld [vmem:[#allocation11_spill] sm:$0xff] }
 0x2a3   :  { %v3228_v46 = vpop.f32.mrf.mxu0  ;;  %v3389_v19 = vpop.f32.mrf.mxu1 }
 0x2a4   :  { %7700 = vst [vmem:[#allocation18_spill] sm:$0xff] %v7365_v29 }
 0x2a5   :  { %v3229_v28 = vpop.f32.mrf.mxu0  ;;  %v3390_v21 = vpop.f32.mrf.mxu1 }
 0x2a6   :  { %v7371_v55 = vadd.f32 %v3229_v28, %v7702_v24  ;;  %v7374_v7 = vadd.f32 %v3390_v21, %v7704_v12  ;;  %v7710_v28 = vld [vmem:[#allocation12_spill] sm:$0xff] }
 0x2a7   :  { %v3231_v47 = vpop.f32.mrf.mxu0  ;;  %v3392_v44 = vpop.f32.mrf.mxu1 }
 0x2a8   :  { %7703 = vst [vmem:[#allocation19_spill] sm:$0xff] %v7371_v55 }
 0x2a9   :  { %v3234_v35 = vpop.f32.mrf.mxu0  ;;  %v3395_v43 = vpop.f32.mrf.mxu1 }
 0x2aa   :  { %v7377_v63 = vadd.f32 %v3234_v35, %v7705_v20  ;;  %v7380_v41 = vadd.f32 %v3395_v43, %v7707_v30  ;;  %v7713_v35 = vld [vmem:[#allocation13_spill] sm:$0xff] }
 0x2ab   :  { %v3236_v1 = vpop.f32.mrf.mxu0  ;;  %v3397_v46 = vpop.f32.mrf.mxu1 }
 0x2ac   :  { %7706 = vst [vmem:[#allocation9_spill] sm:$0xff] %v7377_v63 }
 0x2ad   :  { %v3237_v19 = vpop.f32.mrf.mxu0  ;;  %v3398_v29 = vpop.f32.mrf.mxu1 }
 0x2ae   :  { %v7383_v24 = vadd.f32 %v3237_v19, %v7708_v51  ;;  %v7386_v21 = vadd.f32 %v3398_v29, %v7710_v28  ;;  %v7716_v19 = vld [vmem:[#allocation14_spill] sm:$0xff] }
 0x2af   :  { %v3239_v12 = vpop.f32.mrf.mxu0  ;;  %v3400_v47 = vpop.f32.mrf.mxu1 }
 0x2b0   :  { %7709 = vst [vmem:[#allocation2_spill] sm:$0xff] %v7383_v24 }
 0x2b1   :  { %v3242_v44 = vpop.f32.mrf.mxu0  ;;  %v3403_v55 = vpop.f32.mrf.mxu1 }
 0x2b2   :  { %v7389_v20 = vadd.f32 %v3242_v44, %v7711_v36  ;;  %v7392_v43 = vadd.f32 %v3403_v55, %v7713_v35 }
 0x2b3   :  { %v3244_v30 = vpop.f32.mrf.mxu0  ;;  %v3405_v1 = vpop.f32.mrf.mxu1 }
 0x2b4   :  { %7712 = vst [vmem:[#allocation10_spill] sm:$0xff] %v7389_v20 }
 0x2b5   :  { %v3245_v46 = vpop.f32.mrf.mxu0  ;;  %v3406_v63 = vpop.f32.mrf.mxu1 }
 0x2b6   :  { %v7395_v51 = vadd.f32 %v3245_v46, %v7714_v4  ;;  %v7398_v29 = vadd.f32 %v3406_v63, %v7716_v19 }
 0x2b7   :  { %v3247_v28 = vpop.f32.mrf.mxu0  ;;  %v3408_v12 = vpop.f32.mrf.mxu1 }
 0x2b8   :  { %7715 = vst [vmem:[#allocation3_spill] sm:$0xff] %v7395_v51 }
 0x2b9   :  { %v3250_v47 = vpop.f32.mrf.mxu0  ;;  %v3411_v24 = vpop.f32.mrf.mxu1 }
 0x2ba   :  { %v7401_v36 = vadd.f32 %v3250_v47, %v7118_v16  ;;  %v7404_v55 = vadd.f32 %v3411_v24, %v7121_v62 }
 0x2bb   :  { %v3252_v44 = vpop.f32.mrf.mxu0  ;;  %v3413_v35 = vpop.f32.mrf.mxu1 }
 0x2bc   :  { %7717 = vst [vmem:[#allocation11_spill] sm:$0xff] %v7401_v36 }
 0x2bd   :  { %v3253_v30 = vpop.f32.mrf.mxu0  ;;  %v7406_v1 = vpop.f32.mrf.mxu1 }
 0x2be   :  { %v7409_v4 = vadd.f32 %v3253_v30, %v7131_v2 }
 0x2bf   :  { %v3255_v63 = vpop.f32.mrf.mxu0  ;;  %v3416_v46 = vpop.f32.mrf.mxu1 }
 0x2c0   :  { %7718 = vst [vmem:[#allocation4_spill] sm:$0xff] %v7409_v4 }
 0x2c1   :  { %v3419_v19 = vpop.f32.mrf.mxu1  ;;  %v4961_v28 = vpop.f32.mrf.mxu0 }
 0x2c2   :  { %v7412_v12 = vadd.f32 %v3419_v19, %v7143_v11  ;;  %v3589_v62 = vadd.f32 %v4961_v28, %v7170_v39 }
 0x2c3   :  { %v3421_v16 = vpop.f32.mrf.mxu1  ;;  %v3580_v47 = vpop.f32.mrf.mxu0 }
 0x2c4   :  { %v3581_v35 = vadd.f32 %v3580_v47, %v7146_v14  ;;  %v3837_v46 = vmax.f32 %v3589_v62, 0.0 }
 0x2c5   :  { %v3422_v24 = vpop.f32.mrf.mxu1  ;;  %v4962_v44 = vpop.f32.mrf.mxu0 }
 0x2c6   :  { %v7417_v51 = vadd.f32 %v3422_v24, %v7155_v0  ;;  %v3592_v2 = vadd.f32 %v4962_v44, %v7182_v54  ;;  %v3835_v20 = vmax.f32 %v3581_v35, 0.0 }
 0x2c7   :  { %v3424_v30 = vpop.f32.mrf.mxu1  ;;  %v3583_v63 = vpop.f32.mrf.mxu0 }
 0x2c8   :  { %v3838_v4 = vmax.f32 %v3592_v2, 0.0  ;;  %v3584_v11 = vadd.f32 %v3583_v63, %v7158_v40 }
 0x2c9   :  { %v7421_v19 = vpop.f32.mrf.mxu1  ;;  %v4965_v16 = vpop.f32.mrf.mxu0 }
 0x2ca   :  { %v4720_v39 = vpack.c.bf16 %v3838_v4, %v3837_v46  ;;  %v3836_v28 = vmax.f32 %v3584_v11, 0.0  ;;  %v3605_v0 = vadd.f32 %v4965_v16, %v7218_v38 }
 0x2cb   :  { %v3429_v36 = vpop.f32.mrf.mxu1  ;;  %v3596_v57 = vpop.f32.mrf.mxu0 }
 0x2cc   :  { %4872 = vst [vmem:[%s7641_s3 + $0x8] sm:$0xff] %v4720_v39   ;;  %v4715_v14 = vpack.c.bf16 %v3836_v28, %v3835_v20  ;;  %v3597_v40 = vadd.f32 %v3596_v57, %v7194_v8  ;;  %v3841_v24 = vmax.f32 %v3605_v0, 0.0 }
 0x2cd   :  { %v7427_v54 = vpop.f32.mrf.mxu1  ;;  %v4966_v47 = vpop.f32.mrf.mxu0 }
 0x2ce   :  { %4716 = vst [vmem:[%s7641_s3] sm:$0xff] %v4715_v14   ;;  %v3608_v4 = vadd.f32 %v4966_v47, %v7230_v53  ;;  %v3839_v2 = vmax.f32 %v3597_v40, 0.0 }
 0x2cf   :  { %v3432_v36 = vpop.f32.mrf.mxu1  ;;  %v3599_v62 = vpop.f32.mrf.mxu0 }
 0x2d0   :  { %v3842_v44 = vmax.f32 %v3608_v4, 0.0  ;;  %v3600_v35 = vadd.f32 %v3599_v62, %v7206_v26 }
 0x2d1   :  { %v7435_v20 = vpop.f32.mrf.mxu1  ;;  %v4969_v38 = vpop.f32.mrf.mxu0 }
 0x2d2   :  { %v4730_v30 = vpack.c.bf16 %v3842_v44, %v3841_v24  ;;  %v3840_v63 = vmax.f32 %v3600_v35, 0.0  ;;  %v3621_v53 = vadd.f32 %v4969_v38, %v7266_v42 }
 0x2d3   :  { %v3437_v46 = vpop.f32.mrf.mxu1  ;;  %v3612_v11 = vpop.f32.mrf.mxu0 }
 0x2d4   :  { %4874 = vst [vmem:[%s7641_s3 + $0x18] sm:$0xff] %v4730_v30   ;;  %v4725_v8 = vpack.c.bf16 %v3840_v63, %v3839_v2  ;;  %v3613_v26 = vadd.f32 %v3612_v11, %v7242_v9  ;;  %v3845_v0 = vmax.f32 %v3621_v53, 0.0 }
 0x2d5   :  { %v7441_v57 = vpop.f32.mrf.mxu1  ;;  %v4970_v16 = vpop.f32.mrf.mxu0 }
 0x2d6   :  { %4873 = vst [vmem:[%s7641_s3 + $0x10] sm:$0xff] %v4725_v8   ;;  %v3624_v39 = vadd.f32 %v4970_v16, %v7278_v59  ;;  %v3843_v36 = vmax.f32 %v3613_v26, 0.0 }
 0x2d7   :  { %v3440_v28 = vpop.f32.mrf.mxu1  ;;  %v3615_v14 = vpop.f32.mrf.mxu0 }
 0x2d8   :  { %v3846_v47 = vmax.f32 %v3624_v39, 0.0  ;;  %v3616_v40 = vadd.f32 %v3615_v14, %v7254_v61 }
 0x2d9   :  { %v7449_v4 = vpop.f32.mrf.mxu1  ;;  %v4973_v42 = vpop.f32.mrf.mxu0 }
 0x2da   :  { %v4740_v62 = vpack.c.bf16 %v3846_v47, %v3845_v0  ;;  %v3844_v24 = vmax.f32 %v3616_v40, 0.0  ;;  %v3637_v59 = vadd.f32 %v4973_v42, %v7308_v56 }
 0x2db   :  { %v3445_v44 = vpop.f32.mrf.mxu1  ;;  %v3628_v35 = vpop.f32.mrf.mxu0 }
 0x2dc   :  { %4876 = vst [vmem:[%s7641_s3 + $0x28] sm:$0xff] %v4740_v62   ;;  %v4735_v9 = vpack.c.bf16 %v3844_v24, %v3843_v36  ;;  %v3629_v61 = vadd.f32 %v3628_v35, %v7290_v27  ;;  %v3849_v11 = vmax.f32 %v3637_v59, 0.0 }
 0x2dd   :  { %v7455_v38 = vpop.f32.mrf.mxu1  ;;  %v4974_v2 = vpop.f32.mrf.mxu0 }
 0x2de   :  { %4875 = vst [vmem:[%s7641_s3 + $0x20] sm:$0xff] %v4735_v9   ;;  %v3640_v30 = vadd.f32 %v4974_v2, %v7314_v5  ;;  %v3847_v26 = vmax.f32 %v3629_v61, 0.0 }
 0x2df   :  { %v3448_v63 = vpop.f32.mrf.mxu1  ;;  %v3631_v46 = vpop.f32.mrf.mxu0 }
 0x2e0   :  { %v3850_v8 = vmax.f32 %v3640_v30, 0.0  ;;  %v3632_v53 = vadd.f32 %v3631_v46, %v7302_v50 }
 0x2e1   :  { %v7463_v16 = vpop.f32.mrf.mxu1  ;;  %v4977_v56 = vpop.f32.mrf.mxu0 }
 0x2e2   :  { %v4750_v39 = vpack.c.bf16 %v3850_v8, %v3849_v11  ;;  %v3848_v28 = vmax.f32 %v3632_v53, 0.0  ;;  %v3653_v5 = vadd.f32 %v4977_v56, %v7332_v18 }
 0x2e3   :  { %v3453_v14 = vpop.f32.mrf.mxu1  ;;  %v3644_v0 = vpop.f32.mrf.mxu0 }
 0x2e4   :  { %4878 = vst [vmem:[%s7641_s3 + $0x38] sm:$0xff] %v4750_v39   ;;  %v4745_v27 = vpack.c.bf16 %v3848_v28, %v3847_v26  ;;  %v3645_v50 = vadd.f32 %v3644_v0, %v7320_v22  ;;  %v3853_v24 = vmax.f32 %v3653_v5, 0.0 }
 0x2e5   :  { %v7469_v47 = vpop.f32.mrf.mxu1  ;;  %v4978_v40 = vpop.f32.mrf.mxu0 }
 0x2e6   :  { %4877 = vst [vmem:[%s7641_s3 + $0x30] sm:$0xff] %v4745_v27   ;;  %v3656_v42 = vadd.f32 %v4978_v40, %v7338_v33  ;;  %v3851_v59 = vmax.f32 %v3645_v50, 0.0 }
 0x2e7   :  { %v3456_v36 = vpop.f32.mrf.mxu1  ;;  %v3647_v62 = vpop.f32.mrf.mxu0 }
 0x2e8   :  { %v3854_v44 = vmax.f32 %v3656_v42, 0.0  ;;  %v3648_v35 = vadd.f32 %v3647_v62, %v7326_v52 }
 0x2e9   :  { %v7477_v9 = vpop.f32.mrf.mxu1  ;;  %v4981_v18 = vpop.f32.mrf.mxu0 }
 0x2ea   :  { %v4760_v2 = vpack.c.bf16 %v3854_v44, %v3853_v24  ;;  %v3852_v61 = vmax.f32 %v3648_v35, 0.0  ;;  %v3669_v33 = vadd.f32 %v4981_v18, %v7356_v15 }
 0x2eb   :  { %v3461_v30 = vpop.f32.mrf.mxu1  ;;  %v3660_v63 = vpop.f32.mrf.mxu0 }
 0x2ec   :  { %4880 = vst [vmem:[%s7641_s3 + $0x48] sm:$0xff] %v4760_v2   ;;  %v4755_v22 = vpack.c.bf16 %v3852_v61, %v3851_v59  ;;  %v3661_v52 = vadd.f32 %v3660_v63, %v7344_v13  ;;  %v3857_v26 = vmax.f32 %v3669_v33, 0.0 }
 0x2ed   :  { %v7483_v46 = vpop.f32.mrf.mxu1  ;;  %v4982_v11 = vpop.f32.mrf.mxu0 }
 0x2ee   :  { %4879 = vst [vmem:[%s7641_s3 + $0x40] sm:$0xff] %v4755_v22   ;;  %v3672_v8 = vadd.f32 %v4982_v11, %v7362_v10  ;;  %v3855_v0 = vmax.f32 %v3661_v52, 0.0  ;;  %v3415_v11 = vadd.f32 %v7406_v1, %v7134_v23 }
 0x2ef   :  { %v3464_v53 = vpop.f32.mrf.mxu1  ;;  %v3663_v56 = vpop.f32.mrf.mxu0 }
 0x2f0   :  { %v3858_v39 = vmax.f32 %v3672_v8, 0.0  ;;  %v3664_v28 = vadd.f32 %v3663_v56, %v7350_v32 }
 0x2f1   :  { %v7491_v14 = vpop.f32.mrf.mxu1  ;;  %v4985_v15 = vpop.f32.mrf.mxu0 }
 0x2f2   :  { %v4770_v27 = vpack.c.bf16 %v3858_v39, %v3857_v26  ;;  %v3856_v5 = vmax.f32 %v3664_v28, 0.0  ;;  %v3685_v10 = vadd.f32 %v4985_v15, %v7380_v41 }
 0x2f3   :  { %v3469_v40 = vpop.f32.mrf.mxu1  ;;  %v3676_v50 = vpop.f32.mrf.mxu0 }
 0x2f4   :  { %4882 = vst [vmem:[%s7641_s3 + $0x58] sm:$0xff] %v4770_v27   ;;  %v4765_v13 = vpack.c.bf16 %v3856_v5, %v3855_v0  ;;  %v3677_v32 = vadd.f32 %v3676_v50, %v7368_v37  ;;  %v3861_v35 = vmax.f32 %v3685_v10, 0.0 }
 0x2f5   :  { %v7497_v42 = vpop.f32.mrf.mxu1  ;;  %v4986_v36 = vpop.f32.mrf.mxu0 }
 0x2f6   :  { %4881 = vst [vmem:[%s7641_s3 + $0x50] sm:$0xff] %v4765_v13   ;;  %v3688_v62 = vadd.f32 %v4986_v36, %v7386_v21  ;;  %v3859_v61 = vmax.f32 %v3677_v32, 0.0 }
 0x2f7   :  { %v3472_v24 = vpop.f32.mrf.mxu1  ;;  %v3679_v44 = vpop.f32.mrf.mxu0 }
 0x2f8   :  { %v3862_v18 = vmax.f32 %v3688_v62, 0.0  ;;  %v3680_v59 = vadd.f32 %v3679_v44, %v7374_v7 }
 0x2f9   :  { %v7505_v2 = vpop.f32.mrf.mxu1  ;;  %v4989_v41 = vpop.f32.mrf.mxu0 }
 0x2fa   :  { %v4780_v30 = vpack.c.bf16 %v3862_v18, %v3861_v35  ;;  %v3860_v63 = vmax.f32 %v3680_v59, 0.0  ;;  %v3701_v21 = vadd.f32 %v4989_v41, %v7404_v55  ;;  %v3428_v55 = vadd.f32 %v7421_v19, %v7167_v48 }
 0x2fb   :  { %v3477_v22 = vpop.f32.mrf.mxu1  ;;  %v3692_v33 = vpop.f32.mrf.mxu0  ;;  %v3444_v18 = vadd.f32 %v7449_v4, %v7215_v34  ;;  %v3439_v4 = vadd.f32 %v7441_v57, %v7203_v17 }
 0x2fc   :  { %4884 = vst [vmem:[%s7641_s3 + $0x68] sm:$0xff] %v4780_v30   ;;  %v4775_v37 = vpack.c.bf16 %v3860_v63, %v3859_v61  ;;  %v3693_v8 = vadd.f32 %v3692_v33, %v7392_v43  ;;  %v3865_v23 = vmax.f32 %v3701_v21, 0.0  ;;  %v3431_v43 = vadd.f32 %v7427_v54, %v7179_v31 }
 0x2fd   :  { %v7513_v52 = vpop.f32.mrf.mxu1  ;;  %v4990_v7 = vpop.f32.mrf.mxu0  ;;  %v3447_v22 = vadd.f32 %v7455_v38, %v7227_v60 }
 0x2fe   :  { %4883 = vst [vmem:[%s7641_s3 + $0x60] sm:$0xff] %v4775_v37   ;;  %v3704_v53 = vadd.f32 %v4990_v7, %v3415_v11  ;;  %v3863_v0 = vmax.f32 %v3693_v8, 0.0 }
 0x2ff   :  { %v3480_v56 = vpop.f32.mrf.mxu1  ;;  %v3695_v26 = vpop.f32.mrf.mxu0 }
 0x300   :  { %v3866_v1 = vmax.f32 %v3704_v53, 0.0  ;;  %v3696_v39 = vadd.f32 %v3695_v26, %v7398_v29  ;;  %v3460_v56 = vadd.f32 %v7477_v9, %v7263_v45  ;;  %v3455_v9 = vadd.f32 %v7469_v47, %v7251_v58 }
 0x301   :  { %v7520_v28 = vpop.f32.mrf.mxu1  ;;  %v4993_v15 = vpop.f32.mrf.mxu0 }
 0x302   :  { %v4790_v27 = vpack.c.bf16 %v3866_v1, %v3865_v23  ;;  %v3864_v5 = vmax.f32 %v3696_v39, 0.0  ;;  %v3717_v29 = vadd.f32 %v4993_v15, %v3428_v55  ;;  %v3452_v39 = vadd.f32 %v7463_v16, %v7239_v3 }
 0x303   :  { %v3485_v40 = vpop.f32.mrf.mxu1  ;;  %v3708_v50 = vpop.f32.mrf.mxu0  ;;  %v3463_v15 = vadd.f32 %v7483_v46, %v7275_v25 }
 0x304   :  { %4886 = vst [vmem:[%s7641_s3 + $0x78] sm:$0xff] %v4790_v27   ;;  %v4785_v13 = vpack.c.bf16 %v3864_v5, %v3863_v0  ;;  %v3709_v48 = vadd.f32 %v3708_v50, %v7412_v12  ;;  %v3869_v24 = vmax.f32 %v3717_v29, 0.0  ;;  %v3436_v12 = vadd.f32 %v7435_v20, %v7191_v6 }
 0x305   :  { %v7529_v10 = vpop.f32.mrf.mxu1  ;;  %v4994_v36 = vpop.f32.mrf.mxu0  ;;  %v3476_v29 = vadd.f32 %v7505_v2, %v7305_v49  ;;  %v7721_v49 = vld [vmem:[#allocation15_spill] sm:$0xff] }
 0x306   :  { %4885 = vst [vmem:[%s7641_s3 + $0x70] sm:$0xff] %v4785_v13   ;;  %v3720_v19 = vadd.f32 %v4994_v36, %v3431_v43  ;;  %v3867_v59 = vmax.f32 %v3709_v48, 0.0  ;;  %v3471_v2 = vadd.f32 %v7497_v42, %v7721_v49  ;;  %v7730_v49 = vld [vmem:[#allocation9_spill] sm:$0xff] }
 0x307   :  { %v3488_v32 = vpop.f32.mrf.mxu1  ;;  %v3711_v62 = vpop.f32.mrf.mxu0 }
 0x308   :  { %v3870_v31 = vmax.f32 %v3720_v19, 0.0  ;;  %v3712_v54 = vadd.f32 %v3711_v62, %v7417_v51  ;;  %v7719_v32 = vld [vmem:[#allocation7_spill] sm:$0xff] }
 0x309   :  { %v7536_v44 = vpop.f32.mrf.mxu1  ;;  %v4997_v35 = vpop.f32.mrf.mxu0  ;;  %v3468_v62 = vadd.f32 %v7491_v14, %v7719_v32 }
 0x30a   :  { %v4800_v41 = vpack.c.bf16 %v3870_v31, %v3869_v24  ;;  %v3868_v61 = vmax.f32 %v3712_v54, 0.0  ;;  %v3733_v33 = vadd.f32 %v4997_v35, %v3444_v18  ;;  %v7720_v24 = vld [vmem:[#allocation8_spill] sm:$0xff] }
 0x30b   :  { %v3493_v30 = vpop.f32.mrf.mxu1  ;;  %v3724_v63 = vpop.f32.mrf.mxu0  ;;  %v3479_v31 = vadd.f32 %v7513_v52, %v7720_v24 }
 0x30c   :  { %4888 = vst [vmem:[%s7641_s3 + $0x88] sm:$0xff] %v4800_v41   ;;  %v4795_v51 = vpack.c.bf16 %v3868_v61, %v3867_v59  ;;  %v3725_v6 = vadd.f32 %v3724_v63, %v3436_v12  ;;  %v3873_v38 = vmax.f32 %v3733_v33, 0.0  ;;  %v7722_v33 = vld [vmem:[#allocation21_spill] sm:$0xff] }
 0x30d   :  { %v7547_v11 = vpop.f32.mrf.mxu1  ;;  %v4998_v34 = vpop.f32.mrf.mxu0 }
 0x30e   :  { %4887 = vst [vmem:[%s7641_s3 + $0x80] sm:$0xff] %v4795_v51   ;;  %v3736_v20 = vadd.f32 %v4998_v34, %v3447_v22  ;;  %v3871_v26 = vmax.f32 %v3725_v6, 0.0  ;;  %v3492_v34 = vadd.f32 %v7536_v44, %v7722_v33  ;;  %v7725_v44 = vld [vmem:[#allocation20_spill] sm:$0xff] }
 0x30f   :  { %v3496_v37 = vpop.f32.mrf.mxu1  ;;  %v3727_v60 = vpop.f32.mrf.mxu0 }
 0x310   :  { %v3874_v21 = vmax.f32 %v3736_v20, 0.0  ;;  %v3728_v7 = vadd.f32 %v3727_v60, %v3439_v4  ;;  %v7723_v60 = vld [vmem:[#allocation16_spill] sm:$0xff] }
 0x311   :  { %v7554_v8 = vpop.f32.mrf.mxu1  ;;  %v5001_v53 = vpop.f32.mrf.mxu0 }
 0x312   :  { %v4810_v23 = vpack.c.bf16 %v3874_v21, %v3873_v38  ;;  %v3872_v17 = vmax.f32 %v3728_v7, 0.0  ;;  %v3749_v0 = vadd.f32 %v5001_v53, %v3460_v56  ;;  %v3484_v38 = vadd.f32 %v7520_v28, %v7723_v60  ;;  %v7724_v21 = vld [vmem:[#allocation22_spill] sm:$0xff] }
 0x313   :  { %v3501_v57 = vpop.f32.mrf.mxu1  ;;  %v3740_v1 = vpop.f32.mrf.mxu0  ;;  %v3495_v7 = vadd.f32 %v7547_v11, %v7724_v21 }
 0x314   :  { %4890 = vst [vmem:[%s7641_s3 + $0x98] sm:$0xff] %v4810_v23   ;;  %v4805_v55 = vpack.c.bf16 %v3872_v17, %v3871_v26  ;;  %v3741_v3 = vadd.f32 %v3740_v1, %v3452_v39  ;;  %v3877_v46 = vmax.f32 %v3749_v0, 0.0  ;;  %v3487_v17 = vadd.f32 %v7529_v10, %v7725_v44 }
 0x315   :  { %v7565_v27 = vpop.f32.mrf.mxu1  ;;  %v5002_v45 = vpop.f32.mrf.mxu0 }
 0x316   :  { %4889 = vst [vmem:[%s7641_s3 + $0x90] sm:$0xff] %v4805_v55   ;;  %v3752_v16 = vadd.f32 %v5002_v45, %v3463_v15  ;;  %v3875_v36 = vmax.f32 %v3741_v3, 0.0 }
 0x317   :  { %v3504_v5 = vpop.f32.mrf.mxu1  ;;  %v3743_v25 = vpop.f32.mrf.mxu0 }
 0x318   :  { %v3878_v40 = vmax.f32 %v3752_v16, 0.0  ;;  %v3744_v50 = vadd.f32 %v3743_v25, %v3455_v9  ;;  %v7726_v9 = vld [vmem:[#allocation25_spill] sm:$0xff] }
 0x319   :  { %v3507_v43 = vpop.f32.mrf.mxu1  ;;  %v5005_v13 = vpop.f32.mrf.mxu0 }
 0x31a   :  { %v4820_v48 = vpack.c.bf16 %v3878_v40, %v3877_v46  ;;  %v3876_v19 = vmax.f32 %v3744_v50, 0.0  ;;  %v3765_v35 = vadd.f32 %v5005_v13, %v3476_v29  ;;  %v3508_v3 = vadd.f32 %v3507_v43, %v7726_v9  ;;  %v7727_v40 = vld [vmem:[#allocation23_spill] sm:$0xff]  ;;  %v7728_v13 = vld [vmem:[#allocation17_spill] sm:$0xff] }
 0x31b   :  { %v3509_v58 = vpop.f32.mrf.mxu1  ;;  %v3756_v47 = vpop.f32.mrf.mxu0  ;;  %v3500_v50 = vadd.f32 %v7554_v8, %v7727_v40  ;;  %v7736_v9 = vld [vmem:[#allocation3_spill] sm:$0xff] }
 0x31c   :  { %4892 = vst [vmem:[%s7641_s3 + $0xa8] sm:$0xff] %v4820_v48   ;;  %v4815_v54 = vpack.c.bf16 %v3876_v19, %v3875_v36  ;;  %v3757_v41 = vadd.f32 %v3756_v47, %v3468_v62  ;;  %v3881_v52 = vmax.f32 %v3765_v35, 0.0  ;;  %v7729_v47 = vld [vmem:[#allocation24_spill] sm:$0xff] }
 0x31d   :  { %v3510_v18 = vpop.f32.mrf.mxu1  ;;  %v5006_v59 = vpop.f32.mrf.mxu0  ;;  %v3503_v43 = vadd.f32 %v7565_v27, %v7729_v47 }
 0x31e   :  { %4891 = vst [vmem:[%s7641_s3 + $0xa0] sm:$0xff] %v4815_v54   ;;  %v3768_v14 = vadd.f32 %v5006_v59, %v3479_v31  ;;  %v3879_v4 = vmax.f32 %v3757_v41, 0.0  ;;  %v3511_v29 = vadd.f32 %v3510_v18, %v7728_v13 }
 0x31f   :  { %v3512_v61 = vpop.f32.mrf.mxu1  ;;  %v3759_v30 = vpop.f32.mrf.mxu0 }
 0x320   :  { %v3882_v63 = vmax.f32 %v3768_v14, 0.0  ;;  %v3760_v12 = vadd.f32 %v3759_v30, %v3471_v2 }
 0x321   :  { %v3515_v22 = vpop.f32.mrf.mxu1  ;;  %v5009_v51 = vpop.f32.mrf.mxu0 }
 0x322   :  { %v4830_v6 = vpack.c.bf16 %v3882_v63, %v3881_v52  ;;  %v3880_v20 = vmax.f32 %v3760_v12, 0.0  ;;  %v3781_v56 = vadd.f32 %v5009_v51, %v3492_v34  ;;  %v7731_v52 = vld [vmem:[#allocation18_spill] sm:$0xff] }
 0x323   :  { %v3517_v42 = vpop.f32.mrf.mxu1  ;;  %v3772_v37 = vpop.f32.mrf.mxu0  ;;  %v3516_v63 = vadd.f32 %v3515_v22, %v7731_v52  ;;  %v7732_v12 = vld [vmem:[#allocation2_spill] sm:$0xff] }
 0x324   :  { %4894 = vst [vmem:[%s7641_s3 + $0xb8] sm:$0xff] %v4830_v6   ;;  %v4825_v53 = vpack.c.bf16 %v3880_v20, %v3879_v4  ;;  %v3773_v57 = vadd.f32 %v3772_v37, %v3484_v38  ;;  %v3885_v11 = vmax.f32 %v3781_v56, 0.0  ;;  %v7733_v20 = vld [vmem:[#allocation19_spill] sm:$0xff] }
 0x325   :  { %v3518_v26 = vpop.f32.mrf.mxu1  ;;  %v5010_v23 = vpop.f32.mrf.mxu0 }
 0x326   :  { %4893 = vst [vmem:[%s7641_s3 + $0xb0] sm:$0xff] %v4825_v53   ;;  %v3784_v28 = vadd.f32 %v5010_v23, %v3495_v7  ;;  %v3883_v16 = vmax.f32 %v3773_v57, 0.0  ;;  %v3519_v42 = vadd.f32 %v3518_v26, %v7733_v20 }
 0x327   :  { %v3520_v1 = vpop.f32.mrf.mxu1  ;;  %v3775_v39 = vpop.f32.mrf.mxu0 }
 0x328   :  { %v3886_v15 = vmax.f32 %v3784_v28, 0.0  ;;  %v3776_v55 = vadd.f32 %v3775_v39, %v3487_v17  ;;  %v7734_v28 = vld [vmem:[#allocation11_spill] sm:$0xff] }
 0x329   :  { %v3523_v0 = vpop.f32.mrf.mxu1  ;;  %v5013_v45 = vpop.f32.mrf.mxu0 }
 0x32a   :  { %v4840_v5 = vpack.c.bf16 %v3886_v15, %v3885_v11  ;;  %v3884_v25 = vmax.f32 %v3776_v55, 0.0  ;;  %v3797_v48 = vadd.f32 %v5013_v45, %v3508_v3  ;;  %v3524_v2 = vadd.f32 %v3523_v0, %v7730_v49  ;;  %v7735_v11 = vld [vmem:[#allocation10_spill] sm:$0xff] }
 0x32b   :  { %v3525_v46 = vpop.f32.mrf.mxu1  ;;  %v3788_v10 = vpop.f32.mrf.mxu0 }
 0x32c   :  { %4896 = vst [vmem:[%s7641_s3 + $0xc8] sm:$0xff] %v4840_v5   ;;  %v4835_v36 = vpack.c.bf16 %v3884_v25, %v3883_v16  ;;  %v3789_v32 = vadd.f32 %v3788_v10, %v3500_v50  ;;  %v3889_v31 = vmax.f32 %v3797_v48, 0.0  ;;  %v7737_v25 = vld [vmem:[#allocation4_spill] sm:$0xff] }
 0x32d   :  { %v3526_v19 = vpop.f32.mrf.mxu1  ;;  %v5014_v58 = vpop.f32.mrf.mxu0 }
 0x32e   :  { %4895 = vst [vmem:[%s7641_s3 + $0xc0] sm:$0xff] %v4835_v36   ;;  %v3800_v62 = vadd.f32 %v5014_v58, %v3511_v29  ;;  %v3887_v41 = vmax.f32 %v3789_v32, 0.0  ;;  %v3527_v51 = vadd.f32 %v3526_v19, %v7732_v12 }
 0x32f   :  { %v3528_v8 = vpop.f32.mrf.mxu1  ;;  %v3791_v24 = vpop.f32.mrf.mxu0 }
 0x330   :  { %v3890_v54 = vmax.f32 %v3800_v62, 0.0  ;;  %v3792_v35 = vadd.f32 %v3791_v24, %v3503_v43 }
 0x331   :  { %v3531_v18 = vpop.f32.mrf.mxu1  ;;  %v5017_v59 = vpop.f32.mrf.mxu0 }
 0x332   :  { %v4850_v14 = vpack.c.bf16 %v3890_v54, %v3889_v31  ;;  %v3888_v61 = vmax.f32 %v3792_v35, 0.0  ;;  %v3813_v34 = vadd.f32 %v5017_v59, %v3524_v2  ;;  %v3532_v15 = vadd.f32 %v3531_v18, %v7735_v11 }
 0x333   :  { %v3533_v30 = vpop.f32.mrf.mxu1  ;;  %v3804_v27 = vpop.f32.mrf.mxu0 }
 0x334   :  { %4898 = vst [vmem:[%s7641_s3 + $0xd8] sm:$0xff] %v4850_v14   ;;  %v4845_v33 = vpack.c.bf16 %v3888_v61, %v3887_v41  ;;  %v3805_v37 = vadd.f32 %v3804_v27, %v3516_v63  ;;  %v3893_v21 = vmax.f32 %v3813_v34, 0.0 }
 0x335   :  { %v3534_v4 = vpop.f32.mrf.mxu1  ;;  %v5018_v6 = vpop.f32.mrf.mxu0 }
 0x336   :  { %4897 = vst [vmem:[%s7641_s3 + $0xd0] sm:$0xff] %v4845_v33   ;;  %v3816_v60 = vadd.f32 %v5018_v6, %v3527_v51  ;;  %v3891_v44 = vmax.f32 %v3805_v37, 0.0  ;;  %v3535_v3 = vadd.f32 %v3534_v4, %v7736_v9 }
 0x337   :  { %v3536_v38 = vpop.f32.mrf.mxu1  ;;  %v3807_v22 = vpop.f32.mrf.mxu0 }
 0x338   :  { %v3894_v7 = vmax.f32 %v3816_v60, 0.0  ;;  %v3808_v53 = vadd.f32 %v3807_v22, %v3519_v42 }
 0x339   :  { %v3539_v56 = vpop.f32.mrf.mxu1  ;;  %v5021_v23 = vpop.f32.mrf.mxu0 }
 0x33a   :  { %v4860_v17 = vpack.c.bf16 %v3894_v7, %v3893_v21  ;;  %v3892_v57 = vmax.f32 %v3808_v53, 0.0  ;;  %v3540_v1 = vadd.f32 %v3539_v56, %v7734_v28 }
 0x33b   :  { %v3541_v39 = vpop.f32.mrf.mxu1  ;;  %v3820_v26 = vpop.f32.mrf.mxu0 }
 0x33c   :  { %4900 = vst [vmem:[%s7641_s3 + $0xe8] sm:$0xff] %v4860_v17   ;;  %v4855_v55 = vpack.c.bf16 %v3892_v57, %v3891_v44  ;;  %v3829_v16 = vadd.f32 %v5021_v23, %v3540_v1  ;;  %v3821_v5 = vadd.f32 %v3820_v26, %v3532_v15 }
 0x33d   :  { %v3542_v0 = vpop.f32.mrf.mxu1  ;;  %v5022_v45 = vpop.f32.mrf.mxu0 }
 0x33e   :  { %4899 = vst [vmem:[%s7641_s3 + $0xe0] sm:$0xff] %v4855_v55   ;;  %v3543_v46 = vadd.f32 %v3542_v0, %v7737_v25  ;;  %v3897_v29 = vmax.f32 %v3829_v16, 0.0  ;;  %v3895_v36 = vmax.f32 %v3821_v5, 0.0 }
 0x33f   :  { %v3544_v10 = vpop.f32.mrf.mxu1  ;;  %v3823_v40 = vpop.f32.mrf.mxu0 }
 0x340   :  { %v3832_v50 = vadd.f32 %v5022_v45, %v3543_v46  ;;  %v3824_v13 = vadd.f32 %v3823_v40, %v3535_v3 }
 0x342   :  { %v3898_v48 = vmax.f32 %v3832_v50, 0.0  ;;  %v3896_v19 = vmax.f32 %v3824_v13, 0.0 }
 0x344   :  { %v4870_v58 = vpack.c.bf16 %v3898_v48, %v3897_v29  ;;  %v4865_v47 = vpack.c.bf16 %v3896_v19, %v3895_v36 }
 0x346   :  { %4902 = vst [vmem:[%s7641_s3 + $0xf8] sm:$0xff] %v4870_v58   ;;  %4901 = vst [vmem:[%s7641_s3 + $0xf0] sm:$0xff] %v4865_v47  }

// kernel: model_forward.6
= control target key start
LH: loop header
LB: loop body
LE: loop exit
PB: predicated region body
PF: predicated region fallthrough
CT: control target
= control target key end

     0   :  { %s8833_s1 = inlined_call_operand.vmem [shape: bf16[1152,128], index: 1, kind: input, shape index: {}]   ;;  %s8834_s0 = inlined_call_operand.vmem [shape: bf16[128,1152], index: 0, kind: input, shape index: {}]   ;;  %s8835_s2 = inlined_call_operand.vmem [shape: bf16[9,128,128], index: 2, kind: input, shape index: {}]   ;;  %s8836_s4 = inlined_call_operand.vmem [shape: f32[2,128], index: 4, kind: input, shape index: {}]   ;;  %s8837_s3 = inlined_call_operand.vmem [shape: f32[9,128,128], index: 3, kind: input, shape index: {}]   ;;  %s8838_s5 = inlined_call_operand.vmem [shape: bf16[128,128], index: 5, kind: output, shape index: {}]  }
   0x1   :  { %v6819_v0 = vld [vmem:[%s8833_s1 + $0x78] sm:$0xff]   ;;  %v6823_v4 = vld [vmem:[%s8833_s1 + $0x70] sm:$0xff]   ;;  %v6827_v8 = vld [vmem:[%s8833_s1 + $0x68] sm:$0xff]  }
   0x2   :  { %v6820_v1 = vld [vmem:[%s8833_s1 + $0x38] sm:$0xff]   ;;  %5259 = vmatprep.subr.bf16.mxu0 %v6819_v0  ;;  %v6824_v5 = vld [vmem:[%s8833_s1 + $0x30] sm:$0xff]   ;;  %v6828_v9 = vld [vmem:[%s8833_s1 + $0x28] sm:$0xff]  }
   0x3   :  { %v6821_v2 = vld [vmem:[%s8833_s1 + $0xf8] sm:$0xff]   ;;  %5260 = vmatpush3.bf16.msra.mxu0 %v6820_v1  ;;  %v6825_v6 = vld [vmem:[%s8833_s1 + $0xf0] sm:$0xff]   ;;  %v6829_v10 = vld [vmem:[%s8833_s1 + $0xe8] sm:$0xff]  }
   0x4   :  { %v6822_v3 = vld [vmem:[%s8833_s1 + $0xb8] sm:$0xff]   ;;  %5323 = vmatprep.subr.bf16.mxu1 %v6821_v2  ;;  %5261 = vmatprep.subr.bf16.mxu0 %v6823_v4  ;;  %v6826_v7 = vld [vmem:[%s8833_s1 + $0xb0] sm:$0xff]   ;;  %v6830_v11 = vld [vmem:[%s8833_s1 + $0xa8] sm:$0xff]  }
   0x5   :  { %5324 = vmatpush3.bf16.msra.mxu1 %v6822_v3  ;;  %v6831_v12 = vld [vmem:[%s8833_s1 + $0x60] sm:$0xff]   ;;  %v6835_v16 = vld [vmem:[%s8833_s1 + $0x58] sm:$0xff]   ;;  %v6839_v20 = vld [vmem:[%s8833_s1 + $0x50] sm:$0xff]  }
   0x6   :  { %5325 = vmatprep.subr.bf16.mxu1 %v6825_v6  ;;  %v6832_v13 = vld [vmem:[%s8833_s1 + $0x20] sm:$0xff]   ;;  %v6836_v17 = vld [vmem:[%s8833_s1 + $0x18] sm:$0xff]   ;;  %v6840_v21 = vld [vmem:[%s8833_s1 + $0x10] sm:$0xff]  }
   0x7   :  { %5262 = vmatpush3.bf16.msra.mxu0 %v6824_v5  ;;  %v6833_v14 = vld [vmem:[%s8833_s1 + $0xe0] sm:$0xff]   ;;  %v6837_v18 = vld [vmem:[%s8833_s1 + $0xd8] sm:$0xff]   ;;  %v6841_v22 = vld [vmem:[%s8833_s1 + $0xd0] sm:$0xff]  }
   0x8   :  { %5263 = vmatprep.subr.bf16.mxu0 %v6827_v8  ;;  %v6834_v15 = vld [vmem:[%s8833_s1 + $0xa0] sm:$0xff]   ;;  %v6838_v19 = vld [vmem:[%s8833_s1 + $0x98] sm:$0xff]   ;;  %v6842_v23 = vld [vmem:[%s8833_s1 + $0x90] sm:$0xff]  }
   0x9   :  { %5326 = vmatpush3.bf16.msra.mxu1 %v6826_v7  ;;  %v6843_v24 = vld [vmem:[%s8833_s1 + $0x48] sm:$0xff]   ;;  %v6847_v28 = vld [vmem:[%s8833_s1 + $0x40] sm:$0xff]   ;;  %v6854_v34 = vld [vmem:[%s8833_s1 + $0x178] sm:$0xff]  }
   0xa   :  { %5327 = vmatprep.subr.bf16.mxu1 %v6829_v10  ;;  %v6844_v25 = vld [vmem:[%s8833_s1 + $0x8] sm:$0xff]   ;;  %v6848_v29 = vld [vmem:[%s8833_s1] sm:$0xff]   ;;  %v6858_v37 = vld [vmem:[%s8833_s1 + $0x138] sm:$0xff]  }
   0xb   :  { %5264 = vmatpush3.bf16.msra.mxu0 %v6828_v9  ;;  %v6845_v26 = vld [vmem:[%s8833_s1 + $0xc8] sm:$0xff]   ;;  %v6849_v30 = vld [vmem:[%s8833_s1 + $0xc0] sm:$0xff]   ;;  %v6862_v40 = vld [vmem:[%s8833_s1 + $0x170] sm:$0xff]  }
   0xc   :  { %5265 = vmatprep.subr.bf16.mxu0 %v6831_v12  ;;  %v6846_v27 = vld [vmem:[%s8833_s1 + $0x88] sm:$0xff]   ;;  %v6850_v31 = vld [vmem:[%s8834_s0] ss:$36 sps:$4 sm:$0xff]   ;;  %v6863_v41 = vld [vmem:[%s8834_s0 + $0x54] ss:$36 sps:$4 sm:$0xff]  }
   0xd   :  { %5328 = vmatpush3.bf16.msra.mxu1 %v6830_v11  ;;  %v6852_v32 = vld [vmem:[%s8834_s0 + $0x4] ss:$36 sps:$4 sm:$0xff]   ;;  %v6857_v36 = vld [vmem:[%s8834_s0 + $0xc] ss:$36 sps:$4 sm:$0xff]   ;;  %v6867_v44 = vld [vmem:[%s8834_s0 + $0x94] ss:$36 sps:$4 sm:$0xff]  }
   0xe   :  { %5329 = vmatprep.subr.bf16.mxu1 %v6833_v14  ;;  %v6853_v33 = vld [vmem:[%s8833_s1 + $0x80] sm:$0xff]   ;;  %1082 = vmatprep.mubr.bf16.mxu0 %v6852_v32  ;;  %v6855_v35 = vld [vmem:[%s8834_s0 + $0x8] ss:$36 sps:$4 sm:$0xff]   ;;  %v6865_v42 = vld [vmem:[%s8833_s1 + $0x130] sm:$0xff]  }
   0xf   :  { %5266 = vmatpush3.bf16.msra.mxu0 %v6832_v13  ;;  %1179 = vmatprep.mubr.bf16.mxu1 %v6857_v36  ;;  %v6859_v38 = vld [vmem:[%s8834_s0 + $0x4c] ss:$36 sps:$4 sm:$0xff]   ;;  %v6871_v46 = vld [vmem:[%s8834_s0 + $0x9c] ss:$36 sps:$4 sm:$0xff]   ;;  %v6879_v52 = vld [vmem:[%s8834_s0 + $0xe4] ss:$36 sps:$4 sm:$0xff]  }
  0x10   :  { %5267 = vmatprep.subr.bf16.mxu0 %v6835_v16  ;;  %v6861_v39 = vld [vmem:[%s8834_s0 + $0x48] ss:$36 sps:$4 sm:$0xff]   ;;  %v6866_v43 = vld [vmem:[%s8834_s0 + $0x50] ss:$36 sps:$4 sm:$0xff]   ;;  %v6875_v49 = vld [vmem:[%s8834_s0 + $0xdc] ss:$36 sps:$4 sm:$0xff]  }
  0x11   :  { %5330 = vmatpush3.bf16.msra.mxu1 %v6834_v15  ;;  %v6870_v45 = vld [vmem:[%s8833_s1 + $0x168] sm:$0xff]   ;;  %v6869_v48 = vld [vmem:[%s8834_s0 + $0x90] ss:$36 sps:$4 sm:$0xff]   ;;  %v6878_v50 = vld [vmem:[%s8833_s1 + $0x160] sm:$0xff]  }
  0x12   :  { %5331 = vmatprep.subr.bf16.mxu1 %v6837_v18  ;;  %v6873_v47 = vld [vmem:[%s8833_s1 + $0x128] sm:$0xff]   ;;  %v6874_v51 = vld [vmem:[%s8834_s0 + $0x98] ss:$36 sps:$4 sm:$0xff]   ;;  %v6881_v53 = vld [vmem:[%s8833_s1 + $0x120] sm:$0xff]  }
  0x13   :  { %5268 = vmatpush3.bf16.msra.mxu0 %v6836_v17  ;;  %v6883_v54 = vld [vmem:[%s8833_s1 + $0x1f8] sm:$0xff]   ;;  %v6885_v58 = vld [vmem:[%s8834_s0 + $0x124] ss:$36 sps:$4 sm:$0xff]   ;;  %v6889_v61 = vld [vmem:[%s8834_s0 + $0x12c] ss:$36 sps:$4 sm:$0xff]  }
  0x14   :  { %5269 = vmatprep.subr.bf16.mxu0 %v6839_v20  ;;  %v6884_v55 = vld [vmem:[%s8833_s1 + $0x1b8] sm:$0xff]   ;;  %v6882_v59 = vld [vmem:[%s8834_s0 + $0xe0] ss:$36 sps:$4 sm:$0xff]   ;;  %v6893_v62 = vld [vmem:[%s8833_s1 + $0x1f0] sm:$0xff]  }
  0x15   :  { %5332 = vmatpush3.bf16.msra.mxu1 %v6838_v19  ;;  %v6877_v56 = vld [vmem:[%s8834_s0 + $0xd8] ss:$36 sps:$4 sm:$0xff]   ;;  %v6894_v63 = vld [vmem:[%s8833_s1 + $0x1b0] sm:$0xff]   ;;  %v6887_v1 = vld [vmem:[%s8834_s0 + $0x120] ss:$36 sps:$4 sm:$0xff]  }
  0x16   :  { %5333 = vmatprep.subr.bf16.mxu1 %v6841_v22  ;;  %v6888_v57 = vld [vmem:[%s8833_s1 + $0x158] sm:$0xff]   ;;  %v6898_v0 = vld [vmem:[%s8833_s1 + $0x150] sm:$0xff]   ;;  %v6892_v4 = vld [vmem:[%s8834_s0 + $0x128] ss:$36 sps:$4 sm:$0xff]  }
  0x17   :  { %5270 = vmatpush3.bf16.msra.mxu0 %v6840_v21  ;;  %v6891_v60 = vld [vmem:[%s8833_s1 + $0x118] sm:$0xff]   ;;  %v6895_v2 = vld [vmem:[%s8834_s0 + $0x16c] ss:$36 sps:$4 sm:$0xff]   ;;  %v6905_v7 = vld [vmem:[%s8833_s1 + $0x1e0] sm:$0xff]  }
  0x18   :  { %5271 = vmatprep.subr.bf16.mxu0 %v6843_v24  ;;  %v6901_v3 = vld [vmem:[%s8833_s1 + $0x110] sm:$0xff]   ;;  %v6903_v5 = vld [vmem:[%s8833_s1 + $0x1e8] sm:$0xff]   ;;  %v6908_v9 = vld [vmem:[%s8833_s1 + $0x1a0] sm:$0xff]  }
  0x19   :  { %5334 = vmatpush3.bf16.msra.mxu1 %v6842_v23  ;;  %v6904_v6 = vld [vmem:[%s8833_s1 + $0x1a8] sm:$0xff]   ;;  %v6899_v8 = vld [vmem:[%s8834_s0 + $0x174] ss:$36 sps:$4 sm:$0xff]   ;;  %v6911_v15 = vld [vmem:[%s8834_s0 + $0x1bc] ss:$36 sps:$4 sm:$0xff]  }
  0x1a   :  { %5335 = vmatprep.subr.bf16.mxu1 %v6845_v26  ;;  %v6910_v10 = vld [vmem:[%s8833_s1 + $0x148] sm:$0xff]   ;;  %v6902_v12 = vld [vmem:[%s8834_s0 + $0x170] ss:$36 sps:$4 sm:$0xff]   ;;  %v6915_v16 = vld [vmem:[%s8833_s1 + $0x1d8] sm:$0xff]  }
  0x1b   :  { %5272 = vmatpush3.bf16.msra.mxu0 %v6844_v25  ;;  %v6897_v11 = vld [vmem:[%s8834_s0 + $0x168] ss:$36 sps:$4 sm:$0xff]   ;;  %v6906_v13 = vld [vmem:[%s8834_s0 + $0x1b4] ss:$36 sps:$4 sm:$0xff]   ;;  %v6922_v21 = vld [vmem:[%s8833_s1 + $0x140] sm:$0xff]  }
  0x1c   :  { %5273 = vmatprep.subr.bf16.mxu0 %v6847_v28  ;;  %v6913_v14 = vld [vmem:[%s8833_s1 + $0x108] sm:$0xff]   ;;  %v6916_v17 = vld [vmem:[%s8833_s1 + $0x198] sm:$0xff]   ;;  %v6917_v18 = vld [vmem:[%s8833_s1 + $0x1d0] sm:$0xff]  }
  0x1d   :  { %5336 = vmatpush3.bf16.msra.mxu1 %v6846_v27  ;;  %v6909_v19 = vld [vmem:[%s8834_s0 + $0x1b0] ss:$36 sps:$4 sm:$0xff]   ;;  %v6918_v22 = vld [vmem:[%s8834_s0 + $0x1fc] ss:$36 sps:$4 sm:$0xff]   ;;  %v6923_v25 = vld [vmem:[%s8834_s0 + $0x204] ss:$36 sps:$4 sm:$0xff]  }
  0x1e   :  { %5337 = vmatprep.subr.bf16.mxu1 %v6849_v30  ;;  %v6920_v20 = vld [vmem:[%s8833_s1 + $0x190] sm:$0xff]   ;;  %v6914_v23 = vld [vmem:[%s8834_s0 + $0x1b8] ss:$36 sps:$4 sm:$0xff]   ;;  %v6925_v24 = vld [vmem:[%s8833_s1 + $0x100] sm:$0xff]  }
  0x1f   :  { %5274 = vmatpush3.bf16.msra.mxu0 %v6848_v29  ;;  %v6927_v26 = vld [vmem:[%s8833_s1 + $0x1c8] sm:$0xff]   ;;  %v6929_v28 = vld [vmem:[%s8833_s1 + $0x1c0] sm:$0xff]   ;;  %v6921_v29 = vld [vmem:[%s8834_s0 + $0x1f8] ss:$36 sps:$4 sm:$0xff]  }
  0x20   :  { %5387 = vmatprep.subr.bf16.mxu0 %v6854_v34  ;;  %v6928_v27 = vld [vmem:[%s8833_s1 + $0x188] sm:$0xff]   ;;  %v6933_v30 = vld [vmem:[%s8833_s1 + $0x180] sm:$0xff]   ;;  %v6932_v32 = vld [vmem:[%s8834_s0 + $0x14] ss:$36 sps:$4 sm:$0xff]  }
  0x21   :  { %5338 = vmatpush3.bf16.msra.mxu1 %v6853_v33  ;;  %v6926_v33 = vld [vmem:[%s8834_s0 + $0x200] ss:$36 sps:$4 sm:$0xff]  }
  0x22   :  { %1083 = vmatmul.mubr.bf16.vlgmr.msra.gmra.mxu0 %v6850_v31  ;;  %5451 = vmatprep.subr.bf16.mxu1 %v6883_v54  ;;  %v6934_v31 = vld [vmem:[%s8833_s1 + $0x238] sm:$0xff]  }
  0x23   :  { %5388 = vmatpush3.bf16.msra.mxu0 %v6858_v37  ;;  %1090 = vmatprep.mubr.bf16.mxu0 %v6859_v38  ;;  %v6937_v34 = vld [vmem:[%s8834_s0 + $0x1c] ss:$36 sps:$4 sm:$0xff]   ;;  %v6941_v37 = vld [vmem:[%s8833_s1 + $0x230] sm:$0xff]  }
  0x24   :  { %1180 = vmatmul.mubr.bf16.vlgmr.msra.gmra.mxu1 %v6855_v35  ;;  %5389 = vmatprep.subr.bf16.mxu0 %v6862_v40  ;;  %v6930_v35 = vld [vmem:[%s8834_s0 + $0x10] ss:$36 sps:$4 sm:$0xff]   ;;  %v6938_v36 = vld [vmem:[%s8834_s0 + $0x5c] ss:$36 sps:$4 sm:$0xff]   ;;  %v6948_v40 = vld [vmem:[%s8833_s1 + $0x228] sm:$0xff]  }
  0x25   :  { %1187 = vmatprep.mubr.bf16.mxu1 %v6863_v41  ;;  %5452 = vmatpush3.bf16.msra.mxu1 %v6884_v55  ;;  %v6935_v38 = vld [vmem:[%s8834_s0 + $0x18] ss:$36 sps:$4 sm:$0xff]   ;;  %v6983_v55 = vld [vmem:[%s8833_s1 + $0x200] sm:$0xff]  }
  0x26   :  { %5453 = vmatprep.subr.bf16.mxu1 %v6893_v62  ;;  %v6940_v41 = vld [vmem:[%s8834_s0 + $0x58] ss:$36 sps:$4 sm:$0xff]  }
  0x27   :  { %5390 = vmatpush3.bf16.msra.mxu0 %v6865_v42  ;;  %v6945_v42 = vld [vmem:[%s8834_s0 + $0xa4] ss:$36 sps:$4 sm:$0xff]   ;;  %v6959_v54 = vld [vmem:[%s8834_s0 + $0x134] ss:$36 sps:$4 sm:$0xff]  }
  0x28   :  { %5391 = vmatprep.subr.bf16.mxu0 %v6870_v45  ;;  %v6949_v45 = vld [vmem:[%s8834_s0 + $0xac] ss:$36 sps:$4 sm:$0xff]   ;;  %v6968_v62 = vld [vmem:[%s8834_s0 + $0x178] ss:$36 sps:$4 sm:$0xff]  }
  0x29   :  { %5454 = vmatpush3.bf16.msra.mxu1 %v6894_v63  ;;  %v6973_v63 = vld [vmem:[%s8834_s0 + $0x1c4] ss:$36 sps:$4 sm:$0xff]  }
  0x2a   :  { %1091 = vmatmul.mubr.bf16.gmra.mxu0 %v6861_v39  ;;  %5455 = vmatprep.subr.bf16.mxu1 %v6903_v5  ;;  %v6942_v39 = vld [vmem:[%s8834_s0 + $0x64] ss:$36 sps:$4 sm:$0xff]   ;;  %v6984_v5 = vld [vmem:[%s8834_s0 + $0x214] ss:$36 sps:$4 sm:$0xff]  }
  0x2b   :  { %1098 = vmatprep.mubr.bf16.mxu0 %v6867_v44  ;;  %5392 = vmatpush3.bf16.msra.mxu0 %v6873_v47  ;;  %v6944_v44 = vld [vmem:[%s8834_s0 + $0x60] ss:$36 sps:$4 sm:$0xff]  }
  0x2c   :  { %1188 = vmatmul.mubr.bf16.gmra.mxu1 %v6866_v43  ;;  %5393 = vmatprep.subr.bf16.mxu0 %v6878_v50  ;;  %v6955_v43 = vld [vmem:[%s8833_s1 + $0x220] sm:$0xff]   ;;  %v6951_v50 = vld [vmem:[%s8834_s0 + $0xa8] ss:$36 sps:$4 sm:$0xff]  }
  0x2d   :  { %1195 = vmatprep.mubr.bf16.mxu1 %v6871_v46  ;;  %5456 = vmatpush3.bf16.msra.mxu1 %v6904_v6  ;;  %v6962_v46 = vld [vmem:[%s8833_s1 + $0x218] sm:$0xff]   ;;  %v6947_v47 = vld [vmem:[%s8834_s0 + $0xa0] ss:$36 sps:$4 sm:$0xff]   ;;  %v6982_v6 = vld [vmem:[%s8834_s0 + $0x208] ss:$36 sps:$4 sm:$0xff]  }
  0x2e   :  { %5457 = vmatprep.subr.bf16.mxu1 %v6905_v7  ;;  %v6987_v7 = vld [vmem:[%s8834_s0 + $0x20] ss:$36 sps:$4 sm:$0xff]  }
  0x2f   :  { %5394 = vmatpush3.bf16.msra.mxu0 %v6881_v53  ;;  %v6954_v53 = vld [vmem:[%s8834_s0 + $0xe8] ss:$36 sps:$4 sm:$0xff]  }
  0x30   :  { %5395 = vmatprep.subr.bf16.mxu0 %v6888_v57  ;;  %v6963_v57 = vld [vmem:[%s8834_s0 + $0x13c] ss:$36 sps:$4 sm:$0xff]  }
  0x31   :  { %5458 = vmatpush3.bf16.msra.mxu1 %v6908_v9  ;;  %v6988_v9 = vld [vmem:[%s8834_s0 + $0x68] ss:$36 sps:$4 sm:$0xff]  }
  0x32   :  { %1099 = vmatmul.mubr.bf16.gmra.mxu0 %v6869_v48  ;;  %5459 = vmatprep.subr.bf16.mxu1 %v6915_v16  ;;  %v6952_v48 = vld [vmem:[%s8834_s0 + $0xec] ss:$36 sps:$4 sm:$0xff]   ;;  %v6995_v16 = vld [vmem:[%s8835_s2 + $0x38] sm:$0xff]  }
  0x33   :  { %1106 = vmatprep.mubr.bf16.mxu0 %v6875_v49  ;;  %5396 = vmatpush3.bf16.msra.mxu0 %v6891_v60  ;;  %v6969_v49 = vld [vmem:[%s8833_s1 + $0x210] sm:$0xff]   ;;  %v6965_v60 = vld [vmem:[%s8834_s0 + $0x138] ss:$36 sps:$4 sm:$0xff]  }
  0x34   :  { %1196 = vmatmul.mubr.bf16.gmra.mxu1 %v6874_v51  ;;  %5397 = vmatprep.subr.bf16.mxu0 %v6898_v0  ;;  %v6956_v51 = vld [vmem:[%s8834_s0 + $0xf4] ss:$36 sps:$4 sm:$0xff]   ;;  %v6972_v0 = vld [vmem:[%s8834_s0 + $0x180] ss:$36 sps:$4 sm:$0xff]  }
  0x35   :  { %1203 = vmatprep.mubr.bf16.mxu1 %v6879_v52  ;;  %5460 = vmatpush3.bf16.msra.mxu1 %v6916_v17  ;;  %v6976_v52 = vld [vmem:[%s8833_s1 + $0x208] sm:$0xff]   ;;  %v6996_v17 = vld [vmem:[%s8835_s2 + $0x78] sm:$0xff]  }
  0x36   :  { %5461 = vmatprep.subr.bf16.mxu1 %v6917_v18  ;;  %v6997_v18 = vld [vmem:[%s8835_s2 + $0x30] sm:$0xff]  }
  0x37   :  { %5398 = vmatpush3.bf16.msra.mxu0 %v6901_v3  ;;  %v6980_v3 = vld [vmem:[%s8834_s0 + $0x20c] ss:$36 sps:$4 sm:$0xff]  }
  0x38   :  { %5399 = vmatprep.subr.bf16.mxu0 %v6910_v10  ;;  %v6989_v10 = vld [vmem:[%s8834_s0 + $0xb0] ss:$36 sps:$4 sm:$0xff]  }
  0x39   :  { %5462 = vmatpush3.bf16.msra.mxu1 %v6920_v20  ;;  %v6999_v20 = vld [vmem:[%s8835_s2 + $0x28] sm:$0xff]  }
  0x3a   :  { %1107 = vmatmul.mubr.bf16.gmra.mxu0 %v6877_v56  ;;  %5463 = vmatprep.subr.bf16.mxu1 %v6927_v26  ;;  %v6958_v56 = vld [vmem:[%s8834_s0 + $0xf0] ss:$36 sps:$4 sm:$0xff]  }
  0x3b   :  { %1114 = vmatprep.mubr.bf16.mxu0 %v6885_v58  ;;  %5400 = vmatpush3.bf16.msra.mxu0 %v6913_v14  ;;  %v6961_v58 = vld [vmem:[%s8834_s0 + $0x130] ss:$36 sps:$4 sm:$0xff]  }
  0x3c   :  { %1204 = vmatmul.mubr.bf16.gmra.mxu1 %v6882_v59  ;;  %5401 = vmatprep.subr.bf16.mxu0 %v6922_v21  ;;  %v6966_v59 = vld [vmem:[%s8834_s0 + $0x17c] ss:$36 sps:$4 sm:$0xff]   ;;  %v6993_v14 = vld [vmem:[%s8834_s0 + $0x1d0] ss:$36 sps:$4 sm:$0xff]   ;;  %v7000_v21 = vld [vmem:[%s8835_s2 + $0x68] sm:$0xff]  }
  0x3d   :  { %1211 = vmatprep.mubr.bf16.mxu1 %v6889_v61  ;;  %5464 = vmatpush3.bf16.msra.mxu1 %v6928_v27  ;;  %v6970_v61 = vld [vmem:[%s8834_s0 + $0x184] ss:$36 sps:$4 sm:$0xff]   ;;  %v7562_v27 = vld [vmem:[%s8836_s4] ss:$0 sm:$0xff] }
  0x3e   :  { %5465 = vmatprep.subr.bf16.mxu1 %v6929_v28  ;;  %v7005_v28 = vld [vmem:[%s8835_s2 + $0x10] sm:$0xff]  }
  0x3f   :  { %5402 = vmatpush3.bf16.msra.mxu0 %v6925_v24  ;;  %v7003_v24 = vld [vmem:[%s8835_s2 + $0x18] sm:$0xff]  }
  0x40   :  { %5963 = vmatprep.subr.bf16.mxu0 %v6934_v31 }
  0x41   :  { %5466 = vmatpush3.bf16.msra.mxu1 %v6933_v30 }
  0x42   :  { %1115 = vmatmul.mubr.bf16.gmra.mxu0 %v6887_v1  ;;  %v6977_v1 = vld [vmem:[%s8834_s0 + $0x1cc] ss:$36 sps:$4 sm:$0xff]   ;;  %5995 = vmatprep.subr.bf16.mxu1 %v6995_v16 }
  0x43   :  { %1122 = vmatprep.mubr.bf16.mxu0 %v6895_v2  ;;  %v6975_v2 = vld [vmem:[%s8834_s0 + $0x1c0] ss:$36 sps:$4 sm:$0xff]  }
  0x44   :  { %1212 = vmatmul.mubr.bf16.gmra.mxu1 %v6892_v4  ;;  %v6979_v4 = vld [vmem:[%s8834_s0 + $0x1c8] ss:$36 sps:$4 sm:$0xff]  }
  0x45   :  { %1219 = vmatprep.mubr.bf16.mxu1 %v6899_v8  ;;  %v6986_v8 = vld [vmem:[%s8834_s0 + $0x210] ss:$36 sps:$4 sm:$0xff]  }
  0x4a   :  { %1123 = vmatmul.mubr.bf16.gmra.mxu0 %v6897_v11  ;;  %v6990_v11 = vld [vmem:[%s8834_s0 + $0xf8] ss:$36 sps:$4 sm:$0xff]  }
  0x4b   :  { %1130 = vmatprep.mubr.bf16.mxu0 %v6906_v13  ;;  %v6992_v13 = vld [vmem:[%s8834_s0 + $0x188] ss:$36 sps:$4 sm:$0xff]  }
  0x4c   :  { %1220 = vmatmul.mubr.bf16.gmra.mxu1 %v6902_v12  ;;  %v6991_v12 = vld [vmem:[%s8834_s0 + $0x140] ss:$36 sps:$4 sm:$0xff]  }
  0x4d   :  { %1227 = vmatprep.mubr.bf16.mxu1 %v6911_v15  ;;  %v6994_v15 = vld [vmem:[%s8834_s0 + $0x218] ss:$36 sps:$4 sm:$0xff]  }
  0x52   :  { %1131 = vmatmul.mubr.bf16.gmra.mxu0 %v6909_v19  ;;  %v6998_v19 = vld [vmem:[%s8835_s2 + $0x70] sm:$0xff]  }
  0x53   :  { %1138 = vmatprep.mubr.bf16.mxu0 %v6918_v22  ;;  %v7001_v22 = vld [vmem:[%s8835_s2 + $0x20] sm:$0xff]  }
  0x54   :  { %1228 = vmatmul.mubr.bf16.gmra.mxu1 %v6914_v23  ;;  %v7002_v23 = vld [vmem:[%s8835_s2 + $0x60] sm:$0xff]  }
  0x55   :  { %1235 = vmatprep.mubr.bf16.mxu1 %v6923_v25  ;;  %v7004_v25 = vld [vmem:[%s8835_s2 + $0x58] sm:$0xff]  }
  0x5a   :  { %1139 = vmatmul.mubr.bf16.gmra.mxu0 %v6921_v29  ;;  %v7006_v29 = vld [vmem:[%s8835_s2 + $0x50] sm:$0xff]  }
  0x5b   :  { %1276 = vmatprep.mubr.bf16.mxu0 %v6932_v32 }
  0x5c   :  { %1236 = vmatmul.mubr.bf16.gmra.mxu1 %v6926_v33 }
  0x5d   :  { %1373 = vmatprep.mubr.bf16.mxu1 %v6937_v34 }
  0x62   :  { %1277 = vmatmul.mubr.bf16.vlgmr.msra.gmra.mxu0 %v6930_v35 }
  0x63   :  { %5964 = vmatpush3.bf16.msra.mxu0 %v6934_v31  ;;  %1284 = vmatprep.mubr.bf16.mxu0 %v6938_v36  ;;  %v7007_v36 = vld [vmem:[%s8835_s2 + $0x8] sm:$0xff]  }
  0x64   :  { %5965 = vmatprep.subr.bf16.mxu0 %v6941_v37  ;;  %1374 = vmatmul.mubr.bf16.vlgmr.msra.gmra.mxu1 %v6935_v38 }
  0x65   :  { %1381 = vmatprep.mubr.bf16.mxu1 %v6942_v39  ;;  %5996 = vmatpush3.bf16.msra.mxu1 %v6995_v16 }
  0x66   :  { %5997 = vmatprep.subr.bf16.mxu1 %v6997_v18 }
  0x67   :  { %5966 = vmatpush3.bf16.msra.mxu0 %v6941_v37  ;;  %v7008_v37 = vld [vmem:[%s8835_s2 + $0x48] sm:$0xff]  }
  0x68   :  { %5967 = vmatprep.subr.bf16.mxu0 %v6948_v40 }
  0x69   :  { %5998 = vmatpush3.bf16.msra.mxu1 %v6997_v18 }
  0x6a   :  { %1285 = vmatmul.mubr.bf16.gmra.mxu0 %v6940_v41  ;;  %5999 = vmatprep.subr.bf16.mxu1 %v6999_v20 }
  0x6b   :  { %1292 = vmatprep.mubr.bf16.mxu0 %v6945_v42  ;;  %5968 = vmatpush3.bf16.msra.mxu0 %v6948_v40 }
  0x6c   :  { %5969 = vmatprep.subr.bf16.mxu0 %v6955_v43  ;;  %1382 = vmatmul.mubr.bf16.gmra.mxu1 %v6944_v44 }
  0x6d   :  { %1389 = vmatprep.mubr.bf16.mxu1 %v6949_v45  ;;  %6000 = vmatpush3.bf16.msra.mxu1 %v6999_v20 }
  0x6e   :  { %6001 = vmatprep.subr.bf16.mxu1 %v7001_v22 }
  0x6f   :  { %5970 = vmatpush3.bf16.msra.mxu0 %v6955_v43 }
  0x70   :  { %5971 = vmatprep.subr.bf16.mxu0 %v6962_v46 }
  0x71   :  { %6002 = vmatpush3.bf16.msra.mxu1 %v7001_v22 }
  0x72   :  { %1293 = vmatmul.mubr.bf16.gmra.mxu0 %v6947_v47  ;;  %6003 = vmatprep.subr.bf16.mxu1 %v7003_v24  ;;  %v7010_v47 = vld [vmem:[%s8835_s2 + $0x40] sm:$0xff]  }
  0x73   :  { %1300 = vmatprep.mubr.bf16.mxu0 %v6952_v48  ;;  %5972 = vmatpush3.bf16.msra.mxu0 %v6962_v46  ;;  %v7009_v46 = vld [vmem:[%s8835_s2] sm:$0xff]  }
  0x74   :  { %5973 = vmatprep.subr.bf16.mxu0 %v6969_v49  ;;  %1390 = vmatmul.mubr.bf16.gmra.mxu1 %v6951_v50 }
  0x75   :  { %1397 = vmatprep.mubr.bf16.mxu1 %v6956_v51  ;;  %6004 = vmatpush3.bf16.msra.mxu1 %v7003_v24 }
  0x76   :  { %6005 = vmatprep.subr.bf16.mxu1 %v7005_v28 }
  0x77   :  { %5974 = vmatpush3.bf16.msra.mxu0 %v6969_v49 }
  0x78   :  { %5975 = vmatprep.subr.bf16.mxu0 %v6976_v52 }
  0x79   :  { %6006 = vmatpush3.bf16.msra.mxu1 %v7005_v28 }
  0x7a   :  { %1301 = vmatmul.mubr.bf16.gmra.mxu0 %v6954_v53  ;;  %6007 = vmatprep.subr.bf16.mxu1 %v7007_v36 }
  0x7b   :  { %1308 = vmatprep.mubr.bf16.mxu0 %v6959_v54  ;;  %5976 = vmatpush3.bf16.msra.mxu0 %v6976_v52 }
  0x7c   :  { %5977 = vmatprep.subr.bf16.mxu0 %v6983_v55  ;;  %1398 = vmatmul.mubr.bf16.gmra.mxu1 %v6958_v56 }
  0x7d   :  { %1405 = vmatprep.mubr.bf16.mxu1 %v6963_v57  ;;  %6008 = vmatpush3.bf16.msra.mxu1 %v7007_v36 }
  0x7e   :  { %6009 = vmatprep.subr.bf16.mxu1 %v7009_v46 }
  0x7f   :  { %5978 = vmatpush3.bf16.msra.mxu0 %v6983_v55 }
  0x80   :  { %6027 = vmatprep.subr.bf16.mxu0 %v6996_v17 }
  0x81   :  { %6010 = vmatpush3.bf16.msra.mxu1 %v7009_v46 }
  0x82   :  { %1309 = vmatmul.mubr.bf16.gmra.mxu0 %v6961_v58 }
  0x83   :  { %1316 = vmatprep.mubr.bf16.mxu0 %v6966_v59 }
  0x84   :  { %1406 = vmatmul.mubr.bf16.gmra.mxu1 %v6965_v60 }
  0x85   :  { %1413 = vmatprep.mubr.bf16.mxu1 %v6970_v61 }
  0x8a   :  { %1317 = vmatmul.mubr.bf16.gmra.mxu0 %v6968_v62 }
  0x8b   :  { %1324 = vmatprep.mubr.bf16.mxu0 %v6973_v63 }
  0x8c   :  { %1414 = vmatmul.mubr.bf16.gmra.mxu1 %v6972_v0 }
  0x8d   :  { %1421 = vmatprep.mubr.bf16.mxu1 %v6977_v1 }
  0x92   :  { %1325 = vmatmul.mubr.bf16.gmra.mxu0 %v6975_v2 }
  0x93   :  { %1332 = vmatprep.mubr.bf16.mxu0 %v6980_v3 }
  0x94   :  { %1422 = vmatmul.mubr.bf16.gmra.mxu1 %v6979_v4 }
  0x95   :  { %1429 = vmatprep.mubr.bf16.mxu1 %v6984_v5 }
  0x9a   :  { %1333 = vmatmul.mubr.bf16.gmra.mxu0 %v6982_v6 }
  0x9b   :  { %5979 = vmatprep.mubr.bf16.mxu0 %v6987_v7 }
  0x9c   :  { %1430 = vmatmul.mubr.bf16.gmra.mxu1 %v6986_v8 }
  0xa2   :  { %5980 = vmatmul.mubr.bf16.vlgmr.msra.gmra.mxu0 %v6988_v9 }
  0xa3   :  { %5983 = vmatprep.mubr.bf16.mxu0 %v6989_v10  ;;  %6028 = vmatpush3.bf16.msra.mxu0 %v6996_v17 }
  0xa4   :  { %6029 = vmatprep.subr.bf16.mxu0 %v6998_v19 }
  0xa7   :  { %6030 = vmatpush3.bf16.msra.mxu0 %v6998_v19 }
  0xa8   :  { %6031 = vmatprep.subr.bf16.mxu0 %v7000_v21 }
  0xaa   :  { %5984 = vmatmul.mubr.bf16.gmra.mxu0 %v6990_v11 }
  0xab   :  { %5987 = vmatprep.mubr.bf16.mxu0 %v6991_v12  ;;  %6032 = vmatpush3.bf16.msra.mxu0 %v7000_v21 }
  0xac   :  { %6033 = vmatprep.subr.bf16.mxu0 %v7002_v23 }
  0xaf   :  { %6034 = vmatpush3.bf16.msra.mxu0 %v7002_v23 }
  0xb0   :  { %6035 = vmatprep.subr.bf16.mxu0 %v7004_v25 }
  0xb2   :  { %5988 = vmatmul.mubr.bf16.gmra.mxu0 %v6992_v13 }
  0xb3   :  { %5991 = vmatprep.mubr.bf16.mxu0 %v6993_v14  ;;  %6036 = vmatpush3.bf16.msra.mxu0 %v7004_v25 }
  0xb4   :  { %6037 = vmatprep.subr.bf16.mxu0 %v7006_v29 }
  0xb7   :  { %6038 = vmatpush3.bf16.msra.mxu0 %v7006_v29 }
  0xb8   :  { %6039 = vmatprep.subr.bf16.mxu0 %v7008_v37 }
  0xba   :  { %5992 = vmatmul.mubr.bf16.gmra.mxu0 %v6994_v15 }
  0xbb   :  { %6040 = vmatpush3.bf16.msra.mxu0 %v7008_v37 }
  0xbc   :  { %6041 = vmatprep.subr.bf16.mxu0 %v7010_v47 }
  0xbf   :  { %6042 = vmatpush3.bf16.msra.mxu0 %v7010_v47 }
  0xe2   :  { %v5275_v26 = vpop.f32.mrf.mxu0 }
  0xe4   :  { %v5276_v30 = vpop.f32.mrf.mxu0  ;;  %v5339_v32 = vpop.f32.mrf.mxu1 }
  0xe5   :  { %v5277_v31 = vadd.f32 %v5276_v30, %v5275_v26 }
  0xe6   :  { %v5278_v33 = vpop.f32.mrf.mxu0  ;;  %v5340_v35 = vpop.f32.mrf.mxu1 }
  0xe7   :  { %v1085_v34 = vadd.f32 %v5277_v31, %v7562_v27  ;;  %v5341_v38 = vadd.f32 %v5340_v35, %v5339_v32 }
  0xe8   :  { %v5279_v39 = vpop.f32.mrf.mxu0  ;;  %v5342_v41 = vpop.f32.mrf.mxu1 }
  0xe9   :  { %v5280_v40 = vadd.f32 %v5279_v39, %v5278_v33  ;;  %v7577_v42 = vadd.f32 %v5341_v38, %v1085_v34 }
  0xea   :  { %v5281_v43 = vpop.f32.mrf.mxu0  ;;  %v5343_v45 = vpop.f32.mrf.mxu1 }
  0xeb   :  { %v1088_v44 = vadd.f32 %v5280_v40, %v7562_v27  ;;  %v5344_v48 = vadd.f32 %v5343_v45, %v5342_v41 }
  0xec   :  { %v5282_v49 = vpop.f32.mrf.mxu0  ;;  %v5345_v51 = vpop.f32.mrf.mxu1 }
  0xed   :  { %v5283_v50 = vadd.f32 %v5282_v49, %v5281_v43  ;;  %v7586_v52 = vadd.f32 %v5344_v48, %v1088_v44 }
  0xee   :  { %v5284_v53 = vpop.f32.mrf.mxu0  ;;  %v5346_v55 = vpop.f32.mrf.mxu1 }
  0xef   :  { %v1093_v54 = vadd.f32 %v5283_v50, %v7562_v27  ;;  %v5347_v56 = vadd.f32 %v5346_v55, %v5345_v51 }
  0xf0   :  { %v5285_v57 = vpop.f32.mrf.mxu0  ;;  %v5348_v59 = vpop.f32.mrf.mxu1 }
  0xf1   :  { %v5286_v58 = vadd.f32 %v5285_v57, %v5284_v53  ;;  %v7589_v60 = vadd.f32 %v5347_v56, %v1093_v54 }
  0xf2   :  { %v5287_v61 = vpop.f32.mrf.mxu0  ;;  %v5349_v63 = vpop.f32.mrf.mxu1 }
  0xf3   :  { %v1096_v62 = vadd.f32 %v5286_v58, %v7562_v27  ;;  %v5350_v0 = vadd.f32 %v5349_v63, %v5348_v59 }
  0xf4   :  { %v5288_v1 = vpop.f32.mrf.mxu0  ;;  %v5351_v3 = vpop.f32.mrf.mxu1 }
  0xf5   :  { %v5289_v2 = vadd.f32 %v5288_v1, %v5287_v61  ;;  %v7592_v4 = vadd.f32 %v5350_v0, %v1096_v62 }
  0xf6   :  { %v5290_v5 = vpop.f32.mrf.mxu0  ;;  %v5352_v7 = vpop.f32.mrf.mxu1 }
  0xf7   :  { %v1101_v6 = vadd.f32 %v5289_v2, %v7562_v27  ;;  %v5353_v8 = vadd.f32 %v5352_v7, %v5351_v3 }
  0xf8   :  { %v5291_v9 = vpop.f32.mrf.mxu0  ;;  %v5354_v11 = vpop.f32.mrf.mxu1 }
  0xf9   :  { %v5292_v10 = vadd.f32 %v5291_v9, %v5290_v5  ;;  %v7595_v12 = vadd.f32 %v5353_v8, %v1101_v6 }
  0xfa   :  { %v5293_v13 = vpop.f32.mrf.mxu0  ;;  %v5355_v15 = vpop.f32.mrf.mxu1 }
  0xfb   :  { %v1104_v14 = vadd.f32 %v5292_v10, %v7562_v27  ;;  %v5356_v16 = vadd.f32 %v5355_v15, %v5354_v11 }
  0xfc   :  { %v5294_v17 = vpop.f32.mrf.mxu0  ;;  %v5357_v19 = vpop.f32.mrf.mxu1 }
  0xfd   :  { %v5295_v18 = vadd.f32 %v5294_v17, %v5293_v13  ;;  %v7598_v20 = vadd.f32 %v5356_v16, %v1104_v14 }
  0xfe   :  { %v5296_v21 = vpop.f32.mrf.mxu0  ;;  %v5358_v23 = vpop.f32.mrf.mxu1 }
  0xff   :  { %v1109_v22 = vadd.f32 %v5295_v18, %v7562_v27  ;;  %v5359_v24 = vadd.f32 %v5358_v23, %v5357_v19 }
 0x100   :  { %v5297_v25 = vpop.f32.mrf.mxu0  ;;  %v5360_v28 = vpop.f32.mrf.mxu1 }
 0x101   :  { %v5298_v26 = vadd.f32 %v5297_v25, %v5296_v21  ;;  %v7601_v29 = vadd.f32 %v5359_v24, %v1109_v22 }
 0x102   :  { %v5299_v30 = vpop.f32.mrf.mxu0  ;;  %v5361_v32 = vpop.f32.mrf.mxu1 }
 0x103   :  { %v1112_v31 = vadd.f32 %v5298_v26, %v7562_v27  ;;  %v5362_v33 = vadd.f32 %v5361_v32, %v5360_v28 }
 0x104   :  { %v5300_v34 = vpop.f32.mrf.mxu0  ;;  %v5363_v36 = vpop.f32.mrf.mxu1 }
 0x105   :  { %v5301_v35 = vadd.f32 %v5300_v34, %v5299_v30  ;;  %v7604_v37 = vadd.f32 %v5362_v33, %v1112_v31 }
 0x106   :  { %v5302_v38 = vpop.f32.mrf.mxu0  ;;  %v5364_v40 = vpop.f32.mrf.mxu1 }
 0x107   :  { %v1117_v39 = vadd.f32 %v5301_v35, %v7562_v27  ;;  %v5365_v41 = vadd.f32 %v5364_v40, %v5363_v36 }
 0x108   :  { %v5303_v43 = vpop.f32.mrf.mxu0  ;;  %v5366_v45 = vpop.f32.mrf.mxu1 }
 0x109   :  { %v5304_v44 = vadd.f32 %v5303_v43, %v5302_v38  ;;  %v7607_v46 = vadd.f32 %v5365_v41, %v1117_v39 }
 0x10a   :  { %v5305_v47 = vpop.f32.mrf.mxu0  ;;  %v5367_v49 = vpop.f32.mrf.mxu1 }
 0x10b   :  { %8839 = vst [vmem:[#allocation2_spill] sm:$0xff] %v7607_v46  ;;  %v1120_v48 = vadd.f32 %v5304_v44, %v7562_v27  ;;  %v5368_v50 = vadd.f32 %v5367_v49, %v5366_v45 }
 0x10c   :  { %v5306_v51 = vpop.f32.mrf.mxu0  ;;  %v5369_v54 = vpop.f32.mrf.mxu1 }
 0x10d   :  { %v5307_v53 = vadd.f32 %v5306_v51, %v5305_v47  ;;  %v7610_v55 = vadd.f32 %v5368_v50, %v1120_v48 }
 0x10e   :  { %v5308_v56 = vpop.f32.mrf.mxu0  ;;  %v5370_v58 = vpop.f32.mrf.mxu1 }
 0x10f   :  { %8840 = vst [vmem:[#allocation3_spill] sm:$0xff] %v7610_v55  ;;  %v1125_v57 = vadd.f32 %v5307_v53, %v7562_v27  ;;  %v5371_v59 = vadd.f32 %v5370_v58, %v5369_v54 }
 0x110   :  { %v5309_v61 = vpop.f32.mrf.mxu0  ;;  %v5372_v63 = vpop.f32.mrf.mxu1 }
 0x111   :  { %v5310_v62 = vadd.f32 %v5309_v61, %v5308_v56  ;;  %v7613_v0 = vadd.f32 %v5371_v59, %v1125_v57 }
 0x112   :  { %v5311_v1 = vpop.f32.mrf.mxu0  ;;  %v5373_v3 = vpop.f32.mrf.mxu1 }
 0x113   :  { %v1128_v2 = vadd.f32 %v5310_v62, %v7562_v27  ;;  %v5374_v5 = vadd.f32 %v5373_v3, %v5372_v63 }
 0x114   :  { %v5312_v6 = vpop.f32.mrf.mxu0  ;;  %v5375_v8 = vpop.f32.mrf.mxu1 }
 0x115   :  { %v5313_v7 = vadd.f32 %v5312_v6, %v5311_v1  ;;  %v7616_v9 = vadd.f32 %v5374_v5, %v1128_v2 }
 0x116   :  { %v5314_v10 = vpop.f32.mrf.mxu0  ;;  %v5376_v13 = vpop.f32.mrf.mxu1 }
 0x117   :  { %8841 = vst [vmem:[#allocation4_spill] sm:$0xff] %v7616_v9  ;;  %v1133_v11 = vadd.f32 %v5313_v7, %v7562_v27  ;;  %v5377_v14 = vadd.f32 %v5376_v13, %v5375_v8 }
 0x118   :  { %v5315_v15 = vpop.f32.mrf.mxu0  ;;  %v5378_v17 = vpop.f32.mrf.mxu1 }
 0x119   :  { %v5316_v16 = vadd.f32 %v5315_v15, %v5314_v10  ;;  %v7619_v18 = vadd.f32 %v5377_v14, %v1133_v11 }
 0x11a   :  { %v5317_v19 = vpop.f32.mrf.mxu0  ;;  %v5379_v22 = vpop.f32.mrf.mxu1 }
 0x11b   :  { %8842 = vst [vmem:[#allocation5_spill] sm:$0xff] %v7619_v18  ;;  %v1136_v21 = vadd.f32 %v5316_v16, %v7562_v27  ;;  %v5380_v23 = vadd.f32 %v5379_v22, %v5378_v17 }
 0x11c   :  { %v5318_v24 = vpop.f32.mrf.mxu0  ;;  %v5381_v26 = vpop.f32.mrf.mxu1 }
 0x11d   :  { %v5319_v25 = vadd.f32 %v5318_v24, %v5317_v19  ;;  %v7622_v28 = vadd.f32 %v5380_v23, %v1136_v21 }
 0x11e   :  { %v7624_v30 = vpop.f32.mrf.mxu0  ;;  %v5382_v32 = vpop.f32.mrf.mxu1 }
 0x11f   :  { %8843 = vst [vmem:[#allocation6_spill] sm:$0xff] %v7622_v28  ;;  %v1141_v31 = vadd.f32 %v5319_v25, %v7562_v27  ;;  %v5383_v33 = vadd.f32 %v5382_v32, %v5381_v26 }
 0x120   :  { %v7627_v34 = vpop.f32.mrf.mxu0  ;;  %v7629_v35 = vpop.f32.mrf.mxu1 }
 0x121   :  { %8844 = vst [vmem:[#allocation7_spill] sm:$0xff] %v7629_v35  ;;  %v7631_v36 = vadd.f32 %v5383_v33, %v1141_v31 }
 0x122   :  { %v5403_v38 = vpop.f32.mrf.mxu0  ;;  %v7633_v39 = vpop.f32.mrf.mxu1 }
 0x123   :  { %8845 = vst [vmem:[#allocation8_spill] sm:$0xff] %v7631_v36  ;;  %8846 = vst [vmem:[#allocation9_spill] sm:$0xff] %v7633_v39 }
 0x124   :  { %v5404_v40 = vpop.f32.mrf.mxu0  ;;  %v5467_v43 = vpop.f32.mrf.mxu1 }
 0x125   :  { %v5405_v41 = vadd.f32 %v5404_v40, %v5403_v38 }
 0x126   :  { %v5406_v44 = vpop.f32.mrf.mxu0  ;;  %v5468_v47 = vpop.f32.mrf.mxu1 }
 0x127   :  { %v7636_v45 = vadd.f32 %v5405_v41, %v7577_v42 }
 0x128   :  { %v5407_v48 = vpop.f32.mrf.mxu0  ;;  %v5470_v49 = vpop.f32.mrf.mxu1 }
 0x129   :  { %v5408_v46 = vadd.f32 %v5407_v48, %v5406_v44 }
 0x12a   :  { %v5409_v50 = vpop.f32.mrf.mxu0  ;;  %v5471_v51 = vpop.f32.mrf.mxu1 }
 0x12c   :  { %v5410_v53 = vpop.f32.mrf.mxu0  ;;  %v5473_v54 = vpop.f32.mrf.mxu1 }
 0x12d   :  { %v5411_v9 = vadd.f32 %v5410_v53, %v5409_v50  ;;  %v5472_v50 = vadd.f32 %v5471_v51, %v5470_v49 }
 0x12e   :  { %v5412_v56 = vpop.f32.mrf.mxu0  ;;  %v5474_v57 = vpop.f32.mrf.mxu1 }
 0x130   :  { %v5413_v58 = vpop.f32.mrf.mxu0  ;;  %v5476_v59 = vpop.f32.mrf.mxu1 }
 0x132   :  { %v5415_v61 = vpop.f32.mrf.mxu0  ;;  %v5477_v62 = vpop.f32.mrf.mxu1 }
 0x134   :  { %v5416_v63 = vpop.f32.mrf.mxu0  ;;  %v7638_v1 = vpop.f32.mrf.mxu1 }
 0x136   :  { %v5418_v2 = vpop.f32.mrf.mxu0  ;;  %v7640_v3 = vpop.f32.mrf.mxu1 }
 0x138   :  { %v5419_v42 = vpop.f32.mrf.mxu0  ;;  %v7642_v5 = vpop.f32.mrf.mxu1 }
 0x13a   :  { %v5421_v6 = vpop.f32.mrf.mxu0  ;;  %v7644_v7 = vpop.f32.mrf.mxu1 }
 0x13c   :  { %v5422_v8 = vpop.f32.mrf.mxu0  ;;  %v5485_v10 = vpop.f32.mrf.mxu1 }
 0x13d   :  { %v5423_v44 = vadd.f32 %v5422_v8, %v5421_v6 }
 0x13e   :  { %v5424_v11 = vpop.f32.mrf.mxu0  ;;  %v5486_v13 = vpop.f32.mrf.mxu1 }
 0x140   :  { %v5425_v14 = vpop.f32.mrf.mxu0  ;;  %v5488_v15 = vpop.f32.mrf.mxu1 }
 0x142   :  { %v7646_v16 = vpop.f32.mrf.mxu0  ;;  %v5489_v17 = vpop.f32.mrf.mxu1 }
 0x144   :  { %v7648_v19 = vpop.f32.mrf.mxu0  ;;  %v7650_v21 = vpop.f32.mrf.mxu1 }
 0x145   :  { %8847 = vst [vmem:[#allocation10_spill] sm:$0xff] %v7650_v21  ;;  %v5414_v21 = vadd.f32 %v5413_v58, %v5412_v56  ;;  %v5417_v58 = vadd.f32 %v5416_v63, %v5415_v61 }
 0x146   :  { %v7652_v22 = vpop.f32.mrf.mxu0  ;;  %v7654_v23 = vpop.f32.mrf.mxu1 }
 0x147   :  { %8848 = vst [vmem:[#allocation11_spill] sm:$0xff] %v7654_v23 }
 0x148   :  { %v7656_v24 = vpop.f32.mrf.mxu0  ;;  %v7658_v25 = vpop.f32.mrf.mxu1 }
 0x149   :  { %8849 = vst [vmem:[#allocation12_spill] sm:$0xff] %v7658_v25 }
 0x14a   :  { %v5433_v26 = vpop.f32.mrf.mxu0  ;;  %v7660_v31 = vpop.f32.mrf.mxu1 }
 0x14b   :  { %8850 = vst [vmem:[#allocation13_spill] sm:$0xff] %v7660_v31 }
 0x14c   :  { %v5434_v32 = vpop.f32.mrf.mxu0  ;;  %v7662_v33 = vpop.f32.mrf.mxu1 }
 0x14e   :  { %v5436_v38 = vpop.f32.mrf.mxu0  ;;  %v7664_v40 = vpop.f32.mrf.mxu1 }
 0x14f   :  { %8851 = vst [vmem:[#allocation14_spill] sm:$0xff] %v7664_v40 }
 0x150   :  { %v5437_v41 = vpop.f32.mrf.mxu0  ;;  %v7666_v28 = vpop.f32.mrf.mxu1 }
 0x151   :  { %8852 = vst [vmem:[#allocation15_spill] sm:$0xff] %v7666_v28  ;;  %v5438_v8 = vadd.f32 %v5437_v41, %v5436_v38 }
 0x152   :  { %v7668_v18 = vpop.f32.mrf.mxu0  ;;  %v7672_v55 = vpop.f32.mrf.mxu1 }
 0x153   :  { %8853 = vst [vmem:[#allocation16_spill] sm:$0xff] %v7668_v18  ;;  %8855 = vst [vmem:[#allocation18_spill] sm:$0xff] %v7672_v55  ;;  %v5475_v55 = vadd.f32 %v5474_v57, %v5473_v54  ;;  %v5420_v57 = vadd.f32 %v5419_v42, %v5418_v2  ;;  %v5435_v2 = vadd.f32 %v5434_v32, %v5433_v26  ;;  %v8863_v26 = vld [vmem:[#allocation2_spill] sm:$0xff]  ;;  %v8865_v32 = vld [vmem:[#allocation11_spill] sm:$0xff] }
 0x154   :  { %v7670_v36 = vpop.f32.mrf.mxu0  ;;  %v7678_v31 = vpop.f32.mrf.mxu1 }
 0x155   :  { %8854 = vst [vmem:[#allocation17_spill] sm:$0xff] %v7670_v36  ;;  %8858 = vst [vmem:[#allocation21_spill] sm:$0xff] %v7678_v31  ;;  %v1287_v36 = vadd.f32 %v5411_v9, %v7589_v60  ;;  %v5478_v31 = vadd.f32 %v5477_v62, %v5476_v59  ;;  %v1295_v59 = vadd.f32 %v5417_v58, %v7595_v12  ;;  %v8869_v58 = vld [vmem:[#allocation7_spill] sm:$0xff] }
 0x156   :  { %v7674_v39 = vpop.f32.mrf.mxu0  ;;  %v7684_v28 = vpop.f32.mrf.mxu1 }
 0x157   :  { %8856 = vst [vmem:[#allocation19_spill] sm:$0xff] %v7674_v39  ;;  %8860 = vst [vmem:[#allocation23_spill] sm:$0xff] %v7684_v28  ;;  %v5469_v39 = vadd.f32 %v5468_v47, %v5467_v43  ;;  %v1384_v48 = vadd.f32 %v5475_v55, %v1287_v36  ;;  %v5426_v28 = vadd.f32 %v5425_v14, %v5424_v11 }
 0x158   :  { %v7676_v25 = vpop.f32.mrf.mxu0  ;;  %v7693_v53 = vpop.f32.mrf.mxu1  ;;  %v5481_v55 = vadd.f32 %v7640_v3, %v7638_v1  ;;  %v5429_v3 = vadd.f32 %v7648_v19, %v7646_v16  ;;  %v8867_v41 = vld [vmem:[#allocation15_spill] sm:$0xff] }
 0x159   :  { %8857 = vst [vmem:[#allocation20_spill] sm:$0xff] %v7676_v25  ;;  %v1290_v25 = vadd.f32 %v5414_v21, %v7592_v4  ;;  %v1376_v60 = vadd.f32 %v5469_v39, %v7636_v45  ;;  %v1306_v36 = vadd.f32 %v5426_v28, %v7604_v37  ;;  %v5490_v45 = vadd.f32 %v5489_v17, %v5488_v15  ;;  %v8862_v21 = vld [vmem:[#allocation14_spill] sm:$0xff] }
 0x15a   :  { %v7680_v35 = vpop.f32.mrf.mxu0  ;;  %v7696_v43 = vpop.f32.mrf.mxu1  ;;  %v1392_v11 = vadd.f32 %v5481_v55, %v1295_v59  ;;  %v5499_v16 = vadd.f32 %v8862_v21, %v7662_v33  ;;  %v8868_v33 = vld [vmem:[#allocation18_spill] sm:$0xff] }
 0x15b   :  { %8859 = vst [vmem:[#allocation22_spill] sm:$0xff] %v7680_v35  ;;  %v1282_v35 = vadd.f32 %v5408_v46, %v7586_v52  ;;  %v1387_v54 = vadd.f32 %v5478_v31, %v1290_v25  ;;  %v1303_v52 = vadd.f32 %v5423_v44, %v7601_v29  ;;  %v5487_v46 = vadd.f32 %v5486_v13, %v5485_v10 }
 0x15c   :  { %v7682_v23 = vpop.f32.mrf.mxu0  ;;  %v1298_v29 = vadd.f32 %v5420_v57, %v7598_v20  ;;  %v5509_v12 = vpop.f32.mrf.mxu1  ;;  %v1319_v13 = vadd.f32 %v5435_v2, %v7613_v0  ;;  %v1311_v31 = vadd.f32 %v5429_v3, %v8863_v26 }
 0x15d   :  { %v1379_v47 = vadd.f32 %v5472_v50, %v1282_v35  ;;  %v5322_v35 = vadd.f32 %v7627_v34, %v7624_v30  ;;  %v1400_v28 = vadd.f32 %v5487_v46, %v1303_v52  ;;  %v1403_v34 = vadd.f32 %v5490_v45, %v1306_v36 }
 0x15e   :  { %v7686_v18 = vpop.f32.mrf.mxu0  ;;  %v5510_v14 = vpop.f32.mrf.mxu1  ;;  %v5502_v50 = vadd.f32 %v8868_v33, %v8867_v41  ;;  %v1416_v45 = vadd.f32 %v5499_v16, %v1319_v13  ;;  %v8882_v16 = vld [vmem:[#allocation21_spill] sm:$0xff] }
 0x15f   :  { %8861 = vst [vmem:[#allocation24_spill] sm:$0xff] %v7686_v18  ;;  %v5511_v13 = vadd.f32 %v5510_v14, %v5509_v12 }
 0x160   :  { %v7689_v40 = vpop.f32.mrf.mxu0  ;;  %v8879_v3 = vld [vmem:[#allocation20_spill] sm:$0xff] }
 0x162   :  { %v5981_v56 = vpop.f32.mrf.mxu0  ;;  %v8874_v46 = vld [vmem:[#allocation22_spill] sm:$0xff] }
 0x163   :  { %v1481_v9 = vadd.f32 %v5981_v56, %v1384_v48 }
 0x164   :  { %v1472_v18 = vpop.f32.mrf.mxu0 }
 0x165   :  { %v1473_v49 = vadd.f32 %v1472_v18, %v1376_v60  ;;  %v1537_v61 = vmax.f32 %v1481_v9, 0.0  ;;  %v5484_v18 = vadd.f32 %v7644_v7, %v7642_v5  ;;  %v1144_v5 = vadd.f32 %v5322_v35, %v7562_v27  ;;  %v8864_v27 = vld [vmem:[#allocation10_spill] sm:$0xff]  ;;  %v8870_v60 = vld [vmem:[#allocation9_spill] sm:$0xff] }
 0x166   :  { %v5982_v4 = vpop.f32.mrf.mxu0  ;;  %v5432_v7 = vadd.f32 %v7656_v24, %v7652_v22  ;;  %v5493_v38 = vadd.f32 %v8865_v32, %v8864_v27  ;;  %v8866_v22 = vld [vmem:[#allocation4_spill] sm:$0xff]  ;;  %v5386_v9 = vadd.f32 %v8870_v60, %v8869_v58  ;;  %v8884_v32 = vld [vmem:[#allocation6_spill] sm:$0xff] }
 0x167   :  { %v1484_v51 = vadd.f32 %v5982_v4, %v1387_v54  ;;  %v1535_v6 = vmax.f32 %v1473_v49, 0.0  ;;  %v1395_v17 = vadd.f32 %v5484_v18, %v1298_v29  ;;  %v1322_v24 = vadd.f32 %v5438_v8, %v8866_v22  ;;  %v8871_v54 = vld [vmem:[#allocation3_spill] sm:$0xff]  ;;  %v8872_v4 = vld [vmem:[#allocation12_spill] sm:$0xff] }
 0x168   :  { %v1475_v39 = vpop.f32.mrf.mxu0  ;;  %v1314_v57 = vadd.f32 %v5432_v7, %v8871_v54  ;;  %v5447_v49 = vadd.f32 %v7682_v23, %v8874_v46  ;;  %v8877_v35 = vld [vmem:[#allocation24_spill] sm:$0xff]  ;;  %v1408_v2 = vadd.f32 %v5493_v38, %v1311_v31  ;;  %v1241_v23 = vadd.f32 %v5386_v9, %v1144_v5 }
 0x169   :  { %v1538_v62 = vmax.f32 %v1484_v51, 0.0  ;;  %v1476_v63 = vadd.f32 %v1475_v39, %v1379_v47  ;;  %v8873_v47 = vld [vmem:[#allocation13_spill] sm:$0xff]  ;;  %v5512_v51 = vpop.f32.mrf.mxu1  ;;  %v5450_v29 = vadd.f32 %v7689_v40, %v8877_v35  ;;  %v5508_v22 = vadd.f32 %v7696_v43, %v7693_v53 }
 0x16a   :  { %v5985_v42 = vpop.f32.mrf.mxu0  ;;  %v5496_v52 = vadd.f32 %v8873_v47, %v8872_v4  ;;  %v8881_v40 = vld [vmem:[#allocation5_spill] sm:$0xff] }
 0x16b   :  { %v7708_v1 = vpack.c.bf16 %v1538_v62, %v1537_v61  ;;  %v1536_v37 = vmax.f32 %v1476_v63, 0.0  ;;  %v1497_v20 = vadd.f32 %v5985_v42, %v1400_v28  ;;  %v8875_v61 = vld [vmem:[#allocation16_spill] sm:$0xff]  ;;  %v8876_v62 = vld [vmem:[#allocation17_spill] sm:$0xff]  ;;  %v8878_v28 = vld [vmem:[#allocation19_spill] sm:$0xff] }
 0x16c   :  { %v1488_v10 = vpop.f32.mrf.mxu0  ;;  %v5441_v63 = vadd.f32 %v8876_v62, %v8875_v61  ;;  %v5444_v8 = vadd.f32 %v8879_v3, %v8878_v28  ;;  %v1411_v7 = vadd.f32 %v5496_v52, %v1314_v57 }
 0x16d   :  { %v7712_v30 = vpack.c.bf16 %v1536_v37, %v1535_v6  ;;  %v1489_v19 = vadd.f32 %v1488_v10, %v1392_v11  ;;  %v1541_v56 = vmax.f32 %v1497_v20, 0.0  ;;  %v1419_v37 = vadd.f32 %v5502_v50, %v1322_v24  ;;  %v8880_v10 = vld [vmem:[#allocation8_spill] sm:$0xff]  ;;  %v5513_v20 = vpop.f32.mrf.mxu1 }
 0x16e   :  { %v5986_v15 = vpop.f32.mrf.mxu0  ;;  %v1335_v11 = vadd.f32 %v5447_v49, %v8880_v10  ;;  %v1327_v21 = vadd.f32 %v5441_v63, %v8881_v40  ;;  %v5514_v31 = vadd.f32 %v5513_v20, %v5512_v51  ;;  %v1330_v38 = vadd.f32 %v5444_v8, %v8884_v32  ;;  %v1721_v32 = vld [vmem:[%s8837_s3 + $0x8] sm:$0xff] }
 0x16f   :  { %v1500_v25 = vadd.f32 %v5986_v15, %v1403_v34  ;;  %6011 = vmatprep.mubr.bf16.mxu1 %v7712_v30  ;;  %6043 = vmatprep.mubr.bf16.mxu0 %v7712_v30  ;;  %v1539_v55 = vmax.f32 %v1489_v19, 0.0  ;;  %v8883_v19 = vld [vmem:[#allocation23_spill] sm:$0xff] }
 0x170   :  { %v1491_v0 = vpop.f32.mrf.mxu0  ;;  %6012 = vmatmul.mubr.bf16.vlgmr.msra.gmra.mxu1 %v7708_v1  ;;  %6044 = vmatmul.mubr.bf16.vlgmr.msra.gmra.mxu0 %v7708_v1  ;;  %v5505_v5 = vadd.f32 %v8883_v19, %v8882_v16  ;;  %v1432_v50 = vadd.f32 %v5511_v13, %v1335_v11  ;;  %v1427_v53 = vadd.f32 %v5508_v22, %v1330_v38  ;;  %v7011_v38 = vld [vmem:[%s8835_s2 + $0xb8] sm:$0xff]   ;;  %v4885_v22 = vld [vmem:[%s8837_s3 + $0x90] sm:$0xff] }
 0x171   :  { %v1542_v44 = vmax.f32 %v1500_v25, 0.0  ;;  %v1492_v48 = vadd.f32 %v1491_v0, %v1395_v17  ;;  %v1338_v25 = vadd.f32 %v5450_v29, %v1241_v23 }
 0x172   :  { %v5989_v59 = vpop.f32.mrf.mxu0 }
 0x173   :  { %v7737_v36 = vpack.c.bf16 %v1542_v44, %v1541_v56  ;;  %v1540_v39 = vmax.f32 %v1492_v48, 0.0  ;;  %v1513_v6 = vadd.f32 %v5989_v59, %v1416_v45  ;;  %v1424_v44 = vadd.f32 %v5505_v5, %v1327_v21 }
 0x174   :  { %v1504_v18 = vpop.f32.mrf.mxu0  ;;  %v1435_v60 = vadd.f32 %v5514_v31, %v1338_v25 }
 0x175   :  { %v7743_v42 = vpack.c.bf16 %v1540_v39, %v1539_v55  ;;  %v1505_v15 = vadd.f32 %v1504_v18, %v1408_v2  ;;  %v1545_v27 = vmax.f32 %v1513_v6, 0.0  ;;  %v4883_v55 = vld [vmem:[%s8837_s3 + $0x80] sm:$0xff] }
 0x176   :  { %v5990_v34 = vpop.f32.mrf.mxu0  ;;  %v1720_v39 = vld [vmem:[%s8837_s3] sm:$0xff] }
 0x177   :  { %v1516_v17 = vadd.f32 %v5990_v34, %v1419_v37  ;;  %6015 = vmatprep.mubr.bf16.mxu1 %v7743_v42  ;;  %6047 = vmatprep.mubr.bf16.mxu0 %v7743_v42  ;;  %v1543_v0 = vmax.f32 %v1505_v15, 0.0 }
 0x178   :  { %v1507_v26 = vpop.f32.mrf.mxu0  ;;  %6016 = vmatmul.mubr.bf16.gmra.mxu1 %v7737_v36  ;;  %6048 = vmatmul.mubr.bf16.gmra.mxu0 %v7737_v36 }
 0x179   :  { %v1546_v12 = vmax.f32 %v1516_v17, 0.0  ;;  %v1508_v14 = vadd.f32 %v1507_v26, %v1411_v7 }
 0x17a   :  { %v5993_v24 = vpop.f32.mrf.mxu0 }
 0x17b   :  { %v7758_v41 = vpack.c.bf16 %v1546_v12, %v1545_v27  ;;  %v1544_v33 = vmax.f32 %v1508_v14, 0.0  ;;  %v1529_v58 = vadd.f32 %v5993_v24, %v1432_v50  ;;  %v4884_v14 = vld [vmem:[%s8837_s3 + $0x88] sm:$0xff]  ;;  %v1722_v24 = vld [vmem:[%s8837_s3 + $0x10] sm:$0xff]  ;;  %v1723_v50 = vld [vmem:[%s8837_s3 + $0x18] sm:$0xff] }
 0x17c   :  { %v1520_v56 = vpop.f32.mrf.mxu0 }
 0x17d   :  { %v7760_v48 = vpack.c.bf16 %v1544_v33, %v1543_v0  ;;  %v1521_v54 = vadd.f32 %v1520_v56, %v1424_v44  ;;  %v1549_v4 = vmax.f32 %v1529_v58, 0.0  ;;  %v7012_v0 = vld [vmem:[%s8835_s2 + $0xb0] sm:$0xff]   ;;  %v4886_v33 = vld [vmem:[%s8837_s3 + $0x98] sm:$0xff]  ;;  %v4887_v56 = vld [vmem:[%s8837_s3 + $0xa0] sm:$0xff] }
 0x17e   :  { %v5994_v9 = vpop.f32.mrf.mxu0  ;;  %v1724_v44 = vld [vmem:[%s8837_s3 + $0x20] sm:$0xff]  ;;  %v7013_v58 = vld [vmem:[%s8835_s2 + $0xa8] sm:$0xff]  }
 0x17f   :  { %v1532_v57 = vadd.f32 %v5994_v9, %v1435_v60  ;;  %6019 = vmatprep.mubr.bf16.mxu1 %v7760_v48  ;;  %6051 = vmatprep.mubr.bf16.mxu0 %v7760_v48  ;;  %v1547_v46 = vmax.f32 %v1521_v54, 0.0  ;;  %v4888_v60 = vld [vmem:[%s8837_s3 + $0xa8] sm:$0xff]  ;;  %v4889_v54 = vld [vmem:[%s8837_s3 + $0xb0] sm:$0xff] }
 0x180   :  { %v1523_v43 = vpop.f32.mrf.mxu0  ;;  %6020 = vmatmul.mubr.bf16.gmra.mxu1 %v7758_v41  ;;  %6052 = vmatmul.mubr.bf16.gmra.mxu0 %v7758_v41  ;;  %v1725_v9 = vld [vmem:[%s8837_s3 + $0x28] sm:$0xff] }
 0x181   :  { %v1550_v47 = vmax.f32 %v1532_v57, 0.0  ;;  %v1524_v52 = vadd.f32 %v1523_v43, %v1427_v53  ;;  %v1726_v57 = vld [vmem:[%s8837_s3 + $0x30] sm:$0xff]  ;;  %v7014_v53 = vld [vmem:[%s8835_s2 + $0xa0] sm:$0xff]   ;;  %v4890_v43 = vld [vmem:[%s8837_s3 + $0xb8] sm:$0xff] }
 0x183   :  { %v7766_v49 = vpack.c.bf16 %v1550_v47, %v1549_v4  ;;  %v1548_v51 = vmax.f32 %v1524_v52, 0.0  ;;  %v1727_v4 = vld [vmem:[%s8837_s3 + $0x38] sm:$0xff]  ;;  %v4891_v47 = vld [vmem:[%s8837_s3 + $0xc0] sm:$0xff] }
 0x184   :  { %v1728_v52 = vld [vmem:[%s8837_s3 + $0x40] sm:$0xff] }
 0x185   :  { %v7768_v59 = vpack.c.bf16 %v1548_v51, %v1547_v46  ;;  %v7015_v46 = vld [vmem:[%s8835_s2 + $0x98] sm:$0xff]   ;;  %v4892_v51 = vld [vmem:[%s8837_s3 + $0xc8] sm:$0xff] }
 0x187   :  { %6023 = vmatprep.mubr.bf16.mxu1 %v7768_v59  ;;  %6055 = vmatprep.mubr.bf16.mxu0 %v7768_v59 }
 0x188   :  { %6024 = vmatmul.mubr.bf16.gmra.mxu1 %v7766_v49  ;;  %6056 = vmatmul.mubr.bf16.gmra.mxu0 %v7766_v49 }
 0x189   :  { %6091 = vmatprep.mubr.f32.mxu1 %v4883_v55  ;;  %6147 = vmatprep.mubr.f32.mxu0 %v1720_v39  ;;  %v1729_v55 = vld [vmem:[%s8837_s3 + $0x48] sm:$0xff]  ;;  %v4893_v39 = vld [vmem:[%s8837_s3 + $0xd0] sm:$0xff] }
 0x230   :  { %v7780_v45 = vpop.f32.mrf.mxu1  ;;  %v7782_v61 = vpop.f32.mrf.mxu0 }
 0x232   :  { %v7784_v62 = vpop.f32.mrf.mxu1  ;;  %v7786_v63 = vpop.f32.mrf.mxu0 }
 0x234   :  { %v7788_v35 = vpop.f32.mrf.mxu1  ;;  %v7790_v29 = vpop.f32.mrf.mxu0 }
 0x236   :  { %v7792_v18 = vpop.f32.mrf.mxu1  ;;  %v7794_v2 = vpop.f32.mrf.mxu0 }
 0x238   :  { %v6017_v6 = vpop.f32.mrf.mxu1  ;;  %v6049_v37 = vpop.f32.mrf.mxu0 }
 0x23a   :  { %v7796_v23 = vpop.f32.mrf.mxu1  ;;  %v7798_v28 = vpop.f32.mrf.mxu0 }
 0x23c   :  { %v6018_v3 = vpop.f32.mrf.mxu1  ;;  %v6050_v8 = vpop.f32.mrf.mxu0 }
 0x23e   :  { %v1676_v10 = vpop.f32.mrf.mxu1  ;;  %v1854_v11 = vpop.f32.mrf.mxu0 }
 0x240   :  { %v6021_v20 = vpop.f32.mrf.mxu1  ;;  %v6053_v34 = vpop.f32.mrf.mxu0 }
 0x242   :  { %v1689_v7 = vpop.f32.mrf.mxu1  ;;  %v1867_v13 = vpop.f32.mrf.mxu0 }
 0x244   :  { %v6022_v15 = vpop.f32.mrf.mxu1  ;;  %v6054_v17 = vpop.f32.mrf.mxu0 }
 0x246   :  { %v1692_v40 = vpop.f32.mrf.mxu1  ;;  %v1870_v21 = vpop.f32.mrf.mxu0 }
 0x248   :  { %v6025_v16 = vpop.f32.mrf.mxu1  ;;  %v6057_v19 = vpop.f32.mrf.mxu0 }
 0x24a   :  { %v1705_v5 = vpop.f32.mrf.mxu1  ;;  %v1883_v25 = vpop.f32.mrf.mxu0 }
 0x24c   :  { %v6026_v26 = vpop.f32.mrf.mxu1  ;;  %v6058_v31 = vpop.f32.mrf.mxu0 }
 0x24d   :  { %6059 = vmatprep.subr.mxu1 %v6058_v31  ;;  %6115 = vmatprep.subr.mxu0 %v6026_v26 }
 0x24e   :  { %6060 = vmatpush3.msra.mxu1 %v6058_v31  ;;  %6116 = vmatpush3.msra.mxu0 %v6026_v26  ;;  %v1708_v27 = vpop.f32.mrf.mxu1  ;;  %v1886_v12 = vpop.f32.mrf.mxu0  ;;  %v7033_v26 = vld [vmem:[%s8835_s2 + $0x108] sm:$0xff]   ;;  %v7034_v31 = vld [vmem:[%s8835_s2 + $0x100] sm:$0xff]  }
 0x24f   :  { %6061 = vmatprep.subr.mxu1 %v6057_v19  ;;  %6117 = vmatprep.subr.mxu0 %v6025_v16 }
 0x250   :  { %6062 = vmatpush3.msra.mxu1 %v6057_v19  ;;  %6118 = vmatpush3.msra.mxu0 %v6025_v16  ;;  %v7029_v16 = vld [vmem:[%s8835_s2 + $0x128] sm:$0xff]   ;;  %v7030_v19 = vld [vmem:[%s8835_s2 + $0x120] sm:$0xff]  }
 0x251   :  { %6063 = vmatprep.subr.mxu1 %v1886_v12  ;;  %6119 = vmatprep.subr.mxu0 %v1708_v27 }
 0x252   :  { %6064 = vmatpush3.msra.mxu1 %v1886_v12  ;;  %6120 = vmatpush3.msra.mxu0 %v1708_v27  ;;  %v7035_v27 = vld [vmem:[%s8835_s2 + $0x178] sm:$0xff]   ;;  %v7036_v12 = vld [vmem:[%s8835_s2 + $0x170] sm:$0xff]  }
 0x253   :  { %6065 = vmatprep.subr.mxu1 %v1883_v25  ;;  %6121 = vmatprep.subr.mxu0 %v1705_v5 }
 0x254   :  { %6066 = vmatpush3.msra.mxu1 %v1883_v25  ;;  %6122 = vmatpush3.msra.mxu0 %v1705_v5  ;;  %v7031_v5 = vld [vmem:[%s8835_s2 + $0x118] sm:$0xff]   ;;  %v7032_v25 = vld [vmem:[%s8835_s2 + $0x110] sm:$0xff]  }
 0x255   :  { %6067 = vmatprep.subr.mxu1 %v6054_v17  ;;  %6123 = vmatprep.subr.mxu0 %v6022_v15 }
 0x256   :  { %6068 = vmatpush3.msra.mxu1 %v6054_v17  ;;  %6124 = vmatpush3.msra.mxu0 %v6022_v15  ;;  %v7025_v15 = vld [vmem:[%s8835_s2 + $0xc8] sm:$0xff]   ;;  %v7026_v17 = vld [vmem:[%s8835_s2 + $0xc0] sm:$0xff]  }
 0x257   :  { %6069 = vmatprep.subr.mxu1 %v6053_v34  ;;  %6125 = vmatprep.subr.mxu0 %v6021_v20 }
 0x258   :  { %6070 = vmatpush3.msra.mxu1 %v6053_v34  ;;  %6126 = vmatpush3.msra.mxu0 %v6021_v20  ;;  %v7021_v20 = vld [vmem:[%s8835_s2 + $0xe8] sm:$0xff]   ;;  %v7022_v34 = vld [vmem:[%s8835_s2 + $0xe0] sm:$0xff]  }
 0x259   :  { %6071 = vmatprep.subr.mxu1 %v1870_v21  ;;  %6127 = vmatprep.subr.mxu0 %v1692_v40 }
 0x25a   :  { %6072 = vmatpush3.msra.mxu1 %v1870_v21  ;;  %6128 = vmatpush3.msra.mxu0 %v1692_v40  ;;  %v7027_v40 = vld [vmem:[%s8835_s2 + $0x138] sm:$0xff]   ;;  %v7028_v21 = vld [vmem:[%s8835_s2 + $0x130] sm:$0xff]  }
 0x25b   :  { %6073 = vmatprep.subr.mxu1 %v1867_v13  ;;  %6129 = vmatprep.subr.mxu0 %v1689_v7 }
 0x25c   :  { %6074 = vmatpush3.msra.mxu1 %v1867_v13  ;;  %6130 = vmatpush3.msra.mxu0 %v1689_v7  ;;  %v7023_v7 = vld [vmem:[%s8835_s2 + $0xd8] sm:$0xff]   ;;  %v7024_v13 = vld [vmem:[%s8835_s2 + $0xd0] sm:$0xff]  }
 0x25d   :  { %6075 = vmatprep.subr.mxu1 %v6050_v8  ;;  %6131 = vmatprep.subr.mxu0 %v6018_v3 }
 0x25e   :  { %6076 = vmatpush3.msra.mxu1 %v6050_v8  ;;  %6132 = vmatpush3.msra.mxu0 %v6018_v3  ;;  %v4898_v3 = vld [vmem:[%s8837_s3 + $0xf8] sm:$0xff] }
 0x25f   :  { %6077 = vmatprep.subr.mxu1 %v6049_v37  ;;  %6133 = vmatprep.subr.mxu0 %v6017_v6  ;;  %v1735_v8 = vld [vmem:[%s8837_s3 + $0x78] sm:$0xff] }
 0x260   :  { %6078 = vmatpush3.msra.mxu1 %v6049_v37  ;;  %6134 = vmatpush3.msra.mxu0 %v6017_v6  ;;  %v1733_v6 = vld [vmem:[%s8837_s3 + $0x68] sm:$0xff]  ;;  %v4897_v37 = vld [vmem:[%s8837_s3 + $0xf0] sm:$0xff] }
 0x261   :  { %6079 = vmatprep.subr.mxu1 %v1854_v11  ;;  %6135 = vmatprep.subr.mxu0 %v1676_v10 }
 0x262   :  { %6080 = vmatpush3.msra.mxu1 %v1854_v11  ;;  %6136 = vmatpush3.msra.mxu0 %v1676_v10  ;;  %v7019_v10 = vld [vmem:[%s8835_s2 + $0xf8] sm:$0xff]   ;;  %v7020_v11 = vld [vmem:[%s8835_s2 + $0xf0] sm:$0xff]  }
 0x263   :  { %6081 = vmatprep.subr.mxu1 %v7798_v28  ;;  %6137 = vmatprep.subr.mxu0 %v7796_v23 }
 0x264   :  { %6082 = vmatpush3.msra.mxu1 %v7798_v28  ;;  %6138 = vmatpush3.msra.mxu0 %v7796_v23  ;;  %v1734_v23 = vld [vmem:[%s8837_s3 + $0x70] sm:$0xff]  ;;  %v7018_v28 = vld [vmem:[%s8835_s2 + $0x80] sm:$0xff]  }
 0x265   :  { %6083 = vmatprep.subr.mxu1 %v7790_v29  ;;  %6139 = vmatprep.subr.mxu0 %v7788_v35 }
 0x266   :  { %6084 = vmatpush3.msra.mxu1 %v7790_v29  ;;  %6140 = vmatpush3.msra.mxu0 %v7788_v35  ;;  %v4895_v35 = vld [vmem:[%s8837_s3 + $0xe0] sm:$0xff] }
 0x267   :  { %6085 = vmatprep.subr.mxu1 %v7782_v61  ;;  %6141 = vmatprep.subr.mxu0 %v7780_v45  ;;  %v1732_v29 = vld [vmem:[%s8837_s3 + $0x60] sm:$0xff] }
 0x268   :  { %6086 = vmatpush3.msra.mxu1 %v7782_v61  ;;  %6142 = vmatpush3.msra.mxu0 %v7780_v45  ;;  %v1730_v45 = vld [vmem:[%s8837_s3 + $0x50] sm:$0xff] }
 0x269   :  { %6087 = vmatprep.subr.mxu1 %v7794_v2  ;;  %6143 = vmatprep.subr.mxu0 %v7792_v18  ;;  %v7016_v61 = vld [vmem:[%s8835_s2 + $0x90] sm:$0xff]  }
 0x26a   :  { %6088 = vmatpush3.msra.mxu1 %v7794_v2  ;;  %6144 = vmatpush3.msra.mxu0 %v7792_v18  ;;  %v7017_v18 = vld [vmem:[%s8835_s2 + $0x88] sm:$0xff]  }
 0x26b   :  { %6089 = vmatprep.subr.mxu1 %v7786_v63  ;;  %6145 = vmatprep.subr.mxu0 %v7784_v62  ;;  %v4896_v2 = vld [vmem:[%s8837_s3 + $0xe8] sm:$0xff] }
 0x26c   :  { %6090 = vmatpush3.msra.mxu1 %v7786_v63  ;;  %6146 = vmatpush3.msra.mxu0 %v7784_v62  ;;  %v4894_v62 = vld [vmem:[%s8837_s3 + $0xd8] sm:$0xff] }
 0x26d   :  { %6092 = vmatmul.mubr.f32.vlgmr.msra.gmra.mxu1 %v4884_v14  ;;  %6148 = vmatmul.mubr.f32.vlgmr.msra.gmra.mxu0 %v1721_v32  ;;  %v1731_v63 = vld [vmem:[%s8837_s3 + $0x58] sm:$0xff]  ;;  %v7037_v14 = vld [vmem:[%s8835_s2 + $0x168] sm:$0xff]   ;;  %v7038_v32 = vld [vmem:[%s8835_s2 + $0x160] sm:$0xff]  }
 0x26e   :  { %6171 = vmatprep.subr.bf16.mxu1 %v7011_v38  ;;  %6094 = vmatprep.mubr.f32.mxu1 %v4885_v22  ;;  %v7040_v22 = vld [vmem:[%s8835_s2 + $0x150] sm:$0xff]  }
 0x26f   :  { %6172 = vmatpush3.bf16.msra.mxu1 %v7011_v38  ;;  %6150 = vmatprep.mubr.f32.mxu0 %v1722_v24  ;;  %v7039_v38 = vld [vmem:[%s8835_s2 + $0x158] sm:$0xff]   ;;  %v7041_v24 = vld [vmem:[%s8835_s2 + $0x148] sm:$0xff]  }
 0x270   :  { %6173 = vmatprep.subr.bf16.mxu1 %v7012_v0 }
 0x271   :  { %6095 = vmatmul.mubr.f32.gmra.mxu1 %v4886_v33  ;;  %6151 = vmatmul.mubr.f32.gmra.mxu0 %v1723_v50  ;;  %v7043_v33 = vld [vmem:[%s8835_s2 + $0x1b8] sm:$0xff]   ;;  %v7044_v50 = vld [vmem:[%s8835_s2 + $0x1b0] sm:$0xff]  }
 0x272   :  { %6097 = vmatprep.mubr.f32.mxu1 %v4887_v56  ;;  %6153 = vmatprep.mubr.f32.mxu0 %v1724_v44  ;;  %v7045_v56 = vld [vmem:[%s8835_s2 + $0x1a8] sm:$0xff]   ;;  %v7046_v44 = vld [vmem:[%s8835_s2 + $0x1a0] sm:$0xff]  }
 0x273   :  { %6174 = vmatpush3.bf16.msra.mxu1 %v7012_v0  ;;  %v7042_v0 = vld [vmem:[%s8835_s2 + $0x140] sm:$0xff]  }
 0x274   :  { %6175 = vmatprep.subr.bf16.mxu1 %v7013_v58 }
 0x275   :  { %6098 = vmatmul.mubr.f32.gmra.mxu1 %v4888_v60  ;;  %6154 = vmatmul.mubr.f32.gmra.mxu0 %v1725_v9  ;;  %v7048_v60 = vld [vmem:[%s8835_s2 + $0x190] sm:$0xff]   ;;  %v7049_v9 = vld [vmem:[%s8835_s2 + $0x188] sm:$0xff]  }
 0x276   :  { %6100 = vmatprep.mubr.f32.mxu1 %v4889_v54  ;;  %6156 = vmatprep.mubr.f32.mxu0 %v1726_v57  ;;  %v7050_v54 = vld [vmem:[%s8835_s2 + $0x180] sm:$0xff]   ;;  %v7051_v57 = vld [vmem:[%s8835_s2 + $0x1f8] sm:$0xff]  }
 0x277   :  { %6176 = vmatpush3.bf16.msra.mxu1 %v7013_v58  ;;  %v7047_v58 = vld [vmem:[%s8835_s2 + $0x198] sm:$0xff]  }
 0x278   :  { %6177 = vmatprep.subr.bf16.mxu1 %v7014_v53 }
 0x279   :  { %6101 = vmatmul.mubr.f32.gmra.mxu1 %v4890_v43  ;;  %6157 = vmatmul.mubr.f32.gmra.mxu0 %v1727_v4  ;;  %v7052_v43 = vld [vmem:[%s8835_s2 + $0x1f0] sm:$0xff]   ;;  %v7053_v4 = vld [vmem:[%s8835_s2 + $0x1e8] sm:$0xff]  }
 0x27a   :  { %6103 = vmatprep.mubr.f32.mxu1 %v4891_v47  ;;  %6159 = vmatprep.mubr.f32.mxu0 %v1728_v52  ;;  %v7054_v47 = vld [vmem:[%s8835_s2 + $0x1e0] sm:$0xff]   ;;  %v7055_v52 = vld [vmem:[%s8835_s2 + $0x1d8] sm:$0xff]  }
 0x27b   :  { %6178 = vmatpush3.bf16.msra.mxu1 %v7014_v53  ;;  %v4923_v53 = vld [vmem:[%s8837_s3 + $0x100] sm:$0xff] }
 0x27c   :  { %6179 = vmatprep.subr.bf16.mxu1 %v7015_v46 }
 0x27d   :  { %6104 = vmatmul.mubr.f32.gmra.mxu1 %v4892_v51  ;;  %6160 = vmatmul.mubr.f32.gmra.mxu0 %v1729_v55  ;;  %v7057_v51 = vld [vmem:[%s8835_s2 + $0x1c8] sm:$0xff]   ;;  %v7058_v55 = vld [vmem:[%s8835_s2 + $0x1c0] sm:$0xff]  }
 0x27e   :  { %6106 = vmatprep.mubr.f32.mxu1 %v4893_v39  ;;  %6162 = vmatprep.mubr.f32.mxu0 %v1730_v45  ;;  %v7059_v39 = vld [vmem:[%s8835_s2 + $0x238] sm:$0xff]   ;;  %v7060_v45 = vld [vmem:[%s8835_s2 + $0x230] sm:$0xff]  }
 0x27f   :  { %6180 = vmatpush3.bf16.msra.mxu1 %v7015_v46  ;;  %v7056_v46 = vld [vmem:[%s8835_s2 + $0x1d0] sm:$0xff]  }
 0x280   :  { %6181 = vmatprep.subr.bf16.mxu1 %v7016_v61 }
 0x281   :  { %6107 = vmatmul.mubr.f32.gmra.mxu1 %v4894_v62  ;;  %6163 = vmatmul.mubr.f32.gmra.mxu0 %v1731_v63 }
 0x282   :  { %6109 = vmatprep.mubr.f32.mxu1 %v4895_v35  ;;  %6165 = vmatprep.mubr.f32.mxu0 %v1732_v29 }
 0x283   :  { %6182 = vmatpush3.bf16.msra.mxu1 %v7016_v61 }
 0x284   :  { %6183 = vmatprep.subr.bf16.mxu1 %v7017_v18 }
 0x285   :  { %6110 = vmatmul.mubr.f32.gmra.mxu1 %v4896_v2  ;;  %6166 = vmatmul.mubr.f32.gmra.mxu0 %v1733_v6 }
 0x286   :  { %6112 = vmatprep.mubr.f32.mxu1 %v4897_v37  ;;  %6168 = vmatprep.mubr.f32.mxu0 %v1734_v23 }
 0x287   :  { %6184 = vmatpush3.bf16.msra.mxu1 %v7017_v18  ;;  %v7061_v18 = vld [vmem:[%s8835_s2 + $0x228] sm:$0xff]  }
 0x288   :  { %6185 = vmatprep.subr.bf16.mxu1 %v7018_v28 }
 0x289   :  { %6113 = vmatmul.mubr.f32.gmra.mxu1 %v4898_v3  ;;  %6169 = vmatmul.mubr.f32.gmra.mxu0 %v1735_v8  ;;  %v7062_v3 = vld [vmem:[%s8835_s2 + $0x220] sm:$0xff]  }
 0x28a   :  { %6187 = vmatprep.mubr.bf16.mxu1 %v7712_v30  ;;  %6235 = vmatprep.mubr.f32.mxu0 %v4923_v53 }
 0x28b   :  { %6186 = vmatpush3.bf16.msra.mxu1 %v7018_v28 }
 0x28c   :  { %6259 = vmatprep.subr.bf16.mxu1 %v7019_v10 }
 0x28e   :  { %6188 = vmatmul.mubr.bf16.vlgmr.msra.gmra.mxu1 %v7708_v1 }
 0x28f   :  { %6191 = vmatprep.mubr.bf16.mxu1 %v7743_v42  ;;  %6260 = vmatpush3.bf16.msra.mxu1 %v7019_v10 }
 0x290   :  { %6261 = vmatprep.subr.bf16.mxu1 %v7020_v11 }
 0x293   :  { %6262 = vmatpush3.bf16.msra.mxu1 %v7020_v11 }
 0x294   :  { %6263 = vmatprep.subr.bf16.mxu1 %v7021_v20 }
 0x296   :  { %6192 = vmatmul.mubr.bf16.gmra.mxu1 %v7737_v36 }
 0x297   :  { %6195 = vmatprep.mubr.bf16.mxu1 %v7760_v48  ;;  %6264 = vmatpush3.bf16.msra.mxu1 %v7021_v20 }
 0x298   :  { %6265 = vmatprep.subr.bf16.mxu1 %v7022_v34 }
 0x29b   :  { %6266 = vmatpush3.bf16.msra.mxu1 %v7022_v34 }
 0x29c   :  { %6267 = vmatprep.subr.bf16.mxu1 %v7023_v7 }
 0x29e   :  { %6196 = vmatmul.mubr.bf16.gmra.mxu1 %v7758_v41 }
 0x29f   :  { %6199 = vmatprep.mubr.bf16.mxu1 %v7768_v59  ;;  %6268 = vmatpush3.bf16.msra.mxu1 %v7023_v7  ;;  %v7063_v7 = vld [vmem:[%s8835_s2 + $0x218] sm:$0xff]  }
 0x2a0   :  { %6269 = vmatprep.subr.bf16.mxu1 %v7024_v13 }
 0x2a3   :  { %6270 = vmatpush3.bf16.msra.mxu1 %v7024_v13 }
 0x2a4   :  { %6271 = vmatprep.subr.bf16.mxu1 %v7025_v15 }
 0x2a6   :  { %6200 = vmatmul.mubr.bf16.gmra.mxu1 %v7766_v49 }
 0x2a7   :  { %6272 = vmatpush3.bf16.msra.mxu1 %v7025_v15  ;;  %6275 = vmatprep.mubr.bf16.mxu1 %v7712_v30 }
 0x2a8   :  { %6273 = vmatprep.subr.bf16.mxu1 %v7026_v17 }
 0x2ab   :  { %6274 = vmatpush3.bf16.msra.mxu1 %v7026_v17 }
 0x2ac   :  { %6347 = vmatprep.subr.bf16.mxu1 %v7027_v40 }
 0x2ae   :  { %6276 = vmatmul.mubr.bf16.vlgmr.msra.gmra.mxu1 %v7708_v1 }
 0x2af   :  { %6279 = vmatprep.mubr.bf16.mxu1 %v7743_v42  ;;  %6348 = vmatpush3.bf16.msra.mxu1 %v7027_v40 }
 0x2b0   :  { %6349 = vmatprep.subr.bf16.mxu1 %v7028_v21 }
 0x2b3   :  { %6350 = vmatpush3.bf16.msra.mxu1 %v7028_v21 }
 0x2b4   :  { %6351 = vmatprep.subr.bf16.mxu1 %v7029_v16 }
 0x2b6   :  { %6280 = vmatmul.mubr.bf16.gmra.mxu1 %v7737_v36 }
 0x2b7   :  { %6283 = vmatprep.mubr.bf16.mxu1 %v7760_v48  ;;  %6352 = vmatpush3.bf16.msra.mxu1 %v7029_v16  ;;  %v7064_v16 = vld [vmem:[%s8835_s2 + $0x210] sm:$0xff]  }
 0x2b8   :  { %6353 = vmatprep.subr.bf16.mxu1 %v7030_v19 }
 0x2bb   :  { %6354 = vmatpush3.bf16.msra.mxu1 %v7030_v19 }
 0x2bc   :  { %6355 = vmatprep.subr.bf16.mxu1 %v7031_v5 }
 0x2be   :  { %6284 = vmatmul.mubr.bf16.gmra.mxu1 %v7758_v41 }
 0x2bf   :  { %6287 = vmatprep.mubr.bf16.mxu1 %v7768_v59  ;;  %6356 = vmatpush3.bf16.msra.mxu1 %v7031_v5 }
 0x2c0   :  { %6357 = vmatprep.subr.bf16.mxu1 %v7032_v25 }
 0x2c3   :  { %6358 = vmatpush3.bf16.msra.mxu1 %v7032_v25 }
 0x2c4   :  { %6359 = vmatprep.subr.bf16.mxu1 %v7033_v26 }
 0x2c6   :  { %6288 = vmatmul.mubr.bf16.gmra.mxu1 %v7766_v49 }
 0x2c7   :  { %6360 = vmatpush3.bf16.msra.mxu1 %v7033_v26  ;;  %6363 = vmatprep.mubr.bf16.mxu1 %v7712_v30 }
 0x2c8   :  { %6361 = vmatprep.subr.bf16.mxu1 %v7034_v31 }
 0x2cb   :  { %6362 = vmatpush3.bf16.msra.mxu1 %v7034_v31 }
 0x2cc   :  { %6435 = vmatprep.subr.bf16.mxu1 %v7035_v27 }
 0x2ce   :  { %6364 = vmatmul.mubr.bf16.vlgmr.msra.gmra.mxu1 %v7708_v1 }
 0x2cf   :  { %6367 = vmatprep.mubr.bf16.mxu1 %v7743_v42  ;;  %6436 = vmatpush3.bf16.msra.mxu1 %v7035_v27 }
 0x2d0   :  { %6437 = vmatprep.subr.bf16.mxu1 %v7036_v12 }
 0x2d3   :  { %6438 = vmatpush3.bf16.msra.mxu1 %v7036_v12  ;;  %v7065_v12 = vld [vmem:[%s8835_s2 + $0x208] sm:$0xff]  }
 0x2d4   :  { %6439 = vmatprep.subr.bf16.mxu1 %v7037_v14 }
 0x2d6   :  { %6368 = vmatmul.mubr.bf16.gmra.mxu1 %v7737_v36 }
 0x2d7   :  { %6371 = vmatprep.mubr.bf16.mxu1 %v7760_v48  ;;  %6440 = vmatpush3.bf16.msra.mxu1 %v7037_v14 }
 0x2d8   :  { %6441 = vmatprep.subr.bf16.mxu1 %v7038_v32 }
 0x2db   :  { %6442 = vmatpush3.bf16.msra.mxu1 %v7038_v32 }
 0x2dc   :  { %6443 = vmatprep.subr.bf16.mxu1 %v7039_v38 }
 0x2de   :  { %6372 = vmatmul.mubr.bf16.gmra.mxu1 %v7758_v41 }
 0x2df   :  { %6375 = vmatprep.mubr.bf16.mxu1 %v7768_v59  ;;  %6444 = vmatpush3.bf16.msra.mxu1 %v7039_v38 }
 0x2e0   :  { %6445 = vmatprep.subr.bf16.mxu1 %v7040_v22 }
 0x2e3   :  { %6446 = vmatpush3.bf16.msra.mxu1 %v7040_v22 }
 0x2e4   :  { %6447 = vmatprep.subr.bf16.mxu1 %v7041_v24 }
 0x2e6   :  { %6376 = vmatmul.mubr.bf16.gmra.mxu1 %v7766_v49 }
 0x2e7   :  { %6448 = vmatpush3.bf16.msra.mxu1 %v7041_v24  ;;  %6451 = vmatprep.mubr.bf16.mxu1 %v7712_v30 }
 0x2e8   :  { %6449 = vmatprep.subr.bf16.mxu1 %v7042_v0 }
 0x2eb   :  { %6450 = vmatpush3.bf16.msra.mxu1 %v7042_v0 }
 0x2ec   :  { %6523 = vmatprep.subr.bf16.mxu1 %v7043_v33 }
 0x2ee   :  { %6452 = vmatmul.mubr.bf16.vlgmr.msra.gmra.mxu1 %v7708_v1 }
 0x2ef   :  { %6455 = vmatprep.mubr.bf16.mxu1 %v7743_v42  ;;  %6524 = vmatpush3.bf16.msra.mxu1 %v7043_v33  ;;  %v7066_v33 = vld [vmem:[%s8835_s2 + $0x200] sm:$0xff]  }
 0x2f0   :  { %6525 = vmatprep.subr.bf16.mxu1 %v7044_v50 }
 0x2f3   :  { %6526 = vmatpush3.bf16.msra.mxu1 %v7044_v50 }
 0x2f4   :  { %6527 = vmatprep.subr.bf16.mxu1 %v7045_v56 }
 0x2f6   :  { %6456 = vmatmul.mubr.bf16.gmra.mxu1 %v7737_v36 }
 0x2f7   :  { %6459 = vmatprep.mubr.bf16.mxu1 %v7760_v48  ;;  %6528 = vmatpush3.bf16.msra.mxu1 %v7045_v56 }
 0x2f8   :  { %6529 = vmatprep.subr.bf16.mxu1 %v7046_v44 }
 0x2fb   :  { %6530 = vmatpush3.bf16.msra.mxu1 %v7046_v44 }
 0x2fc   :  { %6531 = vmatprep.subr.bf16.mxu1 %v7047_v58 }
 0x2fe   :  { %6460 = vmatmul.mubr.bf16.gmra.mxu1 %v7758_v41 }
 0x2ff   :  { %6463 = vmatprep.mubr.bf16.mxu1 %v7768_v59  ;;  %6532 = vmatpush3.bf16.msra.mxu1 %v7047_v58 }
 0x300   :  { %6533 = vmatprep.subr.bf16.mxu1 %v7048_v60 }
 0x303   :  { %6534 = vmatpush3.bf16.msra.mxu1 %v7048_v60 }
 0x304   :  { %6535 = vmatprep.subr.bf16.mxu1 %v7049_v9 }
 0x306   :  { %6464 = vmatmul.mubr.bf16.gmra.mxu1 %v7766_v49 }
 0x307   :  { %6536 = vmatpush3.bf16.msra.mxu1 %v7049_v9  ;;  %6539 = vmatprep.mubr.bf16.mxu1 %v7712_v30 }
 0x308   :  { %6537 = vmatprep.subr.bf16.mxu1 %v7050_v54 }
 0x30b   :  { %6538 = vmatpush3.bf16.msra.mxu1 %v7050_v54 }
 0x30c   :  { %6611 = vmatprep.subr.bf16.mxu1 %v7051_v57 }
 0x30e   :  { %6540 = vmatmul.mubr.bf16.vlgmr.msra.gmra.mxu1 %v7708_v1 }
 0x30f   :  { %6543 = vmatprep.mubr.bf16.mxu1 %v7743_v42  ;;  %6612 = vmatpush3.bf16.msra.mxu1 %v7051_v57 }
 0x310   :  { %6613 = vmatprep.subr.bf16.mxu1 %v7052_v43 }
 0x313   :  { %6614 = vmatpush3.bf16.msra.mxu1 %v7052_v43 }
 0x314   :  { %6615 = vmatprep.subr.bf16.mxu1 %v7053_v4 }
 0x316   :  { %6544 = vmatmul.mubr.bf16.gmra.mxu1 %v7737_v36 }
 0x317   :  { %6547 = vmatprep.mubr.bf16.mxu1 %v7760_v48  ;;  %6616 = vmatpush3.bf16.msra.mxu1 %v7053_v4 }
 0x318   :  { %6617 = vmatprep.subr.bf16.mxu1 %v7054_v47 }
 0x31b   :  { %6618 = vmatpush3.bf16.msra.mxu1 %v7054_v47 }
 0x31c   :  { %6619 = vmatprep.subr.bf16.mxu1 %v7055_v52 }
 0x31e   :  { %6548 = vmatmul.mubr.bf16.gmra.mxu1 %v7758_v41 }
 0x31f   :  { %6551 = vmatprep.mubr.bf16.mxu1 %v7768_v59  ;;  %6620 = vmatpush3.bf16.msra.mxu1 %v7055_v52 }
 0x320   :  { %6621 = vmatprep.subr.bf16.mxu1 %v7056_v46 }
 0x323   :  { %6622 = vmatpush3.bf16.msra.mxu1 %v7056_v46 }
 0x324   :  { %6623 = vmatprep.subr.bf16.mxu1 %v7057_v51 }
 0x326   :  { %6552 = vmatmul.mubr.bf16.gmra.mxu1 %v7766_v49 }
 0x327   :  { %6624 = vmatpush3.bf16.msra.mxu1 %v7057_v51  ;;  %6627 = vmatprep.mubr.bf16.mxu1 %v7712_v30 }
 0x328   :  { %6625 = vmatprep.subr.bf16.mxu1 %v7058_v55 }
 0x32b   :  { %6626 = vmatpush3.bf16.msra.mxu1 %v7058_v55 }
 0x32c   :  { %6699 = vmatprep.subr.bf16.mxu1 %v7059_v39 }
 0x32d   :  { %v6093_v61 = vpop.f32.mrf.mxu1  ;;  %v6149_v62 = vpop.f32.mrf.mxu0 }
 0x32e   :  { %v8104_v63 = vadd.f32 %v6149_v62, %v6093_v61  ;;  %6628 = vmatmul.mubr.bf16.vlgmr.msra.gmra.mxu1 %v7708_v1 }
 0x32f   :  { %6631 = vmatprep.mubr.bf16.mxu1 %v7743_v42  ;;  %6700 = vmatpush3.bf16.msra.mxu1 %v7059_v39  ;;  %v8108_v35 = vpop.f32.mrf.mxu1  ;;  %v8110_v29 = vpop.f32.mrf.mxu0 }
 0x330   :  { %6701 = vmatprep.subr.bf16.mxu1 %v7060_v45 }
 0x331   :  { %v6096_v2 = vpop.f32.mrf.mxu1  ;;  %v6152_v6 = vpop.f32.mrf.mxu0 }
 0x332   :  { %v8115_v37 = vadd.f32 %v6152_v6, %v6096_v2 }
 0x333   :  { %6702 = vmatpush3.bf16.msra.mxu1 %v7060_v45  ;;  %v8117_v23 = vpop.f32.mrf.mxu1  ;;  %v8119_v28 = vpop.f32.mrf.mxu0 }
 0x334   :  { %6703 = vmatprep.subr.bf16.mxu1 %v7061_v18 }
 0x335   :  { %v6099_v8 = vpop.f32.mrf.mxu1  ;;  %v6155_v10 = vpop.f32.mrf.mxu0 }
 0x336   :  { %v8124_v11 = vadd.f32 %v6155_v10, %v6099_v8  ;;  %6632 = vmatmul.mubr.bf16.gmra.mxu1 %v7737_v36 }
 0x337   :  { %6635 = vmatprep.mubr.bf16.mxu1 %v7760_v48  ;;  %6704 = vmatpush3.bf16.msra.mxu1 %v7061_v18  ;;  %v8128_v20 = vpop.f32.mrf.mxu1  ;;  %v8130_v34 = vpop.f32.mrf.mxu0 }
 0x338   :  { %6705 = vmatprep.subr.bf16.mxu1 %v7062_v3 }
 0x339   :  { %v6102_v13 = vpop.f32.mrf.mxu1  ;;  %v6158_v15 = vpop.f32.mrf.mxu0 }
 0x33a   :  { %v8135_v17 = vadd.f32 %v6158_v15, %v6102_v13 }
 0x33b   :  { %6706 = vmatpush3.bf16.msra.mxu1 %v7062_v3  ;;  %v8137_v40 = vpop.f32.mrf.mxu1  ;;  %v8139_v21 = vpop.f32.mrf.mxu0 }
 0x33c   :  { %6707 = vmatprep.subr.bf16.mxu1 %v7063_v7 }
 0x33d   :  { %v6105_v19 = vpop.f32.mrf.mxu1  ;;  %v6161_v5 = vpop.f32.mrf.mxu0 }
 0x33e   :  { %v8144_v25 = vadd.f32 %v6161_v5, %v6105_v19  ;;  %6636 = vmatmul.mubr.bf16.gmra.mxu1 %v7758_v41 }
 0x33f   :  { %6639 = vmatprep.mubr.bf16.mxu1 %v7768_v59  ;;  %6708 = vmatpush3.bf16.msra.mxu1 %v7063_v7  ;;  %v2021_v26 = vpop.f32.mrf.mxu1  ;;  %v2166_v31 = vpop.f32.mrf.mxu0 }
 0x340   :  { %v8148_v27 = vadd.f32 %v2166_v31, %v2021_v26  ;;  %6709 = vmatprep.subr.bf16.mxu1 %v7064_v16  ;;  %v4924_v26 = vld [vmem:[%s8837_s3 + $0x108] sm:$0xff]  ;;  %v4925_v31 = vld [vmem:[%s8837_s3 + $0x110] sm:$0xff] }
 0x341   :  { %v6108_v14 = vpop.f32.mrf.mxu1  ;;  %v6164_v32 = vpop.f32.mrf.mxu0 }
 0x342   :  { %v8153_v38 = vadd.f32 %v6164_v32, %v6108_v14  ;;  %v4926_v32 = vld [vmem:[%s8837_s3 + $0x118] sm:$0xff] }
 0x343   :  { %6710 = vmatpush3.bf16.msra.mxu1 %v7064_v16  ;;  %v2031_v22 = vpop.f32.mrf.mxu1  ;;  %v2176_v24 = vpop.f32.mrf.mxu0 }
 0x344   :  { %v8155_v0 = vadd.f32 %v2176_v24, %v2031_v22  ;;  %6711 = vmatprep.subr.bf16.mxu1 %v7065_v12  ;;  %v4927_v22 = vld [vmem:[%s8837_s3 + $0x120] sm:$0xff] }
 0x345   :  { %v6111_v50 = vpop.f32.mrf.mxu1  ;;  %v6167_v56 = vpop.f32.mrf.mxu0 }
 0x346   :  { %v8160_v44 = vadd.f32 %v6167_v56, %v6111_v50  ;;  %6640 = vmatmul.mubr.bf16.gmra.mxu1 %v7766_v49  ;;  %v4928_v50 = vld [vmem:[%s8837_s3 + $0x128] sm:$0xff]  ;;  %v4929_v56 = vld [vmem:[%s8837_s3 + $0x130] sm:$0xff] }
 0x347   :  { %6712 = vmatpush3.bf16.msra.mxu1 %v7065_v12  ;;  %6715 = vmatprep.mubr.bf16.mxu1 %v7712_v30  ;;  %v2041_v58 = vpop.f32.mrf.mxu1  ;;  %v2186_v60 = vpop.f32.mrf.mxu0 }
 0x348   :  { %v8164_v9 = vadd.f32 %v2186_v60, %v2041_v58  ;;  %6713 = vmatprep.subr.bf16.mxu1 %v7066_v33 }
 0x349   :  { %v6114_v54 = vpop.f32.mrf.mxu1  ;;  %v6170_v57 = vpop.f32.mrf.mxu0 }
 0x34a   :  { %v8166_v53 = vadd.f32 %v6170_v57, %v6114_v54  ;;  %v4930_v54 = vld [vmem:[%s8837_s3 + $0x138] sm:$0xff]  ;;  %v4931_v57 = vld [vmem:[%s8837_s3 + $0x140] sm:$0xff] }
 0x34b   :  { %6714 = vmatpush3.bf16.msra.mxu1 %v7066_v33  ;;  %v8168_v43 = vpop.f32.mrf.mxu1 }
 0x34e   :  { %v6189_v4 = vpop.f32.mrf.mxu1  ;;  %6716 = vmatmul.mubr.bf16.vlgmr.msra.gmra.mxu1 %v7708_v1 }
 0x34f   :  { %6719 = vmatprep.mubr.bf16.mxu1 %v7743_v42 }
 0x350   :  { %v8172_v47 = vpop.f32.mrf.mxu1 }
 0x352   :  { %v6190_v30 = vpop.f32.mrf.mxu1 }
 0x354   :  { %v2307_v52 = vpop.f32.mrf.mxu1 }
 0x356   :  { %v6193_v46 = vpop.f32.mrf.mxu1  ;;  %6720 = vmatmul.mubr.bf16.gmra.mxu1 %v7737_v36 }
 0x357   :  { %6723 = vmatprep.mubr.bf16.mxu1 %v7760_v48 }
 0x358   :  { %v2320_v51 = vpop.f32.mrf.mxu1 }
 0x35a   :  { %v6194_v55 = vpop.f32.mrf.mxu1 }
 0x35c   :  { %v2323_v39 = vpop.f32.mrf.mxu1 }
 0x35e   :  { %v6197_v45 = vpop.f32.mrf.mxu1  ;;  %6724 = vmatmul.mubr.bf16.gmra.mxu1 %v7758_v41 }
 0x35f   :  { %6727 = vmatprep.mubr.bf16.mxu1 %v7768_v59 }
 0x360   :  { %v2336_v1 = vpop.f32.mrf.mxu1 }
 0x362   :  { %v6198_v61 = vpop.f32.mrf.mxu1 }
 0x364   :  { %v2339_v42 = vpop.f32.mrf.mxu1 }
 0x366   :  { %v6201_v62 = vpop.f32.mrf.mxu1  ;;  %6728 = vmatmul.mubr.bf16.gmra.mxu1 %v7766_v49 }
 0x368   :  { %v2352_v18 = vpop.f32.mrf.mxu1 }
 0x36a   :  { %v6202_v2 = vpop.f32.mrf.mxu1 }
 0x36b   :  { %6203 = vmatprep.subr.mxu0 %v6202_v2 }
 0x36c   :  { %v2355_v36 = vpop.f32.mrf.mxu1  ;;  %6204 = vmatpush3.msra.mxu0 %v6202_v2  ;;  %v4938_v2 = vld [vmem:[%s8837_s3 + $0x178] sm:$0xff] }
 0x36d   :  { %6205 = vmatprep.subr.mxu0 %v6201_v62 }
 0x36e   :  { %6206 = vmatpush3.msra.mxu0 %v6201_v62  ;;  %v8179_v48 = vpop.f32.mrf.mxu1 }
 0x36f   :  { %6207 = vmatprep.subr.mxu0 %v2355_v36 }
 0x370   :  { %6208 = vmatpush3.msra.mxu0 %v2355_v36  ;;  %v8181_v41 = vpop.f32.mrf.mxu1  ;;  %v4963_v36 = vld [vmem:[%s8837_s3 + $0x180] sm:$0xff] }
 0x371   :  { %6209 = vmatprep.subr.mxu0 %v2352_v18 }
 0x372   :  { %6210 = vmatpush3.msra.mxu0 %v2352_v18  ;;  %v8183_v59 = vpop.f32.mrf.mxu1 }
 0x373   :  { %6211 = vmatprep.subr.mxu0 %v6198_v61 }
 0x374   :  { %6212 = vmatpush3.msra.mxu0 %v6198_v61  ;;  %v8185_v49 = vpop.f32.mrf.mxu1  ;;  %v4936_v61 = vld [vmem:[%s8837_s3 + $0x168] sm:$0xff] }
 0x375   :  { %6213 = vmatprep.subr.mxu0 %v6197_v45 }
 0x376   :  { %6214 = vmatpush3.msra.mxu0 %v6197_v45  ;;  %v8187_v6 = vpop.f32.mrf.mxu1 }
 0x377   :  { %6215 = vmatprep.subr.mxu0 %v2339_v42 }
 0x378   :  { %6216 = vmatpush3.msra.mxu0 %v2339_v42  ;;  %v8189_v3 = vpop.f32.mrf.mxu1  ;;  %v4937_v42 = vld [vmem:[%s8837_s3 + $0x170] sm:$0xff] }
 0x379   :  { %6217 = vmatprep.subr.mxu0 %v2336_v1 }
 0x37a   :  { %6218 = vmatpush3.msra.mxu0 %v2336_v1  ;;  %v8191_v8 = vpop.f32.mrf.mxu1 }
 0x37b   :  { %6219 = vmatprep.subr.mxu0 %v6194_v55 }
 0x37c   :  { %6220 = vmatpush3.msra.mxu0 %v6194_v55  ;;  %v8193_v10 = vpop.f32.mrf.mxu1  ;;  %v4934_v55 = vld [vmem:[%s8837_s3 + $0x158] sm:$0xff] }
 0x37d   :  { %6221 = vmatprep.subr.mxu0 %v6193_v46 }
 0x37e   :  { %6222 = vmatpush3.msra.mxu0 %v6193_v46  ;;  %v6285_v7 = vpop.f32.mrf.mxu1 }
 0x37f   :  { %6223 = vmatprep.subr.mxu0 %v2323_v39 }
 0x380   :  { %6224 = vmatpush3.msra.mxu0 %v2323_v39  ;;  %v2676_v13 = vpop.f32.mrf.mxu1  ;;  %v4935_v39 = vld [vmem:[%s8837_s3 + $0x160] sm:$0xff] }
 0x381   :  { %6225 = vmatprep.subr.mxu0 %v2320_v51 }
 0x382   :  { %6226 = vmatpush3.msra.mxu0 %v2320_v51  ;;  %v6286_v15 = vpop.f32.mrf.mxu1 }
 0x383   :  { %6227 = vmatprep.subr.mxu0 %v6190_v30 }
 0x384   :  { %6228 = vmatpush3.msra.mxu0 %v6190_v30  ;;  %v2679_v16 = vpop.f32.mrf.mxu1  ;;  %v4932_v30 = vld [vmem:[%s8837_s3 + $0x148] sm:$0xff] }
 0x385   :  { %6229 = vmatprep.subr.mxu0 %v6189_v4 }
 0x386   :  { %6230 = vmatpush3.msra.mxu0 %v6189_v4  ;;  %v6289_v19 = vpop.f32.mrf.mxu1 }
 0x387   :  { %6231 = vmatprep.subr.mxu0 %v2307_v52 }
 0x388   :  { %6232 = vmatpush3.msra.mxu0 %v2307_v52  ;;  %v2692_v5 = vpop.f32.mrf.mxu1  ;;  %v4933_v52 = vld [vmem:[%s8837_s3 + $0x150] sm:$0xff] }
 0x389   :  { %6233 = vmatprep.subr.mxu0 %v8172_v47 }
 0x38a   :  { %6234 = vmatpush3.msra.mxu0 %v8172_v47  ;;  %v6290_v12 = vpop.f32.mrf.mxu1 }
 0x38b   :  { %6236 = vmatmul.mubr.f32.vlgmr.msra.gmra.mxu0 %v4924_v26  ;;  %6291 = vmatprep.subr.mxu0 %v6290_v12  ;;  %v4970_v26 = vld [vmem:[%s8837_s3 + $0x1b8] sm:$0xff] }
 0x38c   :  { %v2695_v14 = vpop.f32.mrf.mxu1  ;;  %6292 = vmatpush3.msra.mxu0 %v6290_v12  ;;  %6238 = vmatprep.mubr.f32.mxu0 %v4925_v31  ;;  %v4971_v31 = vld [vmem:[%s8837_s3 + $0x1c0] sm:$0xff] }
 0x38d   :  { %6293 = vmatprep.subr.mxu0 %v6289_v19 }
 0x38e   :  { %6294 = vmatpush3.msra.mxu0 %v6289_v19  ;;  %v8209_v24 = vpop.f32.mrf.mxu1 }
 0x38f   :  { %6239 = vmatmul.mubr.f32.gmra.mxu0 %v4926_v32  ;;  %6295 = vmatprep.subr.mxu0 %v2695_v14  ;;  %v4972_v32 = vld [vmem:[%s8837_s3 + $0x1c8] sm:$0xff] }
 0x390   :  { %6296 = vmatpush3.msra.mxu0 %v2695_v14  ;;  %v8211_v33 = vpop.f32.mrf.mxu1  ;;  %6241 = vmatprep.mubr.f32.mxu0 %v4927_v22  ;;  %v4973_v22 = vld [vmem:[%s8837_s3 + $0x1d0] sm:$0xff] }
 0x391   :  { %6297 = vmatprep.subr.mxu0 %v2692_v5 }
 0x392   :  { %6298 = vmatpush3.msra.mxu0 %v2692_v5  ;;  %v8219_v58 = vpop.f32.mrf.mxu1 }
 0x393   :  { %6242 = vmatmul.mubr.f32.gmra.mxu0 %v4928_v50  ;;  %6299 = vmatprep.subr.mxu0 %v6286_v15 }
 0x394   :  { %6300 = vmatpush3.msra.mxu0 %v6286_v15  ;;  %v8221_v60 = vpop.f32.mrf.mxu1  ;;  %6244 = vmatprep.mubr.f32.mxu0 %v4929_v56  ;;  %v4968_v15 = vld [vmem:[%s8837_s3 + $0x1a8] sm:$0xff] }
 0x395   :  { %6301 = vmatprep.subr.mxu0 %v6285_v7 }
 0x396   :  { %6302 = vmatpush3.msra.mxu0 %v6285_v7  ;;  %v8229_v4 = vpop.f32.mrf.mxu1  ;;  %v4967_v7 = vld [vmem:[%s8837_s3 + $0x1a0] sm:$0xff] }
 0x397   :  { %6245 = vmatmul.mubr.f32.gmra.mxu0 %v4930_v54  ;;  %6303 = vmatprep.subr.mxu0 %v2679_v16  ;;  %v4974_v54 = vld [vmem:[%s8837_s3 + $0x1d8] sm:$0xff] }
 0x398   :  { %6304 = vmatpush3.msra.mxu0 %v2679_v16  ;;  %v8231_v47 = vpop.f32.mrf.mxu1  ;;  %6247 = vmatprep.mubr.f32.mxu0 %v4931_v57  ;;  %v4969_v16 = vld [vmem:[%s8837_s3 + $0x1b0] sm:$0xff]  ;;  %v4975_v57 = vld [vmem:[%s8837_s3 + $0x1e0] sm:$0xff] }
 0x399   :  { %6305 = vmatprep.subr.mxu0 %v2676_v13 }
 0x39a   :  { %6306 = vmatpush3.msra.mxu0 %v2676_v13  ;;  %v8239_v46 = vpop.f32.mrf.mxu1 }
 0x39b   :  { %6248 = vmatmul.mubr.f32.gmra.mxu0 %v4932_v30  ;;  %6307 = vmatprep.subr.mxu0 %v8191_v8 }
 0x39c   :  { %6308 = vmatpush3.msra.mxu0 %v8191_v8  ;;  %v8243_v51 = vpop.f32.mrf.mxu1  ;;  %6250 = vmatprep.mubr.f32.mxu0 %v4933_v52  ;;  %v4965_v8 = vld [vmem:[%s8837_s3 + $0x190] sm:$0xff] }
 0x39d   :  { %6309 = vmatprep.subr.mxu0 %v8187_v6 }
 0x39e   :  { %6310 = vmatpush3.msra.mxu0 %v8187_v6  ;;  %v6373_v45 = vpop.f32.mrf.mxu1 }
 0x39f   :  { %6251 = vmatmul.mubr.f32.gmra.mxu0 %v4934_v55  ;;  %6311 = vmatprep.subr.mxu0 %v8193_v10  ;;  %v4977_v55 = vld [vmem:[%s8837_s3 + $0x1f0] sm:$0xff] }
 0x3a0   :  { %6312 = vmatpush3.msra.mxu0 %v8193_v10  ;;  %v8255_v1 = vpop.f32.mrf.mxu1  ;;  %6253 = vmatprep.mubr.f32.mxu0 %v4935_v39  ;;  %v4978_v39 = vld [vmem:[%s8837_s3 + $0x1f8] sm:$0xff] }
 0x3a1   :  { %6313 = vmatprep.subr.mxu0 %v8189_v3 }
 0x3a2   :  { %6314 = vmatpush3.msra.mxu0 %v8189_v3  ;;  %v6374_v62 = vpop.f32.mrf.mxu1  ;;  %v4964_v3 = vld [vmem:[%s8837_s3 + $0x188] sm:$0xff] }
 0x3a3   :  { %6254 = vmatmul.mubr.f32.gmra.mxu0 %v4936_v61  ;;  %6315 = vmatprep.subr.mxu0 %v8183_v59  ;;  %v5005_v61 = vld [vmem:[%s8837_s3 + $0x210] sm:$0xff] }
 0x3a4   :  { %6316 = vmatpush3.msra.mxu0 %v8183_v59  ;;  %v3019_v18 = vpop.f32.mrf.mxu1  ;;  %6256 = vmatprep.mubr.f32.mxu0 %v4937_v42 }
 0x3a5   :  { %6317 = vmatprep.subr.mxu0 %v8179_v48 }
 0x3a6   :  { %6318 = vmatpush3.msra.mxu0 %v8179_v48  ;;  %v6377_v6 = vpop.f32.mrf.mxu1 }
 0x3a7   :  { %6257 = vmatmul.mubr.f32.gmra.mxu0 %v4938_v2  ;;  %6319 = vmatprep.subr.mxu0 %v8185_v49  ;;  %v5008_v2 = vld [vmem:[%s8837_s3 + $0x228] sm:$0xff] }
 0x3a8   :  { %6320 = vmatpush3.msra.mxu0 %v8185_v49  ;;  %v3032_v59 = vpop.f32.mrf.mxu1  ;;  %6323 = vmatprep.mubr.f32.mxu0 %v4963_v36  ;;  %v4966_v49 = vld [vmem:[%s8837_s3 + $0x198] sm:$0xff]  ;;  %v5009_v36 = vld [vmem:[%s8837_s3 + $0x230] sm:$0xff] }
 0x3a9   :  { %6321 = vmatprep.subr.mxu0 %v8181_v41 }
 0x3aa   :  { %6322 = vmatpush3.msra.mxu0 %v8181_v41  ;;  %v6378_v48 = vpop.f32.mrf.mxu1 }
 0x3ab   :  { %6324 = vmatmul.mubr.f32.vlgmr.msra.gmra.mxu0 %v4964_v3  ;;  %6379 = vmatprep.subr.mxu0 %v6378_v48 }
 0x3ac   :  { %v3035_v10 = vpop.f32.mrf.mxu1  ;;  %6380 = vmatpush3.msra.mxu0 %v6378_v48  ;;  %6326 = vmatprep.mubr.f32.mxu0 %v4965_v8  ;;  %v5010_v8 = vld [vmem:[%s8837_s3 + $0x238] sm:$0xff]  ;;  %v5011_v48 = vld [vmem:[%s8837_s3 + $0x240] sm:$0xff] }
 0x3ad   :  { %6381 = vmatprep.subr.mxu0 %v6377_v6 }
 0x3ae   :  { %6382 = vmatpush3.msra.mxu0 %v6377_v6  ;;  %v8291_v13 = vpop.f32.mrf.mxu1  ;;  %v5171_v6 = vld [vmem:[%s8837_s3 + $0x440] sm:$0xff] }
 0x3af   :  { %6327 = vmatmul.mubr.f32.gmra.mxu0 %v4966_v49  ;;  %6383 = vmatprep.subr.mxu0 %v3035_v10 }
 0x3b0   :  { %6384 = vmatpush3.msra.mxu0 %v3035_v10  ;;  %v8293_v41 = vpop.f32.mrf.mxu1  ;;  %6329 = vmatprep.mubr.f32.mxu0 %v4967_v7  ;;  %v5012_v7 = vld [vmem:[%s8837_s3 + $0x248] sm:$0xff] }
 0x3b1   :  { %6385 = vmatprep.subr.mxu0 %v3032_v59  ;;  %6775 = vmatprep.mubr.f32.mxu1 %v5171_v6 }
 0x3b2   :  { %6386 = vmatpush3.msra.mxu0 %v3032_v59  ;;  %v8301_v19 = vpop.f32.mrf.mxu1 }
 0x3b3   :  { %6330 = vmatmul.mubr.f32.gmra.mxu0 %v4968_v15  ;;  %6387 = vmatprep.subr.mxu0 %v6374_v62  ;;  %v5013_v15 = vld [vmem:[%s8837_s3 + $0x250] sm:$0xff] }
 0x3b4   :  { %6388 = vmatpush3.msra.mxu0 %v6374_v62  ;;  %v8303_v5 = vpop.f32.mrf.mxu1  ;;  %6332 = vmatprep.mubr.f32.mxu0 %v4969_v16  ;;  %v5007_v62 = vld [vmem:[%s8837_s3 + $0x220] sm:$0xff] }
 0x3b5   :  { %6389 = vmatprep.subr.mxu0 %v6373_v45 }
 0x3b6   :  { %6390 = vmatpush3.msra.mxu0 %v6373_v45  ;;  %v8311_v12 = vpop.f32.mrf.mxu1  ;;  %v5003_v45 = vld [vmem:[%s8837_s3 + $0x200] sm:$0xff] }
 0x3b7   :  { %6333 = vmatmul.mubr.f32.gmra.mxu0 %v4970_v26  ;;  %6391 = vmatprep.subr.mxu0 %v3019_v18 }
 0x3b8   :  { %6392 = vmatpush3.msra.mxu0 %v3019_v18  ;;  %v8313_v14 = vpop.f32.mrf.mxu1  ;;  %6335 = vmatprep.mubr.f32.mxu0 %v4971_v31  ;;  %v5014_v31 = vld [vmem:[%s8837_s3 + $0x258] sm:$0xff] }
 0x3b9   :  { %6393 = vmatprep.subr.mxu0 %v8255_v1 }
 0x3ba   :  { %6394 = vmatpush3.msra.mxu0 %v8255_v1  ;;  %v8323_v50 = vpop.f32.mrf.mxu1  ;;  %v5004_v1 = vld [vmem:[%s8837_s3 + $0x208] sm:$0xff] }
 0x3bb   :  { %6336 = vmatmul.mubr.f32.gmra.mxu0 %v4972_v32  ;;  %6395 = vmatprep.subr.mxu0 %v8239_v46  ;;  %v5015_v32 = vld [vmem:[%s8837_s3 + $0x260] sm:$0xff] }
 0x3bc   :  { %6396 = vmatpush3.msra.mxu0 %v8239_v46  ;;  %v8327_v56 = vpop.f32.mrf.mxu1  ;;  %6338 = vmatprep.mubr.f32.mxu0 %v4973_v22  ;;  %v4976_v46 = vld [vmem:[%s8837_s3 + $0x1e8] sm:$0xff] }
 0x3bd   :  { %6397 = vmatprep.subr.mxu0 %v8229_v4 }
 0x3be   :  { %6398 = vmatpush3.msra.mxu0 %v8229_v4  ;;  %v6461_v30 = vpop.f32.mrf.mxu1 }
 0x3bf   :  { %6339 = vmatmul.mubr.f32.gmra.mxu0 %v4974_v54  ;;  %6399 = vmatprep.subr.mxu0 %v8243_v51  ;;  %v5016_v54 = vld [vmem:[%s8837_s3 + $0x268] sm:$0xff] }
 0x3c0   :  { %6400 = vmatpush3.msra.mxu0 %v8243_v51  ;;  %v8339_v52 = vpop.f32.mrf.mxu1  ;;  %6341 = vmatprep.mubr.f32.mxu0 %v4975_v57  ;;  %v5017_v57 = vld [vmem:[%s8837_s3 + $0x270] sm:$0xff] }
 0x3c1   :  { %6401 = vmatprep.subr.mxu0 %v8231_v47 }
 0x3c2   :  { %6402 = vmatpush3.msra.mxu0 %v8231_v47  ;;  %v6462_v4 = vpop.f32.mrf.mxu1 }
 0x3c3   :  { %6342 = vmatmul.mubr.f32.gmra.mxu0 %v4976_v46  ;;  %6403 = vmatprep.subr.mxu0 %v8219_v58  ;;  %v5044_v46 = vld [vmem:[%s8837_s3 + $0x288] sm:$0xff] }
 0x3c4   :  { %6404 = vmatpush3.msra.mxu0 %v8219_v58  ;;  %v3359_v51 = vpop.f32.mrf.mxu1  ;;  %6344 = vmatprep.mubr.f32.mxu0 %v4977_v55  ;;  %v5045_v55 = vld [vmem:[%s8837_s3 + $0x290] sm:$0xff] }
 0x3c5   :  { %6405 = vmatprep.subr.mxu0 %v8209_v24 }
 0x3c6   :  { %6406 = vmatpush3.msra.mxu0 %v8209_v24  ;;  %v6465_v47 = vpop.f32.mrf.mxu1 }
 0x3c7   :  { %6345 = vmatmul.mubr.f32.gmra.mxu0 %v4978_v39  ;;  %6407 = vmatprep.subr.mxu0 %v8221_v60 }
 0x3c8   :  { %6408 = vmatpush3.msra.mxu0 %v8221_v60  ;;  %v3372_v58 = vpop.f32.mrf.mxu1  ;;  %6411 = vmatprep.mubr.f32.mxu0 %v5003_v45  ;;  %v5006_v60 = vld [vmem:[%s8837_s3 + $0x218] sm:$0xff]  ;;  %v5048_v45 = vld [vmem:[%s8837_s3 + $0x2a8] sm:$0xff] }
 0x3c9   :  { %6409 = vmatprep.subr.mxu0 %v8211_v33 }
 0x3ca   :  { %6410 = vmatpush3.msra.mxu0 %v8211_v33  ;;  %v6466_v24 = vpop.f32.mrf.mxu1 }
 0x3cb   :  { %6412 = vmatmul.mubr.f32.vlgmr.msra.gmra.mxu0 %v5004_v1  ;;  %6467 = vmatprep.subr.mxu0 %v6466_v24 }
 0x3cc   :  { %v3375_v42 = vpop.f32.mrf.mxu1  ;;  %6468 = vmatpush3.msra.mxu0 %v6466_v24  ;;  %6414 = vmatprep.mubr.f32.mxu0 %v5005_v61  ;;  %v5050_v61 = vld [vmem:[%s8837_s3 + $0x2b8] sm:$0xff]  ;;  %v5051_v24 = vld [vmem:[%s8837_s3 + $0x2c0] sm:$0xff] }
 0x3cd   :  { %6469 = vmatprep.subr.mxu0 %v6465_v47 }
 0x3ce   :  { %6470 = vmatpush3.msra.mxu0 %v6465_v47  ;;  %v8375_v18 = vpop.f32.mrf.mxu1  ;;  %v5049_v47 = vld [vmem:[%s8837_s3 + $0x2b0] sm:$0xff] }
 0x3cf   :  { %6415 = vmatmul.mubr.f32.gmra.mxu0 %v5006_v60  ;;  %6471 = vmatprep.subr.mxu0 %v3375_v42 }
 0x3d0   :  { %6472 = vmatpush3.msra.mxu0 %v3375_v42  ;;  %v8377_v33 = vpop.f32.mrf.mxu1  ;;  %6417 = vmatprep.mubr.f32.mxu0 %v5007_v62  ;;  %v5052_v62 = vld [vmem:[%s8837_s3 + $0x2c8] sm:$0xff] }
 0x3d1   :  { %6473 = vmatprep.subr.mxu0 %v3372_v58 }
 0x3d2   :  { %6474 = vmatpush3.msra.mxu0 %v3372_v58  ;;  %v8388_v59 = vpop.f32.mrf.mxu1 }
 0x3d3   :  { %6418 = vmatmul.mubr.f32.gmra.mxu0 %v5008_v2  ;;  %6475 = vmatprep.subr.mxu0 %v6462_v4  ;;  %v5053_v2 = vld [vmem:[%s8837_s3 + $0x2d0] sm:$0xff] }
 0x3d4   :  { %6476 = vmatpush3.msra.mxu0 %v6462_v4  ;;  %v8390_v3 = vpop.f32.mrf.mxu1  ;;  %6420 = vmatprep.mubr.f32.mxu0 %v5009_v36 }
 0x3d5   :  { %6477 = vmatprep.subr.mxu0 %v6461_v30 }
 0x3d6   :  { %6478 = vmatpush3.msra.mxu0 %v6461_v30  ;;  %v8398_v10 = vpop.f32.mrf.mxu1  ;;  %v5018_v30 = vld [vmem:[%s8837_s3 + $0x278] sm:$0xff] }
 0x3d7   :  { %6421 = vmatmul.mubr.f32.gmra.mxu0 %v5010_v8  ;;  %6479 = vmatprep.subr.mxu0 %v3359_v51  ;;  %v5054_v8 = vld [vmem:[%s8837_s3 + $0x2d8] sm:$0xff] }
 0x3d8   :  { %6480 = vmatpush3.msra.mxu0 %v3359_v51  ;;  %v8400_v49 = vpop.f32.mrf.mxu1  ;;  %6423 = vmatprep.mubr.f32.mxu0 %v5011_v48  ;;  %v5047_v51 = vld [vmem:[%s8837_s3 + $0x2a0] sm:$0xff] }
 0x3d9   :  { %6481 = vmatprep.subr.mxu0 %v8339_v52  ;;  %v5055_v48 = vld [vmem:[%s8837_s3 + $0x2e0] sm:$0xff] }
 0x3da   :  { %6482 = vmatpush3.msra.mxu0 %v8339_v52  ;;  %v8410_v16 = vpop.f32.mrf.mxu1  ;;  %v5043_v52 = vld [vmem:[%s8837_s3 + $0x280] sm:$0xff] }
 0x3db   :  { %6424 = vmatmul.mubr.f32.gmra.mxu0 %v5012_v7  ;;  %6483 = vmatprep.subr.mxu0 %v8323_v50 }
 0x3dc   :  { %6484 = vmatpush3.msra.mxu0 %v8323_v50  ;;  %v8414_v26 = vpop.f32.mrf.mxu1  ;;  %6426 = vmatprep.mubr.f32.mxu0 %v5013_v15 }
 0x3dd   :  { %6485 = vmatprep.subr.mxu0 %v8311_v12 }
 0x3de   :  { %6486 = vmatpush3.msra.mxu0 %v8311_v12  ;;  %v6549_v22 = vpop.f32.mrf.mxu1 }
 0x3df   :  { %6427 = vmatmul.mubr.f32.gmra.mxu0 %v5014_v31  ;;  %6487 = vmatprep.subr.mxu0 %v8327_v56  ;;  %v5057_v31 = vld [vmem:[%s8837_s3 + $0x2f0] sm:$0xff] }
 0x3e0   :  { %6488 = vmatpush3.msra.mxu0 %v8327_v56  ;;  %v8426_v50 = vpop.f32.mrf.mxu1  ;;  %6429 = vmatprep.mubr.f32.mxu0 %v5015_v32  ;;  %v5058_v32 = vld [vmem:[%s8837_s3 + $0x2f8] sm:$0xff] }
 0x3e1   :  { %6489 = vmatprep.subr.mxu0 %v8313_v14 }
 0x3e2   :  { %6490 = vmatpush3.msra.mxu0 %v8313_v14  ;;  %v6550_v12 = vpop.f32.mrf.mxu1 }
 0x3e3   :  { %6430 = vmatmul.mubr.f32.gmra.mxu0 %v5016_v54  ;;  %6491 = vmatprep.subr.mxu0 %v8301_v19  ;;  %v5085_v54 = vld [vmem:[%s8837_s3 + $0x310] sm:$0xff] }
 0x3e4   :  { %6492 = vmatpush3.msra.mxu0 %v8301_v19  ;;  %v3699_v56 = vpop.f32.mrf.mxu1  ;;  %6432 = vmatprep.mubr.f32.mxu0 %v5017_v57 }
 0x3e5   :  { %6493 = vmatprep.subr.mxu0 %v8291_v13 }
 0x3e6   :  { %6494 = vmatpush3.msra.mxu0 %v8291_v13  ;;  %v6553_v14 = vpop.f32.mrf.mxu1 }
 0x3e7   :  { %6433 = vmatmul.mubr.f32.gmra.mxu0 %v5018_v30  ;;  %6495 = vmatprep.subr.mxu0 %v8303_v5  ;;  %v5088_v30 = vld [vmem:[%s8837_s3 + $0x328] sm:$0xff] }
 0x3e8   :  { %6496 = vmatpush3.msra.mxu0 %v8303_v5  ;;  %v3712_v19 = vpop.f32.mrf.mxu1  ;;  %6499 = vmatprep.mubr.f32.mxu0 %v5043_v52  ;;  %v5046_v5 = vld [vmem:[%s8837_s3 + $0x298] sm:$0xff]  ;;  %v5089_v52 = vld [vmem:[%s8837_s3 + $0x330] sm:$0xff] }
 0x3e9   :  { %6497 = vmatprep.subr.mxu0 %v8293_v41 }
 0x3ea   :  { %6498 = vmatpush3.msra.mxu0 %v8293_v41  ;;  %v6554_v13 = vpop.f32.mrf.mxu1 }
 0x3eb   :  { %6500 = vmatmul.mubr.f32.vlgmr.msra.gmra.mxu0 %v5044_v46  ;;  %6555 = vmatprep.subr.mxu0 %v6554_v13  ;;  %v5090_v46 = vld [vmem:[%s8837_s3 + $0x338] sm:$0xff] }
 0x3ec   :  { %v3715_v4 = vpop.f32.mrf.mxu1  ;;  %6556 = vmatpush3.msra.mxu0 %v6554_v13  ;;  %6502 = vmatprep.mubr.f32.mxu0 %v5045_v55  ;;  %v5091_v55 = vld [vmem:[%s8837_s3 + $0x340] sm:$0xff] }
 0x3ed   :  { %6557 = vmatprep.subr.mxu0 %v6553_v14 }
 0x3ee   :  { %6558 = vmatpush3.msra.mxu0 %v6553_v14  ;;  %v8462_v39 = vpop.f32.mrf.mxu1 }
 0x3ef   :  { %6503 = vmatmul.mubr.f32.gmra.mxu0 %v5046_v5  ;;  %6559 = vmatprep.subr.mxu0 %v3715_v4  ;;  %v5092_v5 = vld [vmem:[%s8837_s3 + $0x348] sm:$0xff] }
 0x3f0   :  { %6560 = vmatpush3.msra.mxu0 %v3715_v4  ;;  %v8464_v41 = vpop.f32.mrf.mxu1  ;;  %6505 = vmatprep.mubr.f32.mxu0 %v5047_v51  ;;  %v5093_v51 = vld [vmem:[%s8837_s3 + $0x350] sm:$0xff] }
 0x3f1   :  { %6561 = vmatprep.subr.mxu0 %v3712_v19 }
 0x3f2   :  { %6562 = vmatpush3.msra.mxu0 %v3712_v19  ;;  %v8472_v58 = vpop.f32.mrf.mxu1 }
 0x3f3   :  { %6506 = vmatmul.mubr.f32.gmra.mxu0 %v5048_v45  ;;  %6563 = vmatprep.subr.mxu0 %v6550_v12 }
 0x3f4   :  { %6564 = vmatpush3.msra.mxu0 %v6550_v12  ;;  %v8474_v1 = vpop.f32.mrf.mxu1  ;;  %6508 = vmatprep.mubr.f32.mxu0 %v5049_v47  ;;  %v5087_v12 = vld [vmem:[%s8837_s3 + $0x320] sm:$0xff] }
 0x3f5   :  { %6565 = vmatprep.subr.mxu0 %v6549_v22 }
 0x3f6   :  { %6566 = vmatpush3.msra.mxu0 %v6549_v22  ;;  %v8482_v42 = vpop.f32.mrf.mxu1  ;;  %v5083_v22 = vld [vmem:[%s8837_s3 + $0x300] sm:$0xff] }
 0x3f7   :  { %6509 = vmatmul.mubr.f32.gmra.mxu0 %v5050_v61  ;;  %6567 = vmatprep.subr.mxu0 %v3699_v56  ;;  %v5094_v61 = vld [vmem:[%s8837_s3 + $0x358] sm:$0xff] }
 0x3f8   :  { %6568 = vmatpush3.msra.mxu0 %v3699_v56  ;;  %v8484_v60 = vpop.f32.mrf.mxu1  ;;  %6511 = vmatprep.mubr.f32.mxu0 %v5051_v24  ;;  %v5095_v24 = vld [vmem:[%s8837_s3 + $0x360] sm:$0xff] }
 0x3f9   :  { %6569 = vmatprep.subr.mxu0 %v8426_v50 }
 0x3fa   :  { %6570 = vmatpush3.msra.mxu0 %v8426_v50  ;;  %v8494_v36 = vpop.f32.mrf.mxu1  ;;  %v5084_v50 = vld [vmem:[%s8837_s3 + $0x308] sm:$0xff] }
 0x3fb   :  { %6512 = vmatmul.mubr.f32.gmra.mxu0 %v5052_v62  ;;  %6571 = vmatprep.subr.mxu0 %v8410_v16 }
 0x3fc   :  { %6572 = vmatpush3.msra.mxu0 %v8410_v16  ;;  %v8498_v6 = vpop.f32.mrf.mxu1  ;;  %6514 = vmatprep.mubr.f32.mxu0 %v5053_v2  ;;  %v5056_v16 = vld [vmem:[%s8837_s3 + $0x2e8] sm:$0xff] }
 0x3fd   :  { %6573 = vmatprep.subr.mxu0 %v8398_v10 }
 0x3fe   :  { %6574 = vmatpush3.msra.mxu0 %v8398_v10  ;;  %v6637_v7 = vpop.f32.mrf.mxu1 }
 0x3ff   :  { %6515 = vmatmul.mubr.f32.gmra.mxu0 %v5054_v8  ;;  %6575 = vmatprep.subr.mxu0 %v8414_v26 }
 0x400   :  { %6576 = vmatpush3.msra.mxu0 %v8414_v26  ;;  %v8510_v15 = vpop.f32.mrf.mxu1  ;;  %6517 = vmatprep.mubr.f32.mxu0 %v5055_v48  ;;  %v5098_v48 = vld [vmem:[%s8837_s3 + $0x378] sm:$0xff] }
 0x401   :  { %6577 = vmatprep.subr.mxu0 %v8400_v49 }
 0x402   :  { %6578 = vmatpush3.msra.mxu0 %v8400_v49  ;;  %v6638_v10 = vpop.f32.mrf.mxu1 }
 0x403   :  { %6518 = vmatmul.mubr.f32.gmra.mxu0 %v5056_v16  ;;  %6579 = vmatprep.subr.mxu0 %v8388_v59 }
 0x404   :  { %6580 = vmatpush3.msra.mxu0 %v8388_v59  ;;  %v4039_v26 = vpop.f32.mrf.mxu1  ;;  %6520 = vmatprep.mubr.f32.mxu0 %v5057_v31 }
 0x405   :  { %6581 = vmatprep.subr.mxu0 %v8375_v18 }
 0x406   :  { %6582 = vmatpush3.msra.mxu0 %v8375_v18  ;;  %v6641_v49 = vpop.f32.mrf.mxu1 }
 0x407   :  { %6521 = vmatmul.mubr.f32.gmra.mxu0 %v5058_v32  ;;  %6583 = vmatprep.subr.mxu0 %v8390_v3  ;;  %v5130_v32 = vld [vmem:[%s8837_s3 + $0x3b8] sm:$0xff] }
 0x408   :  { %6584 = vmatpush3.msra.mxu0 %v8390_v3  ;;  %v4052_v59 = vpop.f32.mrf.mxu1  ;;  %6587 = vmatprep.mubr.f32.mxu0 %v5083_v22  ;;  %v5086_v3 = vld [vmem:[%s8837_s3 + $0x318] sm:$0xff]  ;;  %v5131_v22 = vld [vmem:[%s8837_s3 + $0x3c0] sm:$0xff] }
 0x409   :  { %6585 = vmatprep.subr.mxu0 %v8377_v33 }
 0x40a   :  { %6586 = vmatpush3.msra.mxu0 %v8377_v33  ;;  %v6642_v18 = vpop.f32.mrf.mxu1 }
 0x40b   :  { %6588 = vmatmul.mubr.f32.vlgmr.msra.gmra.mxu0 %v5084_v50  ;;  %6643 = vmatprep.subr.mxu0 %v6642_v18  ;;  %v5134_v50 = vld [vmem:[%s8837_s3 + $0x3d8] sm:$0xff] }
 0x40c   :  { %v4055_v57 = vpop.f32.mrf.mxu1  ;;  %6644 = vmatpush3.msra.mxu0 %v6642_v18  ;;  %6590 = vmatprep.mubr.f32.mxu0 %v5085_v54  ;;  %v5135_v54 = vld [vmem:[%s8837_s3 + $0x3e0] sm:$0xff]  ;;  %v5136_v18 = vld [vmem:[%s8837_s3 + $0x3e8] sm:$0xff] }
 0x40d   :  { %6645 = vmatprep.subr.mxu0 %v6641_v49 }
 0x40e   :  { %6646 = vmatpush3.msra.mxu0 %v6641_v49  ;;  %v8546_v56 = vpop.f32.mrf.mxu1  ;;  %v5132_v49 = vld [vmem:[%s8837_s3 + $0x3c8] sm:$0xff] }
 0x40f   :  { %6591 = vmatmul.mubr.f32.gmra.mxu0 %v5086_v3  ;;  %6647 = vmatprep.subr.mxu0 %v4055_v57  ;;  %v5137_v3 = vld [vmem:[%s8837_s3 + $0x3f0] sm:$0xff] }
 0x410   :  { %6648 = vmatpush3.msra.mxu0 %v4055_v57  ;;  %v8548_v33 = vpop.f32.mrf.mxu1  ;;  %6593 = vmatprep.mubr.f32.mxu0 %v5087_v12  ;;  %v8683_v57 = vpop.f32.mrf.mxu0  ;;  %v5138_v12 = vld [vmem:[%s8837_s3 + $0x3f8] sm:$0xff] }
 0x411   :  { %6649 = vmatprep.subr.mxu0 %v4052_v59 }
 0x412   :  { %6650 = vmatpush3.msra.mxu0 %v4052_v59  ;;  %v8556_v14 = vpop.f32.mrf.mxu1  ;;  %v5133_v59 = vld [vmem:[%s8837_s3 + $0x3d0] sm:$0xff] }
 0x413   :  { %6594 = vmatmul.mubr.f32.gmra.mxu0 %v5088_v30  ;;  %6651 = vmatprep.subr.mxu0 %v6638_v10 }
 0x414   :  { %6652 = vmatpush3.msra.mxu0 %v6638_v10  ;;  %v8558_v19 = vpop.f32.mrf.mxu1  ;;  %6596 = vmatprep.mubr.f32.mxu0 %v5089_v52  ;;  %v5128_v10 = vld [vmem:[%s8837_s3 + $0x3a8] sm:$0xff]  ;;  %v2127_v52 = vadd.f32 %v8110_v29, %v8108_v35  ;;  %v5163_v35 = vld [vmem:[%s8837_s3 + $0x400] sm:$0xff]  ;;  %v2137_v29 = vadd.f32 %v8119_v28, %v8117_v23  ;;  %v5165_v23 = vld [vmem:[%s8837_s3 + $0x410] sm:$0xff] }
 0x415   :  { %6653 = vmatprep.subr.mxu0 %v6637_v7  ;;  %v5173_v28 = vld [vmem:[%s8837_s3 + $0x450] sm:$0xff] }
 0x416   :  { %6654 = vmatpush3.msra.mxu0 %v6637_v7  ;;  %v8566_v13 = vpop.f32.mrf.mxu1  ;;  %v5123_v7 = vld [vmem:[%s8837_s3 + $0x380] sm:$0xff] }
 0x417   :  { %6597 = vmatmul.mubr.f32.gmra.mxu0 %v5090_v46  ;;  %6655 = vmatprep.subr.mxu0 %v4039_v26 }
 0x418   :  { %6656 = vmatpush3.msra.mxu0 %v4039_v26  ;;  %v8568_v4 = vpop.f32.mrf.mxu1  ;;  %6599 = vmatprep.mubr.f32.mxu0 %v5091_v55  ;;  %v5129_v26 = vld [vmem:[%s8837_s3 + $0x3b0] sm:$0xff] }
 0x419   :  { %6657 = vmatprep.subr.mxu0 %v8510_v15 }
 0x41a   :  { %6658 = vmatpush3.msra.mxu0 %v8510_v15  ;;  %v8578_v45 = vpop.f32.mrf.mxu1  ;;  %v5124_v15 = vld [vmem:[%s8837_s3 + $0x388] sm:$0xff] }
 0x41b   :  { %6600 = vmatmul.mubr.f32.gmra.mxu0 %v5092_v5  ;;  %6659 = vmatprep.subr.mxu0 %v8494_v36 }
 0x41c   :  { %6660 = vmatpush3.msra.mxu0 %v8494_v36  ;;  %v8582_v47 = vpop.f32.mrf.mxu1  ;;  %6602 = vmatprep.mubr.f32.mxu0 %v5093_v51  ;;  %v5096_v36 = vld [vmem:[%s8837_s3 + $0x368] sm:$0xff]  ;;  %v2147_v51 = vadd.f32 %v8130_v34, %v8128_v20  ;;  %v5175_v20 = vld [vmem:[%s8837_s3 + $0x460] sm:$0xff] }
 0x41d   :  { %6661 = vmatprep.subr.mxu0 %v8482_v42 }
 0x41e   :  { %6662 = vmatpush3.msra.mxu0 %v8482_v42  ;;  %v8592_v62 = vpop.f32.mrf.mxu1  ;;  %v5097_v42 = vld [vmem:[%s8837_s3 + $0x370] sm:$0xff] }
 0x41f   :  { %6603 = vmatmul.mubr.f32.gmra.mxu0 %v5094_v61  ;;  %6663 = vmatprep.subr.mxu0 %v8498_v6  ;;  %v5167_v61 = vld [vmem:[%s8837_s3 + $0x420] sm:$0xff] }
 0x420   :  { %6664 = vmatpush3.msra.mxu0 %v8498_v6  ;;  %v8596_v2 = vpop.f32.mrf.mxu1  ;;  %6605 = vmatprep.mubr.f32.mxu0 %v5095_v24 }
 0x421   :  { %6665 = vmatprep.subr.mxu0 %v8484_v60 }
 0x422   :  { %6666 = vmatpush3.msra.mxu0 %v8484_v60  ;;  %v6726_v8 = vpop.f32.mrf.mxu1 }
 0x423   :  { %6606 = vmatmul.mubr.f32.gmra.mxu0 %v5096_v36  ;;  %6667 = vmatprep.subr.mxu0 %v8472_v58  ;;  %v5176_v36 = vld [vmem:[%s8837_s3 + $0x468] sm:$0xff] }
 0x424   :  { %6668 = vmatpush3.msra.mxu0 %v8472_v58  ;;  %v4379_v6 = vpop.f32.mrf.mxu1  ;;  %6608 = vmatprep.mubr.f32.mxu0 %v5097_v42 }
 0x425   :  { %6669 = vmatprep.subr.mxu0 %v8462_v39 }
 0x426   :  { %6670 = vmatpush3.msra.mxu0 %v8462_v39  ;;  %v6729_v60 = vpop.f32.mrf.mxu1  ;;  %v5125_v39 = vld [vmem:[%s8837_s3 + $0x390] sm:$0xff] }
 0x427   :  { %6609 = vmatmul.mubr.f32.gmra.mxu0 %v5098_v48  ;;  %6671 = vmatprep.subr.mxu0 %v8474_v1 }
 0x428   :  { %6672 = vmatpush3.msra.mxu0 %v8474_v1  ;;  %v4392_v58 = vpop.f32.mrf.mxu1  ;;  %6675 = vmatprep.mubr.f32.mxu0 %v5123_v7  ;;  %v5126_v1 = vld [vmem:[%s8837_s3 + $0x398] sm:$0xff] }
 0x429   :  { %6673 = vmatprep.subr.mxu0 %v8464_v41  ;;  %v5170_v7 = vld [vmem:[%s8837_s3 + $0x438] sm:$0xff] }
 0x42a   :  { %6674 = vmatpush3.msra.mxu0 %v8464_v41  ;;  %v6730_v16 = vpop.f32.mrf.mxu1  ;;  %v5127_v41 = vld [vmem:[%s8837_s3 + $0x3a0] sm:$0xff] }
 0x42b   :  { %6676 = vmatmul.mubr.f32.vlgmr.msra.gmra.mxu0 %v5124_v15  ;;  %6731 = vmatprep.subr.mxu0 %v6730_v16 }
 0x42c   :  { %6787 = vmatprep.subr.mxu1 %v6730_v16  ;;  %6732 = vmatpush3.msra.mxu0 %v6730_v16  ;;  %v4395_v31 = vpop.f32.mrf.mxu1 }
 0x42d   :  { %6803 = vmatpush3.msra.mxu1 %v6730_v16  ;;  %6733 = vmatprep.subr.mxu0 %v6729_v60 }
 0x42e   :  { %6788 = vmatprep.subr.mxu1 %v6729_v60  ;;  %6678 = vmatprep.mubr.f32.mxu0 %v5125_v39 }
 0x42f   :  { %6734 = vmatpush3.msra.mxu0 %v6729_v60  ;;  %6804 = vmatpush3.msra.mxu1 %v6729_v60 }
 0x430   :  { %6679 = vmatmul.mubr.f32.gmra.mxu0 %v5126_v1  ;;  %6735 = vmatprep.subr.mxu0 %v4395_v31 }
 0x431   :  { %6789 = vmatprep.subr.mxu1 %v4395_v31  ;;  %6736 = vmatpush3.msra.mxu0 %v4395_v31 }
 0x432   :  { %6805 = vmatpush3.msra.mxu1 %v4395_v31  ;;  %6737 = vmatprep.subr.mxu0 %v4392_v58 }
 0x433   :  { %6790 = vmatprep.subr.mxu1 %v4392_v58  ;;  %6681 = vmatprep.mubr.f32.mxu0 %v5127_v41 }
 0x434   :  { %6738 = vmatpush3.msra.mxu0 %v4392_v58  ;;  %6806 = vmatpush3.msra.mxu1 %v4392_v58 }
 0x435   :  { %6682 = vmatmul.mubr.f32.gmra.mxu0 %v5128_v10  ;;  %6739 = vmatprep.subr.mxu0 %v6726_v8 }
 0x436   :  { %6791 = vmatprep.subr.mxu1 %v6726_v8  ;;  %6740 = vmatpush3.msra.mxu0 %v6726_v8 }
 0x437   :  { %6807 = vmatpush3.msra.mxu1 %v6726_v8  ;;  %6741 = vmatprep.subr.mxu0 %v8592_v62  ;;  %v5169_v8 = vld [vmem:[%s8837_s3 + $0x430] sm:$0xff] }
 0x438   :  { %6792 = vmatprep.subr.mxu1 %v8592_v62  ;;  %6684 = vmatprep.mubr.f32.mxu0 %v5129_v26 }
 0x439   :  { %6742 = vmatpush3.msra.mxu0 %v8592_v62  ;;  %6808 = vmatpush3.msra.mxu1 %v8592_v62 }
 0x43a   :  { %6685 = vmatmul.mubr.f32.gmra.mxu0 %v5130_v32  ;;  %6743 = vmatprep.subr.mxu0 %v4379_v6 }
 0x43b   :  { %6793 = vmatprep.subr.mxu1 %v4379_v6  ;;  %6744 = vmatpush3.msra.mxu0 %v4379_v6 }
 0x43c   :  { %6809 = vmatpush3.msra.mxu1 %v4379_v6  ;;  %6745 = vmatprep.subr.mxu0 %v8596_v2 }
 0x43d   :  { %6794 = vmatprep.subr.mxu1 %v8596_v2  ;;  %6687 = vmatprep.mubr.f32.mxu0 %v5131_v22 }
 0x43e   :  { %6746 = vmatpush3.msra.mxu0 %v8596_v2  ;;  %6810 = vmatpush3.msra.mxu1 %v8596_v2  ;;  %v2157_v2 = vadd.f32 %v8139_v21, %v8137_v40  ;;  %v5177_v40 = vld [vmem:[%s8837_s3 + $0x470] sm:$0xff] }
 0x43f   :  { %6688 = vmatmul.mubr.f32.gmra.mxu0 %v5132_v49  ;;  %6747 = vmatprep.subr.mxu0 %v8578_v45 }
 0x440   :  { %6795 = vmatprep.subr.mxu1 %v8578_v45  ;;  %6748 = vmatpush3.msra.mxu0 %v8578_v45 }
 0x441   :  { %6811 = vmatpush3.msra.mxu1 %v8578_v45  ;;  %6749 = vmatprep.subr.mxu0 %v8566_v13  ;;  %v5166_v45 = vld [vmem:[%s8837_s3 + $0x418] sm:$0xff] }
 0x442   :  { %6796 = vmatprep.subr.mxu1 %v8566_v13  ;;  %6690 = vmatprep.mubr.f32.mxu0 %v5133_v59 }
 0x443   :  { %6750 = vmatpush3.msra.mxu0 %v8566_v13  ;;  %6812 = vmatpush3.msra.mxu1 %v8566_v13  ;;  %v5172_v13 = vld [vmem:[%s8837_s3 + $0x448] sm:$0xff] }
 0x444   :  { %6691 = vmatmul.mubr.f32.gmra.mxu0 %v5134_v50  ;;  %6751 = vmatprep.subr.mxu0 %v8582_v47 }
 0x445   :  { %6797 = vmatprep.subr.mxu1 %v8582_v47  ;;  %6752 = vmatpush3.msra.mxu0 %v8582_v47 }
 0x446   :  { %6813 = vmatpush3.msra.mxu1 %v8582_v47  ;;  %6753 = vmatprep.subr.mxu0 %v8568_v4  ;;  %v5174_v47 = vld [vmem:[%s8837_s3 + $0x458] sm:$0xff] }
 0x447   :  { %6798 = vmatprep.subr.mxu1 %v8568_v4  ;;  %6693 = vmatprep.mubr.f32.mxu0 %v5135_v54 }
 0x448   :  { %6754 = vmatpush3.msra.mxu0 %v8568_v4  ;;  %6814 = vmatpush3.msra.mxu1 %v8568_v4 }
 0x449   :  { %6694 = vmatmul.mubr.f32.gmra.mxu0 %v5136_v18  ;;  %6755 = vmatprep.subr.mxu0 %v8556_v14 }
 0x44a   :  { %6799 = vmatprep.subr.mxu1 %v8556_v14  ;;  %6756 = vmatpush3.msra.mxu0 %v8556_v14 }
 0x44b   :  { %6815 = vmatpush3.msra.mxu1 %v8556_v14  ;;  %6757 = vmatprep.subr.mxu0 %v8546_v56  ;;  %v6237_v30 = vpop.f32.mrf.mxu0 }
 0x44c   :  { %6800 = vmatprep.subr.mxu1 %v8546_v56  ;;  %6696 = vmatprep.mubr.f32.mxu0 %v5137_v3  ;;  %v8700_v46 = vadd.f32 %v6237_v30, %v8104_v63 }
 0x44d   :  { %6758 = vmatpush3.msra.mxu0 %v8546_v56  ;;  %6816 = vmatpush3.msra.mxu1 %v8546_v56  ;;  %v2450_v14 = vpop.f32.mrf.mxu0  ;;  %v5164_v56 = vld [vmem:[%s8837_s3 + $0x408] sm:$0xff] }
 0x44e   :  { %6697 = vmatmul.mubr.f32.gmra.mxu0 %v5138_v12  ;;  %6759 = vmatprep.subr.mxu0 %v8558_v19  ;;  %v8705_v55 = vadd.f32 %v2450_v14, %v2127_v52 }
 0x44f   :  { %6801 = vmatprep.subr.mxu1 %v8558_v19  ;;  %6760 = vmatpush3.msra.mxu0 %v8558_v19  ;;  %v6240_v63 = vpop.f32.mrf.mxu0 }
 0x450   :  { %6817 = vmatpush3.msra.mxu1 %v8558_v19  ;;  %6761 = vmatprep.subr.mxu0 %v8548_v33  ;;  %v8723_v4 = vadd.f32 %v6240_v63, %v8115_v37 }
 0x451   :  { %6802 = vmatprep.subr.mxu1 %v8548_v33  ;;  %6762 = vmatpush3.msra.mxu0 %v8548_v33  ;;  %v2460_v19 = vpop.f32.mrf.mxu0 }
 0x452   :  { %6818 = vmatpush3.msra.mxu1 %v8548_v33  ;;  %6763 = vmatprep.mubr.f32.mxu0 %v5163_v35  ;;  %v2531_v5 = vadd.f32 %v2460_v19, %v2137_v29 }
 0x453   :  { %6764 = vmatmul.mubr.f32.vlgmr.msra.gmra.mxu0 %v5164_v56  ;;  %6776 = vmatmul.mubr.f32.vlgmr.msra.gmra.mxu1 %v5172_v13  ;;  %v6243_v37 = vpop.f32.mrf.mxu0 }
 0x454   :  { %6766 = vmatprep.mubr.f32.mxu0 %v5165_v23  ;;  %6778 = vmatprep.mubr.f32.mxu1 %v5173_v28  ;;  %v2534_v33 = vadd.f32 %v6243_v37, %v8124_v11  ;;  %v5168_v11 = vld [vmem:[%s8837_s3 + $0x428] sm:$0xff] }
 0x455   :  { %v2470_v34 = vpop.f32.mrf.mxu0 }
 0x456   :  { %v2533_v24 = vadd.f32 %v2470_v34, %v2147_v51 }
 0x457   :  { %6767 = vmatmul.mubr.f32.gmra.mxu0 %v5166_v45  ;;  %6779 = vmatmul.mubr.f32.gmra.mxu1 %v5174_v47  ;;  %v6246_v62 = vpop.f32.mrf.mxu0 }
 0x458   :  { %6769 = vmatprep.mubr.f32.mxu0 %v5167_v61  ;;  %6781 = vmatprep.mubr.f32.mxu1 %v5175_v20  ;;  %v2536_v42 = vadd.f32 %v6246_v62, %v8135_v17  ;;  %v5178_v17 = vld [vmem:[%s8837_s3 + $0x478] sm:$0xff] }
 0x459   :  { %v2480_v21 = vpop.f32.mrf.mxu0 }
 0x45a   :  { %v2535_v6 = vadd.f32 %v2480_v21, %v2157_v2 }
 0x45b   :  { %6770 = vmatmul.mubr.f32.gmra.mxu0 %v5168_v11  ;;  %6782 = vmatmul.mubr.f32.gmra.mxu1 %v5176_v36  ;;  %v6249_v48 = vpop.f32.mrf.mxu0 }
 0x45c   :  { %6772 = vmatprep.mubr.f32.mxu0 %v5169_v8  ;;  %6784 = vmatprep.mubr.f32.mxu1 %v5177_v40  ;;  %v2538_v60 = vadd.f32 %v6249_v48, %v8144_v25  ;;  %v2197_v25 = vadd.f32 %v8683_v57, %v8168_v43 }
 0x45d   :  { %v2490_v58 = vpop.f32.mrf.mxu0 }
 0x45e   :  { %v2537_v15 = vadd.f32 %v2490_v58, %v8148_v27 }
 0x45f   :  { %6773 = vmatmul.mubr.f32.gmra.mxu0 %v5170_v7  ;;  %6785 = vmatmul.mubr.f32.gmra.mxu1 %v5178_v17  ;;  %v6252_v16 = vpop.f32.mrf.mxu0 }
 0x460   :  { %v2540_v39 = vadd.f32 %v6252_v16, %v8153_v38 }
 0x461   :  { %v2500_v1 = vpop.f32.mrf.mxu0 }
 0x462   :  { %v2539_v31 = vadd.f32 %v2500_v1, %v8155_v0 }
 0x463   :  { %v6255_v41 = vpop.f32.mrf.mxu0 }
 0x464   :  { %v2542_v10 = vadd.f32 %v6255_v41, %v8160_v44 }
 0x465   :  { %v2510_v26 = vpop.f32.mrf.mxu0 }
 0x466   :  { %v2541_v32 = vadd.f32 %v2510_v26, %v8164_v9 }
 0x467   :  { %v6258_v22 = vpop.f32.mrf.mxu0 }
 0x468   :  { %v2544_v27 = vadd.f32 %v6258_v22, %v8166_v53 }
 0x469   :  { %v2520_v49 = vpop.f32.mrf.mxu0 }
 0x46a   :  { %v2543_v59 = vadd.f32 %v2520_v49, %v2197_v25 }
 0x46b   :  { %v6325_v50 = vpop.f32.mrf.mxu0 }
 0x46c   :  { %v2870_v38 = vadd.f32 %v6325_v50, %v8700_v46 }
 0x46d   :  { %v2790_v54 = vpop.f32.mrf.mxu0 }
 0x46e   :  { %v2869_v0 = vadd.f32 %v2790_v54, %v8705_v55 }
 0x46f   :  { %v6328_v18 = vpop.f32.mrf.mxu0 }
 0x470   :  { %v2872_v44 = vadd.f32 %v6328_v18, %v8723_v4 }
 0x471   :  { %v2800_v3 = vpop.f32.mrf.mxu0 }
 0x472   :  { %v2871_v12 = vadd.f32 %v2800_v3, %v2531_v5 }
 0x473   :  { %v6331_v9 = vpop.f32.mrf.mxu0 }
 0x474   :  { %v2874_v30 = vadd.f32 %v6331_v9, %v2534_v33 }
 0x475   :  { %v2810_v52 = vpop.f32.mrf.mxu0 }
 0x476   :  { %v2873_v14 = vadd.f32 %v2810_v52, %v2533_v24 }
 0x477   :  { %v6334_v43 = vpop.f32.mrf.mxu0 }
 0x478   :  { %v2876_v57 = vadd.f32 %v6334_v43, %v2536_v42 }
 0x479   :  { %v2820_v53 = vpop.f32.mrf.mxu0 }
 0x47a   :  { %v2875_v35 = vadd.f32 %v2820_v53, %v2535_v6 }
 0x47b   :  { %v6337_v63 = vpop.f32.mrf.mxu0 }
 0x47c   :  { %v2878_v29 = vadd.f32 %v6337_v63, %v2538_v60 }
 0x47d   :  { %v2830_v56 = vpop.f32.mrf.mxu0 }
 0x47e   :  { %v2877_v46 = vadd.f32 %v2830_v56, %v2537_v15 }
 0x47f   :  { %v6340_v13 = vpop.f32.mrf.mxu0 }
 0x480   :  { %v2880_v23 = vadd.f32 %v6340_v13, %v2540_v39 }
 0x481   :  { %v2840_v55 = vpop.f32.mrf.mxu0 }
 0x482   :  { %v2879_v28 = vadd.f32 %v2840_v55, %v2539_v31 }
 0x483   :  { %v6343_v19 = vpop.f32.mrf.mxu0 }
 0x484   :  { %v2882_v4 = vadd.f32 %v6343_v19, %v2542_v10 }
 0x485   :  { %v2850_v37 = vpop.f32.mrf.mxu0 }
 0x486   :  { %v2881_v5 = vadd.f32 %v2850_v37, %v2541_v32 }
 0x487   :  { %v6346_v51 = vpop.f32.mrf.mxu0 }
 0x488   :  { %v2884_v45 = vadd.f32 %v6346_v51, %v2544_v27 }
 0x489   :  { %v2860_v47 = vpop.f32.mrf.mxu0 }
 0x48a   :  { %v2883_v33 = vadd.f32 %v2860_v47, %v2543_v59 }
 0x48b   :  { %v6413_v61 = vpop.f32.mrf.mxu0 }
 0x48c   :  { %v3210_v20 = vadd.f32 %v6413_v61, %v2870_v38 }
 0x48d   :  { %v3130_v34 = vpop.f32.mrf.mxu0 }
 0x48e   :  { %v3209_v24 = vadd.f32 %v3130_v34, %v2869_v0 }
 0x48f   :  { %v6416_v62 = vpop.f32.mrf.mxu0 }
 0x490   :  { %v3212_v2 = vadd.f32 %v6416_v62, %v2872_v44 }
 0x491   :  { %v3140_v11 = vpop.f32.mrf.mxu0 }
 0x492   :  { %v3211_v36 = vadd.f32 %v3140_v11, %v2871_v12 }
 0x493   :  { %v6419_v42 = vpop.f32.mrf.mxu0 }
 0x494   :  { %v3214_v8 = vadd.f32 %v6419_v42, %v2874_v30 }
 0x495   :  { %v3150_v40 = vpop.f32.mrf.mxu0 }
 0x496   :  { %v3213_v21 = vadd.f32 %v3150_v40, %v2873_v14 }
 0x497   :  { %v6422_v6 = vpop.f32.mrf.mxu0 }
 0x498   :  { %v3216_v48 = vadd.f32 %v6422_v6, %v2876_v57 }
 0x499   :  { %v3160_v7 = vpop.f32.mrf.mxu0 }
 0x49a   :  { %v3215_v17 = vadd.f32 %v3160_v7, %v2875_v35 }
 0x49b   :  { %v6425_v60 = vpop.f32.mrf.mxu0 }
 0x49c   :  { %v3218_v58 = vadd.f32 %v6425_v60, %v2878_v29 }
 0x49d   :  { %v3170_v15 = vpop.f32.mrf.mxu0 }
 0x49e   :  { %v3217_v16 = vadd.f32 %v3170_v15, %v2877_v46 }
 0x49f   :  { %v6428_v39 = vpop.f32.mrf.mxu0 }
 0x4a0   :  { %v3220_v1 = vadd.f32 %v6428_v39, %v2880_v23 }
 0x4a1   :  { %v3180_v31 = vpop.f32.mrf.mxu0 }
 0x4a2   :  { %v3219_v41 = vadd.f32 %v3180_v31, %v2879_v28 }
 0x4a3   :  { %v6431_v10 = vpop.f32.mrf.mxu0 }
 0x4a4   :  { %v3222_v26 = vadd.f32 %v6431_v10, %v2882_v4 }
 0x4a5   :  { %v3190_v32 = vpop.f32.mrf.mxu0 }
 0x4a6   :  { %v3221_v22 = vadd.f32 %v3190_v32, %v2881_v5 }
 0x4a7   :  { %v6434_v25 = vpop.f32.mrf.mxu0 }
 0x4a8   :  { %v3224_v27 = vadd.f32 %v6434_v25, %v2884_v45 }
 0x4a9   :  { %v3200_v49 = vpop.f32.mrf.mxu0 }
 0x4aa   :  { %v3223_v59 = vadd.f32 %v3200_v49, %v2883_v33 }
 0x4ab   :  { %v6501_v50 = vpop.f32.mrf.mxu0 }
 0x4ac   :  { %v3550_v38 = vadd.f32 %v6501_v50, %v3210_v20 }
 0x4ad   :  { %v3470_v54 = vpop.f32.mrf.mxu0 }
 0x4ae   :  { %v3549_v0 = vadd.f32 %v3470_v54, %v3209_v24 }
 0x4af   :  { %v6504_v18 = vpop.f32.mrf.mxu0 }
 0x4b0   :  { %v3552_v44 = vadd.f32 %v6504_v18, %v3212_v2 }
 0x4b1   :  { %v3480_v3 = vpop.f32.mrf.mxu0 }
 0x4b2   :  { %v3551_v12 = vadd.f32 %v3480_v3, %v3211_v36 }
 0x4b3   :  { %v6507_v9 = vpop.f32.mrf.mxu0 }
 0x4b4   :  { %v3554_v30 = vadd.f32 %v6507_v9, %v3214_v8 }
 0x4b5   :  { %v3490_v52 = vpop.f32.mrf.mxu0 }
 0x4b6   :  { %v3553_v14 = vadd.f32 %v3490_v52, %v3213_v21 }
 0x4b7   :  { %v6510_v43 = vpop.f32.mrf.mxu0 }
 0x4b8   :  { %v3556_v57 = vadd.f32 %v6510_v43, %v3216_v48 }
 0x4b9   :  { %v3500_v53 = vpop.f32.mrf.mxu0 }
 0x4ba   :  { %v3555_v35 = vadd.f32 %v3500_v53, %v3215_v17 }
 0x4bb   :  { %v6513_v63 = vpop.f32.mrf.mxu0 }
 0x4bc   :  { %v3558_v29 = vadd.f32 %v6513_v63, %v3218_v58 }
 0x4bd   :  { %v3510_v56 = vpop.f32.mrf.mxu0 }
 0x4be   :  { %v3557_v46 = vadd.f32 %v3510_v56, %v3217_v16 }
 0x4bf   :  { %v6516_v13 = vpop.f32.mrf.mxu0 }
 0x4c0   :  { %v3560_v23 = vadd.f32 %v6516_v13, %v3220_v1 }
 0x4c1   :  { %v3520_v55 = vpop.f32.mrf.mxu0 }
 0x4c2   :  { %v3559_v28 = vadd.f32 %v3520_v55, %v3219_v41 }
 0x4c3   :  { %v6519_v19 = vpop.f32.mrf.mxu0 }
 0x4c4   :  { %v3562_v4 = vadd.f32 %v6519_v19, %v3222_v26 }
 0x4c5   :  { %v3530_v37 = vpop.f32.mrf.mxu0 }
 0x4c6   :  { %v3561_v5 = vadd.f32 %v3530_v37, %v3221_v22 }
 0x4c7   :  { %v6522_v51 = vpop.f32.mrf.mxu0 }
 0x4c8   :  { %v3564_v45 = vadd.f32 %v6522_v51, %v3224_v27 }
 0x4c9   :  { %v3540_v47 = vpop.f32.mrf.mxu0 }
 0x4ca   :  { %v3563_v33 = vadd.f32 %v3540_v47, %v3223_v59 }
 0x4cb   :  { %v6589_v61 = vpop.f32.mrf.mxu0 }
 0x4cc   :  { %v3890_v59 = vadd.f32 %v6589_v61, %v3550_v38  ;;  %v8789_v38 = vld [vmem:[%s8836_s4 + $0x1] ss:$0 sm:$0xff] }
 0x4cd   :  { %v3810_v20 = vpop.f32.mrf.mxu0 }
 0x4ce   :  { %v3889_v50 = vadd.f32 %v3810_v20, %v3549_v0 }
 0x4cf   :  { %v6592_v34 = vpop.f32.mrf.mxu0 }
 0x4d0   :  { %v3892_v54 = vadd.f32 %v6592_v34, %v3552_v44 }
 0x4d1   :  { %v3820_v24 = vpop.f32.mrf.mxu0 }
 0x4d2   :  { %v3891_v9 = vadd.f32 %v3820_v24, %v3551_v12 }
 0x4d3   :  { %v6595_v62 = vpop.f32.mrf.mxu0 }
 0x4d4   :  { %v3894_v52 = vadd.f32 %v6595_v62, %v3554_v30 }
 0x4d5   :  { %v3830_v2 = vpop.f32.mrf.mxu0 }
 0x4d6   :  { %v3893_v43 = vadd.f32 %v3830_v2, %v3553_v14 }
 0x4d7   :  { %v6598_v11 = vpop.f32.mrf.mxu0 }
 0x4d8   :  { %v3896_v53 = vadd.f32 %v6598_v11, %v3556_v57 }
 0x4d9   :  { %v3840_v36 = vpop.f32.mrf.mxu0 }
 0x4da   :  { %v3895_v63 = vadd.f32 %v3840_v36, %v3555_v35 }
 0x4db   :  { %v6601_v42 = vpop.f32.mrf.mxu0 }
 0x4dc   :  { %v3898_v18 = vadd.f32 %v6601_v42, %v3558_v29 }
 0x4dd   :  { %v3850_v8 = vpop.f32.mrf.mxu0 }
 0x4de   :  { %v3897_v56 = vadd.f32 %v3850_v8, %v3557_v46 }
 0x4df   :  { %v6604_v40 = vpop.f32.mrf.mxu0 }
 0x4e0   :  { %v3900_v19 = vadd.f32 %v6604_v40, %v3560_v23 }
 0x4e1   :  { %v3860_v21 = vpop.f32.mrf.mxu0 }
 0x4e2   :  { %v3899_v37 = vadd.f32 %v3860_v21, %v3559_v28 }
 0x4e3   :  { %v6607_v6 = vpop.f32.mrf.mxu0 }
 0x4e4   :  { %v3902_v51 = vadd.f32 %v6607_v6, %v3562_v4 }
 0x4e5   :  { %v3870_v48 = vpop.f32.mrf.mxu0 }
 0x4e6   :  { %v3901_v47 = vadd.f32 %v3870_v48, %v3561_v5 }
 0x4e7   :  { %v6610_v7 = vpop.f32.mrf.mxu0 }
 0x4e8   :  { %v3904_v57 = vadd.f32 %v6610_v7, %v3564_v45 }
 0x4e9   :  { %v3880_v17 = vpop.f32.mrf.mxu0 }
 0x4ea   :  { %v3903_v35 = vadd.f32 %v3880_v17, %v3563_v33 }
 0x4eb   :  { %v6677_v60 = vpop.f32.mrf.mxu0 }
 0x4ec   :  { %v4230_v13 = vadd.f32 %v6677_v60, %v3890_v59 }
 0x4ed   :  { %v4150_v58 = vpop.f32.mrf.mxu0 }
 0x4ee   :  { %v4229_v44 = vadd.f32 %v4150_v58, %v3889_v50 }
 0x4f0   :  { %v6680_v15 = vpop.f32.mrf.mxu0 }
 0x4f1   :  { %v4232_v29 = vadd.f32 %v6680_v15, %v3892_v54 }
 0x4f2   :  { %v4160_v16 = vpop.f32.mrf.mxu0 }
 0x4f3   :  { %v4231_v46 = vadd.f32 %v4160_v16, %v3891_v9 }
 0x4f5   :  { %v6683_v39 = vpop.f32.mrf.mxu0 }
 0x4f6   :  { %v4234_v34 = vadd.f32 %v6683_v39, %v3894_v52 }
 0x4f7   :  { %v4170_v1 = vpop.f32.mrf.mxu0 }
 0x4f8   :  { %v4233_v24 = vadd.f32 %v4170_v1, %v3893_v43 }
 0x4fa   :  { %v6686_v31 = vpop.f32.mrf.mxu0 }
 0x4fb   :  { %v4236_v62 = vadd.f32 %v6686_v31, %v3896_v53 }
 0x4fc   :  { %v4180_v41 = vpop.f32.mrf.mxu0 }
 0x4fd   :  { %v4235_v42 = vadd.f32 %v4180_v41, %v3895_v63 }
 0x4ff   :  { %v6689_v10 = vpop.f32.mrf.mxu0 }
 0x500   :  { %v4238_v55 = vadd.f32 %v6689_v10, %v3898_v18 }
 0x501   :  { %v4190_v26 = vpop.f32.mrf.mxu0 }
 0x502   :  { %v4237_v12 = vadd.f32 %v4190_v26, %v3897_v56 }
 0x504   :  { %v6692_v32 = vpop.f32.mrf.mxu0 }
 0x505   :  { %v4240_v2 = vadd.f32 %v6692_v32, %v3900_v19 }
 0x506   :  { %v4200_v22 = vpop.f32.mrf.mxu0 }
 0x507   :  { %v4239_v8 = vadd.f32 %v4200_v22, %v3899_v37 }
 0x509   :  { %v6695_v25 = vpop.f32.mrf.mxu0 }
 0x50a   :  { %v4242_v39 = vadd.f32 %v6695_v25, %v3902_v51 }
 0x50b   :  { %v4210_v27 = vpop.f32.mrf.mxu0 }
 0x50c   :  { %v4241_v1 = vadd.f32 %v4210_v27, %v3901_v47 }
 0x50e   :  { %v8782_v49 = vpop.f32.mrf.mxu0 }
 0x50f   :  { %8885 = vst [vmem:[#allocation14_spill] sm:$0xff] %v8782_v49 }
 0x510   :  { %v8784_v3 = vpop.f32.mrf.mxu0 }
 0x513   :  { %v6765_v49 = vpop.f32.mrf.mxu0  ;;  %v6777_v0 = vpop.f32.mrf.mxu1 }
 0x514   :  { %v4570_v30 = vadd.f32 %v6765_v49, %v4230_v13  ;;  %v4578_v14 = vadd.f32 %v6777_v0, %v4238_v55  ;;  %v4243_v55 = vadd.f32 %v8784_v3, %v3903_v35 }
 0x515   :  { %v4490_v61 = vpop.f32.mrf.mxu0  ;;  %v4530_v23 = vpop.f32.mrf.mxu1 }
 0x516   :  { %v4591_v28 = vadd.f32 %v8789_v38, %v4570_v30  ;;  %v4599_v4 = vadd.f32 %v8789_v38, %v4578_v14  ;;  %v4569_v5 = vadd.f32 %v4490_v61, %v4229_v44  ;;  %v4577_v20 = vadd.f32 %v4530_v23, %v4237_v12  ;;  %v8886_v56 = vld [vmem:[#allocation14_spill] sm:$0xff] }
 0x517   :  { %v6768_v11 = vpop.f32.mrf.mxu0  ;;  %v6780_v36 = vpop.f32.mrf.mxu1  ;;  %v4244_v13 = vadd.f32 %v8886_v56, %v3904_v57 }
 0x518   :  { %v4590_v45 = vadd.f32 %v8789_v38, %v4569_v5  ;;  %v4598_v33 = vadd.f32 %v8789_v38, %v4577_v20  ;;  %v4607_v40 = vmax.f32 %v4591_v28, 0.0  ;;  %v4615_v21 = vmax.f32 %v4599_v4, 0.0 }
 0x519   :  { %v4572_v6 = vadd.f32 %v6768_v11, %v4232_v29  ;;  %v4580_v48 = vadd.f32 %v6780_v36, %v4240_v2  ;;  %v4500_v7 = vpop.f32.mrf.mxu0  ;;  %v4540_v17 = vpop.f32.mrf.mxu1 }
 0x51a   :  { %v4606_v60 = vmax.f32 %v4590_v45, 0.0  ;;  %v4614_v58 = vmax.f32 %v4598_v33, 0.0  ;;  %v4571_v15 = vadd.f32 %v4500_v7, %v4231_v46  ;;  %v4579_v16 = vadd.f32 %v4540_v17, %v4239_v8 }
 0x51b   :  { %v4593_v31 = vadd.f32 %v8789_v38, %v4572_v6  ;;  %v4601_v41 = vadd.f32 %v8789_v38, %v4580_v48  ;;  %v6771_v10 = vpop.f32.mrf.mxu0  ;;  %v6783_v26 = vpop.f32.mrf.mxu1 }
 0x51c   :  { %v5215_v32 = vpack.c.bf16 %v4607_v40, %v4606_v60  ;;  %v5235_v22 = vpack.c.bf16 %v4615_v21, %v4614_v58  ;;  %v4592_v49 = vadd.f32 %v8789_v38, %v4571_v15  ;;  %v4600_v59 = vadd.f32 %v8789_v38, %v4579_v16 }
 0x51d   :  { %v4609_v50 = vmax.f32 %v4593_v31, 0.0  ;;  %v4617_v54 = vmax.f32 %v4601_v41, 0.0  ;;  %v4574_v18 = vadd.f32 %v6771_v10, %v4234_v34  ;;  %v4582_v9 = vadd.f32 %v6783_v26, %v4242_v39  ;;  %v4510_v52 = vpop.f32.mrf.mxu0  ;;  %v4550_v43 = vpop.f32.mrf.mxu1 }
 0x51e   :  { %5216 = vst [vmem:[%s8838_s5] sm:$0xff] %v5215_v32   ;;  %5255 = vst [vmem:[%s8838_s5 + $0x20] sm:$0xff] %v5235_v22   ;;  %v4608_v25 = vmax.f32 %v4592_v49, 0.0  ;;  %v4616_v27 = vmax.f32 %v4600_v59, 0.0  ;;  %v4573_v53 = vadd.f32 %v4510_v52, %v4233_v24  ;;  %v4581_v63 = vadd.f32 %v4550_v43, %v4241_v1 }
 0x51f   :  { %v4595_v19 = vadd.f32 %v8789_v38, %v4574_v18  ;;  %v4603_v37 = vadd.f32 %v8789_v38, %v4582_v9  ;;  %v6774_v51 = vpop.f32.mrf.mxu0  ;;  %v6786_v47 = vpop.f32.mrf.mxu1 }
 0x520   :  { %v5220_v0 = vpack.c.bf16 %v4609_v50, %v4608_v25  ;;  %v5240_v44 = vpack.c.bf16 %v4617_v54, %v4616_v27  ;;  %v4594_v12 = vadd.f32 %v8789_v38, %v4573_v53  ;;  %v4602_v30 = vadd.f32 %v8789_v38, %v4581_v63 }
 0x521   :  { %v4611_v14 = vmax.f32 %v4595_v19, 0.0  ;;  %v4619_v29 = vmax.f32 %v4603_v37, 0.0  ;;  %v4576_v46 = vadd.f32 %v6774_v51, %v4236_v62  ;;  %v4584_v61 = vadd.f32 %v6786_v47, %v4244_v13  ;;  %v4520_v23 = vpop.f32.mrf.mxu0  ;;  %v4560_v57 = vpop.f32.mrf.mxu1 }
 0x522   :  { %5252 = vst [vmem:[%s8838_s5 + $0x8] sm:$0xff] %v5220_v0   ;;  %5256 = vst [vmem:[%s8838_s5 + $0x28] sm:$0xff] %v5240_v44   ;;  %v4610_v3 = vmax.f32 %v4594_v12, 0.0  ;;  %v4618_v35 = vmax.f32 %v4602_v30, 0.0  ;;  %v4575_v28 = vadd.f32 %v4520_v23, %v4235_v42  ;;  %v4583_v4 = vadd.f32 %v4560_v57, %v4243_v55 }
 0x523   :  { %v4597_v5 = vadd.f32 %v8789_v38, %v4576_v46  ;;  %v4605_v20 = vadd.f32 %v8789_v38, %v4584_v61 }
 0x524   :  { %v5225_v34 = vpack.c.bf16 %v4611_v14, %v4610_v3  ;;  %v5245_v24 = vpack.c.bf16 %v4619_v29, %v4618_v35  ;;  %v4596_v62 = vadd.f32 %v8789_v38, %v4575_v28  ;;  %v4604_v2 = vadd.f32 %v8789_v38, %v4583_v4 }
 0x525   :  { %v4613_v11 = vmax.f32 %v4597_v5, 0.0  ;;  %v4621_v36 = vmax.f32 %v4605_v20, 0.0 }
 0x526   :  { %5253 = vst [vmem:[%s8838_s5 + $0x10] sm:$0xff] %v5225_v34   ;;  %5257 = vst [vmem:[%s8838_s5 + $0x30] sm:$0xff] %v5245_v24   ;;  %v4612_v42 = vmax.f32 %v4596_v62, 0.0  ;;  %v4620_v8 = vmax.f32 %v4604_v2, 0.0 }
 0x528   :  { %v5230_v45 = vpack.c.bf16 %v4613_v11, %v4612_v42  ;;  %v5250_v33 = vpack.c.bf16 %v4621_v36, %v4620_v8 }
 0x52a   :  { %5254 = vst [vmem:[%s8838_s5 + $0x18] sm:$0xff] %v5230_v45   ;;  %5258 = vst [vmem:[%s8838_s5 + $0x38] sm:$0xff] %v5250_v33  }

</bundles_post_ra>
